<compile_context>
chip_gen: v7x
topology: tpu7x:2x2x1
jax: 0.10.0
libtpu: 0.0.40
codegen_flags: <defaults>
</compile_context>

<pallas_src>
import functools

import jax
import jax.numpy as jnp
from jax.experimental import pallas as pl
from jax.experimental.pallas import tpu as pltpu

BN_EPS = 1e-5


def _round_up(v, m):
    return ((v + m - 1) // m) * m


# --------------------------------------------------------------------------- conv3x3 + BN stats
def _prep_conv_input(x, TH, Wpp):
    """[N,H,W,C] -> [N, T, (TH+2)*Wpp, 3*Cp] bf16.

    Zero halo (pad=1), three kw-pre-shifted copies packed along channels (so every
    in-kernel window load is a contiguous, sublane-aligned slice), and overlapping
    (2-row-halo) row tiles so the conv kernel only holds a (TH+2)-row slab in VMEM.
    """
    # TODO(synk): the BN+ReLU epilogue could write directly into this padded/shifted
    # layout (input_output_aliases into a pre-zeroed buffer) to save one HBM round trip.
    N, H, W, C = x.shape
    if C < 8:  # keep the MXU contraction dim >= 9*8 (only the very first conv)
        x = jnp.pad(x, ((0, 0), (0, 0), (0, 0), (0, 8 - C)))
        C = 8
    T = H // TH
    xp = jnp.pad(x, ((0, 0), (1, 1), (1, 1), (0, 0)))              # [N, H+2, W+2, C]
    shifted = []
    for kw in range(3):
        s = xp[:, :, kw:, :]
        s = jnp.pad(s, ((0, 0), (0, 0), (0, Wpp - s.shape[2]), (0, 0)))
        shifted.append(s)
    xs = jnp.concatenate(shifted, axis=-1)                         # [N, H+2, Wpp, 3C]
    xt = jnp.stack([xs[:, t * TH:t * TH + TH + 2] for t in range(T)], axis=1)
    return xt.reshape(N, T, (TH + 2) * Wpp, 3 * C).astype(jnp.bfloat16)


def _make_conv_kernel(n_in, ch3_list, Wpp, TH, W, c_out):
    R = TH * Wpp

    def kernel(*refs):
        x_refs = refs[:n_in]
        w_ref = refs[n_in]
        y_ref, ssum_ref, ssq_ref = refs[n_in + 1:n_in + 4]
        slab_ref = refs[n_in + 4]                     # VMEM scratch [R, sum(9*Cin)] bf16

        # Build the im2col slab: 3 aligned contiguous window copies per input
        # (kw shift already packed into channels by the XLA prep).
        off = 0
        for x_ref, c3 in zip(x_refs, ch3_list):
            for kh in range(3):
                slab_ref[:, off:off + c3] = x_ref[0, 0, kh * Wpp:kh * Wpp + R, :]
                off += c3

        # single wide MXU matmul, f32 accumulation
        acc = jnp.dot(slab_ref[...], w_ref[...], preferred_element_type=jnp.float32)
        y_ref[0, 0] = acc.astype(y_ref.dtype)

        # training-mode BN statistics over VALID columns only (per-batch accumulators)
        col = jax.lax.broadcasted_iota(jnp.int32, (R, 1), 0) % Wpp
        av = jnp.where(col < W, acc, 0.0)
        ps = jnp.sum(av.reshape(R // 8, 8, c_out), axis=0)          # [8, c_out] partials
        pq = jnp.sum((av * av).reshape(R // 8, 8, c_out), axis=0)

        @pl.when(pl.program_id(1) == 0)
        def _init():
            ssum_ref[...] = jnp.zeros_like(ssum_ref)
            ssq_ref[...] = jnp.zeros_like(ssq_ref)

        ssum_ref[0] += ps
        ssq_ref[0] += pq

    return kernel


def _conv3x3_stats(x_list, w_merged, c_out):
    """3x3 conv (pad=1, no bias) over channel-concatenated inputs (decoder concat fused as
    extra slab columns) plus per-batch BatchNorm sum / sum-of-squares accumulators."""
    N, H, W, _ = x_list[0].shape
    TH = min(H, 8)                      # raise for large H to amortise per-step overhead
    assert H % TH == 0
    T = H // TH
    Wpp = _round_up(W + 2, 8)           # multiple of 8 -> all window slices sublane-aligned
    R = TH * Wpp
    L = (TH + 2) * Wpp

    xts = [_prep_conv_input(x, TH, Wpp) for x in x_list]
    ch3_list = [xt.shape[-1] for xt in xts]
    assert w_merged.shape[0] == 3 * sum(ch3_list)

    in_specs = [pl.BlockSpec((1, 1, L, c3), lambda n, t: (n, t, 0, 0)) for c3 in ch3_list]
    in_specs.append(pl.BlockSpec(w_merged.shape, lambda n, t: (0, 0)))

    y, ssum, ssq = pl.pallas_call(
        _make_conv_kernel(len(xts), ch3_list, Wpp, TH, W, c_out),
        grid=(N, T),
        in_specs=in_specs,
        out_specs=(pl.BlockSpec((1, 1, R, c_out), lambda n, t: (n, t, 0, 0)),
                   pl.BlockSpec((1, 8, c_out), lambda n, t: (n, 0, 0)),
                   pl.BlockSpec((1, 8, c_out), lambda n, t: (n, 0, 0))),
        out_shape=(jax.ShapeDtypeStruct((N, T, R, c_out), jnp.bfloat16),
                   jax.ShapeDtypeStruct((N, 8, c_out), jnp.float32),
                   jax.ShapeDtypeStruct((N, 8, c_out), jnp.float32)),
        scratch_shapes=[pltpu.VMEM((R, 3 * sum(ch3_list)), jnp.bfloat16)],
        # per-batch stat accumulators -> batch axis is safely parallel (v7x megacore);
        # row-tile axis carries the stats reduction -> arbitrary.
        compiler_params=pltpu.CompilerParams(
            dimension_semantics=("parallel", "arbitrary")),
    )(*xts, w_merged)
    return y, ssum, ssq, TH, T, Wpp


# --------------------------------------------------------------------------- BN + ReLU (+ pool)
def _make_bn_relu_kernel(Wv, inv_count):
    def kernel(y_ref, ssum_ref, ssq_ref, g_ref, b_ref, o_ref):
        c4 = g_ref.shape[-1]
        s = jnp.sum(ssum_ref[...].reshape(-1, c4), axis=0, keepdims=True)
        q = jnp.sum(ssq_ref[...].reshape(-1, c4), axis=0, keepdims=True)
        mean = s * inv_count
        var = q * inv_count - mean * mean
        scale = g_ref[...] * jax.lax.rsqrt(var + BN_EPS)
        shift = b_ref[...] - mean * scale
        z = jnp.maximum(y_ref[0].astype(jnp.float32) * scale + shift, 0.0)  # [TH, Wq, 4C]
        o_ref[0] = z[:, :Wv, :].astype(o_ref.dtype)                         # drop pad cols

    return kernel


def _make_bn_relu_pool_kernel(C, Wv, inv_count):
    def kernel(y_ref, ssum_ref, ssq_ref, g_ref, b_ref, o_ref, p_ref):
        c4 = 4 * C
        s = jnp.sum(ssum_ref[...].reshape(-1, c4), axis=0, keepdims=True)
        q = jnp.sum(ssq_ref[...].reshape(-1, c4), axis=0, keepdims=True)
        mean = s * inv_count
        var = q * inv_count - mean * mean
        scale = g_ref[...] * jax.lax.rsqrt(var + BN_EPS)
        shift = b_ref[...] - mean * scale
        z = jnp.maximum(y_ref[0].astype(jnp.float32) * scale + shift, 0.0)  # [THh,2,Wq,4C]
        zv = z[:, :, :Wv, :]                                                # drop pad cols
        o_ref[0] = zv.astype(o_ref.dtype)                                   # before_pool
        hm = jnp.maximum(zv[:, 0], zv[:, 1])                                # pool over H pair
        # pool over W pairs (packed in the lane dim as width quads)
        p_ref[0, :, :, 0:C] = jnp.maximum(hm[..., 0:C], hm[..., C:2 * C]).astype(p_ref.dtype)
        p_ref[0, :, :, C:2 * C] = jnp.maximum(hm[..., 2 * C:3 * C],
                                              hm[..., 3 * C:4 * C]).astype(p_ref.dtype)

    return kernel


def conv_bn_relu(x_list, w_merged, gamma, beta, pool=False):
    N, H, W, _ = x_list[0].shape
    C = w_merged.shape[-1]
    assert W % 4 == 0  # width-quad lane packing in the epilogue
    y, ssum, ssq, TH, T, Wpp = _conv3x3_stats(x_list, w_merged, C)

    Wq, Wv = Wpp // 4, W // 4
    inv_count = 1.0 / float(N * H * W)
    # pre-tile [C]-sized BN inputs x4 (matches the width-quad lane packing); stays f32.
    ssum4 = jnp.tile(ssum, (1, 1, 4))
    ssq4 = jnp.tile(ssq, (1, 1, 4))
    g4 = jnp.tile(gamma.reshape(1, C).astype(jnp.float32), (1, 4))
    b4 = jnp.tile(beta.reshape(1, C).astype(jnp.float32), (1, 4))

    stat_specs = [pl.BlockSpec(ssum4.shape, lambda n, t: (0, 0, 0)),
                  pl.BlockSpec(ssq4.shape, lambda n, t: (0, 0, 0)),
                  pl.BlockSpec((1, 4 * C), lambda n, t: (0, 0)),
                  pl.BlockSpec((1, 4 * C), lambda n, t: (0, 0))]

    if not pool:
        yv = y.reshape(N, H, Wq, 4 * C)
        out = pl.pallas_call(
            _make_bn_relu_kernel(Wv, inv_count),
            grid=(N, T),
            in_specs=[pl.BlockSpec((1, TH, Wq, 4 * C), lambda n, t: (n, t, 0, 0))] + stat_specs,
            out_specs=pl.BlockSpec((1, TH, Wv, 4 * C), lambda n, t: (n, t, 0, 0)),
            out_shape=jax.ShapeDtypeStruct((N, H, Wv, 4 * C), jnp.bfloat16),
            compiler_params=pltpu.CompilerParams(
                dimension_semantics=("parallel", "parallel")),
        )(yv, ssum4, ssq4, g4, b4)
        return out.reshape(N, H, W, C)

    assert TH % 2 == 0 and H % 2 == 0
    THh = TH // 2
    yv = y.reshape(N, H // 2, 2, Wq, 4 * C)
    bp, pooled = pl.pallas_call(
        _make_bn_relu_pool_kernel(C, Wv, inv_count),
        grid=(N, T),
        in_specs=[pl.BlockSpec((1, THh, 2, Wq, 4 * C), lambda n, t: (n, t, 0, 0, 0))] + stat_specs,
        out_specs=(pl.BlockSpec((1, THh, 2, Wv, 4 * C), lambda n, t: (n, t, 0, 0, 0)),
                   pl.BlockSpec((1, THh, Wv, 2 * C), lambda n, t: (n, t, 0, 0))),
        out_shape=(jax.ShapeDtypeStruct((N, H // 2, 2, Wv, 4 * C), jnp.bfloat16),
                   jax.ShapeDtypeStruct((N, H // 2, Wv, 2 * C), jnp.bfloat16)),
        compiler_params=pltpu.CompilerParams(
            dimension_semantics=("parallel", "parallel")),
    )(yv, ssum4, ssq4, g4, b4)
    return bp.reshape(N, H, W, C), pooled.reshape(N, H // 2, W // 2, C)


# --------------------------------------------------------------------------- ConvTranspose 2x2 s2
def conv_transpose2x2(x, wt4, bt4):
    # x: [N, H, W, Cin] bf16; wt4: [Cin, 4*Cout] bf16 (cols ordered (a, b, co)); bt4: [1, 4*Cout] f32
    N, H, W, Cin = x.shape
    Cout = wt4.shape[-1] // 4

    def kernel(x_ref, w_ref, b_ref, o_ref):
        yv = jnp.dot(x_ref[0], w_ref[...], preferred_element_type=jnp.float32) + b_ref[...]
        o_ref[0] = yv.astype(o_ref.dtype)  # one full-block store

    y = pl.pallas_call(
        kernel,
        grid=(N,),
        in_specs=[pl.BlockSpec((1, H * W, Cin), lambda n: (n, 0, 0)),
                  pl.BlockSpec(wt4.shape, lambda n: (0, 0)),
                  pl.BlockSpec(bt4.shape, lambda n: (0, 0))],
        out_specs=pl.BlockSpec((1, H * W, 4 * Cout), lambda n: (n, 0, 0)),
        out_shape=jax.ShapeDtypeStruct((N, H * W, 4 * Cout), jnp.bfloat16),
        compiler_params=pltpu.CompilerParams(dimension_semantics=("parallel",)),
    )(x.reshape(N, H * W, Cin), wt4, bt4)
    # de-interleave (h, w, a, b, co) -> (h, a, w, b, co): tiny XLA transpose that fuses
    # into the next conv's prep copy chain.
    y = y.reshape(N, H, W, 2, 2, Cout).transpose(0, 1, 3, 2, 4, 5)
    return y.reshape(N, 2 * H, 2 * W, Cout)


# --------------------------------------------------------------------------- final conv1x1 + logsoftmax
def conv1x1_logsoftmax(x, w, b):
    N, H, W, Cin = x.shape
    ncls = w.shape[-1]

    def kernel(x_ref, w_ref, b_ref, o_ref):
        y = jnp.dot(x_ref[0], w_ref[...], preferred_element_type=jnp.float32) + b_ref[...]
        m = jnp.max(y, axis=-1, keepdims=True)
        lse = jnp.log(jnp.sum(jnp.exp(y - m), axis=-1, keepdims=True)) + m
        o_ref[0] = y - lse

    out = pl.pallas_call(
        kernel,
        grid=(N,),
        in_specs=[pl.BlockSpec((1, H * W, Cin), lambda n: (n, 0, 0)),
                  pl.BlockSpec(w.shape, lambda n: (0, 0)),
                  pl.BlockSpec(b.shape, lambda n: (0, 0))],
        out_specs=pl.BlockSpec((1, H * W, ncls), lambda n: (n, 0, 0)),
        out_shape=jax.ShapeDtypeStruct((N, H * W, ncls), jnp.float32),
        compiler_params=pltpu.CompilerParams(dimension_semantics=("parallel",)),
    )(x.reshape(N, H * W, Cin), w, b)
    return out.reshape(N, H, W, ncls)


# --------------------------------------------------------------------------- parameters
def init_unet_params(key, in_channels=1, depth=3, start_filts=8, n_classes=2):
    keys = iter(jax.random.split(key, 256))

    def conv3x3_w(ci, co):
        w = jax.random.normal(next(keys), (3, 3, ci, co), jnp.float32) * (2.0 / (9 * ci)) ** 0.5
        ci_p = max(ci, 8)
        if ci_p != ci:
            w = jnp.pad(w, ((0, 0), (0, 0), (0, ci_p - ci), (0, 0)))
        # rows ordered (kh, kw, cin) -> matches the in-kernel slab column layout.
        # conv bias omitted on purpose: training-mode BN mean subtraction cancels it.
        return w.reshape(9 * ci_p, co).astype(jnp.bfloat16)

    def bn_p(co):
        return jnp.ones((co,), jnp.float32), jnp.zeros((co,), jnp.float32)

    params = {"down": [], "up": []}
    outs = in_channels
    for i in range(depth):
        ins = in_channels if i == 0 else outs
        outs = start_filts * (2 ** i)
        w1 = conv3x3_w(ins, outs); g1, be1 = bn_p(outs)
        w2 = conv3x3_w(outs, outs); g2, be2 = bn_p(outs)
        params["down"].append(dict(w1=w1, g1=g1, be1=be1, w2=w2, g2=g2, be2=be2))
    for i in range(depth - 1):
        ins = outs
        outs = ins // 2
        wt = jax.random.normal(next(keys), (ins, 2, 2, outs), jnp.float32) * (1.0 / (4 * ins)) ** 0.5
        bt = jax.random.normal(next(keys), (outs,), jnp.float32) * 0.01
        wt4 = wt.reshape(ins, 4 * outs).astype(jnp.bfloat16)     # columns ordered (a, b, co)
        bt4 = jnp.tile(bt, 4).reshape(1, 4 * outs)
        # first UpConv conv acts on concat(from_up, skip): fuse as one stacked weight
        w1u = conv3x3_w(outs, outs)   # from_up half
        w1s = conv3x3_w(outs, outs)   # skip half
        w1 = jnp.concatenate([w1u, w1s], axis=0)
        g1, be1 = bn_p(outs)
        w2 = conv3x3_w(outs, outs); g2, be2 = bn_p(outs)
        params["up"].append(dict(wt=wt4, bt=bt4, w1=w1, g1=g1, be1=be1,
                                 w2=w2, g2=g2, be2=be2))
    wf = (jax.random.normal(next(keys), (start_filts, n_classes), jnp.float32)
          * (1.0 / start_filts) ** 0.5).astype(jnp.bfloat16)
    bf = (jax.random.normal(next(keys), (n_classes,), jnp.float32) * 0.01).reshape(1, n_classes)
    params["final"] = dict(w=wf, b=bf)
    return params


# --------------------------------------------------------------------------- forward
def unet_forward(x_nchw, params):
    x = jnp.transpose(x_nchw, (0, 2, 3, 1))          # NCHW -> NHWC once at the input boundary
    depth = len(params["down"])
    encoder_outs = []
    for i, dc in enumerate(params["down"]):
        x = conv_bn_relu([x], dc["w1"], dc["g1"], dc["be1"])
        if i < depth - 1:
            before_pool, x = conv_bn_relu([x], dc["w2"], dc["g2"], dc["be2"], pool=True)
            encoder_outs.append(before_pool)
        else:
            x = conv_bn_relu([x], dc["w2"], dc["g2"], dc["be2"])
            encoder_outs.append(x)
    for i, uc in enumerate(params["up"]):
        skip = encoder_outs[-(i + 2)]
        from_up = conv_transpose2x2(x, uc["wt"], uc["bt"])
        # merge_mode='concat' fused: two inputs share one wide slab / one matmul
        x = conv_bn_relu([from_up, skip], uc["w1"], uc["g1"], uc["be1"])
        x = conv_bn_relu([x], uc["w2"], uc["g2"], uc["be2"])
    x = conv1x1_logsoftmax(x, params["final"]["w"], params["final"]["b"])
    return jnp.transpose(x, (0, 3, 1, 2))            # NHWC -> NCHW once at the output boundary


if __name__ == "__main__":
    key = jax.random.PRNGKey(0)
    pkey, xkey = jax.random.split(key)

    N, IN_CH, H, W = 2, 1, 16, 16
    DEPTH, START_FILTS, N_CLASSES = 3, 8, 2

    params = init_unet_params(pkey, in_channels=IN_CH, depth=DEPTH,
                              start_filts=START_FILTS, n_classes=N_CLASSES)
    x = jax.random.normal(xkey, (N, IN_CH, H, W), jnp.float32)

    fwd = jax.jit(functools.partial(unet_forward, params=params))
    out = jax.block_until_ready(fwd(x))

    assert out.shape == (N, N_CLASSES, H, W), out.shape
    assert bool(jnp.all(jnp.isfinite(out)))
    # log_softmax property: exp(out) sums to 1 over the class dim.
    sums = jnp.sum(jnp.exp(out), axis=1)
    assert bool(jnp.max(jnp.abs(sums - 1.0)) < 1e-3)

    print("KERNEL_OK")
</pallas_src>

<mosaic_0001>
module attributes {stable_mosaic.version = 11 : i64} {
  func.func @kernel(%arg0: i32, %arg1: i32, %arg2: memref<1x1x240x24xbf16, #tpu.memory_space<vmem>>, %arg3: memref<72x8xbf16, #tpu.memory_space<vmem>>, %arg4: memref<1x1x192x8xbf16, #tpu.memory_space<vmem>>, %arg5: memref<1x8x8xf32, #tpu.memory_space<vmem>>, %arg6: memref<1x8x8xf32, #tpu.memory_space<vmem>>, %arg7: memref<192x72xbf16, #tpu.memory_space<vmem>>) attributes {dimension_semantics = [#tpu.dimension_semantics<parallel>, #tpu.dimension_semantics<arbitrary>], iteration_bounds = array<i64: 2, 2>, scalar_prefetch = 0 : i64, scratch_operands = 1 : i64, tpu.core_type = #tpu.core_type<tc>, window_params = [{transform_indices = @transform_0, window_bounds = array<i64: 1, 1, 240, 24>}, {pipeline_mode = #tpu.pipeline_mode<synchronous>, transform_indices = @transform_1, window_bounds = array<i64: 72, 8>}, {transform_indices = @transform_2, window_bounds = array<i64: 1, 1, 192, 8>}, {transform_indices = @transform_3, window_bounds = array<i64: 1, 8, 8>}, {transform_indices = @transform_4, window_bounds = array<i64: 1, 8, 8>}]} {
    %c0 = arith.constant 0 : index
    %c0_0 = arith.constant 0 : index
    %c0_1 = arith.constant 0 : index
    %c0_2 = arith.constant 0 : index
    %0 = vector.load %arg2[%c0, %c0_0, %c0_1, %c0_2] : memref<1x1x240x24xbf16, #tpu.memory_space<vmem>>, vector<1x1x192x24xbf16>
    %1 = vector.shape_cast %0 : vector<1x1x192x24xbf16> to vector<192x24xbf16>
    %c0_3 = arith.constant 0 : index
    %c0_4 = arith.constant 0 : index
    %2 = vector.load %arg7[%c0_3, %c0_4] : memref<192x72xbf16, #tpu.memory_space<vmem>>, vector<192x24xbf16>
    tpu.vector_store %arg7[%c0_3, %c0_4], %1 {strides = array<i32>} : memref<192x72xbf16, #tpu.memory_space<vmem>>, vector<192x24xbf16>,
    %c0_5 = arith.constant 0 : index
    %c0_6 = arith.constant 0 : index
    %c24 = arith.constant 24 : index
    %c0_7 = arith.constant 0 : index
    %3 = vector.load %arg2[%c0_5, %c0_6, %c24, %c0_7] : memref<1x1x240x24xbf16, #tpu.memory_space<vmem>>, vector<1x1x192x24xbf16>
    %4 = vector.shape_cast %3 : vector<1x1x192x24xbf16> to vector<192x24xbf16>
    %c0_8 = arith.constant 0 : index
    %c24_9 = arith.constant 24 : index
    %5 = vector.load %arg7[%c0_8, %c24_9] : memref<192x72xbf16, #tpu.memory_space<vmem>>, vector<192x24xbf16>
    tpu.vector_store %arg7[%c0_8, %c24_9], %4 {strides = array<i32>} : memref<192x72xbf16, #tpu.memory_space<vmem>>, vector<192x24xbf16>,
    %c0_10 = arith.constant 0 : index
    %c0_11 = arith.constant 0 : index
    %c48 = arith.constant 48 : index
    %c0_12 = arith.constant 0 : index
    %6 = vector.load %arg2[%c0_10, %c0_11, %c48, %c0_12] : memref<1x1x240x24xbf16, #tpu.memory_space<vmem>>, vector<1x1x192x24xbf16>
    %7 = vector.shape_cast %6 : vector<1x1x192x24xbf16> to vector<192x24xbf16>
    %c0_13 = arith.constant 0 : index
    %c48_14 = arith.constant 48 : index
    %8 = vector.load %arg7[%c0_13, %c48_14] : memref<192x72xbf16, #tpu.memory_space<vmem>>, vector<192x24xbf16>
    tpu.vector_store %arg7[%c0_13, %c48_14], %7 {strides = array<i32>} : memref<192x72xbf16, #tpu.memory_space<vmem>>, vector<192x24xbf16>,
    %c0_15 = arith.constant 0 : index
    %c0_16 = arith.constant 0 : index
    %9 = vector.load %arg7[%c0_15, %c0_16] : memref<192x72xbf16, #tpu.memory_space<vmem>>, vector<192x72xbf16>
    %c0_17 = arith.constant 0 : index
    %c0_18 = arith.constant 0 : index
    %10 = vector.load %arg3[%c0_17, %c0_18] : memref<72x8xbf16, #tpu.memory_space<vmem>>, vector<72x8xbf16>
    %cst = arith.constant dense<0.000000e+00> : vector<192x8xf32>
    %11 = tpu.matmul %9, %10, %cst {dimension_numbers = #tpu.dot_dimension_numbers<[1], [0], [0], [1], [0, 0, 1, 1], [], []>} : vector<192x72xbf16>, vector<72x8xbf16>, vector<192x8xf32> -> vector<192x8xf32>
    %12 = arith.truncf %11 : vector<192x8xf32> to vector<192x8xbf16>
    %c0_19 = arith.constant 0 : index
    %c0_20 = arith.constant 0 : index
    %c0_21 = arith.constant 0 : index
    %c0_22 = arith.constant 0 : index
    %13 = vector.load %arg4[%c0_19, %c0_20, %c0_21, %c0_22] : memref<1x1x192x8xbf16, #tpu.memory_space<vmem>>, vector<1x1x192x8xbf16>
    %14 = vector.shape_cast %13 : vector<1x1x192x8xbf16> to vector<192x8xbf16>
    %15 = vector.shape_cast %12 : vector<192x8xbf16> to vector<1x1x192x8xbf16>
    tpu.vector_store %arg4[%c0_19, %c0_20, %c0_21, %c0_22], %15 {strides = array<i32>} : memref<1x1x192x8xbf16, #tpu.memory_space<vmem>>, vector<1x1x192x8xbf16>,
    %16 = tpu.iota {dimensions = array<i32: 0>} : vector<192x1xi32>
    %c24_i32 = arith.constant 24 : i32
    %c0_i32 = arith.constant 0 : i32
    %17 = arith.cmpi eq, %c24_i32, %c0_i32 : i32
    %c1_i32 = arith.constant 1 : i32
    %18 = arith.select %17, %c1_i32, %c24_i32 : i32
    %19 = vector.broadcast %18 : i32 to vector<192x1xi32>
    %20 = arith.remsi %16, %19 : vector<192x1xi32>
    %c0_i32_23 = arith.constant 0 : i32
    %21 = vector.broadcast %c0_i32_23 : i32 to vector<192x1xi32>
    %22 = arith.cmpi ne, %20, %21 : vector<192x1xi32>
    %c0_i32_24 = arith.constant 0 : i32
    %23 = vector.broadcast %c0_i32_24 : i32 to vector<192x1xi32>
    %24 = arith.cmpi slt, %20, %23 : vector<192x1xi32>
    %c0_i32_25 = arith.constant 0 : i32
    %25 = arith.cmpi slt, %18, %c0_i32_25 : i32
    %26 = vector.broadcast %25 : i1 to vector<192x1xi1>
    %27 = vector.broadcast %26 : vector<192x1xi1> to vector<192x1xi1>
    %28 = arith.xori %24, %27 : vector<192x1xi1>
    %29 = arith.andi %28, %22 : vector<192x1xi1>
    %30 = vector.broadcast %18 : i32 to vector<192x1xi32>
    %31 = arith.addi %20, %30 : vector<192x1xi32>
    %32 = arith.select %29, %31, %20 : vector<192x1xi1>, vector<192x1xi32>
    %c16_i32 = arith.constant 16 : i32
    %33 = vector.broadcast %c16_i32 : i32 to vector<192x1xi32>
    %34 = arith.cmpi slt, %32, %33 : vector<192x1xi32>
    %cst_26 = arith.constant 0.000000e+00 : f32
    %35 = vector.shape_cast %34 : vector<192x1xi1> to vector<192x1xi1>
    %36 = vector.broadcast %35 : vector<192x1xi1> to vector<192x8xi1>
    %37 = vector.broadcast %cst_26 : f32 to vector<192x8xf32>
    %38 = arith.select %36, %11, %37 : vector<192x8xi1>, vector<192x8xf32>
    %39 = vector.shape_cast %38 : vector<192x8xf32> to vector<24x8x8xf32>
    %cst_27 = arith.constant dense<0.000000e+00> : vector<8x8xf32>
    %40 = vector.multi_reduction <add>, %39, %cst_27 [0] : vector<24x8x8xf32> to vector<8x8xf32>
    %41 = arith.mulf %38, %38 : vector<192x8xf32>
    %42 = vector.shape_cast %41 : vector<192x8xf32> to vector<24x8x8xf32>
    %cst_28 = arith.constant dense<0.000000e+00> : vector<8x8xf32>
    %43 = vector.multi_reduction <add>, %42, %cst_28 [0] : vector<24x8x8xf32> to vector<8x8xf32>
    %c0_i32_29 = arith.constant 0 : i32
    %44 = arith.cmpi eq, %arg1, %c0_i32_29 : i32
    %45 = arith.extui %44 : i1 to i32
    %c0_i32_30 = arith.constant 0 : i32
    %46 = arith.cmpi ne, %45, %c0_i32_30 : i32
    scf.if %46 {
      %cst_43 = arith.constant 0.000000e+00 : f32
      %59 = vector.broadcast %cst_43 : f32 to vector<1x8x8xf32>
      %c0_44 = arith.constant 0 : index
      %c0_45 = arith.constant 0 : index
      %c0_46 = arith.constant 0 : index
      %60 = vector.load %arg5[%c0_44, %c0_45, %c0_46] : memref<1x8x8xf32, #tpu.memory_space<vmem>>, vector<1x8x8xf32>
      tpu.vector_store %arg5[%c0_44, %c0_45, %c0_46], %59 {strides = array<i32>} : memref<1x8x8xf32, #tpu.memory_space<vmem>>, vector<1x8x8xf32>,
      %cst_47 = arith.constant 0.000000e+00 : f32
      %61 = vector.broadcast %cst_47 : f32 to vector<1x8x8xf32>
      %c0_48 = arith.constant 0 : index
      %c0_49 = arith.constant 0 : index
      %c0_50 = arith.constant 0 : index
      %62 = vector.load %arg6[%c0_48, %c0_49, %c0_50] : memref<1x8x8xf32, #tpu.memory_space<vmem>>, vector<1x8x8xf32>
      tpu.vector_store %arg6[%c0_48, %c0_49, %c0_50], %61 {strides = array<i32>} : memref<1x8x8xf32, #tpu.memory_space<vmem>>, vector<1x8x8xf32>,
    } else {
    }
    %c0_31 = arith.constant 0 : index
    %c0_32 = arith.constant 0 : index
    %c0_33 = arith.constant 0 : index
    %47 = vector.load %arg5[%c0_31, %c0_32, %c0_33] : memref<1x8x8xf32, #tpu.memory_space<vmem>>, vector<1x8x8xf32>
    %48 = vector.shape_cast %47 : vector<1x8x8xf32> to vector<8x8xf32>
    %49 = arith.addf %48, %40 : vector<8x8xf32>
    %c0_34 = arith.constant 0 : index
    %c0_35 = arith.constant 0 : index
    %c0_36 = arith.constant 0 : index
    %50 = vector.load %arg5[%c0_34, %c0_35, %c0_36] : memref<1x8x8xf32, #tpu.memory_space<vmem>>, vector<1x8x8xf32>
    %51 = vector.shape_cast %50 : vector<1x8x8xf32> to vector<8x8xf32>
    %52 = vector.shape_cast %49 : vector<8x8xf32> to vector<1x8x8xf32>
    tpu.vector_store %arg5[%c0_34, %c0_35, %c0_36], %52 {strides = array<i32>} : memref<1x8x8xf32, #tpu.memory_space<vmem>>, vector<1x8x8xf32>,
    %c0_37 = arith.constant 0 : index
    %c0_38 = arith.constant 0 : index
    %c0_39 = arith.constant 0 : index
    %53 = vector.load %arg6[%c0_37, %c0_38, %c0_39] : memref<1x8x8xf32, #tpu.memory_space<vmem>>, vector<1x8x8xf32>
    %54 = vector.shape_cast %53 : vector<1x8x8xf32> to vector<8x8xf32>
    %55 = arith.addf %54, %43 : vector<8x8xf32>
    %c0_40 = arith.constant 0 : index
    %c0_41 = arith.constant 0 : index
    %c0_42 = arith.constant 0 : index
    %56 = vector.load %arg6[%c0_40, %c0_41, %c0_42] : memref<1x8x8xf32, #tpu.memory_space<vmem>>, vector<1x8x8xf32>
    %57 = vector.shape_cast %56 : vector<1x8x8xf32> to vector<8x8xf32>
    %58 = vector.shape_cast %55 : vector<8x8xf32> to vector<1x8x8xf32>
    tpu.vector_store %arg6[%c0_40, %c0_41, %c0_42], %58 {strides = array<i32>} : memref<1x8x8xf32, #tpu.memory_space<vmem>>, vector<1x8x8xf32>,
    return
  }
  func.func @transform_0(%arg0: i32, %arg1: i32) -> (i32, i32, i32, i32) {
    %c0_i32 = arith.constant 0 : i32
    %c0_i32_0 = arith.constant 0 : i32
    %c0_i32_1 = arith.constant 0 : i32
    return %arg0, %arg1, %c0_i32, %c0_i32_0 : i32, i32, i32, i32
  }
  func.func @transform_1(%arg0: i32, %arg1: i32) -> (i32, i32) {
    %c0_i32 = arith.constant 0 : i32
    %c0_i32_0 = arith.constant 0 : i32
    %c0_i32_1 = arith.constant 0 : i32
    return %c0_i32, %c0_i32_0 : i32, i32
  }
  func.func @transform_2(%arg0: i32, %arg1: i32) -> (i32, i32, i32, i32) {
    %c0_i32 = arith.constant 0 : i32
    %c0_i32_0 = arith.constant 0 : i32
    %c0_i32_1 = arith.constant 0 : i32
    return %arg0, %arg1, %c0_i32, %c0_i32_0 : i32, i32, i32, i32
  }
  func.func @transform_3(%arg0: i32, %arg1: i32) -> (i32, i32, i32) {
    %c0_i32 = arith.constant 0 : i32
    %c0_i32_0 = arith.constant 0 : i32
    %c0_i32_1 = arith.constant 0 : i32
    return %arg0, %c0_i32, %c0_i32_0 : i32, i32, i32
  }
  func.func @transform_4(%arg0: i32, %arg1: i32) -> (i32, i32, i32) {
    %c0_i32 = arith.constant 0 : i32
    %c0_i32_0 = arith.constant 0 : i32
    %c0_i32_1 = arith.constant 0 : i32
    return %arg0, %c0_i32, %c0_i32_0 : i32, i32, i32
  }
}

module attributes {stable_mosaic.version = 11 : i64} {
  func.func @kernel(%arg0: i32, %arg1: i32, %arg2: memref<1x8x6x32xbf16, #tpu.memory_space<vmem>>, %arg3: memref<2x8x32xf32, #tpu.memory_space<vmem>>, %arg4: memref<2x8x32xf32, #tpu.memory_space<vmem>>, %arg5: memref<1x32xf32, #tpu.memory_space<vmem>>, %arg6: memref<1x32xf32, #tpu.memory_space<vmem>>, %arg7: memref<1x8x4x32xbf16, #tpu.memory_space<vmem>>) attributes {dimension_semantics = [#tpu.dimension_semantics<parallel>, #tpu.dimension_semantics<parallel>], iteration_bounds = array<i64: 2, 2>, scalar_prefetch = 0 : i64, scratch_operands = 0 : i64, tpu.core_type = #tpu.core_type<tc>, window_params = [{transform_indices = @transform_0, window_bounds = array<i64: 1, 8, 6, 32>}, {pipeline_mode = #tpu.pipeline_mode<synchronous>, transform_indices = @transform_1, window_bounds = array<i64: 2, 8, 32>}, {pipeline_mode = #tpu.pipeline_mode<synchronous>, transform_indices = @transform_2, window_bounds = array<i64: 2, 8, 32>}, {pipeline_mode = #tpu.pipeline_mode<synchronous>, transform_indices = @transform_3, window_bounds = array<i64: 1, 32>}, {pipeline_mode = #tpu.pipeline_mode<synchronous>, transform_indices = @transform_4, window_bounds = array<i64: 1, 32>}, {transform_indices = @transform_5, window_bounds = array<i64: 1, 8, 4, 32>}]} {
    %c0 = arith.constant 0 : index
    %c0_0 = arith.constant 0 : index
    %c0_1 = arith.constant 0 : index
    %0 = vector.load %arg3[%c0, %c0_0, %c0_1] : memref<2x8x32xf32, #tpu.memory_space<vmem>>, vector<2x8x32xf32>
    %1 = vector.shape_cast %0 : vector<2x8x32xf32> to vector<16x32xf32>
    %cst = arith.constant dense<0.000000e+00> : vector<32xf32>
    %2 = vector.multi_reduction <add>, %1, %cst [0] : vector<16x32xf32> to vector<32xf32>
    %3 = vector.shape_cast %2 : vector<32xf32> to vector<1x32xf32>
    %c0_2 = arith.constant 0 : index
    %c0_3 = arith.constant 0 : index
    %c0_4 = arith.constant 0 : index
    %4 = vector.load %arg4[%c0_2, %c0_3, %c0_4] : memref<2x8x32xf32, #tpu.memory_space<vmem>>, vector<2x8x32xf32>
    %5 = vector.shape_cast %4 : vector<2x8x32xf32> to vector<16x32xf32>
    %cst_5 = arith.constant dense<0.000000e+00> : vector<32xf32>
    %6 = vector.multi_reduction <add>, %5, %cst_5 [0] : vector<16x32xf32> to vector<32xf32>
    %7 = vector.shape_cast %6 : vector<32xf32> to vector<1x32xf32>
    %cst_6 = arith.constant 0.001953125 : f32
    %8 = vector.broadcast %cst_6 : f32 to vector<1x32xf32>
    %9 = arith.mulf %3, %8 : vector<1x32xf32>
    %cst_7 = arith.constant 0.001953125 : f32
    %10 = vector.broadcast %cst_7 : f32 to vector<1x32xf32>
    %11 = arith.mulf %7, %10 : vector<1x32xf32>
    %12 = arith.mulf %9, %9 : vector<1x32xf32>
    %13 = arith.subf %11, %12 : vector<1x32xf32>
    %c0_8 = arith.constant 0 : index
    %c0_9 = arith.constant 0 : index
    %14 = vector.load %arg5[%c0_8, %c0_9] : memref<1x32xf32, #tpu.memory_space<vmem>>, vector<1x32xf32>
    %cst_10 = arith.constant 9.99999974E-6 : f32
    %15 = vector.broadcast %cst_10 : f32 to vector<1x32xf32>
    %16 = arith.addf %13, %15 : vector<1x32xf32>
    %17 = math.rsqrt %16 : vector<1x32xf32>
    %18 = arith.mulf %14, %17 : vector<1x32xf32>
    %c0_11 = arith.constant 0 : index
    %c0_12 = arith.constant 0 : index
    %19 = vector.load %arg6[%c0_11, %c0_12] : memref<1x32xf32, #tpu.memory_space<vmem>>, vector<1x32xf32>
    %20 = arith.mulf %9, %18 : vector<1x32xf32>
    %21 = arith.subf %19, %20 : vector<1x32xf32>
    %c0_13 = arith.constant 0 : index
    %c0_14 = arith.constant 0 : index
    %c0_15 = arith.constant 0 : index
    %c0_16 = arith.constant 0 : index
    %22 = vector.load %arg2[%c0_13, %c0_14, %c0_15, %c0_16] : memref<1x8x6x32xbf16, #tpu.memory_space<vmem>>, vector<1x8x6x32xbf16>
    %23 = vector.shape_cast %22 : vector<1x8x6x32xbf16> to vector<8x6x32xbf16>
    %24 = arith.extf %23 : vector<8x6x32xbf16> to vector<8x6x32xf32>
    %25 = vector.shape_cast %18 : vector<1x32xf32> to vector<1x1x32xf32>
    %26 = vector.broadcast %25 : vector<1x1x32xf32> to vector<8x6x32xf32>
    %27 = arith.mulf %24, %26 : vector<8x6x32xf32>
    %28 = vector.shape_cast %21 : vector<1x32xf32> to vector<1x1x32xf32>
    %29 = vector.broadcast %28 : vector<1x1x32xf32> to vector<8x6x32xf32>
    %30 = arith.addf %27, %29 : vector<8x6x32xf32>
    %cst_17 = arith.constant 0.000000e+00 : f32
    %31 = vector.broadcast %cst_17 : f32 to vector<8x6x32xf32>
    %32 = arith.maximumf %30, %31 : vector<8x6x32xf32>
    %33 = vector.extract_strided_slice %32 {offsets = [0, 0, 0], sizes = [8, 4, 32], strides = [1, 1, 1]} : vector<8x6x32xf32> to vector<8x4x32xf32>
    %34 = arith.truncf %33 : vector<8x4x32xf32> to vector<8x4x32xbf16>
    %c0_18 = arith.constant 0 : index
    %c0_19 = arith.constant 0 : index
    %c0_20 = arith.constant 0 : index
    %c0_21 = arith.constant 0 : index
    %35 = vector.load %arg7[%c0_18, %c0_19, %c0_20, %c0_21] : memref<1x8x4x32xbf16, #tpu.memory_space<vmem>>, vector<1x8x4x32xbf16>
    %36 = vector.shape_cast %35 : vector<1x8x4x32xbf16> to vector<8x4x32xbf16>
    %37 = vector.shape_cast %34 : vector<8x4x32xbf16> to vector<1x8x4x32xbf16>
    tpu.vector_store %arg7[%c0_18, %c0_19, %c0_20, %c0_21], %37 {strides = array<i32>} : memref<1x8x4x32xbf16, #tpu.memory_space<vmem>>, vector<1x8x4x32xbf16>,
    return
  }
  func.func @transform_0(%arg0: i32, %arg1: i32) -> (i32, i32, i32, i32) {
    %c0_i32 = arith.constant 0 : i32
    %c0_i32_0 = arith.constant 0 : i32
    %c0_i32_1 = arith.constant 0 : i32
    return %arg0, %arg1, %c0_i32, %c0_i32_0 : i32, i32, i32, i32
  }
  func.func @transform_1(%arg0: i32, %arg1: i32) -> (i32, i32, i32) {
    %c0_i32 = arith.constant 0 : i32
    %c0_i32_0 = arith.constant 0 : i32
    %c0_i32_1 = arith.constant 0 : i32
    %c0_i32_2 = arith.constant 0 : i32
    return %c0_i32, %c0_i32_0, %c0_i32_1 : i32, i32, i32
  }
  func.func @transform_2(%arg0: i32, %arg1: i32) -> (i32, i32, i32) {
    %c0_i32 = arith.constant 0 : i32
    %c0_i32_0 = arith.constant 0 : i32
    %c0_i32_1 = arith.constant 0 : i32
    %c0_i32_2 = arith.constant 0 : i32
    return %c0_i32, %c0_i32_0, %c0_i32_1 : i32, i32, i32
  }
  func.func @transform_3(%arg0: i32, %arg1: i32) -> (i32, i32) {
    %c0_i32 = arith.constant 0 : i32
    %c0_i32_0 = arith.constant 0 : i32
    %c0_i32_1 = arith.constant 0 : i32
    return %c0_i32, %c0_i32_0 : i32, i32
  }
  func.func @transform_4(%arg0: i32, %arg1: i32) -> (i32, i32) {
    %c0_i32 = arith.constant 0 : i32
    %c0_i32_0 = arith.constant 0 : i32
    %c0_i32_1 = arith.constant 0 : i32
    return %c0_i32, %c0_i32_0 : i32, i32
  }
  func.func @transform_5(%arg0: i32, %arg1: i32) -> (i32, i32, i32, i32) {
    %c0_i32 = arith.constant 0 : i32
    %c0_i32_0 = arith.constant 0 : i32
    %c0_i32_1 = arith.constant 0 : i32
    return %arg0, %arg1, %c0_i32, %c0_i32_0 : i32, i32, i32, i32
  }
}

module attributes {stable_mosaic.version = 11 : i64} {
  func.func @kernel(%arg0: i32, %arg1: i32, %arg2: memref<1x4x2x6x32xbf16, #tpu.memory_space<vmem>>, %arg3: memref<2x8x32xf32, #tpu.memory_space<vmem>>, %arg4: memref<2x8x32xf32, #tpu.memory_space<vmem>>, %arg5: memref<1x32xf32, #tpu.memory_space<vmem>>, %arg6: memref<1x32xf32, #tpu.memory_space<vmem>>, %arg7: memref<1x4x2x4x32xbf16, #tpu.memory_space<vmem>>, %arg8: memref<1x4x4x16xbf16, #tpu.memory_space<vmem>>) attributes {dimension_semantics = [#tpu.dimension_semantics<parallel>, #tpu.dimension_semantics<parallel>], iteration_bounds = array<i64: 2, 2>, scalar_prefetch = 0 : i64, scratch_operands = 0 : i64, tpu.core_type = #tpu.core_type<tc>, window_params = [{transform_indices = @transform_0, window_bounds = array<i64: 1, 4, 2, 6, 32>}, {pipeline_mode = #tpu.pipeline_mode<synchronous>, transform_indices = @transform_1, window_bounds = array<i64: 2, 8, 32>}, {pipeline_mode = #tpu.pipeline_mode<synchronous>, transform_indices = @transform_2, window_bounds = array<i64: 2, 8, 32>}, {pipeline_mode = #tpu.pipeline_mode<synchronous>, transform_indices = @transform_3, window_bounds = array<i64: 1, 32>}, {pipeline_mode = #tpu.pipeline_mode<synchronous>, transform_indices = @transform_4, window_bounds = array<i64: 1, 32>}, {transform_indices = @transform_5, window_bounds = array<i64: 1, 4, 2, 4, 32>}, {transform_indices = @transform_6, window_bounds = array<i64: 1, 4, 4, 16>}]} {
    %c0 = arith.constant 0 : index
    %c0_0 = arith.constant 0 : index
    %c0_1 = arith.constant 0 : index
    %0 = vector.load %arg3[%c0, %c0_0, %c0_1] : memref<2x8x32xf32, #tpu.memory_space<vmem>>, vector<2x8x32xf32>
    %1 = vector.shape_cast %0 : vector<2x8x32xf32> to vector<16x32xf32>
    %cst = arith.constant dense<0.000000e+00> : vector<32xf32>
    %2 = vector.multi_reduction <add>, %1, %cst [0] : vector<16x32xf32> to vector<32xf32>
    %3 = vector.shape_cast %2 : vector<32xf32> to vector<1x32xf32>
    %c0_2 = arith.constant 0 : index
    %c0_3 = arith.constant 0 : index
    %c0_4 = arith.constant 0 : index
    %4 = vector.load %arg4[%c0_2, %c0_3, %c0_4] : memref<2x8x32xf32, #tpu.memory_space<vmem>>, vector<2x8x32xf32>
    %5 = vector.shape_cast %4 : vector<2x8x32xf32> to vector<16x32xf32>
    %cst_5 = arith.constant dense<0.000000e+00> : vector<32xf32>
    %6 = vector.multi_reduction <add>, %5, %cst_5 [0] : vector<16x32xf32> to vector<32xf32>
    %7 = vector.shape_cast %6 : vector<32xf32> to vector<1x32xf32>
    %cst_6 = arith.constant 0.001953125 : f32
    %8 = vector.broadcast %cst_6 : f32 to vector<1x32xf32>
    %9 = arith.mulf %3, %8 : vector<1x32xf32>
    %cst_7 = arith.constant 0.001953125 : f32
    %10 = vector.broadcast %cst_7 : f32 to vector<1x32xf32>
    %11 = arith.mulf %7, %10 : vector<1x32xf32>
    %12 = arith.mulf %9, %9 : vector<1x32xf32>
    %13 = arith.subf %11, %12 : vector<1x32xf32>
    %c0_8 = arith.constant 0 : index
    %c0_9 = arith.constant 0 : index
    %14 = vector.load %arg5[%c0_8, %c0_9] : memref<1x32xf32, #tpu.memory_space<vmem>>, vector<1x32xf32>
    %cst_10 = arith.constant 9.99999974E-6 : f32
    %15 = vector.broadcast %cst_10 : f32 to vector<1x32xf32>
    %16 = arith.addf %13, %15 : vector<1x32xf32>
    %17 = math.rsqrt %16 : vector<1x32xf32>
    %18 = arith.mulf %14, %17 : vector<1x32xf32>
    %c0_11 = arith.constant 0 : index
    %c0_12 = arith.constant 0 : index
    %19 = vector.load %arg6[%c0_11, %c0_12] : memref<1x32xf32, #tpu.memory_space<vmem>>, vector<1x32xf32>
    %20 = arith.mulf %9, %18 : vector<1x32xf32>
    %21 = arith.subf %19, %20 : vector<1x32xf32>
    %c0_13 = arith.constant 0 : index
    %c0_14 = arith.constant 0 : index
    %c0_15 = arith.constant 0 : index
    %c0_16 = arith.constant 0 : index
    %c0_17 = arith.constant 0 : index
    %22 = vector.load %arg2[%c0_13, %c0_14, %c0_15, %c0_16, %c0_17] : memref<1x4x2x6x32xbf16, #tpu.memory_space<vmem>>, vector<1x4x2x6x32xbf16>
    %23 = vector.shape_cast %22 : vector<1x4x2x6x32xbf16> to vector<4x2x6x32xbf16>
    %24 = arith.extf %23 : vector<4x2x6x32xbf16> to vector<4x2x6x32xf32>
    %25 = vector.shape_cast %18 : vector<1x32xf32> to vector<1x1x1x32xf32>
    %26 = vector.broadcast %25 : vector<1x1x1x32xf32> to vector<4x2x6x32xf32>
    %27 = arith.mulf %24, %26 : vector<4x2x6x32xf32>
    %28 = vector.shape_cast %21 : vector<1x32xf32> to vector<1x1x1x32xf32>
    %29 = vector.broadcast %28 : vector<1x1x1x32xf32> to vector<4x2x6x32xf32>
    %30 = arith.addf %27, %29 : vector<4x2x6x32xf32>
    %cst_18 = arith.constant 0.000000e+00 : f32
    %31 = vector.broadcast %cst_18 : f32 to vector<4x2x6x32xf32>
    %32 = arith.maximumf %30, %31 : vector<4x2x6x32xf32>
    %33 = vector.extract_strided_slice %32 {offsets = [0, 0, 0, 0], sizes = [4, 2, 4, 32], strides = [1, 1, 1, 1]} : vector<4x2x6x32xf32> to vector<4x2x4x32xf32>
    %34 = arith.truncf %33 : vector<4x2x4x32xf32> to vector<4x2x4x32xbf16>
    %c0_19 = arith.constant 0 : index
    %c0_20 = arith.constant 0 : index
    %c0_21 = arith.constant 0 : index
    %c0_22 = arith.constant 0 : index
    %c0_23 = arith.constant 0 : index
    %35 = vector.load %arg7[%c0_19, %c0_20, %c0_21, %c0_22, %c0_23] : memref<1x4x2x4x32xbf16, #tpu.memory_space<vmem>>, vector<1x4x2x4x32xbf16>
    %36 = vector.shape_cast %35 : vector<1x4x2x4x32xbf16> to vector<4x2x4x32xbf16>
    %37 = vector.shape_cast %34 : vector<4x2x4x32xbf16> to vector<1x4x2x4x32xbf16>
    tpu.vector_store %arg7[%c0_19, %c0_20, %c0_21, %c0_22, %c0_23], %37 {strides = array<i32>} : memref<1x4x2x4x32xbf16, #tpu.memory_space<vmem>>, vector<1x4x2x4x32xbf16>,
    %38 = vector.extract_strided_slice %33 {offsets = [0, 0, 0, 0], sizes = [4, 1, 4, 32], strides = [1, 1, 1, 1]} : vector<4x2x4x32xf32> to vector<4x1x4x32xf32>
    %39 = vector.shape_cast %38 : vector<4x1x4x32xf32> to vector<4x4x32xf32>
    %40 = vector.extract_strided_slice %33 {offsets = [0, 1, 0, 0], sizes = [4, 1, 4, 32], strides = [1, 1, 1, 1]} : vector<4x2x4x32xf32> to vector<4x1x4x32xf32>
    %41 = vector.shape_cast %40 : vector<4x1x4x32xf32> to vector<4x4x32xf32>
    %42 = arith.maximumf %39, %41 : vector<4x4x32xf32>
    %43 = vector.extract_strided_slice %42 {offsets = [0, 0, 0], sizes = [4, 4, 8], strides = [1, 1, 1]} : vector<4x4x32xf32> to vector<4x4x8xf32>
    %44 = vector.extract_strided_slice %42 {offsets = [0, 0, 8], sizes = [4, 4, 8], strides = [1, 1, 1]} : vector<4x4x32xf32> to vector<4x4x8xf32>
    %45 = arith.maximumf %43, %44 : vector<4x4x8xf32>
    %46 = arith.truncf %45 : vector<4x4x8xf32> to vector<4x4x8xbf16>
    %c0_24 = arith.constant 0 : index
    %c0_25 = arith.constant 0 : index
    %c0_26 = arith.constant 0 : index
    %c0_27 = arith.constant 0 : index
    %47 = vector.load %arg8[%c0_24, %c0_25, %c0_26, %c0_27] : memref<1x4x4x16xbf16, #tpu.memory_space<vmem>>, vector<1x4x4x8xbf16>
    %48 = vector.shape_cast %47 : vector<1x4x4x8xbf16> to vector<4x4x8xbf16>
    %49 = vector.shape_cast %46 : vector<4x4x8xbf16> to vector<1x4x4x8xbf16>
    tpu.vector_store %arg8[%c0_24, %c0_25, %c0_26, %c0_27], %49 {strides = array<i32>} : memref<1x4x4x16xbf16, #tpu.memory_space<vmem>>, vector<1x4x4x8xbf16>,
    %50 = vector.extract_strided_slice %42 {offsets = [0, 0, 16], sizes = [4, 4, 8], strides = [1, 1, 1]} : vector<4x4x32xf32> to vector<4x4x8xf32>
    %51 = vector.extract_strided_slice %42 {offsets = [0, 0, 24], sizes = [4, 4, 8], strides = [1, 1, 1]} : vector<4x4x32xf32> to vector<4x4x8xf32>
    %52 = arith.maximumf %50, %51 : vector<4x4x8xf32>
    %53 = arith.truncf %52 : vector<4x4x8xf32> to vector<4x4x8xbf16>
    %c0_28 = arith.constant 0 : index
    %c0_29 = arith.constant 0 : index
    %c0_30 = arith.constant 0 : index
    %c8 = arith.constant 8 : index
    %54 = vector.load %arg8[%c0_28, %c0_29, %c0_30, %c8] : memref<1x4x4x16xbf16, #tpu.memory_space<vmem>>, vector<1x4x4x8xbf16>
    %55 = vector.shape_cast %54 : vector<1x4x4x8xbf16> to vector<4x4x8xbf16>
    %56 = vector.shape_cast %53 : vector<4x4x8xbf16> to vector<1x4x4x8xbf16>
    tpu.vector_store %arg8[%c0_28, %c0_29, %c0_30, %c8], %56 {strides = array<i32>} : memref<1x4x4x16xbf16, #tpu.memory_space<vmem>>, vector<1x4x4x8xbf16>,
    return
  }
  func.func @transform_0(%arg0: i32, %arg1: i32) -> (i32, i32, i32, i32, i32) {
    %c0_i32 = arith.constant 0 : i32
    %c0_i32_0 = arith.constant 0 : i32
    %c0_i32_1 = arith.constant 0 : i32
    %c0_i32_2 = arith.constant 0 : i32
    return %arg0, %arg1, %c0_i32, %c0_i32_0, %c0_i32_1 : i32, i32, i32, i32, i32
  }
  func.func @transform_1(%arg0: i32, %arg1: i32) -> (i32, i32, i32) {
    %c0_i32 = arith.constant 0 : i32
    %c0_i32_0 = arith.constant 0 : i32
    %c0_i32_1 = arith.constant 0 : i32
    %c0_i32_2 = arith.constant 0 : i32
    return %c0_i32, %c0_i32_0, %c0_i32_1 : i32, i32, i32
  }
  func.func @transform_2(%arg0: i32, %arg1: i32) -> (i32, i32, i32) {
    %c0_i32 = arith.constant 0 : i32
    %c0_i32_0 = arith.constant 0 : i32
    %c0_i32_1 = arith.constant 0 : i32
    %c0_i32_2 = arith.constant 0 : i32
    return %c0_i32, %c0_i32_0, %c0_i32_1 : i32, i32, i32
  }
  func.func @transform_3(%arg0: i32, %arg1: i32) -> (i32, i32) {
    %c0_i32 = arith.constant 0 : i32
    %c0_i32_0 = arith.constant 0 : i32
    %c0_i32_1 = arith.constant 0 : i32
    return %c0_i32, %c0_i32_0 : i32, i32
  }
  func.func @transform_4(%arg0: i32, %arg1: i32) -> (i32, i32) {
    %c0_i32 = arith.constant 0 : i32
    %c0_i32_0 = arith.constant 0 : i32
    %c0_i32_1 = arith.constant 0 : i32
    return %c0_i32, %c0_i32_0 : i32, i32
  }
  func.func @transform_5(%arg0: i32, %arg1: i32) -> (i32, i32, i32, i32, i32) {
    %c0_i32 = arith.constant 0 : i32
    %c0_i32_0 = arith.constant 0 : i32
    %c0_i32_1 = arith.constant 0 : i32
    %c0_i32_2 = arith.constant 0 : i32
    return %arg0, %arg1, %c0_i32, %c0_i32_0, %c0_i32_1 : i32, i32, i32, i32, i32
  }
  func.func @transform_6(%arg0: i32, %arg1: i32) -> (i32, i32, i32, i32) {
    %c0_i32 = arith.constant 0 : i32
    %c0_i32_0 = arith.constant 0 : i32
    %c0_i32_1 = arith.constant 0 : i32
    return %arg0, %arg1, %c0_i32, %c0_i32_0 : i32, i32, i32, i32
  }
}

module attributes {stable_mosaic.version = 11 : i64} {
  func.func @kernel(%arg0: i32, %arg1: i32, %arg2: memref<1x1x160x24xbf16, #tpu.memory_space<vmem>>, %arg3: memref<72x16xbf16, #tpu.memory_space<vmem>>, %arg4: memref<1x1x128x16xbf16, #tpu.memory_space<vmem>>, %arg5: memref<1x8x16xf32, #tpu.memory_space<vmem>>, %arg6: memref<1x8x16xf32, #tpu.memory_space<vmem>>, %arg7: memref<128x72xbf16, #tpu.memory_space<vmem>>) attributes {dimension_semantics = [#tpu.dimension_semantics<parallel>, #tpu.dimension_semantics<arbitrary>], iteration_bounds = array<i64: 2, 1>, scalar_prefetch = 0 : i64, scratch_operands = 1 : i64, tpu.core_type = #tpu.core_type<tc>, window_params = [{transform_indices = @transform_0, window_bounds = array<i64: 1, 1, 160, 24>}, {pipeline_mode = #tpu.pipeline_mode<synchronous>, transform_indices = @transform_1, window_bounds = array<i64: 72, 16>}, {transform_indices = @transform_2, window_bounds = array<i64: 1, 1, 128, 16>}, {transform_indices = @transform_3, window_bounds = array<i64: 1, 8, 16>}, {transform_indices = @transform_4, window_bounds = array<i64: 1, 8, 16>}]} {
    %c0 = arith.constant 0 : index
    %c0_0 = arith.constant 0 : index
    %c0_1 = arith.constant 0 : index
    %c0_2 = arith.constant 0 : index
    %0 = vector.load %arg2[%c0, %c0_0, %c0_1, %c0_2] : memref<1x1x160x24xbf16, #tpu.memory_space<vmem>>, vector<1x1x128x24xbf16>
    %1 = vector.shape_cast %0 : vector<1x1x128x24xbf16> to vector<128x24xbf16>
    %c0_3 = arith.constant 0 : index
    %c0_4 = arith.constant 0 : index
    %2 = vector.load %arg7[%c0_3, %c0_4] : memref<128x72xbf16, #tpu.memory_space<vmem>>, vector<128x24xbf16>
    tpu.vector_store %arg7[%c0_3, %c0_4], %1 {strides = array<i32>} : memref<128x72xbf16, #tpu.memory_space<vmem>>, vector<128x24xbf16>,
    %c0_5 = arith.constant 0 : index
    %c0_6 = arith.constant 0 : index
    %c16 = arith.constant 16 : index
    %c0_7 = arith.constant 0 : index
    %3 = vector.load %arg2[%c0_5, %c0_6, %c16, %c0_7] : memref<1x1x160x24xbf16, #tpu.memory_space<vmem>>, vector<1x1x128x24xbf16>
    %4 = vector.shape_cast %3 : vector<1x1x128x24xbf16> to vector<128x24xbf16>
    %c0_8 = arith.constant 0 : index
    %c24 = arith.constant 24 : index
    %5 = vector.load %arg7[%c0_8, %c24] : memref<128x72xbf16, #tpu.memory_space<vmem>>, vector<128x24xbf16>
    tpu.vector_store %arg7[%c0_8, %c24], %4 {strides = array<i32>} : memref<128x72xbf16, #tpu.memory_space<vmem>>, vector<128x24xbf16>,
    %c0_9 = arith.constant 0 : index
    %c0_10 = arith.constant 0 : index
    %c32 = arith.constant 32 : index
    %c0_11 = arith.constant 0 : index
    %6 = vector.load %arg2[%c0_9, %c0_10, %c32, %c0_11] : memref<1x1x160x24xbf16, #tpu.memory_space<vmem>>, vector<1x1x128x24xbf16>
    %7 = vector.shape_cast %6 : vector<1x1x128x24xbf16> to vector<128x24xbf16>
    %c0_12 = arith.constant 0 : index
    %c48 = arith.constant 48 : index
    %8 = vector.load %arg7[%c0_12, %c48] : memref<128x72xbf16, #tpu.memory_space<vmem>>, vector<128x24xbf16>
    tpu.vector_store %arg7[%c0_12, %c48], %7 {strides = array<i32>} : memref<128x72xbf16, #tpu.memory_space<vmem>>, vector<128x24xbf16>,
    %c0_13 = arith.constant 0 : index
    %c0_14 = arith.constant 0 : index
    %9 = vector.load %arg7[%c0_13, %c0_14] : memref<128x72xbf16, #tpu.memory_space<vmem>>, vector<128x72xbf16>
    %c0_15 = arith.constant 0 : index
    %c0_16 = arith.constant 0 : index
    %10 = vector.load %arg3[%c0_15, %c0_16] : memref<72x16xbf16, #tpu.memory_space<vmem>>, vector<72x16xbf16>
    %cst = arith.constant dense<0.000000e+00> : vector<128x16xf32>
    %11 = tpu.matmul %9, %10, %cst {dimension_numbers = #tpu.dot_dimension_numbers<[1], [0], [0], [1], [0, 0, 1, 1], [], []>} : vector<128x72xbf16>, vector<72x16xbf16>, vector<128x16xf32> -> vector<128x16xf32>
    %12 = arith.truncf %11 : vector<128x16xf32> to vector<128x16xbf16>
    %c0_17 = arith.constant 0 : index
    %c0_18 = arith.constant 0 : index
    %c0_19 = arith.constant 0 : index
    %c0_20 = arith.constant 0 : index
    %13 = vector.load %arg4[%c0_17, %c0_18, %c0_19, %c0_20] : memref<1x1x128x16xbf16, #tpu.memory_space<vmem>>, vector<1x1x128x16xbf16>
    %14 = vector.shape_cast %13 : vector<1x1x128x16xbf16> to vector<128x16xbf16>
    %15 = vector.shape_cast %12 : vector<128x16xbf16> to vector<1x1x128x16xbf16>
    tpu.vector_store %arg4[%c0_17, %c0_18, %c0_19, %c0_20], %15 {strides = array<i32>} : memref<1x1x128x16xbf16, #tpu.memory_space<vmem>>, vector<1x1x128x16xbf16>,
    %16 = tpu.iota {dimensions = array<i32: 0>} : vector<128x1xi32>
    %c16_i32 = arith.constant 16 : i32
    %c0_i32 = arith.constant 0 : i32
    %17 = arith.cmpi eq, %c16_i32, %c0_i32 : i32
    %c1_i32 = arith.constant 1 : i32
    %18 = arith.select %17, %c1_i32, %c16_i32 : i32
    %19 = vector.broadcast %18 : i32 to vector<128x1xi32>
    %20 = arith.remsi %16, %19 : vector<128x1xi32>
    %c0_i32_21 = arith.constant 0 : i32
    %21 = vector.broadcast %c0_i32_21 : i32 to vector<128x1xi32>
    %22 = arith.cmpi ne, %20, %21 : vector<128x1xi32>
    %c0_i32_22 = arith.constant 0 : i32
    %23 = vector.broadcast %c0_i32_22 : i32 to vector<128x1xi32>
    %24 = arith.cmpi slt, %20, %23 : vector<128x1xi32>
    %c0_i32_23 = arith.constant 0 : i32
    %25 = arith.cmpi slt, %18, %c0_i32_23 : i32
    %26 = vector.broadcast %25 : i1 to vector<128x1xi1>
    %27 = vector.broadcast %26 : vector<128x1xi1> to vector<128x1xi1>
    %28 = arith.xori %24, %27 : vector<128x1xi1>
    %29 = arith.andi %28, %22 : vector<128x1xi1>
    %30 = vector.broadcast %18 : i32 to vector<128x1xi32>
    %31 = arith.addi %20, %30 : vector<128x1xi32>
    %32 = arith.select %29, %31, %20 : vector<128x1xi1>, vector<128x1xi32>
    %c8_i32 = arith.constant 8 : i32
    %33 = vector.broadcast %c8_i32 : i32 to vector<128x1xi32>
    %34 = arith.cmpi slt, %32, %33 : vector<128x1xi32>
    %cst_24 = arith.constant 0.000000e+00 : f32
    %35 = vector.shape_cast %34 : vector<128x1xi1> to vector<128x1xi1>
    %36 = vector.broadcast %35 : vector<128x1xi1> to vector<128x16xi1>
    %37 = vector.broadcast %cst_24 : f32 to vector<128x16xf32>
    %38 = arith.select %36, %11, %37 : vector<128x16xi1>, vector<128x16xf32>
    %39 = vector.shape_cast %38 : vector<128x16xf32> to vector<16x8x16xf32>
    %cst_25 = arith.constant dense<0.000000e+00> : vector<8x16xf32>
    %40 = vector.multi_reduction <add>, %39, %cst_25 [0] : vector<16x8x16xf32> to vector<8x16xf32>
    %41 = arith.mulf %38, %38 : vector<128x16xf32>
    %42 = vector.shape_cast %41 : vector<128x16xf32> to vector<16x8x16xf32>
    %cst_26 = arith.constant dense<0.000000e+00> : vector<8x16xf32>
    %43 = vector.multi_reduction <add>, %42, %cst_26 [0] : vector<16x8x16xf32> to vector<8x16xf32>
    %c0_i32_27 = arith.constant 0 : i32
    %44 = arith.cmpi eq, %arg1, %c0_i32_27 : i32
    %45 = arith.extui %44 : i1 to i32
    %c0_i32_28 = arith.constant 0 : i32
    %46 = arith.cmpi ne, %45, %c0_i32_28 : i32
    scf.if %46 {
      %cst_41 = arith.constant 0.000000e+00 : f32
      %59 = vector.broadcast %cst_41 : f32 to vector<1x8x16xf32>
      %c0_42 = arith.constant 0 : index
      %c0_43 = arith.constant 0 : index
      %c0_44 = arith.constant 0 : index
      %60 = vector.load %arg5[%c0_42, %c0_43, %c0_44] : memref<1x8x16xf32, #tpu.memory_space<vmem>>, vector<1x8x16xf32>
      tpu.vector_store %arg5[%c0_42, %c0_43, %c0_44], %59 {strides = array<i32>} : memref<1x8x16xf32, #tpu.memory_space<vmem>>, vector<1x8x16xf32>,
      %cst_45 = arith.constant 0.000000e+00 : f32
      %61 = vector.broadcast %cst_45 : f32 to vector<1x8x16xf32>
      %c0_46 = arith.constant 0 : index
      %c0_47 = arith.constant 0 : index
      %c0_48 = arith.constant 0 : index
      %62 = vector.load %arg6[%c0_46, %c0_47, %c0_48] : memref<1x8x16xf32, #tpu.memory_space<vmem>>, vector<1x8x16xf32>
      tpu.vector_store %arg6[%c0_46, %c0_47, %c0_48], %61 {strides = array<i32>} : memref<1x8x16xf32, #tpu.memory_space<vmem>>, vector<1x8x16xf32>,
    } else {
    }
    %c0_29 = arith.constant 0 : index
    %c0_30 = arith.constant 0 : index
    %c0_31 = arith.constant 0 : index
    %47 = vector.load %arg5[%c0_29, %c0_30, %c0_31] : memref<1x8x16xf32, #tpu.memory_space<vmem>>, vector<1x8x16xf32>
    %48 = vector.shape_cast %47 : vector<1x8x16xf32> to vector<8x16xf32>
    %49 = arith.addf %48, %40 : vector<8x16xf32>
    %c0_32 = arith.constant 0 : index
    %c0_33 = arith.constant 0 : index
    %c0_34 = arith.constant 0 : index
    %50 = vector.load %arg5[%c0_32, %c0_33, %c0_34] : memref<1x8x16xf32, #tpu.memory_space<vmem>>, vector<1x8x16xf32>
    %51 = vector.shape_cast %50 : vector<1x8x16xf32> to vector<8x16xf32>
    %52 = vector.shape_cast %49 : vector<8x16xf32> to vector<1x8x16xf32>
    tpu.vector_store %arg5[%c0_32, %c0_33, %c0_34], %52 {strides = array<i32>} : memref<1x8x16xf32, #tpu.memory_space<vmem>>, vector<1x8x16xf32>,
    %c0_35 = arith.constant 0 : index
    %c0_36 = arith.constant 0 : index
    %c0_37 = arith.constant 0 : index
    %53 = vector.load %arg6[%c0_35, %c0_36, %c0_37] : memref<1x8x16xf32, #tpu.memory_space<vmem>>, vector<1x8x16xf32>
    %54 = vector.shape_cast %53 : vector<1x8x16xf32> to vector<8x16xf32>
    %55 = arith.addf %54, %43 : vector<8x16xf32>
    %c0_38 = arith.constant 0 : index
    %c0_39 = arith.constant 0 : index
    %c0_40 = arith.constant 0 : index
    %56 = vector.load %arg6[%c0_38, %c0_39, %c0_40] : memref<1x8x16xf32, #tpu.memory_space<vmem>>, vector<1x8x16xf32>
    %57 = vector.shape_cast %56 : vector<1x8x16xf32> to vector<8x16xf32>
    %58 = vector.shape_cast %55 : vector<8x16xf32> to vector<1x8x16xf32>
    tpu.vector_store %arg6[%c0_38, %c0_39, %c0_40], %58 {strides = array<i32>} : memref<1x8x16xf32, #tpu.memory_space<vmem>>, vector<1x8x16xf32>,
    return
  }
  func.func @transform_0(%arg0: i32, %arg1: i32) -> (i32, i32, i32, i32) {
    %c0_i32 = arith.constant 0 : i32
    %c0_i32_0 = arith.constant 0 : i32
    %c0_i32_1 = arith.constant 0 : i32
    return %arg0, %arg1, %c0_i32, %c0_i32_0 : i32, i32, i32, i32
  }
  func.func @transform_1(%arg0: i32, %arg1: i32) -> (i32, i32) {
    %c0_i32 = arith.constant 0 : i32
    %c0_i32_0 = arith.constant 0 : i32
    %c0_i32_1 = arith.constant 0 : i32
    return %c0_i32, %c0_i32_0 : i32, i32
  }
  func.func @transform_2(%arg0: i32, %arg1: i32) -> (i32, i32, i32, i32) {
    %c0_i32 = arith.constant 0 : i32
    %c0_i32_0 = arith.constant 0 : i32
    %c0_i32_1 = arith.constant 0 : i32
    return %arg0, %arg1, %c0_i32, %c0_i32_0 : i32, i32, i32, i32
  }
  func.func @transform_3(%arg0: i32, %arg1: i32) -> (i32, i32, i32) {
    %c0_i32 = arith.constant 0 : i32
    %c0_i32_0 = arith.constant 0 : i32
    %c0_i32_1 = arith.constant 0 : i32
    return %arg0, %c0_i32, %c0_i32_0 : i32, i32, i32
  }
  func.func @transform_4(%arg0: i32, %arg1: i32) -> (i32, i32, i32) {
    %c0_i32 = arith.constant 0 : i32
    %c0_i32_0 = arith.constant 0 : i32
    %c0_i32_1 = arith.constant 0 : i32
    return %arg0, %c0_i32, %c0_i32_0 : i32, i32, i32
  }
}

module attributes {stable_mosaic.version = 11 : i64} {
  func.func @kernel(%arg0: i32, %arg1: i32, %arg2: memref<1x8x4x64xbf16, #tpu.memory_space<vmem>>, %arg3: memref<2x8x64xf32, #tpu.memory_space<vmem>>, %arg4: memref<2x8x64xf32, #tpu.memory_space<vmem>>, %arg5: memref<1x64xf32, #tpu.memory_space<vmem>>, %arg6: memref<1x64xf32, #tpu.memory_space<vmem>>, %arg7: memref<1x8x2x64xbf16, #tpu.memory_space<vmem>>) attributes {dimension_semantics = [#tpu.dimension_semantics<parallel>, #tpu.dimension_semantics<parallel>], iteration_bounds = array<i64: 2, 1>, scalar_prefetch = 0 : i64, scratch_operands = 0 : i64, tpu.core_type = #tpu.core_type<tc>, window_params = [{transform_indices = @transform_0, window_bounds = array<i64: 1, 8, 4, 64>}, {pipeline_mode = #tpu.pipeline_mode<synchronous>, transform_indices = @transform_1, window_bounds = array<i64: 2, 8, 64>}, {pipeline_mode = #tpu.pipeline_mode<synchronous>, transform_indices = @transform_2, window_bounds = array<i64: 2, 8, 64>}, {pipeline_mode = #tpu.pipeline_mode<synchronous>, transform_indices = @transform_3, window_bounds = array<i64: 1, 64>}, {pipeline_mode = #tpu.pipeline_mode<synchronous>, transform_indices = @transform_4, window_bounds = array<i64: 1, 64>}, {transform_indices = @transform_5, window_bounds = array<i64: 1, 8, 2, 64>}]} {
    %c0 = arith.constant 0 : index
    %c0_0 = arith.constant 0 : index
    %c0_1 = arith.constant 0 : index
    %0 = vector.load %arg3[%c0, %c0_0, %c0_1] : memref<2x8x64xf32, #tpu.memory_space<vmem>>, vector<2x8x64xf32>
    %1 = vector.shape_cast %0 : vector<2x8x64xf32> to vector<16x64xf32>
    %cst = arith.constant dense<0.000000e+00> : vector<64xf32>
    %2 = vector.multi_reduction <add>, %1, %cst [0] : vector<16x64xf32> to vector<64xf32>
    %3 = vector.shape_cast %2 : vector<64xf32> to vector<1x64xf32>
    %c0_2 = arith.constant 0 : index
    %c0_3 = arith.constant 0 : index
    %c0_4 = arith.constant 0 : index
    %4 = vector.load %arg4[%c0_2, %c0_3, %c0_4] : memref<2x8x64xf32, #tpu.memory_space<vmem>>, vector<2x8x64xf32>
    %5 = vector.shape_cast %4 : vector<2x8x64xf32> to vector<16x64xf32>
    %cst_5 = arith.constant dense<0.000000e+00> : vector<64xf32>
    %6 = vector.multi_reduction <add>, %5, %cst_5 [0] : vector<16x64xf32> to vector<64xf32>
    %7 = vector.shape_cast %6 : vector<64xf32> to vector<1x64xf32>
    %cst_6 = arith.constant 7.812500e-03 : f32
    %8 = vector.broadcast %cst_6 : f32 to vector<1x64xf32>
    %9 = arith.mulf %3, %8 : vector<1x64xf32>
    %cst_7 = arith.constant 7.812500e-03 : f32
    %10 = vector.broadcast %cst_7 : f32 to vector<1x64xf32>
    %11 = arith.mulf %7, %10 : vector<1x64xf32>
    %12 = arith.mulf %9, %9 : vector<1x64xf32>
    %13 = arith.subf %11, %12 : vector<1x64xf32>
    %c0_8 = arith.constant 0 : index
    %c0_9 = arith.constant 0 : index
    %14 = vector.load %arg5[%c0_8, %c0_9] : memref<1x64xf32, #tpu.memory_space<vmem>>, vector<1x64xf32>
    %cst_10 = arith.constant 9.99999974E-6 : f32
    %15 = vector.broadcast %cst_10 : f32 to vector<1x64xf32>
    %16 = arith.addf %13, %15 : vector<1x64xf32>
    %17 = math.rsqrt %16 : vector<1x64xf32>
    %18 = arith.mulf %14, %17 : vector<1x64xf32>
    %c0_11 = arith.constant 0 : index
    %c0_12 = arith.constant 0 : index
    %19 = vector.load %arg6[%c0_11, %c0_12] : memref<1x64xf32, #tpu.memory_space<vmem>>, vector<1x64xf32>
    %20 = arith.mulf %9, %18 : vector<1x64xf32>
    %21 = arith.subf %19, %20 : vector<1x64xf32>
    %c0_13 = arith.constant 0 : index
    %c0_14 = arith.constant 0 : index
    %c0_15 = arith.constant 0 : index
    %c0_16 = arith.constant 0 : index
    %22 = vector.load %arg2[%c0_13, %c0_14, %c0_15, %c0_16] : memref<1x8x4x64xbf16, #tpu.memory_space<vmem>>, vector<1x8x4x64xbf16>
    %23 = vector.shape_cast %22 : vector<1x8x4x64xbf16> to vector<8x4x64xbf16>
    %24 = arith.extf %23 : vector<8x4x64xbf16> to vector<8x4x64xf32>
    %25 = vector.shape_cast %18 : vector<1x64xf32> to vector<1x1x64xf32>
    %26 = vector.broadcast %25 : vector<1x1x64xf32> to vector<8x4x64xf32>
    %27 = arith.mulf %24, %26 : vector<8x4x64xf32>
    %28 = vector.shape_cast %21 : vector<1x64xf32> to vector<1x1x64xf32>
    %29 = vector.broadcast %28 : vector<1x1x64xf32> to vector<8x4x64xf32>
    %30 = arith.addf %27, %29 : vector<8x4x64xf32>
    %cst_17 = arith.constant 0.000000e+00 : f32
    %31 = vector.broadcast %cst_17 : f32 to vector<8x4x64xf32>
    %32 = arith.maximumf %30, %31 : vector<8x4x64xf32>
    %33 = vector.extract_strided_slice %32 {offsets = [0, 0, 0], sizes = [8, 2, 64], strides = [1, 1, 1]} : vector<8x4x64xf32> to vector<8x2x64xf32>
    %34 = arith.truncf %33 : vector<8x2x64xf32> to vector<8x2x64xbf16>
    %c0_18 = arith.constant 0 : index
    %c0_19 = arith.constant 0 : index
    %c0_20 = arith.constant 0 : index
    %c0_21 = arith.constant 0 : index
    %35 = vector.load %arg7[%c0_18, %c0_19, %c0_20, %c0_21] : memref<1x8x2x64xbf16, #tpu.memory_space<vmem>>, vector<1x8x2x64xbf16>
    %36 = vector.shape_cast %35 : vector<1x8x2x64xbf16> to vector<8x2x64xbf16>
    %37 = vector.shape_cast %34 : vector<8x2x64xbf16> to vector<1x8x2x64xbf16>
    tpu.vector_store %arg7[%c0_18, %c0_19, %c0_20, %c0_21], %37 {strides = array<i32>} : memref<1x8x2x64xbf16, #tpu.memory_space<vmem>>, vector<1x8x2x64xbf16>,
    return
  }
  func.func @transform_0(%arg0: i32, %arg1: i32) -> (i32, i32, i32, i32) {
    %c0_i32 = arith.constant 0 : i32
    %c0_i32_0 = arith.constant 0 : i32
    %c0_i32_1 = arith.constant 0 : i32
    return %arg0, %arg1, %c0_i32, %c0_i32_0 : i32, i32, i32, i32
  }
  func.func @transform_1(%arg0: i32, %arg1: i32) -> (i32, i32, i32) {
    %c0_i32 = arith.constant 0 : i32
    %c0_i32_0 = arith.constant 0 : i32
    %c0_i32_1 = arith.constant 0 : i32
    %c0_i32_2 = arith.constant 0 : i32
    return %c0_i32, %c0_i32_0, %c0_i32_1 : i32, i32, i32
  }
  func.func @transform_2(%arg0: i32, %arg1: i32) -> (i32, i32, i32) {
    %c0_i32 = arith.constant 0 : i32
    %c0_i32_0 = arith.constant 0 : i32
    %c0_i32_1 = arith.constant 0 : i32
    %c0_i32_2 = arith.constant 0 : i32
    return %c0_i32, %c0_i32_0, %c0_i32_1 : i32, i32, i32
  }
  func.func @transform_3(%arg0: i32, %arg1: i32) -> (i32, i32) {
    %c0_i32 = arith.constant 0 : i32
    %c0_i32_0 = arith.constant 0 : i32
    %c0_i32_1 = arith.constant 0 : i32
    return %c0_i32, %c0_i32_0 : i32, i32
  }
  func.func @transform_4(%arg0: i32, %arg1: i32) -> (i32, i32) {
    %c0_i32 = arith.constant 0 : i32
    %c0_i32_0 = arith.constant 0 : i32
    %c0_i32_1 = arith.constant 0 : i32
    return %c0_i32, %c0_i32_0 : i32, i32
  }
  func.func @transform_5(%arg0: i32, %arg1: i32) -> (i32, i32, i32, i32) {
    %c0_i32 = arith.constant 0 : i32
    %c0_i32_0 = arith.constant 0 : i32
    %c0_i32_1 = arith.constant 0 : i32
    return %arg0, %arg1, %c0_i32, %c0_i32_0 : i32, i32, i32, i32
  }
}

module attributes {stable_mosaic.version = 11 : i64} {
  func.func @kernel(%arg0: i32, %arg1: i32, %arg2: memref<1x1x160x48xbf16, #tpu.memory_space<vmem>>, %arg3: memref<144x16xbf16, #tpu.memory_space<vmem>>, %arg4: memref<1x1x128x16xbf16, #tpu.memory_space<vmem>>, %arg5: memref<1x8x16xf32, #tpu.memory_space<vmem>>, %arg6: memref<1x8x16xf32, #tpu.memory_space<vmem>>, %arg7: memref<128x144xbf16, #tpu.memory_space<vmem>>) attributes {dimension_semantics = [#tpu.dimension_semantics<parallel>, #tpu.dimension_semantics<arbitrary>], iteration_bounds = array<i64: 2, 1>, scalar_prefetch = 0 : i64, scratch_operands = 1 : i64, tpu.core_type = #tpu.core_type<tc>, window_params = [{transform_indices = @transform_0, window_bounds = array<i64: 1, 1, 160, 48>}, {pipeline_mode = #tpu.pipeline_mode<synchronous>, transform_indices = @transform_1, window_bounds = array<i64: 144, 16>}, {transform_indices = @transform_2, window_bounds = array<i64: 1, 1, 128, 16>}, {transform_indices = @transform_3, window_bounds = array<i64: 1, 8, 16>}, {transform_indices = @transform_4, window_bounds = array<i64: 1, 8, 16>}]} {
    %c0 = arith.constant 0 : index
    %c0_0 = arith.constant 0 : index
    %c0_1 = arith.constant 0 : index
    %c0_2 = arith.constant 0 : index
    %0 = vector.load %arg2[%c0, %c0_0, %c0_1, %c0_2] : memref<1x1x160x48xbf16, #tpu.memory_space<vmem>>, vector<1x1x128x48xbf16>
    %1 = vector.shape_cast %0 : vector<1x1x128x48xbf16> to vector<128x48xbf16>
    %c0_3 = arith.constant 0 : index
    %c0_4 = arith.constant 0 : index
    %2 = vector.load %arg7[%c0_3, %c0_4] : memref<128x144xbf16, #tpu.memory_space<vmem>>, vector<128x48xbf16>
    tpu.vector_store %arg7[%c0_3, %c0_4], %1 {strides = array<i32>} : memref<128x144xbf16, #tpu.memory_space<vmem>>, vector<128x48xbf16>,
    %c0_5 = arith.constant 0 : index
    %c0_6 = arith.constant 0 : index
    %c16 = arith.constant 16 : index
    %c0_7 = arith.constant 0 : index
    %3 = vector.load %arg2[%c0_5, %c0_6, %c16, %c0_7] : memref<1x1x160x48xbf16, #tpu.memory_space<vmem>>, vector<1x1x128x48xbf16>
    %4 = vector.shape_cast %3 : vector<1x1x128x48xbf16> to vector<128x48xbf16>
    %c0_8 = arith.constant 0 : index
    %c48 = arith.constant 48 : index
    %5 = vector.load %arg7[%c0_8, %c48] : memref<128x144xbf16, #tpu.memory_space<vmem>>, vector<128x48xbf16>
    tpu.vector_store %arg7[%c0_8, %c48], %4 {strides = array<i32>} : memref<128x144xbf16, #tpu.memory_space<vmem>>, vector<128x48xbf16>,
    %c0_9 = arith.constant 0 : index
    %c0_10 = arith.constant 0 : index
    %c32 = arith.constant 32 : index
    %c0_11 = arith.constant 0 : index
    %6 = vector.load %arg2[%c0_9, %c0_10, %c32, %c0_11] : memref<1x1x160x48xbf16, #tpu.memory_space<vmem>>, vector<1x1x128x48xbf16>
    %7 = vector.shape_cast %6 : vector<1x1x128x48xbf16> to vector<128x48xbf16>
    %c0_12 = arith.constant 0 : index
    %c96 = arith.constant 96 : index
    %8 = vector.load %arg7[%c0_12, %c96] : memref<128x144xbf16, #tpu.memory_space<vmem>>, vector<128x48xbf16>
    tpu.vector_store %arg7[%c0_12, %c96], %7 {strides = array<i32>} : memref<128x144xbf16, #tpu.memory_space<vmem>>, vector<128x48xbf16>,
    %c0_13 = arith.constant 0 : index
    %c0_14 = arith.constant 0 : index
    %9 = vector.load %arg7[%c0_13, %c0_14] : memref<128x144xbf16, #tpu.memory_space<vmem>>, vector<128x144xbf16>
    %c0_15 = arith.constant 0 : index
    %c0_16 = arith.constant 0 : index
    %10 = vector.load %arg3[%c0_15, %c0_16] : memref<144x16xbf16, #tpu.memory_space<vmem>>, vector<144x16xbf16>
    %cst = arith.constant dense<0.000000e+00> : vector<128x16xf32>
    %11 = tpu.matmul %9, %10, %cst {dimension_numbers = #tpu.dot_dimension_numbers<[1], [0], [0], [1], [0, 0, 1, 1], [], []>} : vector<128x144xbf16>, vector<144x16xbf16>, vector<128x16xf32> -> vector<128x16xf32>
    %12 = arith.truncf %11 : vector<128x16xf32> to vector<128x16xbf16>
    %c0_17 = arith.constant 0 : index
    %c0_18 = arith.constant 0 : index
    %c0_19 = arith.constant 0 : index
    %c0_20 = arith.constant 0 : index
    %13 = vector.load %arg4[%c0_17, %c0_18, %c0_19, %c0_20] : memref<1x1x128x16xbf16, #tpu.memory_space<vmem>>, vector<1x1x128x16xbf16>
    %14 = vector.shape_cast %13 : vector<1x1x128x16xbf16> to vector<128x16xbf16>
    %15 = vector.shape_cast %12 : vector<128x16xbf16> to vector<1x1x128x16xbf16>
    tpu.vector_store %arg4[%c0_17, %c0_18, %c0_19, %c0_20], %15 {strides = array<i32>} : memref<1x1x128x16xbf16, #tpu.memory_space<vmem>>, vector<1x1x128x16xbf16>,
    %16 = tpu.iota {dimensions = array<i32: 0>} : vector<128x1xi32>
    %c16_i32 = arith.constant 16 : i32
    %c0_i32 = arith.constant 0 : i32
    %17 = arith.cmpi eq, %c16_i32, %c0_i32 : i32
    %c1_i32 = arith.constant 1 : i32
    %18 = arith.select %17, %c1_i32, %c16_i32 : i32
    %19 = vector.broadcast %18 : i32 to vector<128x1xi32>
    %20 = arith.remsi %16, %19 : vector<128x1xi32>
    %c0_i32_21 = arith.constant 0 : i32
    %21 = vector.broadcast %c0_i32_21 : i32 to vector<128x1xi32>
    %22 = arith.cmpi ne, %20, %21 : vector<128x1xi32>
    %c0_i32_22 = arith.constant 0 : i32
    %23 = vector.broadcast %c0_i32_22 : i32 to vector<128x1xi32>
    %24 = arith.cmpi slt, %20, %23 : vector<128x1xi32>
    %c0_i32_23 = arith.constant 0 : i32
    %25 = arith.cmpi slt, %18, %c0_i32_23 : i32
    %26 = vector.broadcast %25 : i1 to vector<128x1xi1>
    %27 = vector.broadcast %26 : vector<128x1xi1> to vector<128x1xi1>
    %28 = arith.xori %24, %27 : vector<128x1xi1>
    %29 = arith.andi %28, %22 : vector<128x1xi1>
    %30 = vector.broadcast %18 : i32 to vector<128x1xi32>
    %31 = arith.addi %20, %30 : vector<128x1xi32>
    %32 = arith.select %29, %31, %20 : vector<128x1xi1>, vector<128x1xi32>
    %c8_i32 = arith.constant 8 : i32
    %33 = vector.broadcast %c8_i32 : i32 to vector<128x1xi32>
    %34 = arith.cmpi slt, %32, %33 : vector<128x1xi32>
    %cst_24 = arith.constant 0.000000e+00 : f32
    %35 = vector.shape_cast %34 : vector<128x1xi1> to vector<128x1xi1>
    %36 = vector.broadcast %35 : vector<128x1xi1> to vector<128x16xi1>
    %37 = vector.broadcast %cst_24 : f32 to vector<128x16xf32>
    %38 = arith.select %36, %11, %37 : vector<128x16xi1>, vector<128x16xf32>
    %39 = vector.shape_cast %38 : vector<128x16xf32> to vector<16x8x16xf32>
    %cst_25 = arith.constant dense<0.000000e+00> : vector<8x16xf32>
    %40 = vector.multi_reduction <add>, %39, %cst_25 [0] : vector<16x8x16xf32> to vector<8x16xf32>
    %41 = arith.mulf %38, %38 : vector<128x16xf32>
    %42 = vector.shape_cast %41 : vector<128x16xf32> to vector<16x8x16xf32>
    %cst_26 = arith.constant dense<0.000000e+00> : vector<8x16xf32>
    %43 = vector.multi_reduction <add>, %42, %cst_26 [0] : vector<16x8x16xf32> to vector<8x16xf32>
    %c0_i32_27 = arith.constant 0 : i32
    %44 = arith.cmpi eq, %arg1, %c0_i32_27 : i32
    %45 = arith.extui %44 : i1 to i32
    %c0_i32_28 = arith.constant 0 : i32
    %46 = arith.cmpi ne, %45, %c0_i32_28 : i32
    scf.if %46 {
      %cst_41 = arith.constant 0.000000e+00 : f32
      %59 = vector.broadcast %cst_41 : f32 to vector<1x8x16xf32>
      %c0_42 = arith.constant 0 : index
      %c0_43 = arith.constant 0 : index
      %c0_44 = arith.constant 0 : index
      %60 = vector.load %arg5[%c0_42, %c0_43, %c0_44] : memref<1x8x16xf32, #tpu.memory_space<vmem>>, vector<1x8x16xf32>
      tpu.vector_store %arg5[%c0_42, %c0_43, %c0_44], %59 {strides = array<i32>} : memref<1x8x16xf32, #tpu.memory_space<vmem>>, vector<1x8x16xf32>,
      %cst_45 = arith.constant 0.000000e+00 : f32
      %61 = vector.broadcast %cst_45 : f32 to vector<1x8x16xf32>
      %c0_46 = arith.constant 0 : index
      %c0_47 = arith.constant 0 : index
      %c0_48 = arith.constant 0 : index
      %62 = vector.load %arg6[%c0_46, %c0_47, %c0_48] : memref<1x8x16xf32, #tpu.memory_space<vmem>>, vector<1x8x16xf32>
      tpu.vector_store %arg6[%c0_46, %c0_47, %c0_48], %61 {strides = array<i32>} : memref<1x8x16xf32, #tpu.memory_space<vmem>>, vector<1x8x16xf32>,
    } else {
    }
    %c0_29 = arith.constant 0 : index
    %c0_30 = arith.constant 0 : index
    %c0_31 = arith.constant 0 : index
    %47 = vector.load %arg5[%c0_29, %c0_30, %c0_31] : memref<1x8x16xf32, #tpu.memory_space<vmem>>, vector<1x8x16xf32>
    %48 = vector.shape_cast %47 : vector<1x8x16xf32> to vector<8x16xf32>
    %49 = arith.addf %48, %40 : vector<8x16xf32>
    %c0_32 = arith.constant 0 : index
    %c0_33 = arith.constant 0 : index
    %c0_34 = arith.constant 0 : index
    %50 = vector.load %arg5[%c0_32, %c0_33, %c0_34] : memref<1x8x16xf32, #tpu.memory_space<vmem>>, vector<1x8x16xf32>
    %51 = vector.shape_cast %50 : vector<1x8x16xf32> to vector<8x16xf32>
    %52 = vector.shape_cast %49 : vector<8x16xf32> to vector<1x8x16xf32>
    tpu.vector_store %arg5[%c0_32, %c0_33, %c0_34], %52 {strides = array<i32>} : memref<1x8x16xf32, #tpu.memory_space<vmem>>, vector<1x8x16xf32>,
    %c0_35 = arith.constant 0 : index
    %c0_36 = arith.constant 0 : index
    %c0_37 = arith.constant 0 : index
    %53 = vector.load %arg6[%c0_35, %c0_36, %c0_37] : memref<1x8x16xf32, #tpu.memory_space<vmem>>, vector<1x8x16xf32>
    %54 = vector.shape_cast %53 : vector<1x8x16xf32> to vector<8x16xf32>
    %55 = arith.addf %54, %43 : vector<8x16xf32>
    %c0_38 = arith.constant 0 : index
    %c0_39 = arith.constant 0 : index
    %c0_40 = arith.constant 0 : index
    %56 = vector.load %arg6[%c0_38, %c0_39, %c0_40] : memref<1x8x16xf32, #tpu.memory_space<vmem>>, vector<1x8x16xf32>
    %57 = vector.shape_cast %56 : vector<1x8x16xf32> to vector<8x16xf32>
    %58 = vector.shape_cast %55 : vector<8x16xf32> to vector<1x8x16xf32>
    tpu.vector_store %arg6[%c0_38, %c0_39, %c0_40], %58 {strides = array<i32>} : memref<1x8x16xf32, #tpu.memory_space<vmem>>, vector<1x8x16xf32>,
    return
  }
  func.func @transform_0(%arg0: i32, %arg1: i32) -> (i32, i32, i32, i32) {
    %c0_i32 = arith.constant 0 : i32
    %c0_i32_0 = arith.constant 0 : i32
    %c0_i32_1 = arith.constant 0 : i32
    return %arg0, %arg1, %c0_i32, %c0_i32_0 : i32, i32, i32, i32
  }
  func.func @transform_1(%arg0: i32, %arg1: i32) -> (i32, i32) {
    %c0_i32 = arith.constant 0 : i32
    %c0_i32_0 = arith.constant 0 : i32
    %c0_i32_1 = arith.constant 0 : i32
    return %c0_i32, %c0_i32_0 : i32, i32
  }
  func.func @transform_2(%arg0: i32, %arg1: i32) -> (i32, i32, i32, i32) {
    %c0_i32 = arith.constant 0 : i32
    %c0_i32_0 = arith.constant 0 : i32
    %c0_i32_1 = arith.constant 0 : i32
    return %arg0, %arg1, %c0_i32, %c0_i32_0 : i32, i32, i32, i32
  }
  func.func @transform_3(%arg0: i32, %arg1: i32) -> (i32, i32, i32) {
    %c0_i32 = arith.constant 0 : i32
    %c0_i32_0 = arith.constant 0 : i32
    %c0_i32_1 = arith.constant 0 : i32
    return %arg0, %c0_i32, %c0_i32_0 : i32, i32, i32
  }
  func.func @transform_4(%arg0: i32, %arg1: i32) -> (i32, i32, i32) {
    %c0_i32 = arith.constant 0 : i32
    %c0_i32_0 = arith.constant 0 : i32
    %c0_i32_1 = arith.constant 0 : i32
    return %arg0, %c0_i32, %c0_i32_0 : i32, i32, i32
  }
}

module attributes {stable_mosaic.version = 11 : i64} {
  func.func @kernel(%arg0: i32, %arg1: i32, %arg2: memref<1x4x2x4x64xbf16, #tpu.memory_space<vmem>>, %arg3: memref<2x8x64xf32, #tpu.memory_space<vmem>>, %arg4: memref<2x8x64xf32, #tpu.memory_space<vmem>>, %arg5: memref<1x64xf32, #tpu.memory_space<vmem>>, %arg6: memref<1x64xf32, #tpu.memory_space<vmem>>, %arg7: memref<1x4x2x2x64xbf16, #tpu.memory_space<vmem>>, %arg8: memref<1x4x2x32xbf16, #tpu.memory_space<vmem>>) attributes {dimension_semantics = [#tpu.dimension_semantics<parallel>, #tpu.dimension_semantics<parallel>], iteration_bounds = array<i64: 2, 1>, scalar_prefetch = 0 : i64, scratch_operands = 0 : i64, tpu.core_type = #tpu.core_type<tc>, window_params = [{transform_indices = @transform_0, window_bounds = array<i64: 1, 4, 2, 4, 64>}, {pipeline_mode = #tpu.pipeline_mode<synchronous>, transform_indices = @transform_1, window_bounds = array<i64: 2, 8, 64>}, {pipeline_mode = #tpu.pipeline_mode<synchronous>, transform_indices = @transform_2, window_bounds = array<i64: 2, 8, 64>}, {pipeline_mode = #tpu.pipeline_mode<synchronous>, transform_indices = @transform_3, window_bounds = array<i64: 1, 64>}, {pipeline_mode = #tpu.pipeline_mode<synchronous>, transform_indices = @transform_4, window_bounds = array<i64: 1, 64>}, {transform_indices = @transform_5, window_bounds = array<i64: 1, 4, 2, 2, 64>}, {transform_indices = @transform_6, window_bounds = array<i64: 1, 4, 2, 32>}]} {
    %c0 = arith.constant 0 : index
    %c0_0 = arith.constant 0 : index
    %c0_1 = arith.constant 0 : index
    %0 = vector.load %arg3[%c0, %c0_0, %c0_1] : memref<2x8x64xf32, #tpu.memory_space<vmem>>, vector<2x8x64xf32>
    %1 = vector.shape_cast %0 : vector<2x8x64xf32> to vector<16x64xf32>
    %cst = arith.constant dense<0.000000e+00> : vector<64xf32>
    %2 = vector.multi_reduction <add>, %1, %cst [0] : vector<16x64xf32> to vector<64xf32>
    %3 = vector.shape_cast %2 : vector<64xf32> to vector<1x64xf32>
    %c0_2 = arith.constant 0 : index
    %c0_3 = arith.constant 0 : index
    %c0_4 = arith.constant 0 : index
    %4 = vector.load %arg4[%c0_2, %c0_3, %c0_4] : memref<2x8x64xf32, #tpu.memory_space<vmem>>, vector<2x8x64xf32>
    %5 = vector.shape_cast %4 : vector<2x8x64xf32> to vector<16x64xf32>
    %cst_5 = arith.constant dense<0.000000e+00> : vector<64xf32>
    %6 = vector.multi_reduction <add>, %5, %cst_5 [0] : vector<16x64xf32> to vector<64xf32>
    %7 = vector.shape_cast %6 : vector<64xf32> to vector<1x64xf32>
    %cst_6 = arith.constant 7.812500e-03 : f32
    %8 = vector.broadcast %cst_6 : f32 to vector<1x64xf32>
    %9 = arith.mulf %3, %8 : vector<1x64xf32>
    %cst_7 = arith.constant 7.812500e-03 : f32
    %10 = vector.broadcast %cst_7 : f32 to vector<1x64xf32>
    %11 = arith.mulf %7, %10 : vector<1x64xf32>
    %12 = arith.mulf %9, %9 : vector<1x64xf32>
    %13 = arith.subf %11, %12 : vector<1x64xf32>
    %c0_8 = arith.constant 0 : index
    %c0_9 = arith.constant 0 : index
    %14 = vector.load %arg5[%c0_8, %c0_9] : memref<1x64xf32, #tpu.memory_space<vmem>>, vector<1x64xf32>
    %cst_10 = arith.constant 9.99999974E-6 : f32
    %15 = vector.broadcast %cst_10 : f32 to vector<1x64xf32>
    %16 = arith.addf %13, %15 : vector<1x64xf32>
    %17 = math.rsqrt %16 : vector<1x64xf32>
    %18 = arith.mulf %14, %17 : vector<1x64xf32>
    %c0_11 = arith.constant 0 : index
    %c0_12 = arith.constant 0 : index
    %19 = vector.load %arg6[%c0_11, %c0_12] : memref<1x64xf32, #tpu.memory_space<vmem>>, vector<1x64xf32>
    %20 = arith.mulf %9, %18 : vector<1x64xf32>
    %21 = arith.subf %19, %20 : vector<1x64xf32>
    %c0_13 = arith.constant 0 : index
    %c0_14 = arith.constant 0 : index
    %c0_15 = arith.constant 0 : index
    %c0_16 = arith.constant 0 : index
    %c0_17 = arith.constant 0 : index
    %22 = vector.load %arg2[%c0_13, %c0_14, %c0_15, %c0_16, %c0_17] : memref<1x4x2x4x64xbf16, #tpu.memory_space<vmem>>, vector<1x4x2x4x64xbf16>
    %23 = vector.shape_cast %22 : vector<1x4x2x4x64xbf16> to vector<4x2x4x64xbf16>
    %24 = arith.extf %23 : vector<4x2x4x64xbf16> to vector<4x2x4x64xf32>
    %25 = vector.shape_cast %18 : vector<1x64xf32> to vector<1x1x1x64xf32>
    %26 = vector.broadcast %25 : vector<1x1x1x64xf32> to vector<4x2x4x64xf32>
    %27 = arith.mulf %24, %26 : vector<4x2x4x64xf32>
    %28 = vector.shape_cast %21 : vector<1x64xf32> to vector<1x1x1x64xf32>
    %29 = vector.broadcast %28 : vector<1x1x1x64xf32> to vector<4x2x4x64xf32>
    %30 = arith.addf %27, %29 : vector<4x2x4x64xf32>
    %cst_18 = arith.constant 0.000000e+00 : f32
    %31 = vector.broadcast %cst_18 : f32 to vector<4x2x4x64xf32>
    %32 = arith.maximumf %30, %31 : vector<4x2x4x64xf32>
    %33 = vector.extract_strided_slice %32 {offsets = [0, 0, 0, 0], sizes = [4, 2, 2, 64], strides = [1, 1, 1, 1]} : vector<4x2x4x64xf32> to vector<4x2x2x64xf32>
    %34 = arith.truncf %33 : vector<4x2x2x64xf32> to vector<4x2x2x64xbf16>
    %c0_19 = arith.constant 0 : index
    %c0_20 = arith.constant 0 : index
    %c0_21 = arith.constant 0 : index
    %c0_22 = arith.constant 0 : index
    %c0_23 = arith.constant 0 : index
    %35 = vector.load %arg7[%c0_19, %c0_20, %c0_21, %c0_22, %c0_23] : memref<1x4x2x2x64xbf16, #tpu.memory_space<vmem>>, vector<1x4x2x2x64xbf16>
    %36 = vector.shape_cast %35 : vector<1x4x2x2x64xbf16> to vector<4x2x2x64xbf16>
    %37 = vector.shape_cast %34 : vector<4x2x2x64xbf16> to vector<1x4x2x2x64xbf16>
    tpu.vector_store %arg7[%c0_19, %c0_20, %c0_21, %c0_22, %c0_23], %37 {strides = array<i32>} : memref<1x4x2x2x64xbf16, #tpu.memory_space<vmem>>, vector<1x4x2x2x64xbf16>,
    %38 = vector.extract_strided_slice %33 {offsets = [0, 0, 0, 0], sizes = [4, 1, 2, 64], strides = [1, 1, 1, 1]} : vector<4x2x2x64xf32> to vector<4x1x2x64xf32>
    %39 = vector.shape_cast %38 : vector<4x1x2x64xf32> to vector<4x2x64xf32>
    %40 = vector.extract_strided_slice %33 {offsets = [0, 1, 0, 0], sizes = [4, 1, 2, 64], strides = [1, 1, 1, 1]} : vector<4x2x2x64xf32> to vector<4x1x2x64xf32>
    %41 = vector.shape_cast %40 : vector<4x1x2x64xf32> to vector<4x2x64xf32>
    %42 = arith.maximumf %39, %41 : vector<4x2x64xf32>
    %43 = vector.extract_strided_slice %42 {offsets = [0, 0, 0], sizes = [4, 2, 16], strides = [1, 1, 1]} : vector<4x2x64xf32> to vector<4x2x16xf32>
    %44 = vector.extract_strided_slice %42 {offsets = [0, 0, 16], sizes = [4, 2, 16], strides = [1, 1, 1]} : vector<4x2x64xf32> to vector<4x2x16xf32>
    %45 = arith.maximumf %43, %44 : vector<4x2x16xf32>
    %46 = arith.truncf %45 : vector<4x2x16xf32> to vector<4x2x16xbf16>
    %c0_24 = arith.constant 0 : index
    %c0_25 = arith.constant 0 : index
    %c0_26 = arith.constant 0 : index
    %c0_27 = arith.constant 0 : index
    %47 = vector.load %arg8[%c0_24, %c0_25, %c0_26, %c0_27] : memref<1x4x2x32xbf16, #tpu.memory_space<vmem>>, vector<1x4x2x16xbf16>
    %48 = vector.shape_cast %47 : vector<1x4x2x16xbf16> to vector<4x2x16xbf16>
    %49 = vector.shape_cast %46 : vector<4x2x16xbf16> to vector<1x4x2x16xbf16>
    tpu.vector_store %arg8[%c0_24, %c0_25, %c0_26, %c0_27], %49 {strides = array<i32>} : memref<1x4x2x32xbf16, #tpu.memory_space<vmem>>, vector<1x4x2x16xbf16>,
    %50 = vector.extract_strided_slice %42 {offsets = [0, 0, 32], sizes = [4, 2, 16], strides = [1, 1, 1]} : vector<4x2x64xf32> to vector<4x2x16xf32>
    %51 = vector.extract_strided_slice %42 {offsets = [0, 0, 48], sizes = [4, 2, 16], strides = [1, 1, 1]} : vector<4x2x64xf32> to vector<4x2x16xf32>
    %52 = arith.maximumf %50, %51 : vector<4x2x16xf32>
    %53 = arith.truncf %52 : vector<4x2x16xf32> to vector<4x2x16xbf16>
    %c0_28 = arith.constant 0 : index
    %c0_29 = arith.constant 0 : index
    %c0_30 = arith.constant 0 : index
    %c16 = arith.constant 16 : index
    %54 = vector.load %arg8[%c0_28, %c0_29, %c0_30, %c16] : memref<1x4x2x32xbf16, #tpu.memory_space<vmem>>, vector<1x4x2x16xbf16>
    %55 = vector.shape_cast %54 : vector<1x4x2x16xbf16> to vector<4x2x16xbf16>
    %56 = vector.shape_cast %53 : vector<4x2x16xbf16> to vector<1x4x2x16xbf16>
    tpu.vector_store %arg8[%c0_28, %c0_29, %c0_30, %c16], %56 {strides = array<i32>} : memref<1x4x2x32xbf16, #tpu.memory_space<vmem>>, vector<1x4x2x16xbf16>,
    return
  }
  func.func @transform_0(%arg0: i32, %arg1: i32) -> (i32, i32, i32, i32, i32) {
    %c0_i32 = arith.constant 0 : i32
    %c0_i32_0 = arith.constant 0 : i32
    %c0_i32_1 = arith.constant 0 : i32
    %c0_i32_2 = arith.constant 0 : i32
    return %arg0, %arg1, %c0_i32, %c0_i32_0, %c0_i32_1 : i32, i32, i32, i32, i32
  }
  func.func @transform_1(%arg0: i32, %arg1: i32) -> (i32, i32, i32) {
    %c0_i32 = arith.constant 0 : i32
    %c0_i32_0 = arith.constant 0 : i32
    %c0_i32_1 = arith.constant 0 : i32
    %c0_i32_2 = arith.constant 0 : i32
    return %c0_i32, %c0_i32_0, %c0_i32_1 : i32, i32, i32
  }
  func.func @transform_2(%arg0: i32, %arg1: i32) -> (i32, i32, i32) {
    %c0_i32 = arith.constant 0 : i32
    %c0_i32_0 = arith.constant 0 : i32
    %c0_i32_1 = arith.constant 0 : i32
    %c0_i32_2 = arith.constant 0 : i32
    return %c0_i32, %c0_i32_0, %c0_i32_1 : i32, i32, i32
  }
  func.func @transform_3(%arg0: i32, %arg1: i32) -> (i32, i32) {
    %c0_i32 = arith.constant 0 : i32
    %c0_i32_0 = arith.constant 0 : i32
    %c0_i32_1 = arith.constant 0 : i32
    return %c0_i32, %c0_i32_0 : i32, i32
  }
  func.func @transform_4(%arg0: i32, %arg1: i32) -> (i32, i32) {
    %c0_i32 = arith.constant 0 : i32
    %c0_i32_0 = arith.constant 0 : i32
    %c0_i32_1 = arith.constant 0 : i32
    return %c0_i32, %c0_i32_0 : i32, i32
  }
  func.func @transform_5(%arg0: i32, %arg1: i32) -> (i32, i32, i32, i32, i32) {
    %c0_i32 = arith.constant 0 : i32
    %c0_i32_0 = arith.constant 0 : i32
    %c0_i32_1 = arith.constant 0 : i32
    %c0_i32_2 = arith.constant 0 : i32
    return %arg0, %arg1, %c0_i32, %c0_i32_0, %c0_i32_1 : i32, i32, i32, i32, i32
  }
  func.func @transform_6(%arg0: i32, %arg1: i32) -> (i32, i32, i32, i32) {
    %c0_i32 = arith.constant 0 : i32
    %c0_i32_0 = arith.constant 0 : i32
    %c0_i32_1 = arith.constant 0 : i32
    return %arg0, %arg1, %c0_i32, %c0_i32_0 : i32, i32, i32, i32
  }
}

module attributes {stable_mosaic.version = 11 : i64} {
  func.func @kernel(%arg0: i32, %arg1: i32, %arg2: memref<1x1x48x48xbf16, #tpu.memory_space<vmem>>, %arg3: memref<144x32xbf16, #tpu.memory_space<vmem>>, %arg4: memref<1x1x32x32xbf16, #tpu.memory_space<vmem>>, %arg5: memref<1x8x32xf32, #tpu.memory_space<vmem>>, %arg6: memref<1x8x32xf32, #tpu.memory_space<vmem>>, %arg7: memref<32x144xbf16, #tpu.memory_space<vmem>>) attributes {dimension_semantics = [#tpu.dimension_semantics<parallel>, #tpu.dimension_semantics<arbitrary>], iteration_bounds = array<i64: 2, 1>, scalar_prefetch = 0 : i64, scratch_operands = 1 : i64, tpu.core_type = #tpu.core_type<tc>, window_params = [{transform_indices = @transform_0, window_bounds = array<i64: 1, 1, 48, 48>}, {pipeline_mode = #tpu.pipeline_mode<synchronous>, transform_indices = @transform_1, window_bounds = array<i64: 144, 32>}, {transform_indices = @transform_2, window_bounds = array<i64: 1, 1, 32, 32>}, {transform_indices = @transform_3, window_bounds = array<i64: 1, 8, 32>}, {transform_indices = @transform_4, window_bounds = array<i64: 1, 8, 32>}]} {
    %c0 = arith.constant 0 : index
    %c0_0 = arith.constant 0 : index
    %c0_1 = arith.constant 0 : index
    %c0_2 = arith.constant 0 : index
    %0 = vector.load %arg2[%c0, %c0_0, %c0_1, %c0_2] : memref<1x1x48x48xbf16, #tpu.memory_space<vmem>>, vector<1x1x32x48xbf16>
    %1 = vector.shape_cast %0 : vector<1x1x32x48xbf16> to vector<32x48xbf16>
    %c0_3 = arith.constant 0 : index
    %c0_4 = arith.constant 0 : index
    %2 = vector.load %arg7[%c0_3, %c0_4] : memref<32x144xbf16, #tpu.memory_space<vmem>>, vector<32x48xbf16>
    tpu.vector_store %arg7[%c0_3, %c0_4], %1 {strides = array<i32>} : memref<32x144xbf16, #tpu.memory_space<vmem>>, vector<32x48xbf16>,
    %c0_5 = arith.constant 0 : index
    %c0_6 = arith.constant 0 : index
    %c8 = arith.constant 8 : index
    %c0_7 = arith.constant 0 : index
    %3 = vector.load %arg2[%c0_5, %c0_6, %c8, %c0_7] : memref<1x1x48x48xbf16, #tpu.memory_space<vmem>>, vector<1x1x32x48xbf16>
    %4 = vector.shape_cast %3 : vector<1x1x32x48xbf16> to vector<32x48xbf16>
    %c0_8 = arith.constant 0 : index
    %c48 = arith.constant 48 : index
    %5 = vector.load %arg7[%c0_8, %c48] : memref<32x144xbf16, #tpu.memory_space<vmem>>, vector<32x48xbf16>
    tpu.vector_store %arg7[%c0_8, %c48], %4 {strides = array<i32>} : memref<32x144xbf16, #tpu.memory_space<vmem>>, vector<32x48xbf16>,
    %c0_9 = arith.constant 0 : index
    %c0_10 = arith.constant 0 : index
    %c16 = arith.constant 16 : index
    %c0_11 = arith.constant 0 : index
    %6 = vector.load %arg2[%c0_9, %c0_10, %c16, %c0_11] : memref<1x1x48x48xbf16, #tpu.memory_space<vmem>>, vector<1x1x32x48xbf16>
    %7 = vector.shape_cast %6 : vector<1x1x32x48xbf16> to vector<32x48xbf16>
    %c0_12 = arith.constant 0 : index
    %c96 = arith.constant 96 : index
    %8 = vector.load %arg7[%c0_12, %c96] : memref<32x144xbf16, #tpu.memory_space<vmem>>, vector<32x48xbf16>
    tpu.vector_store %arg7[%c0_12, %c96], %7 {strides = array<i32>} : memref<32x144xbf16, #tpu.memory_space<vmem>>, vector<32x48xbf16>,
    %c0_13 = arith.constant 0 : index
    %c0_14 = arith.constant 0 : index
    %9 = vector.load %arg7[%c0_13, %c0_14] : memref<32x144xbf16, #tpu.memory_space<vmem>>, vector<32x144xbf16>
    %c0_15 = arith.constant 0 : index
    %c0_16 = arith.constant 0 : index
    %10 = vector.load %arg3[%c0_15, %c0_16] : memref<144x32xbf16, #tpu.memory_space<vmem>>, vector<144x32xbf16>
    %cst = arith.constant dense<0.000000e+00> : vector<32x32xf32>
    %11 = tpu.matmul %9, %10, %cst {dimension_numbers = #tpu.dot_dimension_numbers<[1], [0], [0], [1], [0, 0, 1, 1], [], []>} : vector<32x144xbf16>, vector<144x32xbf16>, vector<32x32xf32> -> vector<32x32xf32>
    %12 = arith.truncf %11 : vector<32x32xf32> to vector<32x32xbf16>
    %c0_17 = arith.constant 0 : index
    %c0_18 = arith.constant 0 : index
    %c0_19 = arith.constant 0 : index
    %c0_20 = arith.constant 0 : index
    %13 = vector.load %arg4[%c0_17, %c0_18, %c0_19, %c0_20] : memref<1x1x32x32xbf16, #tpu.memory_space<vmem>>, vector<1x1x32x32xbf16>
    %14 = vector.shape_cast %13 : vector<1x1x32x32xbf16> to vector<32x32xbf16>
    %15 = vector.shape_cast %12 : vector<32x32xbf16> to vector<1x1x32x32xbf16>
    tpu.vector_store %arg4[%c0_17, %c0_18, %c0_19, %c0_20], %15 {strides = array<i32>} : memref<1x1x32x32xbf16, #tpu.memory_space<vmem>>, vector<1x1x32x32xbf16>,
    %16 = tpu.iota {dimensions = array<i32: 0>} : vector<32x1xi32>
    %c8_i32 = arith.constant 8 : i32
    %c0_i32 = arith.constant 0 : i32
    %17 = arith.cmpi eq, %c8_i32, %c0_i32 : i32
    %c1_i32 = arith.constant 1 : i32
    %18 = arith.select %17, %c1_i32, %c8_i32 : i32
    %19 = vector.broadcast %18 : i32 to vector<32x1xi32>
    %20 = arith.remsi %16, %19 : vector<32x1xi32>
    %c0_i32_21 = arith.constant 0 : i32
    %21 = vector.broadcast %c0_i32_21 : i32 to vector<32x1xi32>
    %22 = arith.cmpi ne, %20, %21 : vector<32x1xi32>
    %c0_i32_22 = arith.constant 0 : i32
    %23 = vector.broadcast %c0_i32_22 : i32 to vector<32x1xi32>
    %24 = arith.cmpi slt, %20, %23 : vector<32x1xi32>
    %c0_i32_23 = arith.constant 0 : i32
    %25 = arith.cmpi slt, %18, %c0_i32_23 : i32
    %26 = vector.broadcast %25 : i1 to vector<32x1xi1>
    %27 = vector.broadcast %26 : vector<32x1xi1> to vector<32x1xi1>
    %28 = arith.xori %24, %27 : vector<32x1xi1>
    %29 = arith.andi %28, %22 : vector<32x1xi1>
    %30 = vector.broadcast %18 : i32 to vector<32x1xi32>
    %31 = arith.addi %20, %30 : vector<32x1xi32>
    %32 = arith.select %29, %31, %20 : vector<32x1xi1>, vector<32x1xi32>
    %c4_i32 = arith.constant 4 : i32
    %33 = vector.broadcast %c4_i32 : i32 to vector<32x1xi32>
    %34 = arith.cmpi slt, %32, %33 : vector<32x1xi32>
    %cst_24 = arith.constant 0.000000e+00 : f32
    %35 = vector.shape_cast %34 : vector<32x1xi1> to vector<32x1xi1>
    %36 = vector.broadcast %35 : vector<32x1xi1> to vector<32x32xi1>
    %37 = vector.broadcast %cst_24 : f32 to vector<32x32xf32>
    %38 = arith.select %36, %11, %37 : vector<32x32xi1>, vector<32x32xf32>
    %39 = vector.shape_cast %38 : vector<32x32xf32> to vector<4x8x32xf32>
    %cst_25 = arith.constant dense<0.000000e+00> : vector<8x32xf32>
    %40 = vector.multi_reduction <add>, %39, %cst_25 [0] : vector<4x8x32xf32> to vector<8x32xf32>
    %41 = arith.mulf %38, %38 : vector<32x32xf32>
    %42 = vector.shape_cast %41 : vector<32x32xf32> to vector<4x8x32xf32>
    %cst_26 = arith.constant dense<0.000000e+00> : vector<8x32xf32>
    %43 = vector.multi_reduction <add>, %42, %cst_26 [0] : vector<4x8x32xf32> to vector<8x32xf32>
    %c0_i32_27 = arith.constant 0 : i32
    %44 = arith.cmpi eq, %arg1, %c0_i32_27 : i32
    %45 = arith.extui %44 : i1 to i32
    %c0_i32_28 = arith.constant 0 : i32
    %46 = arith.cmpi ne, %45, %c0_i32_28 : i32
    scf.if %46 {
      %cst_41 = arith.constant 0.000000e+00 : f32
      %59 = vector.broadcast %cst_41 : f32 to vector<1x8x32xf32>
      %c0_42 = arith.constant 0 : index
      %c0_43 = arith.constant 0 : index
      %c0_44 = arith.constant 0 : index
      %60 = vector.load %arg5[%c0_42, %c0_43, %c0_44] : memref<1x8x32xf32, #tpu.memory_space<vmem>>, vector<1x8x32xf32>
      tpu.vector_store %arg5[%c0_42, %c0_43, %c0_44], %59 {strides = array<i32>} : memref<1x8x32xf32, #tpu.memory_space<vmem>>, vector<1x8x32xf32>,
      %cst_45 = arith.constant 0.000000e+00 : f32
      %61 = vector.broadcast %cst_45 : f32 to vector<1x8x32xf32>
      %c0_46 = arith.constant 0 : index
      %c0_47 = arith.constant 0 : index
      %c0_48 = arith.constant 0 : index
      %62 = vector.load %arg6[%c0_46, %c0_47, %c0_48] : memref<1x8x32xf32, #tpu.memory_space<vmem>>, vector<1x8x32xf32>
      tpu.vector_store %arg6[%c0_46, %c0_47, %c0_48], %61 {strides = array<i32>} : memref<1x8x32xf32, #tpu.memory_space<vmem>>, vector<1x8x32xf32>,
    } else {
    }
    %c0_29 = arith.constant 0 : index
    %c0_30 = arith.constant 0 : index
    %c0_31 = arith.constant 0 : index
    %47 = vector.load %arg5[%c0_29, %c0_30, %c0_31] : memref<1x8x32xf32, #tpu.memory_space<vmem>>, vector<1x8x32xf32>
    %48 = vector.shape_cast %47 : vector<1x8x32xf32> to vector<8x32xf32>
    %49 = arith.addf %48, %40 : vector<8x32xf32>
    %c0_32 = arith.constant 0 : index
    %c0_33 = arith.constant 0 : index
    %c0_34 = arith.constant 0 : index
    %50 = vector.load %arg5[%c0_32, %c0_33, %c0_34] : memref<1x8x32xf32, #tpu.memory_space<vmem>>, vector<1x8x32xf32>
    %51 = vector.shape_cast %50 : vector<1x8x32xf32> to vector<8x32xf32>
    %52 = vector.shape_cast %49 : vector<8x32xf32> to vector<1x8x32xf32>
    tpu.vector_store %arg5[%c0_32, %c0_33, %c0_34], %52 {strides = array<i32>} : memref<1x8x32xf32, #tpu.memory_space<vmem>>, vector<1x8x32xf32>,
    %c0_35 = arith.constant 0 : index
    %c0_36 = arith.constant 0 : index
    %c0_37 = arith.constant 0 : index
    %53 = vector.load %arg6[%c0_35, %c0_36, %c0_37] : memref<1x8x32xf32, #tpu.memory_space<vmem>>, vector<1x8x32xf32>
    %54 = vector.shape_cast %53 : vector<1x8x32xf32> to vector<8x32xf32>
    %55 = arith.addf %54, %43 : vector<8x32xf32>
    %c0_38 = arith.constant 0 : index
    %c0_39 = arith.constant 0 : index
    %c0_40 = arith.constant 0 : index
    %56 = vector.load %arg6[%c0_38, %c0_39, %c0_40] : memref<1x8x32xf32, #tpu.memory_space<vmem>>, vector<1x8x32xf32>
    %57 = vector.shape_cast %56 : vector<1x8x32xf32> to vector<8x32xf32>
    %58 = vector.shape_cast %55 : vector<8x32xf32> to vector<1x8x32xf32>
    tpu.vector_store %arg6[%c0_38, %c0_39, %c0_40], %58 {strides = array<i32>} : memref<1x8x32xf32, #tpu.memory_space<vmem>>, vector<1x8x32xf32>,
    return
  }
  func.func @transform_0(%arg0: i32, %arg1: i32) -> (i32, i32, i32, i32) {
    %c0_i32 = arith.constant 0 : i32
    %c0_i32_0 = arith.constant 0 : i32
    %c0_i32_1 = arith.constant 0 : i32
    return %arg0, %arg1, %c0_i32, %c0_i32_0 : i32, i32, i32, i32
  }
  func.func @transform_1(%arg0: i32, %arg1: i32) -> (i32, i32) {
    %c0_i32 = arith.constant 0 : i32
    %c0_i32_0 = arith.constant 0 : i32
    %c0_i32_1 = arith.constant 0 : i32
    return %c0_i32, %c0_i32_0 : i32, i32
  }
  func.func @transform_2(%arg0: i32, %arg1: i32) -> (i32, i32, i32, i32) {
    %c0_i32 = arith.constant 0 : i32
    %c0_i32_0 = arith.constant 0 : i32
    %c0_i32_1 = arith.constant 0 : i32
    return %arg0, %arg1, %c0_i32, %c0_i32_0 : i32, i32, i32, i32
  }
  func.func @transform_3(%arg0: i32, %arg1: i32) -> (i32, i32, i32) {
    %c0_i32 = arith.constant 0 : i32
    %c0_i32_0 = arith.constant 0 : i32
    %c0_i32_1 = arith.constant 0 : i32
    return %arg0, %c0_i32, %c0_i32_0 : i32, i32, i32
  }
  func.func @transform_4(%arg0: i32, %arg1: i32) -> (i32, i32, i32) {
    %c0_i32 = arith.constant 0 : i32
    %c0_i32_0 = arith.constant 0 : i32
    %c0_i32_1 = arith.constant 0 : i32
    return %arg0, %c0_i32, %c0_i32_0 : i32, i32, i32
  }
}

module attributes {stable_mosaic.version = 11 : i64} {
  func.func @kernel(%arg0: i32, %arg1: i32, %arg2: memref<1x4x2x128xbf16, #tpu.memory_space<vmem>>, %arg3: memref<2x8x128xf32, #tpu.memory_space<vmem>>, %arg4: memref<2x8x128xf32, #tpu.memory_space<vmem>>, %arg5: memref<1x128xf32, #tpu.memory_space<vmem>>, %arg6: memref<1x128xf32, #tpu.memory_space<vmem>>, %arg7: memref<1x4x1x128xbf16, #tpu.memory_space<vmem>>) attributes {dimension_semantics = [#tpu.dimension_semantics<parallel>, #tpu.dimension_semantics<parallel>], iteration_bounds = array<i64: 2, 1>, scalar_prefetch = 0 : i64, scratch_operands = 0 : i64, tpu.core_type = #tpu.core_type<tc>, window_params = [{transform_indices = @transform_0, window_bounds = array<i64: 1, 4, 2, 128>}, {pipeline_mode = #tpu.pipeline_mode<synchronous>, transform_indices = @transform_1, window_bounds = array<i64: 2, 8, 128>}, {pipeline_mode = #tpu.pipeline_mode<synchronous>, transform_indices = @transform_2, window_bounds = array<i64: 2, 8, 128>}, {pipeline_mode = #tpu.pipeline_mode<synchronous>, transform_indices = @transform_3, window_bounds = array<i64: 1, 128>}, {pipeline_mode = #tpu.pipeline_mode<synchronous>, transform_indices = @transform_4, window_bounds = array<i64: 1, 128>}, {transform_indices = @transform_5, window_bounds = array<i64: 1, 4, 1, 128>}]} {
    %c0 = arith.constant 0 : index
    %c0_0 = arith.constant 0 : index
    %c0_1 = arith.constant 0 : index
    %0 = vector.load %arg3[%c0, %c0_0, %c0_1] : memref<2x8x128xf32, #tpu.memory_space<vmem>>, vector<2x8x128xf32>
    %1 = vector.shape_cast %0 : vector<2x8x128xf32> to vector<16x128xf32>
    %cst = arith.constant dense<0.000000e+00> : vector<128xf32>
    %2 = vector.multi_reduction <add>, %1, %cst [0] : vector<16x128xf32> to vector<128xf32>
    %3 = vector.shape_cast %2 : vector<128xf32> to vector<1x128xf32>
    %c0_2 = arith.constant 0 : index
    %c0_3 = arith.constant 0 : index
    %c0_4 = arith.constant 0 : index
    %4 = vector.load %arg4[%c0_2, %c0_3, %c0_4] : memref<2x8x128xf32, #tpu.memory_space<vmem>>, vector<2x8x128xf32>
    %5 = vector.shape_cast %4 : vector<2x8x128xf32> to vector<16x128xf32>
    %cst_5 = arith.constant dense<0.000000e+00> : vector<128xf32>
    %6 = vector.multi_reduction <add>, %5, %cst_5 [0] : vector<16x128xf32> to vector<128xf32>
    %7 = vector.shape_cast %6 : vector<128xf32> to vector<1x128xf32>
    %cst_6 = arith.constant 3.125000e-02 : f32
    %8 = vector.broadcast %cst_6 : f32 to vector<1x128xf32>
    %9 = arith.mulf %3, %8 : vector<1x128xf32>
    %cst_7 = arith.constant 3.125000e-02 : f32
    %10 = vector.broadcast %cst_7 : f32 to vector<1x128xf32>
    %11 = arith.mulf %7, %10 : vector<1x128xf32>
    %12 = arith.mulf %9, %9 : vector<1x128xf32>
    %13 = arith.subf %11, %12 : vector<1x128xf32>
    %c0_8 = arith.constant 0 : index
    %c0_9 = arith.constant 0 : index
    %14 = vector.load %arg5[%c0_8, %c0_9] : memref<1x128xf32, #tpu.memory_space<vmem>>, vector<1x128xf32>
    %cst_10 = arith.constant 9.99999974E-6 : f32
    %15 = vector.broadcast %cst_10 : f32 to vector<1x128xf32>
    %16 = arith.addf %13, %15 : vector<1x128xf32>
    %17 = math.rsqrt %16 : vector<1x128xf32>
    %18 = arith.mulf %14, %17 : vector<1x128xf32>
    %c0_11 = arith.constant 0 : index
    %c0_12 = arith.constant 0 : index
    %19 = vector.load %arg6[%c0_11, %c0_12] : memref<1x128xf32, #tpu.memory_space<vmem>>, vector<1x128xf32>
    %20 = arith.mulf %9, %18 : vector<1x128xf32>
    %21 = arith.subf %19, %20 : vector<1x128xf32>
    %c0_13 = arith.constant 0 : index
    %c0_14 = arith.constant 0 : index
    %c0_15 = arith.constant 0 : index
    %c0_16 = arith.constant 0 : index
    %22 = vector.load %arg2[%c0_13, %c0_14, %c0_15, %c0_16] : memref<1x4x2x128xbf16, #tpu.memory_space<vmem>>, vector<1x4x2x128xbf16>
    %23 = vector.shape_cast %22 : vector<1x4x2x128xbf16> to vector<4x2x128xbf16>
    %24 = arith.extf %23 : vector<4x2x128xbf16> to vector<4x2x128xf32>
    %25 = vector.shape_cast %18 : vector<1x128xf32> to vector<1x1x128xf32>
    %26 = vector.broadcast %25 : vector<1x1x128xf32> to vector<4x2x128xf32>
    %27 = arith.mulf %24, %26 : vector<4x2x128xf32>
    %28 = vector.shape_cast %21 : vector<1x128xf32> to vector<1x1x128xf32>
    %29 = vector.broadcast %28 : vector<1x1x128xf32> to vector<4x2x128xf32>
    %30 = arith.addf %27, %29 : vector<4x2x128xf32>
    %cst_17 = arith.constant 0.000000e+00 : f32
    %31 = vector.broadcast %cst_17 : f32 to vector<4x2x128xf32>
    %32 = arith.maximumf %30, %31 : vector<4x2x128xf32>
    %33 = vector.extract_strided_slice %32 {offsets = [0, 0, 0], sizes = [4, 1, 128], strides = [1, 1, 1]} : vector<4x2x128xf32> to vector<4x1x128xf32>
    %34 = arith.truncf %33 : vector<4x1x128xf32> to vector<4x1x128xbf16>
    %c0_18 = arith.constant 0 : index
    %c0_19 = arith.constant 0 : index
    %c0_20 = arith.constant 0 : index
    %c0_21 = arith.constant 0 : index
    %35 = vector.load %arg7[%c0_18, %c0_19, %c0_20, %c0_21] : memref<1x4x1x128xbf16, #tpu.memory_space<vmem>>, vector<1x4x1x128xbf16>
    %36 = vector.shape_cast %35 : vector<1x4x1x128xbf16> to vector<4x1x128xbf16>
    %37 = vector.shape_cast %34 : vector<4x1x128xbf16> to vector<1x4x1x128xbf16>
    tpu.vector_store %arg7[%c0_18, %c0_19, %c0_20, %c0_21], %37 {strides = array<i32>} : memref<1x4x1x128xbf16, #tpu.memory_space<vmem>>, vector<1x4x1x128xbf16>,
    return
  }
  func.func @transform_0(%arg0: i32, %arg1: i32) -> (i32, i32, i32, i32) {
    %c0_i32 = arith.constant 0 : i32
    %c0_i32_0 = arith.constant 0 : i32
    %c0_i32_1 = arith.constant 0 : i32
    return %arg0, %arg1, %c0_i32, %c0_i32_0 : i32, i32, i32, i32
  }
  func.func @transform_1(%arg0: i32, %arg1: i32) -> (i32, i32, i32) {
    %c0_i32 = arith.constant 0 : i32
    %c0_i32_0 = arith.constant 0 : i32
    %c0_i32_1 = arith.constant 0 : i32
    %c0_i32_2 = arith.constant 0 : i32
    return %c0_i32, %c0_i32_0, %c0_i32_1 : i32, i32, i32
  }
  func.func @transform_2(%arg0: i32, %arg1: i32) -> (i32, i32, i32) {
    %c0_i32 = arith.constant 0 : i32
    %c0_i32_0 = arith.constant 0 : i32
    %c0_i32_1 = arith.constant 0 : i32
    %c0_i32_2 = arith.constant 0 : i32
    return %c0_i32, %c0_i32_0, %c0_i32_1 : i32, i32, i32
  }
  func.func @transform_3(%arg0: i32, %arg1: i32) -> (i32, i32) {
    %c0_i32 = arith.constant 0 : i32
    %c0_i32_0 = arith.constant 0 : i32
    %c0_i32_1 = arith.constant 0 : i32
    return %c0_i32, %c0_i32_0 : i32, i32
  }
  func.func @transform_4(%arg0: i32, %arg1: i32) -> (i32, i32) {
    %c0_i32 = arith.constant 0 : i32
    %c0_i32_0 = arith.constant 0 : i32
    %c0_i32_1 = arith.constant 0 : i32
    return %c0_i32, %c0_i32_0 : i32, i32
  }
  func.func @transform_5(%arg0: i32, %arg1: i32) -> (i32, i32, i32, i32) {
    %c0_i32 = arith.constant 0 : i32
    %c0_i32_0 = arith.constant 0 : i32
    %c0_i32_1 = arith.constant 0 : i32
    return %arg0, %arg1, %c0_i32, %c0_i32_0 : i32, i32, i32, i32
  }
}

module attributes {stable_mosaic.version = 11 : i64} {
  func.func @kernel(%arg0: i32, %arg1: memref<1x16x32xbf16, #tpu.memory_space<vmem>>, %arg2: memref<32x64xbf16, #tpu.memory_space<vmem>>, %arg3: memref<1x64xf32, #tpu.memory_space<vmem>>, %arg4: memref<1x16x64xbf16, #tpu.memory_space<vmem>>) attributes {dimension_semantics = [#tpu.dimension_semantics<parallel>], iteration_bounds = array<i64: 2>, scalar_prefetch = 0 : i64, scratch_operands = 0 : i64, tpu.core_type = #tpu.core_type<tc>, window_params = [{transform_indices = @transform_0, window_bounds = array<i64: 1, 16, 32>}, {pipeline_mode = #tpu.pipeline_mode<synchronous>, transform_indices = @transform_1, window_bounds = array<i64: 32, 64>}, {pipeline_mode = #tpu.pipeline_mode<synchronous>, transform_indices = @transform_2, window_bounds = array<i64: 1, 64>}, {transform_indices = @transform_3, window_bounds = array<i64: 1, 16, 64>}]} {
    %c0 = arith.constant 0 : index
    %c0_0 = arith.constant 0 : index
    %c0_1 = arith.constant 0 : index
    %0 = vector.load %arg1[%c0, %c0_0, %c0_1] : memref<1x16x32xbf16, #tpu.memory_space<vmem>>, vector<1x16x32xbf16>
    %1 = vector.shape_cast %0 : vector<1x16x32xbf16> to vector<16x32xbf16>
    %c0_2 = arith.constant 0 : index
    %c0_3 = arith.constant 0 : index
    %2 = vector.load %arg2[%c0_2, %c0_3] : memref<32x64xbf16, #tpu.memory_space<vmem>>, vector<32x64xbf16>
    %cst = arith.constant dense<0.000000e+00> : vector<16x64xf32>
    %3 = tpu.matmul %1, %2, %cst {dimension_numbers = #tpu.dot_dimension_numbers<[1], [0], [0], [1], [0, 0, 1, 1], [], []>} : vector<16x32xbf16>, vector<32x64xbf16>, vector<16x64xf32> -> vector<16x64xf32>
    %c0_4 = arith.constant 0 : index
    %c0_5 = arith.constant 0 : index
    %4 = vector.load %arg3[%c0_4, %c0_5] : memref<1x64xf32, #tpu.memory_space<vmem>>, vector<1x64xf32>
    %5 = vector.broadcast %4 : vector<1x64xf32> to vector<16x64xf32>
    %6 = arith.addf %3, %5 : vector<16x64xf32>
    %7 = arith.truncf %6 : vector<16x64xf32> to vector<16x64xbf16>
    %c0_6 = arith.constant 0 : index
    %c0_7 = arith.constant 0 : index
    %c0_8 = arith.constant 0 : index
    %8 = vector.load %arg4[%c0_6, %c0_7, %c0_8] : memref<1x16x64xbf16, #tpu.memory_space<vmem>>, vector<1x16x64xbf16>
    %9 = vector.shape_cast %8 : vector<1x16x64xbf16> to vector<16x64xbf16>
    %10 = vector.shape_cast %7 : vector<16x64xbf16> to vector<1x16x64xbf16>
    tpu.vector_store %arg4[%c0_6, %c0_7, %c0_8], %10 {strides = array<i32>} : memref<1x16x64xbf16, #tpu.memory_space<vmem>>, vector<1x16x64xbf16>,
    return
  }
  func.func @transform_0(%arg0: i32) -> (i32, i32, i32) {
    %c0_i32 = arith.constant 0 : i32
    %c0_i32_0 = arith.constant 0 : i32
    %c0_i32_1 = arith.constant 0 : i32
    return %arg0, %c0_i32, %c0_i32_0 : i32, i32, i32
  }
  func.func @transform_1(%arg0: i32) -> (i32, i32) {
    %c0_i32 = arith.constant 0 : i32
    %c0_i32_0 = arith.constant 0 : i32
    %c0_i32_1 = arith.constant 0 : i32
    return %c0_i32, %c0_i32_0 : i32, i32
  }
  func.func @transform_2(%arg0: i32) -> (i32, i32) {
    %c0_i32 = arith.constant 0 : i32
    %c0_i32_0 = arith.constant 0 : i32
    %c0_i32_1 = arith.constant 0 : i32
    return %c0_i32, %c0_i32_0 : i32, i32
  }
  func.func @transform_3(%arg0: i32) -> (i32, i32, i32) {
    %c0_i32 = arith.constant 0 : i32
    %c0_i32_0 = arith.constant 0 : i32
    %c0_i32_1 = arith.constant 0 : i32
    return %arg0, %c0_i32, %c0_i32_0 : i32, i32, i32
  }
}

module attributes {stable_mosaic.version = 11 : i64} {
  func.func @kernel(%arg0: i32, %arg1: i32, %arg2: memref<1x1x48x96xbf16, #tpu.memory_space<vmem>>, %arg3: memref<288x32xbf16, #tpu.memory_space<vmem>>, %arg4: memref<1x1x32x32xbf16, #tpu.memory_space<vmem>>, %arg5: memref<1x8x32xf32, #tpu.memory_space<vmem>>, %arg6: memref<1x8x32xf32, #tpu.memory_space<vmem>>, %arg7: memref<32x288xbf16, #tpu.memory_space<vmem>>) attributes {dimension_semantics = [#tpu.dimension_semantics<parallel>, #tpu.dimension_semantics<arbitrary>], iteration_bounds = array<i64: 2, 1>, scalar_prefetch = 0 : i64, scratch_operands = 1 : i64, tpu.core_type = #tpu.core_type<tc>, window_params = [{transform_indices = @transform_0, window_bounds = array<i64: 1, 1, 48, 96>}, {pipeline_mode = #tpu.pipeline_mode<synchronous>, transform_indices = @transform_1, window_bounds = array<i64: 288, 32>}, {transform_indices = @transform_2, window_bounds = array<i64: 1, 1, 32, 32>}, {transform_indices = @transform_3, window_bounds = array<i64: 1, 8, 32>}, {transform_indices = @transform_4, window_bounds = array<i64: 1, 8, 32>}]} {
    %c0 = arith.constant 0 : index
    %c0_0 = arith.constant 0 : index
    %c0_1 = arith.constant 0 : index
    %c0_2 = arith.constant 0 : index
    %0 = vector.load %arg2[%c0, %c0_0, %c0_1, %c0_2] : memref<1x1x48x96xbf16, #tpu.memory_space<vmem>>, vector<1x1x32x96xbf16>
    %1 = vector.shape_cast %0 : vector<1x1x32x96xbf16> to vector<32x96xbf16>
    %c0_3 = arith.constant 0 : index
    %c0_4 = arith.constant 0 : index
    %2 = vector.load %arg7[%c0_3, %c0_4] : memref<32x288xbf16, #tpu.memory_space<vmem>>, vector<32x96xbf16>
    tpu.vector_store %arg7[%c0_3, %c0_4], %1 {strides = array<i32>} : memref<32x288xbf16, #tpu.memory_space<vmem>>, vector<32x96xbf16>,
    %c0_5 = arith.constant 0 : index
    %c0_6 = arith.constant 0 : index
    %c8 = arith.constant 8 : index
    %c0_7 = arith.constant 0 : index
    %3 = vector.load %arg2[%c0_5, %c0_6, %c8, %c0_7] : memref<1x1x48x96xbf16, #tpu.memory_space<vmem>>, vector<1x1x32x96xbf16>
    %4 = vector.shape_cast %3 : vector<1x1x32x96xbf16> to vector<32x96xbf16>
    %c0_8 = arith.constant 0 : index
    %c96 = arith.constant 96 : index
    %5 = vector.load %arg7[%c0_8, %c96] : memref<32x288xbf16, #tpu.memory_space<vmem>>, vector<32x96xbf16>
    tpu.vector_store %arg7[%c0_8, %c96], %4 {strides = array<i32>} : memref<32x288xbf16, #tpu.memory_space<vmem>>, vector<32x96xbf16>,
    %c0_9 = arith.constant 0 : index
    %c0_10 = arith.constant 0 : index
    %c16 = arith.constant 16 : index
    %c0_11 = arith.constant 0 : index
    %6 = vector.load %arg2[%c0_9, %c0_10, %c16, %c0_11] : memref<1x1x48x96xbf16, #tpu.memory_space<vmem>>, vector<1x1x32x96xbf16>
    %7 = vector.shape_cast %6 : vector<1x1x32x96xbf16> to vector<32x96xbf16>
    %c0_12 = arith.constant 0 : index
    %c192 = arith.constant 192 : index
    %8 = vector.load %arg7[%c0_12, %c192] : memref<32x288xbf16, #tpu.memory_space<vmem>>, vector<32x96xbf16>
    tpu.vector_store %arg7[%c0_12, %c192], %7 {strides = array<i32>} : memref<32x288xbf16, #tpu.memory_space<vmem>>, vector<32x96xbf16>,
    %c0_13 = arith.constant 0 : index
    %c0_14 = arith.constant 0 : index
    %9 = vector.load %arg7[%c0_13, %c0_14] : memref<32x288xbf16, #tpu.memory_space<vmem>>, vector<32x288xbf16>
    %c0_15 = arith.constant 0 : index
    %c0_16 = arith.constant 0 : index
    %10 = vector.load %arg3[%c0_15, %c0_16] : memref<288x32xbf16, #tpu.memory_space<vmem>>, vector<288x32xbf16>
    %cst = arith.constant dense<0.000000e+00> : vector<32x32xf32>
    %11 = tpu.matmul %9, %10, %cst {dimension_numbers = #tpu.dot_dimension_numbers<[1], [0], [0], [1], [0, 0, 1, 1], [], []>} : vector<32x288xbf16>, vector<288x32xbf16>, vector<32x32xf32> -> vector<32x32xf32>
    %12 = arith.truncf %11 : vector<32x32xf32> to vector<32x32xbf16>
    %c0_17 = arith.constant 0 : index
    %c0_18 = arith.constant 0 : index
    %c0_19 = arith.constant 0 : index
    %c0_20 = arith.constant 0 : index
    %13 = vector.load %arg4[%c0_17, %c0_18, %c0_19, %c0_20] : memref<1x1x32x32xbf16, #tpu.memory_space<vmem>>, vector<1x1x32x32xbf16>
    %14 = vector.shape_cast %13 : vector<1x1x32x32xbf16> to vector<32x32xbf16>
    %15 = vector.shape_cast %12 : vector<32x32xbf16> to vector<1x1x32x32xbf16>
    tpu.vector_store %arg4[%c0_17, %c0_18, %c0_19, %c0_20], %15 {strides = array<i32>} : memref<1x1x32x32xbf16, #tpu.memory_space<vmem>>, vector<1x1x32x32xbf16>,
    %16 = tpu.iota {dimensions = array<i32: 0>} : vector<32x1xi32>
    %c8_i32 = arith.constant 8 : i32
    %c0_i32 = arith.constant 0 : i32
    %17 = arith.cmpi eq, %c8_i32, %c0_i32 : i32
    %c1_i32 = arith.constant 1 : i32
    %18 = arith.select %17, %c1_i32, %c8_i32 : i32
    %19 = vector.broadcast %18 : i32 to vector<32x1xi32>
    %20 = arith.remsi %16, %19 : vector<32x1xi32>
    %c0_i32_21 = arith.constant 0 : i32
    %21 = vector.broadcast %c0_i32_21 : i32 to vector<32x1xi32>
    %22 = arith.cmpi ne, %20, %21 : vector<32x1xi32>
    %c0_i32_22 = arith.constant 0 : i32
    %23 = vector.broadcast %c0_i32_22 : i32 to vector<32x1xi32>
    %24 = arith.cmpi slt, %20, %23 : vector<32x1xi32>
    %c0_i32_23 = arith.constant 0 : i32
    %25 = arith.cmpi slt, %18, %c0_i32_23 : i32
    %26 = vector.broadcast %25 : i1 to vector<32x1xi1>
    %27 = vector.broadcast %26 : vector<32x1xi1> to vector<32x1xi1>
    %28 = arith.xori %24, %27 : vector<32x1xi1>
    %29 = arith.andi %28, %22 : vector<32x1xi1>
    %30 = vector.broadcast %18 : i32 to vector<32x1xi32>
    %31 = arith.addi %20, %30 : vector<32x1xi32>
    %32 = arith.select %29, %31, %20 : vector<32x1xi1>, vector<32x1xi32>
    %c4_i32 = arith.constant 4 : i32
    %33 = vector.broadcast %c4_i32 : i32 to vector<32x1xi32>
    %34 = arith.cmpi slt, %32, %33 : vector<32x1xi32>
    %cst_24 = arith.constant 0.000000e+00 : f32
    %35 = vector.shape_cast %34 : vector<32x1xi1> to vector<32x1xi1>
    %36 = vector.broadcast %35 : vector<32x1xi1> to vector<32x32xi1>
    %37 = vector.broadcast %cst_24 : f32 to vector<32x32xf32>
    %38 = arith.select %36, %11, %37 : vector<32x32xi1>, vector<32x32xf32>
    %39 = vector.shape_cast %38 : vector<32x32xf32> to vector<4x8x32xf32>
    %cst_25 = arith.constant dense<0.000000e+00> : vector<8x32xf32>
    %40 = vector.multi_reduction <add>, %39, %cst_25 [0] : vector<4x8x32xf32> to vector<8x32xf32>
    %41 = arith.mulf %38, %38 : vector<32x32xf32>
    %42 = vector.shape_cast %41 : vector<32x32xf32> to vector<4x8x32xf32>
    %cst_26 = arith.constant dense<0.000000e+00> : vector<8x32xf32>
    %43 = vector.multi_reduction <add>, %42, %cst_26 [0] : vector<4x8x32xf32> to vector<8x32xf32>
    %c0_i32_27 = arith.constant 0 : i32
    %44 = arith.cmpi eq, %arg1, %c0_i32_27 : i32
    %45 = arith.extui %44 : i1 to i32
    %c0_i32_28 = arith.constant 0 : i32
    %46 = arith.cmpi ne, %45, %c0_i32_28 : i32
    scf.if %46 {
      %cst_41 = arith.constant 0.000000e+00 : f32
      %59 = vector.broadcast %cst_41 : f32 to vector<1x8x32xf32>
      %c0_42 = arith.constant 0 : index
      %c0_43 = arith.constant 0 : index
      %c0_44 = arith.constant 0 : index
      %60 = vector.load %arg5[%c0_42, %c0_43, %c0_44] : memref<1x8x32xf32, #tpu.memory_space<vmem>>, vector<1x8x32xf32>
      tpu.vector_store %arg5[%c0_42, %c0_43, %c0_44], %59 {strides = array<i32>} : memref<1x8x32xf32, #tpu.memory_space<vmem>>, vector<1x8x32xf32>,
      %cst_45 = arith.constant 0.000000e+00 : f32
      %61 = vector.broadcast %cst_45 : f32 to vector<1x8x32xf32>
      %c0_46 = arith.constant 0 : index
      %c0_47 = arith.constant 0 : index
      %c0_48 = arith.constant 0 : index
      %62 = vector.load %arg6[%c0_46, %c0_47, %c0_48] : memref<1x8x32xf32, #tpu.memory_space<vmem>>, vector<1x8x32xf32>
      tpu.vector_store %arg6[%c0_46, %c0_47, %c0_48], %61 {strides = array<i32>} : memref<1x8x32xf32, #tpu.memory_space<vmem>>, vector<1x8x32xf32>,
    } else {
    }
    %c0_29 = arith.constant 0 : index
    %c0_30 = arith.constant 0 : index
    %c0_31 = arith.constant 0 : index
    %47 = vector.load %arg5[%c0_29, %c0_30, %c0_31] : memref<1x8x32xf32, #tpu.memory_space<vmem>>, vector<1x8x32xf32>
    %48 = vector.shape_cast %47 : vector<1x8x32xf32> to vector<8x32xf32>
    %49 = arith.addf %48, %40 : vector<8x32xf32>
    %c0_32 = arith.constant 0 : index
    %c0_33 = arith.constant 0 : index
    %c0_34 = arith.constant 0 : index
    %50 = vector.load %arg5[%c0_32, %c0_33, %c0_34] : memref<1x8x32xf32, #tpu.memory_space<vmem>>, vector<1x8x32xf32>
    %51 = vector.shape_cast %50 : vector<1x8x32xf32> to vector<8x32xf32>
    %52 = vector.shape_cast %49 : vector<8x32xf32> to vector<1x8x32xf32>
    tpu.vector_store %arg5[%c0_32, %c0_33, %c0_34], %52 {strides = array<i32>} : memref<1x8x32xf32, #tpu.memory_space<vmem>>, vector<1x8x32xf32>,
    %c0_35 = arith.constant 0 : index
    %c0_36 = arith.constant 0 : index
    %c0_37 = arith.constant 0 : index
    %53 = vector.load %arg6[%c0_35, %c0_36, %c0_37] : memref<1x8x32xf32, #tpu.memory_space<vmem>>, vector<1x8x32xf32>
    %54 = vector.shape_cast %53 : vector<1x8x32xf32> to vector<8x32xf32>
    %55 = arith.addf %54, %43 : vector<8x32xf32>
    %c0_38 = arith.constant 0 : index
    %c0_39 = arith.constant 0 : index
    %c0_40 = arith.constant 0 : index
    %56 = vector.load %arg6[%c0_38, %c0_39, %c0_40] : memref<1x8x32xf32, #tpu.memory_space<vmem>>, vector<1x8x32xf32>
    %57 = vector.shape_cast %56 : vector<1x8x32xf32> to vector<8x32xf32>
    %58 = vector.shape_cast %55 : vector<8x32xf32> to vector<1x8x32xf32>
    tpu.vector_store %arg6[%c0_38, %c0_39, %c0_40], %58 {strides = array<i32>} : memref<1x8x32xf32, #tpu.memory_space<vmem>>, vector<1x8x32xf32>,
    return
  }
  func.func @transform_0(%arg0: i32, %arg1: i32) -> (i32, i32, i32, i32) {
    %c0_i32 = arith.constant 0 : i32
    %c0_i32_0 = arith.constant 0 : i32
    %c0_i32_1 = arith.constant 0 : i32
    return %arg0, %arg1, %c0_i32, %c0_i32_0 : i32, i32, i32, i32
  }
  func.func @transform_1(%arg0: i32, %arg1: i32) -> (i32, i32) {
    %c0_i32 = arith.constant 0 : i32
    %c0_i32_0 = arith.constant 0 : i32
    %c0_i32_1 = arith.constant 0 : i32
    return %c0_i32, %c0_i32_0 : i32, i32
  }
  func.func @transform_2(%arg0: i32, %arg1: i32) -> (i32, i32, i32, i32) {
    %c0_i32 = arith.constant 0 : i32
    %c0_i32_0 = arith.constant 0 : i32
    %c0_i32_1 = arith.constant 0 : i32
    return %arg0, %arg1, %c0_i32, %c0_i32_0 : i32, i32, i32, i32
  }
  func.func @transform_3(%arg0: i32, %arg1: i32) -> (i32, i32, i32) {
    %c0_i32 = arith.constant 0 : i32
    %c0_i32_0 = arith.constant 0 : i32
    %c0_i32_1 = arith.constant 0 : i32
    return %arg0, %c0_i32, %c0_i32_0 : i32, i32, i32
  }
  func.func @transform_4(%arg0: i32, %arg1: i32) -> (i32, i32, i32) {
    %c0_i32 = arith.constant 0 : i32
    %c0_i32_0 = arith.constant 0 : i32
    %c0_i32_1 = arith.constant 0 : i32
    return %arg0, %c0_i32, %c0_i32_0 : i32, i32, i32
  }
}

module attributes {stable_mosaic.version = 11 : i64} {
  func.func @kernel(%arg0: i32, %arg1: i32, %arg2: memref<1x1x160x48xbf16, #tpu.memory_space<vmem>>, %arg3: memref<1x1x160x48xbf16, #tpu.memory_space<vmem>>, %arg4: memref<288x16xbf16, #tpu.memory_space<vmem>>, %arg5: memref<1x1x128x16xbf16, #tpu.memory_space<vmem>>, %arg6: memref<1x8x16xf32, #tpu.memory_space<vmem>>, %arg7: memref<1x8x16xf32, #tpu.memory_space<vmem>>, %arg8: memref<128x288xbf16, #tpu.memory_space<vmem>>) attributes {dimension_semantics = [#tpu.dimension_semantics<parallel>, #tpu.dimension_semantics<arbitrary>], iteration_bounds = array<i64: 2, 1>, scalar_prefetch = 0 : i64, scratch_operands = 1 : i64, tpu.core_type = #tpu.core_type<tc>, window_params = [{transform_indices = @transform_0, window_bounds = array<i64: 1, 1, 160, 48>}, {transform_indices = @transform_1, window_bounds = array<i64: 1, 1, 160, 48>}, {pipeline_mode = #tpu.pipeline_mode<synchronous>, transform_indices = @transform_2, window_bounds = array<i64: 288, 16>}, {transform_indices = @transform_3, window_bounds = array<i64: 1, 1, 128, 16>}, {transform_indices = @transform_4, window_bounds = array<i64: 1, 8, 16>}, {transform_indices = @transform_5, window_bounds = array<i64: 1, 8, 16>}]} {
    %c0 = arith.constant 0 : index
    %c0_0 = arith.constant 0 : index
    %c0_1 = arith.constant 0 : index
    %c0_2 = arith.constant 0 : index
    %0 = vector.load %arg2[%c0, %c0_0, %c0_1, %c0_2] : memref<1x1x160x48xbf16, #tpu.memory_space<vmem>>, vector<1x1x128x48xbf16>
    %1 = vector.shape_cast %0 : vector<1x1x128x48xbf16> to vector<128x48xbf16>
    %c0_3 = arith.constant 0 : index
    %c0_4 = arith.constant 0 : index
    %2 = vector.load %arg8[%c0_3, %c0_4] : memref<128x288xbf16, #tpu.memory_space<vmem>>, vector<128x48xbf16>
    tpu.vector_store %arg8[%c0_3, %c0_4], %1 {strides = array<i32>} : memref<128x288xbf16, #tpu.memory_space<vmem>>, vector<128x48xbf16>,
    %c0_5 = arith.constant 0 : index
    %c0_6 = arith.constant 0 : index
    %c16 = arith.constant 16 : index
    %c0_7 = arith.constant 0 : index
    %3 = vector.load %arg2[%c0_5, %c0_6, %c16, %c0_7] : memref<1x1x160x48xbf16, #tpu.memory_space<vmem>>, vector<1x1x128x48xbf16>
    %4 = vector.shape_cast %3 : vector<1x1x128x48xbf16> to vector<128x48xbf16>
    %c0_8 = arith.constant 0 : index
    %c48 = arith.constant 48 : index
    %5 = vector.load %arg8[%c0_8, %c48] : memref<128x288xbf16, #tpu.memory_space<vmem>>, vector<128x48xbf16>
    tpu.vector_store %arg8[%c0_8, %c48], %4 {strides = array<i32>} : memref<128x288xbf16, #tpu.memory_space<vmem>>, vector<128x48xbf16>,
    %c0_9 = arith.constant 0 : index
    %c0_10 = arith.constant 0 : index
    %c32 = arith.constant 32 : index
    %c0_11 = arith.constant 0 : index
    %6 = vector.load %arg2[%c0_9, %c0_10, %c32, %c0_11] : memref<1x1x160x48xbf16, #tpu.memory_space<vmem>>, vector<1x1x128x48xbf16>
    %7 = vector.shape_cast %6 : vector<1x1x128x48xbf16> to vector<128x48xbf16>
    %c0_12 = arith.constant 0 : index
    %c96 = arith.constant 96 : index
    %8 = vector.load %arg8[%c0_12, %c96] : memref<128x288xbf16, #tpu.memory_space<vmem>>, vector<128x48xbf16>
    tpu.vector_store %arg8[%c0_12, %c96], %7 {strides = array<i32>} : memref<128x288xbf16, #tpu.memory_space<vmem>>, vector<128x48xbf16>,
    %c0_13 = arith.constant 0 : index
    %c0_14 = arith.constant 0 : index
    %c0_15 = arith.constant 0 : index
    %c0_16 = arith.constant 0 : index
    %9 = vector.load %arg3[%c0_13, %c0_14, %c0_15, %c0_16] : memref<1x1x160x48xbf16, #tpu.memory_space<vmem>>, vector<1x1x128x48xbf16>
    %10 = vector.shape_cast %9 : vector<1x1x128x48xbf16> to vector<128x48xbf16>
    %c0_17 = arith.constant 0 : index
    %c144 = arith.constant 144 : index
    %11 = vector.load %arg8[%c0_17, %c144] : memref<128x288xbf16, #tpu.memory_space<vmem>>, vector<128x48xbf16>
    tpu.vector_store %arg8[%c0_17, %c144], %10 {strides = array<i32>} : memref<128x288xbf16, #tpu.memory_space<vmem>>, vector<128x48xbf16>,
    %c0_18 = arith.constant 0 : index
    %c0_19 = arith.constant 0 : index
    %c16_20 = arith.constant 16 : index
    %c0_21 = arith.constant 0 : index
    %12 = vector.load %arg3[%c0_18, %c0_19, %c16_20, %c0_21] : memref<1x1x160x48xbf16, #tpu.memory_space<vmem>>, vector<1x1x128x48xbf16>
    %13 = vector.shape_cast %12 : vector<1x1x128x48xbf16> to vector<128x48xbf16>
    %c0_22 = arith.constant 0 : index
    %c192 = arith.constant 192 : index
    %14 = vector.load %arg8[%c0_22, %c192] : memref<128x288xbf16, #tpu.memory_space<vmem>>, vector<128x48xbf16>
    tpu.vector_store %arg8[%c0_22, %c192], %13 {strides = array<i32>} : memref<128x288xbf16, #tpu.memory_space<vmem>>, vector<128x48xbf16>,
    %c0_23 = arith.constant 0 : index
    %c0_24 = arith.constant 0 : index
    %c32_25 = arith.constant 32 : index
    %c0_26 = arith.constant 0 : index
    %15 = vector.load %arg3[%c0_23, %c0_24, %c32_25, %c0_26] : memref<1x1x160x48xbf16, #tpu.memory_space<vmem>>, vector<1x1x128x48xbf16>
    %16 = vector.shape_cast %15 : vector<1x1x128x48xbf16> to vector<128x48xbf16>
    %c0_27 = arith.constant 0 : index
    %c240 = arith.constant 240 : index
    %17 = vector.load %arg8[%c0_27, %c240] : memref<128x288xbf16, #tpu.memory_space<vmem>>, vector<128x48xbf16>
    tpu.vector_store %arg8[%c0_27, %c240], %16 {strides = array<i32>} : memref<128x288xbf16, #tpu.memory_space<vmem>>, vector<128x48xbf16>,
    %c0_28 = arith.constant 0 : index
    %c0_29 = arith.constant 0 : index
    %18 = vector.load %arg8[%c0_28, %c0_29] : memref<128x288xbf16, #tpu.memory_space<vmem>>, vector<128x288xbf16>
    %c0_30 = arith.constant 0 : index
    %c0_31 = arith.constant 0 : index
    %19 = vector.load %arg4[%c0_30, %c0_31] : memref<288x16xbf16, #tpu.memory_space<vmem>>, vector<288x16xbf16>
    %cst = arith.constant dense<0.000000e+00> : vector<128x16xf32>
    %20 = tpu.matmul %18, %19, %cst {dimension_numbers = #tpu.dot_dimension_numbers<[1], [0], [0], [1], [0, 0, 1, 1], [], []>} : vector<128x288xbf16>, vector<288x16xbf16>, vector<128x16xf32> -> vector<128x16xf32>
    %21 = arith.truncf %20 : vector<128x16xf32> to vector<128x16xbf16>
    %c0_32 = arith.constant 0 : index
    %c0_33 = arith.constant 0 : index
    %c0_34 = arith.constant 0 : index
    %c0_35 = arith.constant 0 : index
    %22 = vector.load %arg5[%c0_32, %c0_33, %c0_34, %c0_35] : memref<1x1x128x16xbf16, #tpu.memory_space<vmem>>, vector<1x1x128x16xbf16>
    %23 = vector.shape_cast %22 : vector<1x1x128x16xbf16> to vector<128x16xbf16>
    %24 = vector.shape_cast %21 : vector<128x16xbf16> to vector<1x1x128x16xbf16>
    tpu.vector_store %arg5[%c0_32, %c0_33, %c0_34, %c0_35], %24 {strides = array<i32>} : memref<1x1x128x16xbf16, #tpu.memory_space<vmem>>, vector<1x1x128x16xbf16>,
    %25 = tpu.iota {dimensions = array<i32: 0>} : vector<128x1xi32>
    %c16_i32 = arith.constant 16 : i32
    %c0_i32 = arith.constant 0 : i32
    %26 = arith.cmpi eq, %c16_i32, %c0_i32 : i32
    %c1_i32 = arith.constant 1 : i32
    %27 = arith.select %26, %c1_i32, %c16_i32 : i32
    %28 = vector.broadcast %27 : i32 to vector<128x1xi32>
    %29 = arith.remsi %25, %28 : vector<128x1xi32>
    %c0_i32_36 = arith.constant 0 : i32
    %30 = vector.broadcast %c0_i32_36 : i32 to vector<128x1xi32>
    %31 = arith.cmpi ne, %29, %30 : vector<128x1xi32>
    %c0_i32_37 = arith.constant 0 : i32
    %32 = vector.broadcast %c0_i32_37 : i32 to vector<128x1xi32>
    %33 = arith.cmpi slt, %29, %32 : vector<128x1xi32>
    %c0_i32_38 = arith.constant 0 : i32
    %34 = arith.cmpi slt, %27, %c0_i32_38 : i32
    %35 = vector.broadcast %34 : i1 to vector<128x1xi1>
    %36 = vector.broadcast %35 : vector<128x1xi1> to vector<128x1xi1>
    %37 = arith.xori %33, %36 : vector<128x1xi1>
    %38 = arith.andi %37, %31 : vector<128x1xi1>
    %39 = vector.broadcast %27 : i32 to vector<128x1xi32>
    %40 = arith.addi %29, %39 : vector<128x1xi32>
    %41 = arith.select %38, %40, %29 : vector<128x1xi1>, vector<128x1xi32>
    %c8_i32 = arith.constant 8 : i32
    %42 = vector.broadcast %c8_i32 : i32 to vector<128x1xi32>
    %43 = arith.cmpi slt, %41, %42 : vector<128x1xi32>
    %cst_39 = arith.constant 0.000000e+00 : f32
    %44 = vector.shape_cast %43 : vector<128x1xi1> to vector<128x1xi1>
    %45 = vector.broadcast %44 : vector<128x1xi1> to vector<128x16xi1>
    %46 = vector.broadcast %cst_39 : f32 to vector<128x16xf32>
    %47 = arith.select %45, %20, %46 : vector<128x16xi1>, vector<128x16xf32>
    %48 = vector.shape_cast %47 : vector<128x16xf32> to vector<16x8x16xf32>
    %cst_40 = arith.constant dense<0.000000e+00> : vector<8x16xf32>
    %49 = vector.multi_reduction <add>, %48, %cst_40 [0] : vector<16x8x16xf32> to vector<8x16xf32>
    %50 = arith.mulf %47, %47 : vector<128x16xf32>
    %51 = vector.shape_cast %50 : vector<128x16xf32> to vector<16x8x16xf32>
    %cst_41 = arith.constant dense<0.000000e+00> : vector<8x16xf32>
    %52 = vector.multi_reduction <add>, %51, %cst_41 [0] : vector<16x8x16xf32> to vector<8x16xf32>
    %c0_i32_42 = arith.constant 0 : i32
    %53 = arith.cmpi eq, %arg1, %c0_i32_42 : i32
    %54 = arith.extui %53 : i1 to i32
    %c0_i32_43 = arith.constant 0 : i32
    %55 = arith.cmpi ne, %54, %c0_i32_43 : i32
    scf.if %55 {
      %cst_56 = arith.constant 0.000000e+00 : f32
      %68 = vector.broadcast %cst_56 : f32 to vector<1x8x16xf32>
      %c0_57 = arith.constant 0 : index
      %c0_58 = arith.constant 0 : index
      %c0_59 = arith.constant 0 : index
      %69 = vector.load %arg6[%c0_57, %c0_58, %c0_59] : memref<1x8x16xf32, #tpu.memory_space<vmem>>, vector<1x8x16xf32>
      tpu.vector_store %arg6[%c0_57, %c0_58, %c0_59], %68 {strides = array<i32>} : memref<1x8x16xf32, #tpu.memory_space<vmem>>, vector<1x8x16xf32>,
      %cst_60 = arith.constant 0.000000e+00 : f32
      %70 = vector.broadcast %cst_60 : f32 to vector<1x8x16xf32>
      %c0_61 = arith.constant 0 : index
      %c0_62 = arith.constant 0 : index
      %c0_63 = arith.constant 0 : index
      %71 = vector.load %arg7[%c0_61, %c0_62, %c0_63] : memref<1x8x16xf32, #tpu.memory_space<vmem>>, vector<1x8x16xf32>
      tpu.vector_store %arg7[%c0_61, %c0_62, %c0_63], %70 {strides = array<i32>} : memref<1x8x16xf32, #tpu.memory_space<vmem>>, vector<1x8x16xf32>,
    } else {
    }
    %c0_44 = arith.constant 0 : index
    %c0_45 = arith.constant 0 : index
    %c0_46 = arith.constant 0 : index
    %56 = vector.load %arg6[%c0_44, %c0_45, %c0_46] : memref<1x8x16xf32, #tpu.memory_space<vmem>>, vector<1x8x16xf32>
    %57 = vector.shape_cast %56 : vector<1x8x16xf32> to vector<8x16xf32>
    %58 = arith.addf %57, %49 : vector<8x16xf32>
    %c0_47 = arith.constant 0 : index
    %c0_48 = arith.constant 0 : index
    %c0_49 = arith.constant 0 : index
    %59 = vector.load %arg6[%c0_47, %c0_48, %c0_49] : memref<1x8x16xf32, #tpu.memory_space<vmem>>, vector<1x8x16xf32>
    %60 = vector.shape_cast %59 : vector<1x8x16xf32> to vector<8x16xf32>
    %61 = vector.shape_cast %58 : vector<8x16xf32> to vector<1x8x16xf32>
    tpu.vector_store %arg6[%c0_47, %c0_48, %c0_49], %61 {strides = array<i32>} : memref<1x8x16xf32, #tpu.memory_space<vmem>>, vector<1x8x16xf32>,
    %c0_50 = arith.constant 0 : index
    %c0_51 = arith.constant 0 : index
    %c0_52 = arith.constant 0 : index
    %62 = vector.load %arg7[%c0_50, %c0_51, %c0_52] : memref<1x8x16xf32, #tpu.memory_space<vmem>>, vector<1x8x16xf32>
    %63 = vector.shape_cast %62 : vector<1x8x16xf32> to vector<8x16xf32>
    %64 = arith.addf %63, %52 : vector<8x16xf32>
    %c0_53 = arith.constant 0 : index
    %c0_54 = arith.constant 0 : index
    %c0_55 = arith.constant 0 : index
    %65 = vector.load %arg7[%c0_53, %c0_54, %c0_55] : memref<1x8x16xf32, #tpu.memory_space<vmem>>, vector<1x8x16xf32>
    %66 = vector.shape_cast %65 : vector<1x8x16xf32> to vector<8x16xf32>
    %67 = vector.shape_cast %64 : vector<8x16xf32> to vector<1x8x16xf32>
    tpu.vector_store %arg7[%c0_53, %c0_54, %c0_55], %67 {strides = array<i32>} : memref<1x8x16xf32, #tpu.memory_space<vmem>>, vector<1x8x16xf32>,
    return
  }
  func.func @transform_0(%arg0: i32, %arg1: i32) -> (i32, i32, i32, i32) {
    %c0_i32 = arith.constant 0 : i32
    %c0_i32_0 = arith.constant 0 : i32
    %c0_i32_1 = arith.constant 0 : i32
    return %arg0, %arg1, %c0_i32, %c0_i32_0 : i32, i32, i32, i32
  }
  func.func @transform_1(%arg0: i32, %arg1: i32) -> (i32, i32, i32, i32) {
    %c0_i32 = arith.constant 0 : i32
    %c0_i32_0 = arith.constant 0 : i32
    %c0_i32_1 = arith.constant 0 : i32
    return %arg0, %arg1, %c0_i32, %c0_i32_0 : i32, i32, i32, i32
  }
  func.func @transform_2(%arg0: i32, %arg1: i32) -> (i32, i32) {
    %c0_i32 = arith.constant 0 : i32
    %c0_i32_0 = arith.constant 0 : i32
    %c0_i32_1 = arith.constant 0 : i32
    return %c0_i32, %c0_i32_0 : i32, i32
  }
  func.func @transform_3(%arg0: i32, %arg1: i32) -> (i32, i32, i32, i32) {
    %c0_i32 = arith.constant 0 : i32
    %c0_i32_0 = arith.constant 0 : i32
    %c0_i32_1 = arith.constant 0 : i32
    return %arg0, %arg1, %c0_i32, %c0_i32_0 : i32, i32, i32, i32
  }
  func.func @transform_4(%arg0: i32, %arg1: i32) -> (i32, i32, i32) {
    %c0_i32 = arith.constant 0 : i32
    %c0_i32_0 = arith.constant 0 : i32
    %c0_i32_1 = arith.constant 0 : i32
    return %arg0, %c0_i32, %c0_i32_0 : i32, i32, i32
  }
  func.func @transform_5(%arg0: i32, %arg1: i32) -> (i32, i32, i32) {
    %c0_i32 = arith.constant 0 : i32
    %c0_i32_0 = arith.constant 0 : i32
    %c0_i32_1 = arith.constant 0 : i32
    return %arg0, %c0_i32, %c0_i32_0 : i32, i32, i32
  }
}

module attributes {stable_mosaic.version = 11 : i64} {
  func.func @kernel(%arg0: i32, %arg1: memref<1x64x16xbf16, #tpu.memory_space<vmem>>, %arg2: memref<16x32xbf16, #tpu.memory_space<vmem>>, %arg3: memref<1x32xf32, #tpu.memory_space<vmem>>, %arg4: memref<1x64x32xbf16, #tpu.memory_space<vmem>>) attributes {dimension_semantics = [#tpu.dimension_semantics<parallel>], iteration_bounds = array<i64: 2>, scalar_prefetch = 0 : i64, scratch_operands = 0 : i64, tpu.core_type = #tpu.core_type<tc>, window_params = [{transform_indices = @transform_0, window_bounds = array<i64: 1, 64, 16>}, {pipeline_mode = #tpu.pipeline_mode<synchronous>, transform_indices = @transform_1, window_bounds = array<i64: 16, 32>}, {pipeline_mode = #tpu.pipeline_mode<synchronous>, transform_indices = @transform_2, window_bounds = array<i64: 1, 32>}, {transform_indices = @transform_3, window_bounds = array<i64: 1, 64, 32>}]} {
    %c0 = arith.constant 0 : index
    %c0_0 = arith.constant 0 : index
    %c0_1 = arith.constant 0 : index
    %0 = vector.load %arg1[%c0, %c0_0, %c0_1] : memref<1x64x16xbf16, #tpu.memory_space<vmem>>, vector<1x64x16xbf16>
    %1 = vector.shape_cast %0 : vector<1x64x16xbf16> to vector<64x16xbf16>
    %c0_2 = arith.constant 0 : index
    %c0_3 = arith.constant 0 : index
    %2 = vector.load %arg2[%c0_2, %c0_3] : memref<16x32xbf16, #tpu.memory_space<vmem>>, vector<16x32xbf16>
    %cst = arith.constant dense<0.000000e+00> : vector<64x32xf32>
    %3 = tpu.matmul %1, %2, %cst {dimension_numbers = #tpu.dot_dimension_numbers<[1], [0], [0], [1], [0, 0, 1, 1], [], []>} : vector<64x16xbf16>, vector<16x32xbf16>, vector<64x32xf32> -> vector<64x32xf32>
    %c0_4 = arith.constant 0 : index
    %c0_5 = arith.constant 0 : index
    %4 = vector.load %arg3[%c0_4, %c0_5] : memref<1x32xf32, #tpu.memory_space<vmem>>, vector<1x32xf32>
    %5 = vector.broadcast %4 : vector<1x32xf32> to vector<64x32xf32>
    %6 = arith.addf %3, %5 : vector<64x32xf32>
    %7 = arith.truncf %6 : vector<64x32xf32> to vector<64x32xbf16>
    %c0_6 = arith.constant 0 : index
    %c0_7 = arith.constant 0 : index
    %c0_8 = arith.constant 0 : index
    %8 = vector.load %arg4[%c0_6, %c0_7, %c0_8] : memref<1x64x32xbf16, #tpu.memory_space<vmem>>, vector<1x64x32xbf16>
    %9 = vector.shape_cast %8 : vector<1x64x32xbf16> to vector<64x32xbf16>
    %10 = vector.shape_cast %7 : vector<64x32xbf16> to vector<1x64x32xbf16>
    tpu.vector_store %arg4[%c0_6, %c0_7, %c0_8], %10 {strides = array<i32>} : memref<1x64x32xbf16, #tpu.memory_space<vmem>>, vector<1x64x32xbf16>,
    return
  }
  func.func @transform_0(%arg0: i32) -> (i32, i32, i32) {
    %c0_i32 = arith.constant 0 : i32
    %c0_i32_0 = arith.constant 0 : i32
    %c0_i32_1 = arith.constant 0 : i32
    return %arg0, %c0_i32, %c0_i32_0 : i32, i32, i32
  }
  func.func @transform_1(%arg0: i32) -> (i32, i32) {
    %c0_i32 = arith.constant 0 : i32
    %c0_i32_0 = arith.constant 0 : i32
    %c0_i32_1 = arith.constant 0 : i32
    return %c0_i32, %c0_i32_0 : i32, i32
  }
  func.func @transform_2(%arg0: i32) -> (i32, i32) {
    %c0_i32 = arith.constant 0 : i32
    %c0_i32_0 = arith.constant 0 : i32
    %c0_i32_1 = arith.constant 0 : i32
    return %c0_i32, %c0_i32_0 : i32, i32
  }
  func.func @transform_3(%arg0: i32) -> (i32, i32, i32) {
    %c0_i32 = arith.constant 0 : i32
    %c0_i32_0 = arith.constant 0 : i32
    %c0_i32_1 = arith.constant 0 : i32
    return %arg0, %c0_i32, %c0_i32_0 : i32, i32, i32
  }
}

module attributes {stable_mosaic.version = 11 : i64} {
  func.func @kernel(%arg0: i32, %arg1: i32, %arg2: memref<1x1x240x24xbf16, #tpu.memory_space<vmem>>, %arg3: memref<1x1x240x24xbf16, #tpu.memory_space<vmem>>, %arg4: memref<144x8xbf16, #tpu.memory_space<vmem>>, %arg5: memref<1x1x192x8xbf16, #tpu.memory_space<vmem>>, %arg6: memref<1x8x8xf32, #tpu.memory_space<vmem>>, %arg7: memref<1x8x8xf32, #tpu.memory_space<vmem>>, %arg8: memref<192x144xbf16, #tpu.memory_space<vmem>>) attributes {dimension_semantics = [#tpu.dimension_semantics<parallel>, #tpu.dimension_semantics<arbitrary>], iteration_bounds = array<i64: 2, 2>, scalar_prefetch = 0 : i64, scratch_operands = 1 : i64, tpu.core_type = #tpu.core_type<tc>, window_params = [{transform_indices = @transform_0, window_bounds = array<i64: 1, 1, 240, 24>}, {transform_indices = @transform_1, window_bounds = array<i64: 1, 1, 240, 24>}, {pipeline_mode = #tpu.pipeline_mode<synchronous>, transform_indices = @transform_2, window_bounds = array<i64: 144, 8>}, {transform_indices = @transform_3, window_bounds = array<i64: 1, 1, 192, 8>}, {transform_indices = @transform_4, window_bounds = array<i64: 1, 8, 8>}, {transform_indices = @transform_5, window_bounds = array<i64: 1, 8, 8>}]} {
    %c0 = arith.constant 0 : index
    %c0_0 = arith.constant 0 : index
    %c0_1 = arith.constant 0 : index
    %c0_2 = arith.constant 0 : index
    %0 = vector.load %arg2[%c0, %c0_0, %c0_1, %c0_2] : memref<1x1x240x24xbf16, #tpu.memory_space<vmem>>, vector<1x1x192x24xbf16>
    %1 = vector.shape_cast %0 : vector<1x1x192x24xbf16> to vector<192x24xbf16>
    %c0_3 = arith.constant 0 : index
    %c0_4 = arith.constant 0 : index
    %2 = vector.load %arg8[%c0_3, %c0_4] : memref<192x144xbf16, #tpu.memory_space<vmem>>, vector<192x24xbf16>
    tpu.vector_store %arg8[%c0_3, %c0_4], %1 {strides = array<i32>} : memref<192x144xbf16, #tpu.memory_space<vmem>>, vector<192x24xbf16>,
    %c0_5 = arith.constant 0 : index
    %c0_6 = arith.constant 0 : index
    %c24 = arith.constant 24 : index
    %c0_7 = arith.constant 0 : index
    %3 = vector.load %arg2[%c0_5, %c0_6, %c24, %c0_7] : memref<1x1x240x24xbf16, #tpu.memory_space<vmem>>, vector<1x1x192x24xbf16>
    %4 = vector.shape_cast %3 : vector<1x1x192x24xbf16> to vector<192x24xbf16>
    %c0_8 = arith.constant 0 : index
    %c24_9 = arith.constant 24 : index
    %5 = vector.load %arg8[%c0_8, %c24_9] : memref<192x144xbf16, #tpu.memory_space<vmem>>, vector<192x24xbf16>
    tpu.vector_store %arg8[%c0_8, %c24_9], %4 {strides = array<i32>} : memref<192x144xbf16, #tpu.memory_space<vmem>>, vector<192x24xbf16>,
    %c0_10 = arith.constant 0 : index
    %c0_11 = arith.constant 0 : index
    %c48 = arith.constant 48 : index
    %c0_12 = arith.constant 0 : index
    %6 = vector.load %arg2[%c0_10, %c0_11, %c48, %c0_12] : memref<1x1x240x24xbf16, #tpu.memory_space<vmem>>, vector<1x1x192x24xbf16>
    %7 = vector.shape_cast %6 : vector<1x1x192x24xbf16> to vector<192x24xbf16>
    %c0_13 = arith.constant 0 : index
    %c48_14 = arith.constant 48 : index
    %8 = vector.load %arg8[%c0_13, %c48_14] : memref<192x144xbf16, #tpu.memory_space<vmem>>, vector<192x24xbf16>
    tpu.vector_store %arg8[%c0_13, %c48_14], %7 {strides = array<i32>} : memref<192x144xbf16, #tpu.memory_space<vmem>>, vector<192x24xbf16>,
    %c0_15 = arith.constant 0 : index
    %c0_16 = arith.constant 0 : index
    %c0_17 = arith.constant 0 : index
    %c0_18 = arith.constant 0 : index
    %9 = vector.load %arg3[%c0_15, %c0_16, %c0_17, %c0_18] : memref<1x1x240x24xbf16, #tpu.memory_space<vmem>>, vector<1x1x192x24xbf16>
    %10 = vector.shape_cast %9 : vector<1x1x192x24xbf16> to vector<192x24xbf16>
    %c0_19 = arith.constant 0 : index
    %c72 = arith.constant 72 : index
    %11 = vector.load %arg8[%c0_19, %c72] : memref<192x144xbf16, #tpu.memory_space<vmem>>, vector<192x24xbf16>
    tpu.vector_store %arg8[%c0_19, %c72], %10 {strides = array<i32>} : memref<192x144xbf16, #tpu.memory_space<vmem>>, vector<192x24xbf16>,
    %c0_20 = arith.constant 0 : index
    %c0_21 = arith.constant 0 : index
    %c24_22 = arith.constant 24 : index
    %c0_23 = arith.constant 0 : index
    %12 = vector.load %arg3[%c0_20, %c0_21, %c24_22, %c0_23] : memref<1x1x240x24xbf16, #tpu.memory_space<vmem>>, vector<1x1x192x24xbf16>
    %13 = vector.shape_cast %12 : vector<1x1x192x24xbf16> to vector<192x24xbf16>
    %c0_24 = arith.constant 0 : index
    %c96 = arith.constant 96 : index
    %14 = vector.load %arg8[%c0_24, %c96] : memref<192x144xbf16, #tpu.memory_space<vmem>>, vector<192x24xbf16>
    tpu.vector_store %arg8[%c0_24, %c96], %13 {strides = array<i32>} : memref<192x144xbf16, #tpu.memory_space<vmem>>, vector<192x24xbf16>,
    %c0_25 = arith.constant 0 : index
    %c0_26 = arith.constant 0 : index
    %c48_27 = arith.constant 48 : index
    %c0_28 = arith.constant 0 : index
    %15 = vector.load %arg3[%c0_25, %c0_26, %c48_27, %c0_28] : memref<1x1x240x24xbf16, #tpu.memory_space<vmem>>, vector<1x1x192x24xbf16>
    %16 = vector.shape_cast %15 : vector<1x1x192x24xbf16> to vector<192x24xbf16>
    %c0_29 = arith.constant 0 : index
    %c120 = arith.constant 120 : index
    %17 = vector.load %arg8[%c0_29, %c120] : memref<192x144xbf16, #tpu.memory_space<vmem>>, vector<192x24xbf16>
    tpu.vector_store %arg8[%c0_29, %c120], %16 {strides = array<i32>} : memref<192x144xbf16, #tpu.memory_space<vmem>>, vector<192x24xbf16>,
    %c0_30 = arith.constant 0 : index
    %c0_31 = arith.constant 0 : index
    %18 = vector.load %arg8[%c0_30, %c0_31] : memref<192x144xbf16, #tpu.memory_space<vmem>>, vector<192x144xbf16>
    %c0_32 = arith.constant 0 : index
    %c0_33 = arith.constant 0 : index
    %19 = vector.load %arg4[%c0_32, %c0_33] : memref<144x8xbf16, #tpu.memory_space<vmem>>, vector<144x8xbf16>
    %cst = arith.constant dense<0.000000e+00> : vector<192x8xf32>
    %20 = tpu.matmul %18, %19, %cst {dimension_numbers = #tpu.dot_dimension_numbers<[1], [0], [0], [1], [0, 0, 1, 1], [], []>} : vector<192x144xbf16>, vector<144x8xbf16>, vector<192x8xf32> -> vector<192x8xf32>
    %21 = arith.truncf %20 : vector<192x8xf32> to vector<192x8xbf16>
    %c0_34 = arith.constant 0 : index
    %c0_35 = arith.constant 0 : index
    %c0_36 = arith.constant 0 : index
    %c0_37 = arith.constant 0 : index
    %22 = vector.load %arg5[%c0_34, %c0_35, %c0_36, %c0_37] : memref<1x1x192x8xbf16, #tpu.memory_space<vmem>>, vector<1x1x192x8xbf16>
    %23 = vector.shape_cast %22 : vector<1x1x192x8xbf16> to vector<192x8xbf16>
    %24 = vector.shape_cast %21 : vector<192x8xbf16> to vector<1x1x192x8xbf16>
    tpu.vector_store %arg5[%c0_34, %c0_35, %c0_36, %c0_37], %24 {strides = array<i32>} : memref<1x1x192x8xbf16, #tpu.memory_space<vmem>>, vector<1x1x192x8xbf16>,
    %25 = tpu.iota {dimensions = array<i32: 0>} : vector<192x1xi32>
    %c24_i32 = arith.constant 24 : i32
    %c0_i32 = arith.constant 0 : i32
    %26 = arith.cmpi eq, %c24_i32, %c0_i32 : i32
    %c1_i32 = arith.constant 1 : i32
    %27 = arith.select %26, %c1_i32, %c24_i32 : i32
    %28 = vector.broadcast %27 : i32 to vector<192x1xi32>
    %29 = arith.remsi %25, %28 : vector<192x1xi32>
    %c0_i32_38 = arith.constant 0 : i32
    %30 = vector.broadcast %c0_i32_38 : i32 to vector<192x1xi32>
    %31 = arith.cmpi ne, %29, %30 : vector<192x1xi32>
    %c0_i32_39 = arith.constant 0 : i32
    %32 = vector.broadcast %c0_i32_39 : i32 to vector<192x1xi32>
    %33 = arith.cmpi slt, %29, %32 : vector<192x1xi32>
    %c0_i32_40 = arith.constant 0 : i32
    %34 = arith.cmpi slt, %27, %c0_i32_40 : i32
    %35 = vector.broadcast %34 : i1 to vector<192x1xi1>
    %36 = vector.broadcast %35 : vector<192x1xi1> to vector<192x1xi1>
    %37 = arith.xori %33, %36 : vector<192x1xi1>
    %38 = arith.andi %37, %31 : vector<192x1xi1>
    %39 = vector.broadcast %27 : i32 to vector<192x1xi32>
    %40 = arith.addi %29, %39 : vector<192x1xi32>
    %41 = arith.select %38, %40, %29 : vector<192x1xi1>, vector<192x1xi32>
    %c16_i32 = arith.constant 16 : i32
    %42 = vector.broadcast %c16_i32 : i32 to vector<192x1xi32>
    %43 = arith.cmpi slt, %41, %42 : vector<192x1xi32>
    %cst_41 = arith.constant 0.000000e+00 : f32
    %44 = vector.shape_cast %43 : vector<192x1xi1> to vector<192x1xi1>
    %45 = vector.broadcast %44 : vector<192x1xi1> to vector<192x8xi1>
    %46 = vector.broadcast %cst_41 : f32 to vector<192x8xf32>
    %47 = arith.select %45, %20, %46 : vector<192x8xi1>, vector<192x8xf32>
    %48 = vector.shape_cast %47 : vector<192x8xf32> to vector<24x8x8xf32>
    %cst_42 = arith.constant dense<0.000000e+00> : vector<8x8xf32>
    %49 = vector.multi_reduction <add>, %48, %cst_42 [0] : vector<24x8x8xf32> to vector<8x8xf32>
    %50 = arith.mulf %47, %47 : vector<192x8xf32>
    %51 = vector.shape_cast %50 : vector<192x8xf32> to vector<24x8x8xf32>
    %cst_43 = arith.constant dense<0.000000e+00> : vector<8x8xf32>
    %52 = vector.multi_reduction <add>, %51, %cst_43 [0] : vector<24x8x8xf32> to vector<8x8xf32>
    %c0_i32_44 = arith.constant 0 : i32
    %53 = arith.cmpi eq, %arg1, %c0_i32_44 : i32
    %54 = arith.extui %53 : i1 to i32
    %c0_i32_45 = arith.constant 0 : i32
    %55 = arith.cmpi ne, %54, %c0_i32_45 : i32
    scf.if %55 {
      %cst_58 = arith.constant 0.000000e+00 : f32
      %68 = vector.broadcast %cst_58 : f32 to vector<1x8x8xf32>
      %c0_59 = arith.constant 0 : index
      %c0_60 = arith.constant 0 : index
      %c0_61 = arith.constant 0 : index
      %69 = vector.load %arg6[%c0_59, %c0_60, %c0_61] : memref<1x8x8xf32, #tpu.memory_space<vmem>>, vector<1x8x8xf32>
      tpu.vector_store %arg6[%c0_59, %c0_60, %c0_61], %68 {strides = array<i32>} : memref<1x8x8xf32, #tpu.memory_space<vmem>>, vector<1x8x8xf32>,
      %cst_62 = arith.constant 0.000000e+00 : f32
      %70 = vector.broadcast %cst_62 : f32 to vector<1x8x8xf32>
      %c0_63 = arith.constant 0 : index
      %c0_64 = arith.constant 0 : index
      %c0_65 = arith.constant 0 : index
      %71 = vector.load %arg7[%c0_63, %c0_64, %c0_65] : memref<1x8x8xf32, #tpu.memory_space<vmem>>, vector<1x8x8xf32>
      tpu.vector_store %arg7[%c0_63, %c0_64, %c0_65], %70 {strides = array<i32>} : memref<1x8x8xf32, #tpu.memory_space<vmem>>, vector<1x8x8xf32>,
    } else {
    }
    %c0_46 = arith.constant 0 : index
    %c0_47 = arith.constant 0 : index
    %c0_48 = arith.constant 0 : index
    %56 = vector.load %arg6[%c0_46, %c0_47, %c0_48] : memref<1x8x8xf32, #tpu.memory_space<vmem>>, vector<1x8x8xf32>
    %57 = vector.shape_cast %56 : vector<1x8x8xf32> to vector<8x8xf32>
    %58 = arith.addf %57, %49 : vector<8x8xf32>
    %c0_49 = arith.constant 0 : index
    %c0_50 = arith.constant 0 : index
    %c0_51 = arith.constant 0 : index
    %59 = vector.load %arg6[%c0_49, %c0_50, %c0_51] : memref<1x8x8xf32, #tpu.memory_space<vmem>>, vector<1x8x8xf32>
    %60 = vector.shape_cast %59 : vector<1x8x8xf32> to vector<8x8xf32>
    %61 = vector.shape_cast %58 : vector<8x8xf32> to vector<1x8x8xf32>
    tpu.vector_store %arg6[%c0_49, %c0_50, %c0_51], %61 {strides = array<i32>} : memref<1x8x8xf32, #tpu.memory_space<vmem>>, vector<1x8x8xf32>,
    %c0_52 = arith.constant 0 : index
    %c0_53 = arith.constant 0 : index
    %c0_54 = arith.constant 0 : index
    %62 = vector.load %arg7[%c0_52, %c0_53, %c0_54] : memref<1x8x8xf32, #tpu.memory_space<vmem>>, vector<1x8x8xf32>
    %63 = vector.shape_cast %62 : vector<1x8x8xf32> to vector<8x8xf32>
    %64 = arith.addf %63, %52 : vector<8x8xf32>
    %c0_55 = arith.constant 0 : index
    %c0_56 = arith.constant 0 : index
    %c0_57 = arith.constant 0 : index
    %65 = vector.load %arg7[%c0_55, %c0_56, %c0_57] : memref<1x8x8xf32, #tpu.memory_space<vmem>>, vector<1x8x8xf32>
    %66 = vector.shape_cast %65 : vector<1x8x8xf32> to vector<8x8xf32>
    %67 = vector.shape_cast %64 : vector<8x8xf32> to vector<1x8x8xf32>
    tpu.vector_store %arg7[%c0_55, %c0_56, %c0_57], %67 {strides = array<i32>} : memref<1x8x8xf32, #tpu.memory_space<vmem>>, vector<1x8x8xf32>,
    return
  }
  func.func @transform_0(%arg0: i32, %arg1: i32) -> (i32, i32, i32, i32) {
    %c0_i32 = arith.constant 0 : i32
    %c0_i32_0 = arith.constant 0 : i32
    %c0_i32_1 = arith.constant 0 : i32
    return %arg0, %arg1, %c0_i32, %c0_i32_0 : i32, i32, i32, i32
  }
  func.func @transform_1(%arg0: i32, %arg1: i32) -> (i32, i32, i32, i32) {
    %c0_i32 = arith.constant 0 : i32
    %c0_i32_0 = arith.constant 0 : i32
    %c0_i32_1 = arith.constant 0 : i32
    return %arg0, %arg1, %c0_i32, %c0_i32_0 : i32, i32, i32, i32
  }
  func.func @transform_2(%arg0: i32, %arg1: i32) -> (i32, i32) {
    %c0_i32 = arith.constant 0 : i32
    %c0_i32_0 = arith.constant 0 : i32
    %c0_i32_1 = arith.constant 0 : i32
    return %c0_i32, %c0_i32_0 : i32, i32
  }
  func.func @transform_3(%arg0: i32, %arg1: i32) -> (i32, i32, i32, i32) {
    %c0_i32 = arith.constant 0 : i32
    %c0_i32_0 = arith.constant 0 : i32
    %c0_i32_1 = arith.constant 0 : i32
    return %arg0, %arg1, %c0_i32, %c0_i32_0 : i32, i32, i32, i32
  }
  func.func @transform_4(%arg0: i32, %arg1: i32) -> (i32, i32, i32) {
    %c0_i32 = arith.constant 0 : i32
    %c0_i32_0 = arith.constant 0 : i32
    %c0_i32_1 = arith.constant 0 : i32
    return %arg0, %c0_i32, %c0_i32_0 : i32, i32, i32
  }
  func.func @transform_5(%arg0: i32, %arg1: i32) -> (i32, i32, i32) {
    %c0_i32 = arith.constant 0 : i32
    %c0_i32_0 = arith.constant 0 : i32
    %c0_i32_1 = arith.constant 0 : i32
    return %arg0, %c0_i32, %c0_i32_0 : i32, i32, i32
  }
}

module attributes {stable_mosaic.version = 11 : i64} {
  func.func @kernel(%arg0: i32, %arg1: memref<1x256x8xbf16, #tpu.memory_space<vmem>>, %arg2: memref<8x2xbf16, #tpu.memory_space<vmem>>, %arg3: memref<1x2xf32, #tpu.memory_space<vmem>>, %arg4: memref<1x256x2xf32, #tpu.memory_space<vmem>>) attributes {dimension_semantics = [#tpu.dimension_semantics<parallel>], iteration_bounds = array<i64: 2>, scalar_prefetch = 0 : i64, scratch_operands = 0 : i64, tpu.core_type = #tpu.core_type<tc>, window_params = [{transform_indices = @transform_0, window_bounds = array<i64: 1, 256, 8>}, {pipeline_mode = #tpu.pipeline_mode<synchronous>, transform_indices = @transform_1, window_bounds = array<i64: 8, 2>}, {pipeline_mode = #tpu.pipeline_mode<synchronous>, transform_indices = @transform_2, window_bounds = array<i64: 1, 2>}, {transform_indices = @transform_3, window_bounds = array<i64: 1, 256, 2>}]} {
    %c0 = arith.constant 0 : index
    %c0_0 = arith.constant 0 : index
    %c0_1 = arith.constant 0 : index
    %0 = vector.load %arg1[%c0, %c0_0, %c0_1] : memref<1x256x8xbf16, #tpu.memory_space<vmem>>, vector<1x256x8xbf16>
    %1 = vector.shape_cast %0 : vector<1x256x8xbf16> to vector<256x8xbf16>
    %c0_2 = arith.constant 0 : index
    %c0_3 = arith.constant 0 : index
    %2 = vector.load %arg2[%c0_2, %c0_3] : memref<8x2xbf16, #tpu.memory_space<vmem>>, vector<8x2xbf16>
    %cst = arith.constant dense<0.000000e+00> : vector<256x2xf32>
    %3 = tpu.matmul %1, %2, %cst {dimension_numbers = #tpu.dot_dimension_numbers<[1], [0], [0], [1], [0, 0, 1, 1], [], []>} : vector<256x8xbf16>, vector<8x2xbf16>, vector<256x2xf32> -> vector<256x2xf32>
    %c0_4 = arith.constant 0 : index
    %c0_5 = arith.constant 0 : index
    %4 = vector.load %arg3[%c0_4, %c0_5] : memref<1x2xf32, #tpu.memory_space<vmem>>, vector<1x2xf32>
    %5 = vector.broadcast %4 : vector<1x2xf32> to vector<256x2xf32>
    %6 = arith.addf %3, %5 : vector<256x2xf32>
    %cst_6 = arith.constant dense<0xFF800000> : vector<256xf32>
    %7 = vector.multi_reduction <maximumf>, %6, %cst_6 [1] : vector<256x2xf32> to vector<256xf32>
    %8 = vector.shape_cast %7 : vector<256xf32> to vector<256x1xf32>
    %9 = vector.broadcast %8 : vector<256x1xf32> to vector<256x2xf32>
    %10 = arith.subf %6, %9 : vector<256x2xf32>
    %11 = math.exp %10 : vector<256x2xf32>
    %cst_7 = arith.constant dense<0.000000e+00> : vector<256xf32>
    %12 = vector.multi_reduction <add>, %11, %cst_7 [1] : vector<256x2xf32> to vector<256xf32>
    %13 = vector.shape_cast %12 : vector<256xf32> to vector<256x1xf32>
    %14 = math.log %13 : vector<256x1xf32>
    %15 = arith.addf %14, %8 : vector<256x1xf32>
    %16 = vector.broadcast %15 : vector<256x1xf32> to vector<256x2xf32>
    %17 = arith.subf %6, %16 : vector<256x2xf32>
    %c0_8 = arith.constant 0 : index
    %c0_9 = arith.constant 0 : index
    %c0_10 = arith.constant 0 : index
    %18 = vector.load %arg4[%c0_8, %c0_9, %c0_10] : memref<1x256x2xf32, #tpu.memory_space<vmem>>, vector<1x256x2xf32>
    %19 = vector.shape_cast %18 : vector<1x256x2xf32> to vector<256x2xf32>
    %20 = vector.shape_cast %17 : vector<256x2xf32> to vector<1x256x2xf32>
    tpu.vector_store %arg4[%c0_8, %c0_9, %c0_10], %20 {strides = array<i32>} : memref<1x256x2xf32, #tpu.memory_space<vmem>>, vector<1x256x2xf32>,
    return
  }
  func.func @transform_0(%arg0: i32) -> (i32, i32, i32) {
    %c0_i32 = arith.constant 0 : i32
    %c0_i32_0 = arith.constant 0 : i32
    %c0_i32_1 = arith.constant 0 : i32
    return %arg0, %c0_i32, %c0_i32_0 : i32, i32, i32
  }
  func.func @transform_1(%arg0: i32) -> (i32, i32) {
    %c0_i32 = arith.constant 0 : i32
    %c0_i32_0 = arith.constant 0 : i32
    %c0_i32_1 = arith.constant 0 : i32
    return %c0_i32, %c0_i32_0 : i32, i32
  }
  func.func @transform_2(%arg0: i32) -> (i32, i32) {
    %c0_i32 = arith.constant 0 : i32
    %c0_i32_0 = arith.constant 0 : i32
    %c0_i32_1 = arith.constant 0 : i32
    return %c0_i32, %c0_i32_0 : i32, i32
  }
  func.func @transform_3(%arg0: i32) -> (i32, i32, i32) {
    %c0_i32 = arith.constant 0 : i32
    %c0_i32_0 = arith.constant 0 : i32
    %c0_i32_1 = arith.constant 0 : i32
    return %arg0, %c0_i32, %c0_i32_0 : i32, i32, i32
  }
}

</mosaic_0001>

<bundles_post_ra>
// kernel: tile.104
= control target key start
LH: loop header
LB: loop body
LE: loop exit
PB: predicated region body
PF: predicated region fallthrough
CT: control target
= control target key end

     0   :  { %vm82_vm0 = vcmask 1047556   ;;  %vm84_vm1 = vcmask 64512   ;;  %s195_s9 = smov 24   ;;  %s196_s14 = smov 8   ;;  %vm103_vm2 = vcmask 261312   ;;  %vm124_vm3 = vcmask 195712   ;;  %s289_s0 = inlined_call_operand.vmem [shape: f32[2,8,4,8], index: 0, kind: input, shape index: {}]   ;;  %s290_s1 = inlined_call_operand.vmem [shape: f32[2,8,32], index: 1, kind: output, shape index: {}]  }
   0x1   :  { %v180_v0 = vld [vmem:[%s289_s0 + $0x1c] sm:$0xf]  ;;  %v181_v1 = vld [vmem:[%s289_s0 + $0x18] sm:$0xf]  ;;  %v182_v2 = vld [vmem:[%s289_s0 + $0x14] sm:$0xf] }
   0x2   :  { %48 = vst [vmem:[#allocation0 + $0x38] sm:$0xf] %v180_v0  ;;  %53 = vst [vmem:[#allocation0 + $0x30] sm:$0xf] %v181_v1  ;;  %v183_v3 = vld [vmem:[%s289_s0 + $0x10] sm:$0xf] }
   0x3   :  { %58 = vst [vmem:[#allocation0 + $0x28] sm:$0xf] %v182_v2  ;;  %v184_v4 = vld [vmem:[%s289_s0 + $0xc] sm:$0xf]  ;;  %v185_v5 = vld [vmem:[%s289_s0 + $0x8] sm:$0xf] }
   0x4   :  { %63 = vst [vmem:[#allocation0 + $0x20] sm:$0xf] %v183_v3  ;;  %68 = vst [vmem:[#allocation0 + $0x18] sm:$0xf] %v184_v4  ;;  %v186_v6 = vld [vmem:[%s289_s0 + $0x4] sm:$0xf] }
   0x5   :  { %73 = vst [vmem:[#allocation0 + $0x10] sm:$0xf] %v185_v5  ;;  %v78_v7 = vld [vmem:[%s289_s0] sm:$0xf]  ;;  %77 = vst [vmem:[#allocation0 + $0x8] sm:$0xf] %v186_v6 }
   0x6   :  { %79 = vst [vmem:[#allocation0] sm:$0xf] %v78_v7  ;;  %v172_v8 = vld [vmem:[%s289_s0 + $0x3c] sm:$0xf]  ;;  %v173_v9 = vld [vmem:[%s289_s0 + $0x38] sm:$0xf] }
   0x7   :  { %8 = vst [vmem:[#allocation0 + $0x78] sm:$0xf] %v172_v8  ;;  %13 = vst [vmem:[#allocation0 + $0x70] sm:$0xf] %v173_v9  ;;  %v174_v10 = vld [vmem:[%s289_s0 + $0x34] sm:$0xf] }
   0x8   :  { %v175_v11 = vld [vmem:[%s289_s0 + $0x30] sm:$0xf]  ;;  %v176_v12 = vld [vmem:[%s289_s0 + $0x2c] sm:$0xf]  ;;  %18 = vst [vmem:[#allocation0 + $0x68] sm:$0xf] %v174_v10 }
   0x9   :  { %23 = vst [vmem:[#allocation0 + $0x60] sm:$0xf] %v175_v11  ;;  %28 = vst [vmem:[#allocation0 + $0x58] sm:$0xf] %v176_v12  ;;  %v177_v13 = vld [vmem:[%s289_s0 + $0x28] sm:$0xf] }
   0xa   :  { %v178_v14 = vld [vmem:[%s289_s0 + $0x24] sm:$0xf]  ;;  %v179_v15 = vld [vmem:[%s289_s0 + $0x20] sm:$0xf]  ;;  %33 = vst [vmem:[#allocation0 + $0x50] sm:$0xf] %v177_v13 }
   0xb   :  { %38 = vst [vmem:[#allocation0 + $0x48] sm:$0xf] %v178_v14  ;;  %43 = vst [vmem:[#allocation0 + $0x40] sm:$0xf] %v179_v15  ;;  %s194_s0 = smov 16   ;;  %vm145_vm4 = vcmask 130112  }
   0xc   :  { %v119_v16 = vld [vmem:[#allocation0 + $0x2] ss:$8 sm:$0xf0]   ;;  %v98_v17 = vld [vmem:[#allocation0 + $0x3] ss:$8 sm:$0xf0]  }
   0xd   :  { %v117_v18 = vld [vmem:[#allocation0 + $0x2] ss:$8 sm:$0xf]   ;;  %v96_v19 = vld [vmem:[#allocation0 + $0x3] ss:$8 sm:$0xf]  }
   0xe   :  { %v121_v20 = vsel %vm82_vm0, %v119_v16, %v117_v18  ;;  %v100_v21 = vsel %vm82_vm0, %v98_v17, %v96_v19  ;;  %v138_v24 = vld [vmem:[#allocation0 + $0x1] ss:$8 sm:$0xf]   ;;  %v80_v32 = vld [vmem:[#allocation0] ss:$8 sm:$0xf]  }
   0xf   :  { %122 = vrot.lane.b32.xlu1 %v121_v20, %s194_s0  ;;  %101 = vrot.lane.b32.xlu0 %v100_v21, %s195_s9  ;;  %v140_v25 = vld [vmem:[#allocation0 + $0x1] ss:$8 sm:$0xf0]   ;;  %v81_v33 = vld [vmem:[#allocation0] ss:$8 sm:$0xf0]  }
  0x10   :  { %v129_v22 = vld [vmem:[#allocation0 + $0x42] ss:$8 sm:$0xf0]   ;;  %v108_v23 = vld [vmem:[#allocation0 + $0x43] ss:$8 sm:$0xf0]   ;;  %v83_v34 = vsel %vm82_vm0, %v81_v33, %v80_v32  ;;  %v142_v38 = vsel %vm82_vm0, %v140_v25, %v138_v24 }
  0x11   :  { %v150_v31 = vld [vmem:[#allocation0 + $0x41] ss:$8 sm:$0xf0]   ;;  %v89_v36 = vld [vmem:[#allocation0 + $0x40] ss:$8 sm:$0xf0]  }
  0x12   :  { %v127_v26 = vld [vmem:[#allocation0 + $0x42] ss:$8 sm:$0xf]   ;;  %v106_v27 = vld [vmem:[#allocation0 + $0x43] ss:$8 sm:$0xf]  }
  0x13   :  { %v131_v28 = vsel %vm82_vm0, %v129_v22, %v127_v26  ;;  %v110_v29 = vsel %vm82_vm0, %v108_v23, %v106_v27  ;;  %v148_v30 = vld [vmem:[#allocation0 + $0x41] ss:$8 sm:$0xf]   ;;  %v87_v35 = vld [vmem:[#allocation0 + $0x40] ss:$8 sm:$0xf]  }
  0x14   :  { %132 = vrot.lane.b32.xlu1 %v131_v28, %s194_s0  ;;  %111 = vrot.lane.b32.xlu0 %v110_v29, %s195_s9  ;;  %v152_v37 = vsel %vm82_vm0, %v150_v31, %v148_v30  ;;  %85 = vst.msk [vmem:[%s290_s1] sm:$0xff] %vm84_vm1, %v83_v34   ;;  %v91_v39 = vsel %vm82_vm0, %v89_v36, %v87_v35 }
  0x15   :  { %187 = vst.msk [vmem:[%s290_s1 + $0x8] sm:$0xff] %vm84_vm1, %v91_v39  }
  0x18   :  { %153 = vrot.lane.b32.xlu1 %v152_v37, %s196_s14  ;;  %143 = vrot.lane.b32.xlu0 %v142_v38, %s196_s14 }
  0x81   :  { %v123_v40 = vpop.permute.xlu1 %122   ;;  %v102_v41 = vpop.permute.xlu0 %101  }
  0x82   :  { %104 = vst.msk [vmem:[%s290_s1] sm:$0xff] %vm103_vm2, %v102_v41  }
  0x83   :  { %125 = vst.msk [vmem:[%s290_s1] sm:$0xff] %vm124_vm3, %v123_v40  }
  0x86   :  { %v133_v42 = vpop.permute.xlu1 %132   ;;  %v112_v43 = vpop.permute.xlu0 %111  }
  0x87   :  { %188 = vst.msk [vmem:[%s290_s1 + $0x8] sm:$0xff] %vm103_vm2, %v112_v43  }
  0x88   :  { %189 = vst.msk [vmem:[%s290_s1 + $0x8] sm:$0xff] %vm124_vm3, %v133_v42  }
  0x8a   :  { %v154_v44 = vpop.permute.xlu1 %153   ;;  %v144_v45 = vpop.permute.xlu0 %143  }
  0x8b   :  { %190 = vst.msk [vmem:[%s290_s1 + $0x8] sm:$0xff] %vm145_vm4, %v154_v44   ;;  %146 = vst.msk [vmem:[%s290_s1] sm:$0xff] %vm145_vm4, %v144_v45  }

// kernel: unet_forward.24
= control target key start
LH: loop header
LB: loop body
LE: loop exit
PB: predicated region body
PF: predicated region fallthrough
CT: control target
= control target key end

     0   :  { %s582_s18 = smov 0   ;;  %s584_s19 = smov 0   ;;  %s670_s0 = inlined_call_operand.vmem [shape: bf16[2,16,6,32], index: 0, kind: input, shape index: {}]   ;;  %s671_s1 = inlined_call_operand.vmem [shape: f32[2,8,32], index: 1, kind: input, shape index: {}]   ;;  %s672_s2 = inlined_call_operand.vmem [shape: f32[2,8,32], index: 2, kind: input, shape index: {}]   ;;  %s673_s3 = inlined_call_operand.vmem [shape: f32[1,32], index: 3, kind: input, shape index: {}]   ;;  %s674_s4 = inlined_call_operand.vmem [shape: f32[1,32], index: 4, kind: input, shape index: {}]   ;;  %s675_s5 = inlined_call_operand.vmem [shape: bf16[2,16,4,32], index: 5, kind: output, shape index: {}]  }
   0x1   :  { %s586_s20 = smov 0   ;;  %s588_s21 = smov 0  }
   0x2   :  { %s590_s22 = smov 0  }
   0x3 LB: > { %s24_s23 = sadd.s32 1, %s542_s20  ;;  %s27_s24 = sadd.s32 1, %s546_s21  ;;  %s550_s22 = sphi %s590_s22, %s15_s22   ;;  %s546_s21 = sphi %s588_s21, %s679_s21   ;;  %s542_s20 = sphi %s586_s20, %s678_s20   ;;  %s538_s19 = sphi %s584_s19, %s677_s19   ;;  %s534_s18 = sphi %s582_s18, %s676_s18  }
   0x4   : > { %p25_p0 = scmp.ge.s32.totalorder %s24_s23, 2  ;;  %p461_p1 = scmp.ge.s32.totalorder %s550_s22, 1 }
   0x5   : > { %p208_p2 = scmp.lt.s32.totalorder %s550_s22, 5 }
   0x6   : > { %s681_s23 = smov (%p25_p0, %s24_s23), 0  ;;  %s683_s24 = smov (!%p25_p0, %s27_s24), %s546_s21 }
   0x7   : > { %p209_p3 = pnand %p461_p1, %p208_p2  ;;  %p29_p4 = scmp.ge.s32.totalorder %s683_s24, 2 }
   0x8   : > { %v264_v0 = vld [vmem:[%s671_s1] sm:$0xff] (!%p209_p3)  ;;  %v265_v1 = vld [vmem:[%s671_s1 + $0x8] sm:$0xff] (!%p209_p3)  ;;  %vm266_vm0 = vcmask (!%p209_p3), 261120   ;;  %s462_s8 = sshll.u32 (!%p209_p3), %s534_s18, 3  ;;  %p245_p5 = scmp.lt.s32.totalorder (!%p209_p3), %s538_s19, 1  ;;  %v315_v27 = vlaneseq (!%p209_p3)  ;;  %vm358_vm1 = vcmask (!%p209_p3), 254976  }
   0x9   : > { %s685_s24 = smov (%p29_p4, %s683_s24), 0  ;;  %212 = sbr.rel (%p209_p3) target bundleno = 62 (0x3e), region = 40 }
   0xa   : > { %v276_v2 = vld [vmem:[%s672_s2] sm:$0xff] (!%p209_p3)  ;;  %v267_v3 = vsel (!%p209_p3), %vm266_vm0, %v264_v0, 0.0  ;;  %v268_v4 = vsel (!%p209_p3), %vm266_vm0, %v265_v1, 0.0  ;;  %v277_v5 = vld [vmem:[%s672_s2 + $0x8] sm:$0xff] (!%p209_p3)  ;;  %p247_p6 = scmp.lt.s32.totalorder (!%p209_p3), %s462_s8, 15  ;;  %v316_v28 = vshrl.u32 (!%p209_p3), %v315_v27, 7 }
   0xb   : > { %v278_v6 = vsel (!%p209_p3), %vm266_vm0, %v276_v2, 0.0  ;;  %v269_v7 = vadd.f32 (!%p209_p3), %v268_v4, %v267_v3  ;;  %v279_v8 = vsel (!%p209_p3), %vm266_vm0, %v277_v5, 0.0  ;;  %v291_v29 = vld [vmem:[%s673_s3] sm:$0x1] (!%p209_p3) }
   0xc   : > { %v280_v9 = vadd.f32 (!%p209_p3), %v279_v8, %v278_v6  ;;  %v317_v31 = vsub.s32 (!%p209_p3), 0, %v316_v28  ;;  %v295_v44 = vld [vmem:[%s674_s4] sm:$0x1] (!%p209_p3) }
   0xd   : > { %v270_v10 = vrot.slane (!%p209_p3), %v269_v7, 4 }
   0xe   : > { %v281_v11 = vrot.slane (!%p209_p3), %v280_v9, 4 }
   0xf   : > { %v271_v12 = vadd.f32 (!%p209_p3), %v270_v10, %v269_v7 }
  0x10   : > { %v282_v13 = vadd.f32 %v281_v11, %v280_v9  ;;  %s687_s19 = smov (!%p245_p5, %s538_s19), 1  ;;  %s689_s8 = smov (!%p247_p6, %s462_s8), 15 }
  0x11   : > { %v272_v14 = vrot.slane %v271_v12, 2  ;;  %s463_s9 = sshll.u32 %s687_s19, 4 }
  0x12   : > { %v283_v15 = vrot.slane %v282_v13, 2  ;;  %s631_s10 = sadd.s32 %s463_s9, %s689_s8 }
  0x13   : > { %v273_v16 = vadd.f32 %v272_v14, %v271_v12  ;;  %s464_s11 = sshll.u32 %s631_s10, 2  ;;  %s467_s19 = sshll.u32 %s631_s10, 1 }
  0x14   : > { %v284_v17 = vadd.f32 %v283_v15, %v282_v13  ;;  %s252_s14 = scalar_lea.vmem %s670_s0, %s464_s11  ;;  %s262_s27 = scalar_lea.vmem %s675_s5, %s467_s19 }
  0x15   : > { %v274_v18 = vrot.slane %v273_v16, 1  ;;  %v298_v30 = vld [vmem:[%s252_s14] sm:$0x7]  ;;  %v299_v32 = vld [vmem:[%s252_s14 + $0x4] sm:$0x7] }
  0x16   : > { %v285_v19 = vrot.slane %v284_v17, 1  ;;  %v300_v33 = vld [vmem:[%s252_s14 + $0x8] sm:$0x7]  ;;  %v301_v34 = vld [vmem:[%s252_s14 + $0xc] sm:$0x7]  ;;  %v306_v41 = vunpack.c.l.bf16 %v298_v30  ;;  %v307_v42 = vunpack.c.l.bf16 %v299_v32 }
  0x17   : > { %v275_v20 = vadd.f32 %v274_v18, %v273_v16  ;;  %v302_v35 = vld [vmem:[%s252_s14 + $0x10] sm:$0x7]  ;;  %v303_v36 = vld [vmem:[%s252_s14 + $0x14] sm:$0x7]  ;;  %v304_v37 = vld [vmem:[%s252_s14 + $0x18] sm:$0x7]  ;;  %v308_v43 = vunpack.c.l.bf16 %v300_v33  ;;  %v309_v45 = vunpack.c.l.bf16 %v301_v34 }
  0x18   : > { %v286_v21 = vadd.f32 %v285_v19, %v284_v17  ;;  %v305_v39 = vld [vmem:[%s252_s14 + $0x1c] sm:$0x7]  ;;  %v310_v46 = vunpack.c.l.bf16 %v302_v35  ;;  %v311_v47 = vunpack.c.l.bf16 %v303_v36  ;;  %v312_v48 = vunpack.c.l.bf16 %v304_v37 }
  0x19   : > { %v287_v22 = vmul.f32 0.001953125, %v275_v20  ;;  %v313_v51 = vunpack.c.l.bf16 %v305_v39 }
  0x1a   : > { %v288_v23 = vmul.f32 0.001953125, %v286_v21 }
  0x1b   : > { %v289_v24 = vmul.f32 %v287_v22, %v287_v22 }
  0x1d   : > { %v290_v25 = vsub.f32 %v288_v23, %v289_v24 }
  0x1f   : > { %v292_v26 = vadd.f32 1e-05, %v290_v25 }
  0x21   : > { %510 = vrsqrt.f32 %v292_v26 }
  0x2b   : > { %v511_v38 = vpop.eup %510 }
  0x2c   : > { %v294_v40 = vmul.f32 %v511_v38, %v291_v29 }
  0x2e   : > { %v296_v49 = vmul.f32 %v294_v40, %v287_v22  ;;  %v318_v50 = vrot.slane %v294_v40, %v317_v31 }
  0x30   : > { %v297_v52 = vsub.f32 %v295_v44, %v296_v49  ;;  %v320_v53 = vmul.f32 %v318_v50, %v306_v41  ;;  %v321_v54 = vmul.f32 %v318_v50, %v307_v42  ;;  %v322_v55 = vmul.f32 %v318_v50, %v308_v43 }
  0x31   : > { %v323_v56 = vmul.f32 %v318_v50, %v309_v45  ;;  %v324_v57 = vmul.f32 %v318_v50, %v310_v46  ;;  %v325_v58 = vmul.f32 %v318_v50, %v311_v47  ;;  %v326_v59 = vmul.f32 %v318_v50, %v312_v48 }
  0x32   : > { %v332_v60 = vrot.slane %v297_v52, %v317_v31  ;;  %v327_v61 = vmul.f32 %v318_v50, %v313_v51 }
  0x34   : > { %v334_v62 = vadd.f32 %v332_v60, %v320_v53  ;;  %v335_v63 = vadd.f32 %v332_v60, %v321_v54  ;;  %v336_v0 = vadd.f32 %v332_v60, %v322_v55  ;;  %v337_v1 = vadd.f32 %v332_v60, %v323_v56 }
  0x35   : > { %v338_v2 = vadd.f32 %v332_v60, %v324_v57  ;;  %v339_v3 = vadd.f32 %v332_v60, %v325_v58  ;;  %v340_v4 = vadd.f32 %v332_v60, %v326_v59  ;;  %v341_v5 = vadd.f32 %v332_v60, %v327_v61 }
  0x36   : > { %v342_v6 = vmax.f32 %v334_v62, 0.0  ;;  %v343_v7 = vmax.f32 %v335_v63, 0.0  ;;  %v344_v8 = vmax.f32 %v336_v0, 0.0  ;;  %v345_v9 = vmax.f32 %v337_v1, 0.0 }
  0x37   : > { %v346_v10 = vmax.f32 %v338_v2, 0.0  ;;  %v347_v11 = vmax.f32 %v339_v3, 0.0  ;;  %v348_v12 = vmax.f32 %v340_v4, 0.0  ;;  %v349_v13 = vmax.f32 %v341_v5, 0.0 }
  0x38   : > { %v350_v14 = vpack.c.bf16 %v342_v6, %v342_v6  ;;  %v351_v15 = vpack.c.bf16 %v343_v7, %v343_v7  ;;  %v352_v16 = vpack.c.bf16 %v344_v8, %v344_v8  ;;  %v353_v17 = vpack.c.bf16 %v345_v9, %v345_v9 }
  0x39   : > { %v354_v18 = vpack.c.bf16 %v346_v10, %v346_v10  ;;  %v355_v19 = vpack.c.bf16 %v347_v11, %v347_v11  ;;  %v356_v20 = vpack.c.bf16 %v348_v12, %v348_v12  ;;  %v357_v21 = vpack.c.bf16 %v349_v13, %v349_v13 }
  0x3a   : > { %359 = vst.msk [vmem:[%s262_s27] sm:$0x3] %vm358_vm1, %v350_v14  ;;  %360 = vst.msk [vmem:[%s262_s27 + $0x2] sm:$0x3] %vm358_vm1, %v351_v15 }
  0x3b   : > { %361 = vst.msk [vmem:[%s262_s27 + $0x4] sm:$0x3] %vm358_vm1, %v352_v16  ;;  %362 = vst.msk [vmem:[%s262_s27 + $0x6] sm:$0x3] %vm358_vm1, %v353_v17 }
  0x3c   : > { %363 = vst.msk [vmem:[%s262_s27 + $0x8] sm:$0x3] %vm358_vm1, %v354_v18  ;;  %364 = vst.msk [vmem:[%s262_s27 + $0xa] sm:$0x3] %vm358_vm1, %v355_v19 }
  0x3d   : > { %365 = vst.msk [vmem:[%s262_s27 + $0xc] sm:$0x3] %vm358_vm1, %v356_v20  ;;  %366 = vst.msk [vmem:[%s262_s27 + $0xe] sm:$0x3] %vm358_vm1, %v357_v21 }
  0x3e PF: > { %s15_s22 = sadd.s32 1, %s550_s22   ;;  %s676_s18 = smov %s542_s20 }
  0x3f   : > { %p12_p7 = scmp.ge.s32.totalorder %s15_s22, 6   ;;  %s677_s19 = smov %s546_s21 }
  0x40   : > { %s678_s20 = smov %s681_s23  ;;  %s679_s21 = smov %s685_s24 }
  0x41   :  { %14 = sbr.rel (!%p12_p7) target bundleno = 3 (0x3), region = 70 }

// kernel: unet_forward.23
= control target key start
LH: loop header
LB: loop body
LE: loop exit
PB: predicated region body
PF: predicated region fallthrough
CT: control target
= control target key end

     0   :  { %s2143_s15 = smov 0   ;;  %s2145_s16 = smov 0   ;;  %s3329_s0 = inlined_call_operand.vmem [shape: bf16[2,2,240,24], index: 0, kind: input, shape index: {}]   ;;  %s3330_s1 = inlined_call_operand.vmem [shape: bf16[72,8], index: 1, kind: input, shape index: {}]   ;;  %s3331_s2 = inlined_call_operand.vmem [shape: bf16[2,2,192,8], index: 2, kind: output, shape index: {0}]   ;;  %s3332_s3 = inlined_call_operand.vmem [shape: f32[2,8,8], index: 3, kind: output, shape index: {1}]   ;;  %s3333_s4 = inlined_call_operand.vmem [shape: f32[2,8,8], index: 4, kind: output, shape index: {2}]  }
   0x1   :  { %s2147_s17 = smov 0   ;;  %s2149_s18 = smov 0  }
   0x2   :  { %s2151_s19 = smov 0  }
   0x3 LB: > { %s24_s20 = sadd.s32 1, %s2105_s17  ;;  %s27_s21 = sadd.s32 1, %s2109_s18  ;;  %s2113_s19 = sphi %s2151_s19, %s15_s19   ;;  %s2109_s18 = sphi %s2149_s18, %s3555_s18   ;;  %s2105_s17 = sphi %s2147_s17, %s3554_s17   ;;  %s2101_s16 = sphi %s2145_s16, %s3553_s16   ;;  %s2097_s15 = sphi %s2143_s15, %s3552_s15  }
   0x4   : > { %p25_p0 = scmp.ge.s32.totalorder %s24_s20, 2  ;;  %p1767_p1 = scmp.ge.s32.totalorder %s2113_s19, 1 }
   0x5   : > { %p187_p2 = scmp.lt.s32.totalorder %s2113_s19, 5 }
   0x6   : > { %s3557_s20 = smov (%p25_p0, %s24_s20), 0  ;;  %s3559_s21 = smov (!%p25_p0, %s27_s21), %s2109_s18 }
   0x7   : > { %p188_p3 = pnand %p1767_p1, %p187_p2  ;;  %p29_p4 = scmp.ge.s32.totalorder %s3559_s21, 2 }
   0x9   : > { %s3561_s21 = smov (%p29_p4, %s3559_s21), 0  ;;  %191 = sbr.rel (%p188_p3) target bundleno = 448 (0x1c0), region = 28 }
  0x10   : > { %p229_p5 = scmp.lt.s32.totalorder %s2101_s16, 1  ;;  %p231_p6 = scmp.lt.s32.totalorder %s2097_s15, 1  ;;  %v2058_v0 = vld [vmem:[%s3330_s1] sm:$0xff]   ;;  %v2059_v1 = vld [vmem:[%s3330_s1 + $0x8] sm:$0xff]   ;;  %v2061_v2 = vld [vmem:[%s3330_s1 + $0x10] sm:$0xff]   ;;  %vm716_vm0 = vcmask 1043456  }
  0x11   : > { %1893 = vmatprep.subr.bf16.mxu0 %v2058_v0  ;;  %1927 = vmatprep.subr.bf16.mxu1 %v2058_v0  ;;  %v2063_v3 = vld [vmem:[%s3330_s1 + $0x18] sm:$0xff]   ;;  %v2066_v6 = vld [vmem:[%s3330_s1 + $0x20] ss:$0 sps:$4 sm:$0xff]   ;;  %s2116_s30 = smov 48   ;;  %vm352_vm1 = vcmask 195584   ;;  %vm485_vm2 = vcmask 392384  }
  0x12   : > { %s3563_s16 = smov (!%p229_p5, %s2101_s16), 1  ;;  %1894 = vmatpush3.bf16.msra.mxu0 %v2058_v0  ;;  %1932 = vmatpush3.bf16.msra.mxu1 %v2058_v0  ;;  %v718_v11 = vsel %vm716_vm0, %v2066_v6, 0  ;;  %vm618_vm3 = vcmask 589184   ;;  %vm679_vm4 = vcmask 588800   ;;  %p1849_p7 = scmp.ne.s32.totalorder %s2097_s15, 0 }
  0x13   : > { %s2185_s26 = scalar_select %p231_p6, %s2097_s15, 1  ;;  %1895 = vmatprep.subr.bf16.mxu0 %v2059_v1  ;;  %1928 = vmatprep.subr.bf16.mxu1 %v2059_v1 }
  0x14   : > { %s1940_s27 = smul.u32 60, %s3563_s16  ;;  %s1770_s28 = sshll.u32 %s3563_s16, 3 }
  0x15   : > { %s1939_s29 = smul.u32 30, %s2185_s26  ;;  %s2193_s6 = scalar_lea.vmem %s3332_s3, %s1770_s28 }
  0x16   : > { %s2201_s11 = scalar_lea.vmem %s3333_s4, %s1770_s28  ;;  %1896 = vmatpush3.bf16.msra.mxu0 %v2059_v1  ;;  %1933 = vmatpush3.bf16.msra.mxu1 %v2059_v1  ;;  %s1941_s5 = smul.u32 24, %s2185_s26 }
  0x17   : > { %s235_s12 = sadd.s32 %s1940_s27, %s1939_s29  ;;  %1897 = vmatprep.subr.bf16.mxu0 %v2061_v2  ;;  %1929 = vmatprep.subr.bf16.mxu1 %v2061_v2  ;;  %s2115_s29 = smov 24  }
  0x18   : > { %s1768_s13 = sshll.u32 %s235_s12, 2  ;;  %s1942_s7 = smul.u32 48, %s3563_s16 }
  0x19   : > { %s2206_s23 = scalar_lea.vmem %s3329_s0, %s1768_s13 }
  0x1a   : > { %v2034_v4 = vld [vmem:[%s2206_s23 + $0xc] sm:$0xff]   ;;  %v2035_v5 = vld [vmem:[%s2206_s23 + $0x18] sm:$0xff]   ;;  %1898 = vmatpush3.bf16.msra.mxu0 %v2061_v2  ;;  %v2037_v8 = vld [vmem:[%s2206_s23 + $0x20] sm:$0xff]   ;;  %1934 = vmatpush3.bf16.msra.mxu1 %v2061_v2  ;;  %s2286_s8 = sadd.s32 %s1942_s7, %s1941_s5 }
  0x1b   : > { %449 = vrot.lane.b32.xlu0 %v2034_v4, %s2115_s29  ;;  %v2036_v7 = vld [vmem:[%s2206_s23 + $0x14] sm:$0xff]   ;;  %582 = vrot.lane.b32.xlu1 %v2035_v5, %s2116_s30  ;;  %v2038_v9 = vld [vmem:[%s2206_s23 + $0x1c] sm:$0xff]   ;;  %s1769_s16 = sshll.u32 %s2286_s8, 2 }
  0x1c   : > { %1899 = vmatprep.subr.bf16.mxu0 %v2063_v3  ;;  %1930 = vmatprep.subr.bf16.mxu1 %v2063_v3  ;;  %v2039_v10 = vld [vmem:[%s2206_s23 + $0x24] sm:$0xff]   ;;  %v2041_v13 = vld [vmem:[%s2206_s23 + $0x30] sm:$0xff]   ;;  %v2044_v16 = vld [vmem:[%s2206_s23 + $0x38] sm:$0xff]   ;;  %s2891_s10 = scalar_lea.vmem %s3331_s2, %s1769_s16 }
  0x1d   : > { %v2040_v12 = vld [vmem:[%s2206_s23 + $0x28] sm:$0xff]   ;;  %v2043_v15 = vld [vmem:[%s2206_s23 + $0x34] sm:$0xff]   ;;  %v2045_v17 = vld [vmem:[%s2206_s23 + $0x40] sm:$0xff]  }
  0x1e   : > { %1900 = vmatpush3.bf16.msra.mxu0 %v2063_v3  ;;  %1935 = vmatpush3.bf16.msra.mxu1 %v2063_v3  ;;  %v2042_v14 = vld [vmem:[%s2206_s23 + $0x2c] sm:$0xff]   ;;  %v2046_v18 = vld [vmem:[%s2206_s23 + $0x3c] sm:$0xff]   ;;  %v2047_v19 = vld [vmem:[%s2206_s23 + $0x44] sm:$0xff]  }
  0x1f   : > { %451 = vrot.lane.b32.xlu0 %v2036_v7, %s2115_s29  ;;  %584 = vrot.lane.b32.xlu1 %v2037_v8, %s2116_s30  ;;  %v2048_v20 = vld [vmem:[%s2206_s23 + $0x48] sm:$0xff]   ;;  %v2060_v21 = vld [vmem:[%s2206_s23] sm:$0xff]  }
  0x20   : > { %1937 = vmatprep.subr.msk.bf16.mxu0 %vm716_vm0, %v2066_v6  ;;  %1938 = vmatprep.subr.msk.bf16.mxu1 %vm716_vm0, %v2066_v6  ;;  %v2049_v22 = vld [vmem:[%s2206_s23 + $0x50] sm:$0xff]   ;;  %v2062_v23 = vld [vmem:[%s2206_s23 + $0x8] sm:$0xff]   ;;  %353 = vst.msk [vmem:[#allocation2] sm:$0xff] %vm352_vm1, %v2060_v21  ;;  %v2065_v25 = vld [vmem:[%s2206_s23 + $0x18] sm:$0xff]  }
  0x21   : > { %v2064_v24 = vld [vmem:[%s2206_s23 + $0x10] sm:$0xff]   ;;  %354 = vst.msk [vmem:[#allocation2 + $0x8] sm:$0xff] %vm352_vm1, %v2062_v23  ;;  %v2067_v27 = vld [vmem:[%s2206_s23 + $0x20] sm:$0xff]   ;;  %356 = vst.msk [vmem:[#allocation2 + $0x18] sm:$0xff] %vm352_vm1, %v2065_v25 }
  0x22   : > { %1902 = vmatpush3.bf16.msra.mxu0 %v718_v11  ;;  %1936 = vmatpush3.bf16.msra.mxu1 %v718_v11  ;;  %v2050_v26 = vld [vmem:[%s2206_s23 + $0x4c] sm:$0xff]   ;;  %355 = vst.msk [vmem:[#allocation2 + $0x10] sm:$0xff] %vm352_vm1, %v2064_v24  ;;  %v2051_v28 = vld [vmem:[%s2206_s23 + $0x54] sm:$0xff]   ;;  %357 = vst.msk [vmem:[#allocation2 + $0x20] sm:$0xff] %vm352_vm1, %v2067_v27 }
  0x23   : > { %453 = vrot.lane.b32.xlu0 %v2038_v9, %s2115_s29  ;;  %455 = vrot.lane.b32.xlu1 %v2039_v10, %s2115_s29  ;;  %v2068_v29 = vld [vmem:[%s2206_s23 + $0x28] sm:$0xff]   ;;  %v2069_v30 = vld [vmem:[%s2206_s23 + $0x30] sm:$0xff]  }
  0x24   : > { %358 = vst.msk [vmem:[#allocation2 + $0x28] sm:$0xff] %vm352_vm1, %v2068_v29  ;;  %v2070_v31 = vld [vmem:[%s2206_s23 + $0x38] sm:$0xff]   ;;  %359 = vst.msk [vmem:[#allocation2 + $0x30] sm:$0xff] %vm352_vm1, %v2069_v30  ;;  %v2071_v33 = vld [vmem:[%s2206_s23 + $0x40] sm:$0xff]  }
  0x25   : > { %v2052_v32 = vld [vmem:[%s2206_s23 + $0x58] sm:$0xff]   ;;  %v2053_v34 = vld [vmem:[%s2206_s23 + $0x60] sm:$0xff]   ;;  %360 = vst.msk [vmem:[#allocation2 + $0x38] sm:$0xff] %vm352_vm1, %v2070_v31  ;;  %v2072_v35 = vld [vmem:[%s2206_s23 + $0x48] sm:$0xff]  }
  0x26   : > { %361 = vst.msk [vmem:[#allocation2 + $0x40] sm:$0xff] %vm352_vm1, %v2071_v33  ;;  %v2073_v36 = vld [vmem:[%s2206_s23 + $0x50] sm:$0xff]   ;;  %362 = vst.msk [vmem:[#allocation2 + $0x48] sm:$0xff] %vm352_vm1, %v2072_v35  ;;  %v2074_v37 = vld [vmem:[%s2206_s23 + $0x58] sm:$0xff]  }
  0x27   : > { %586 = vrot.lane.b32.xlu0 %v2040_v12, %s2116_s30  ;;  %588 = vrot.lane.b32.xlu1 %v2041_v13, %s2116_s30  ;;  %363 = vst.msk [vmem:[#allocation2 + $0x50] sm:$0xff] %vm352_vm1, %v2073_v36  ;;  %364 = vst.msk [vmem:[#allocation2 + $0x58] sm:$0xff] %vm352_vm1, %v2074_v37  ;;  %v2054_v38 = vld [vmem:[%s2206_s23 + $0x5c] sm:$0xff]   ;;  %v2055_v39 = vld [vmem:[%s2206_s23 + $0x64] sm:$0xff]  }
  0x28   : > { %v2056_v40 = vld [vmem:[%s2206_s23 + $0x68] sm:$0xff]   ;;  %v2057_v41 = vld [vmem:[%s2206_s23 + $0x70] sm:$0xff]  }
  0x2b   : > { %457 = vrot.lane.b32.xlu0 %v2042_v14, %s2115_s29  ;;  %459 = vrot.lane.b32.xlu1 %v2043_v15, %s2115_s29  ;;  %v970_v14 = vlaneseq }
  0x2d   : > { %v2326_v15 = vshrl.u32 %v970_v14, 7 }
  0x2f   : > { %590 = vrot.lane.b32.xlu0 %v2044_v16, %s2116_s30  ;;  %592 = vrot.lane.b32.xlu1 %v2045_v17, %s2116_s30  ;;  %v973_v16 = vadd.s32 16, %v2326_v15  ;;  %v972_v24 = vadd.s32 8, %v2326_v15  ;;  %v977_v25 = vadd.s32 48, %v2326_v15  ;;  %v2452_v14 = vadd.s32 112, %v2326_v15 }
  0x31   : > { %v2347_v30 = vmul.u32.u64.low 2863311531, %v977_v25  ;;  %v2348_v31 = vmul.u32.u64.high 2863311531, %v977_v25, %v2347_v30 }
  0x33   : > { %461 = vrot.lane.b32.xlu0 %v2046_v18, %s2115_s29  ;;  %463 = vrot.lane.b32.xlu1 %v2047_v19, %s2115_s29  ;;  %v2329_v17 = vmul.u32.u64.low 2863311531, %v973_v16  ;;  %v2330_v18 = vmul.u32.u64.high 2863311531, %v973_v16, %v2329_v17  ;;  %v974_v19 = vadd.s32 24, %v2326_v15 }
  0x37   : > { %594 = vrot.lane.b32.xlu0 %v2048_v20, %s2116_s30  ;;  %596 = vrot.lane.b32.xlu1 %v2049_v22, %s2116_s30  ;;  %v2334_v20 = vmul.u32.u64.low 2863311531, %v2326_v15  ;;  %v2335_v21 = vmul.u32.u64.high 2863311531, %v2326_v15, %v2334_v20  ;;  %v2337_v22 = vmul.u32.u64.low 2863311531, %v974_v19  ;;  %v2338_v23 = vmul.u32.u64.high 2863311531, %v974_v19, %v2337_v22 }
  0x39   : > { %v1001_v29 = vshrl.u32 %v2335_v21, 4  ;;  %v2466_v21 = vadd.s32 96, %v2326_v15 }
  0x3b   : > { %465 = vrot.lane.b32.xlu0 %v2050_v26, %s2115_s29  ;;  %467 = vrot.lane.b32.xlu1 %v2051_v28, %s2115_s29  ;;  %v1023_v26 = vshrl.u32 %v2330_v18, 4  ;;  %v2343_v27 = vmul.u32.u64.low 2863311531, %v972_v24  ;;  %v2344_v28 = vmul.u32.u64.high 2863311531, %v972_v24, %v2343_v27  ;;  %v1002_v35 = vmul.u32 24, %v1001_v29 }
  0x3c   : > { %v2480_v29 = vadd.s32 104, %v2326_v15 }
  0x3d   : > { %v1024_v33 = vmul.u32 24, %v1023_v26 }
  0x3f   : > { %598 = vrot.lane.b32.xlu0 %v2052_v32, %s2116_s30  ;;  %600 = vrot.lane.b32.xlu1 %v2053_v34, %s2116_s30  ;;  %v975_v32 = vadd.s32 32, %v2326_v15  ;;  %v1034_v34 = vshrl.u32 %v2338_v23, 4 }
  0x41   : > { %v2352_v36 = vmul.u32.u64.low 2863311531, %v975_v32  ;;  %v2353_v37 = vmul.u32.u64.high 2863311531, %v975_v32, %v2352_v36 }
  0x43   : > { %469 = vrot.lane.b32.xlu0 %v2054_v38, %s2115_s29  ;;  %471 = vrot.lane.b32.xlu1 %v2055_v39, %s2115_s29  ;;  %v2356_v38 = vadd.s32 56, %v2326_v15  ;;  %v2358_v39 = vsub.s32 %v973_v16, %v1024_v33 }
  0x45   : > { %vm1261_vm5 = vcmp.ne.s32.totalorder %v2358_v39, 0  ;;  %vm1285_vm6 = vcmp.lt.s32.totalorder %v2358_v39, 0 }
  0x46   : > { %vm2393_vm9 = vmand %vm1285_vm6, %vm1261_vm5 }
  0x47   : > { %602 = vrot.lane.b32.xlu0 %v2056_v40, %s2116_s30  ;;  %604 = vrot.lane.b32.xlu1 %v2057_v41, %s2116_s30  ;;  %v1035_v40 = vmul.u32 24, %v1034_v34  ;;  %v1012_v41 = vshrl.u32 %v2344_v28, 4  ;;  %v2476_v27 = vmul.u32.u64.low 2863311531, %v2452_v14  ;;  %v2477_v28 = vmul.u32.u64.high 2863311531, %v2452_v14, %v2476_v27 }
  0x48   : > { %v3362_v27 = vmov 0 }
  0x8d   : > { %v450_v42 = vpop.permute.xlu0 %449  ;;  %v583_v43 = vpop.permute.xlu1 %582 }
  0x8e   : > { %486 = vst.msk [vmem:[#allocation2] sm:$0xff] %vm485_vm2, %v450_v42  ;;  %v2362_v42 = vadd.s32 40, %v2326_v15 }
  0x8f   : > { %619 = vst.msk [vmem:[#allocation2] sm:$0xff] %vm618_vm3, %v583_v43  ;;  %v2365_v43 = vadd.s32 80, %v2326_v15 }
  0x91   : > { %v452_v44 = vpop.permute.xlu0 %451  ;;  %v585_v45 = vpop.permute.xlu1 %584 }
  0x92   : > { %487 = vst.msk [vmem:[#allocation2 + $0x8] sm:$0xff] %vm485_vm2, %v452_v44  ;;  %v2368_v44 = vsub.s32 %v2326_v15, %v1002_v35  ;;  %v2497_v34 = vmul.u32.u64.low 2863311531, %v2466_v21  ;;  %v2498_v35 = vmul.u32.u64.high 2863311531, %v2466_v21, %v2497_v34 }
  0x93   : > { %620 = vst.msk [vmem:[#allocation2 + $0x8] sm:$0xff] %vm618_vm3, %v585_v45  ;;  %v1067_v45 = vshrl.u32 %v2348_v31, 4  ;;  %v2487_v31 = vadd.s32 144, %v2326_v15 }
  0x94   : > { %vm1259_vm7 = vcmp.ne.s32.totalorder %v2368_v44, 0  ;;  %vm1283_vm8 = vcmp.lt.s32.totalorder %v2368_v44, 0 }
  0x95   : > { %v454_v46 = vpop.permute.xlu0 %453  ;;  %v456_v47 = vpop.permute.xlu1 %455  ;;  %vm2405_vm12 = vmand %vm1283_vm8, %vm1259_vm7 }
  0x96   : > { %488 = vst.msk [vmem:[#allocation2 + $0x10] sm:$0xff] %vm485_vm2, %v454_v46  ;;  %v631_v48 = vld [vmem:[#allocation2] sm:$0xff]  ;;  %489 = vst.msk [vmem:[#allocation2 + $0x18] sm:$0xff] %vm485_vm2, %v456_v47  ;;  %v2372_v46 = vmul.u32.u64.low 2863311531, %v2356_v38  ;;  %v2373_v47 = vmul.u32.u64.high 2863311531, %v2356_v38, %v2372_v46 }
  0x97   : > { %1903 = vmatprep.mubr.msk.bf16.mxu0 %vm679_vm4, %v631_v48  ;;  %v2377_v48 = vsub.s32 %v974_v19, %v1035_v40 }
  0x99   : > { %v587_v49 = vpop.permute.xlu0 %586  ;;  %v589_v50 = vpop.permute.xlu1 %588  ;;  %vm1262_vm10 = vcmp.ne.s32.totalorder %v2377_v48, 0  ;;  %vm1286_vm11 = vcmp.lt.s32.totalorder %v2377_v48, 0 }
  0x9a   : > { %621 = vst.msk [vmem:[#allocation2 + $0x10] sm:$0xff] %vm618_vm3, %v587_v49  ;;  %v632_v51 = vld [vmem:[#allocation2 + $0x8] sm:$0xff]  ;;  %622 = vst.msk [vmem:[#allocation2 + $0x18] sm:$0xff] %vm618_vm3, %v589_v50  ;;  %v1013_v49 = vmul.u32 24, %v1012_v41 }
  0x9b   : > { %1904 = vmatmul.mubr.msk.bf16.vlgmr.msra.gmra.mrb[0].mxu0 %vm679_vm4, %v632_v51  ;;  %v2380_v50 = vmul.u32.u64.low 2863311531, %v2362_v42  ;;  %v2381_v51 = vmul.u32.u64.high 2863311531, %v2362_v42, %v2380_v50  ;;  %vm2421_vm13 = vmand %vm1286_vm11, %vm1262_vm10 }
  0x9d   : > { %v458_v52 = vpop.permute.xlu0 %457  ;;  %v460_v53 = vpop.permute.xlu1 %459 }
  0x9e   : > { %490 = vst.msk [vmem:[#allocation2 + $0x20] sm:$0xff] %vm485_vm2, %v458_v52  ;;  %491 = vst.msk [vmem:[#allocation2 + $0x28] sm:$0xff] %vm485_vm2, %v460_v53  ;;  %v2384_v52 = vmul.u32.u64.low 2863311531, %v2365_v43  ;;  %v2385_v53 = vmul.u32.u64.high 2863311531, %v2365_v43, %v2384_v52 }
  0xa1   : > { %v591_v54 = vpop.permute.xlu0 %590  ;;  %v633_v55 = vld [vmem:[#allocation2 + $0x10] sm:$0xff]  ;;  %v593_v56 = vpop.permute.xlu1 %592  ;;  %v634_v57 = vld [vmem:[#allocation2 + $0x18] sm:$0xff] }
  0xa2   : > { %623 = vst.msk [vmem:[#allocation2 + $0x20] sm:$0xff] %vm618_vm3, %v591_v54  ;;  %1907 = vmatprep.mubr.msk.bf16.mxu0 %vm679_vm4, %v633_v55  ;;  %624 = vst.msk [vmem:[#allocation2 + $0x28] sm:$0xff] %vm618_vm3, %v593_v56  ;;  %v2390_v54 = vadd.s32 64, %v2326_v15  ;;  %v1068_v55 = vmul.u32 24, %v1067_v45  ;;  %v1045_v56 = vshrl.u32 %v2353_v37, 4 }
  0xa3   : > { %1908 = vmatmul.mubr.msk.bf16.gmra.mrb[4].mxu0 %vm679_vm4, %v634_v57  ;;  %v2512_v45 = vmul.u32.u64.low 2863311531, %v2480_v29  ;;  %v2513_v46 = vmul.u32.u64.high 2863311531, %v2480_v29, %v2512_v45 }
  0xa5   : > { %v462_v58 = vpop.permute.xlu0 %461  ;;  %v464_v59 = vpop.permute.xlu1 %463 }
  0xa6   : > { %492 = vst.msk [vmem:[#allocation2 + $0x30] sm:$0xff] %vm485_vm2, %v462_v58  ;;  %493 = vst.msk [vmem:[#allocation2 + $0x38] sm:$0xff] %vm485_vm2, %v464_v59  ;;  %v2398_v58 = vadd.s32 24, %v2358_v39  ;;  %v2401_v59 = vadd.s32 24, %v2368_v44 }
  0xa9   : > { %v595_v60 = vpop.permute.xlu0 %594  ;;  %v635_v61 = vld [vmem:[#allocation2 + $0x20] sm:$0xff]  ;;  %v597_v62 = vpop.permute.xlu1 %596  ;;  %v636_v63 = vld [vmem:[#allocation2 + $0x28] sm:$0xff] }
  0xaa   : > { %625 = vst.msk [vmem:[#allocation2 + $0x30] sm:$0xff] %vm618_vm3, %v595_v60  ;;  %1911 = vmatprep.mubr.msk.bf16.mxu0 %vm679_vm4, %v635_v61  ;;  %626 = vst.msk [vmem:[#allocation2 + $0x38] sm:$0xff] %vm618_vm3, %v597_v62  ;;  %v2409_v61 = vsub.s32 %v972_v24, %v1013_v49  ;;  %v2412_v62 = vadd.s32 24, %v2377_v48 }
  0xab   : > { %1912 = vmatmul.mubr.msk.bf16.gmra.mrb[8].mxu0 %vm679_vm4, %v636_v63 }
  0xac   : > { %vm1260_vm14 = vcmp.ne.s32.totalorder %v2409_v61, 0  ;;  %vm1284_vm15 = vcmp.lt.s32.totalorder %v2409_v61, 0  ;;  %v2455_v16 = vadd.s32 24, %v2409_v61 }
  0xad   : > { %v466_v0 = vpop.permute.xlu0 %465  ;;  %v468_v1 = vpop.permute.xlu1 %467 }
  0xae   : > { %494 = vst.msk [vmem:[#allocation2 + $0x40] sm:$0xff] %vm485_vm2, %v466_v0  ;;  %495 = vst.msk [vmem:[#allocation2 + $0x48] sm:$0xff] %vm485_vm2, %v468_v1  ;;  %v2415_v63 = vmul.u32.u64.low 2863311531, %v2390_v54  ;;  %v2416_v0 = vmul.u32.u64.high 2863311531, %v2390_v54, %v2415_v63  ;;  %v2419_v1 = vadd.s32 88, %v2326_v15 }
  0xaf   : > { %v3406_v63 = vmov 0 }
  0xb0   : > { %v1089_v26 = vshrl.u32 %v2416_v0, 4  ;;  %v1155_v0 = vshrl.u32 %v2477_v28, 4 }
  0xb1   : > { %v599_v2 = vpop.permute.xlu0 %598  ;;  %v637_v3 = vld [vmem:[#allocation2 + $0x30] sm:$0xff]  ;;  %v601_v4 = vpop.permute.xlu1 %600  ;;  %v638_v5 = vld [vmem:[#allocation2 + $0x38] sm:$0xff] }
  0xb2   : > { %627 = vst.msk [vmem:[#allocation2 + $0x40] sm:$0xff] %vm618_vm3, %v599_v2  ;;  %1915 = vmatprep.mubr.msk.bf16.mxu1 %vm679_vm4, %v637_v3  ;;  %628 = vst.msk [vmem:[#allocation2 + $0x48] sm:$0xff] %vm618_vm3, %v601_v4  ;;  %v2425_v3 = vsub.s32 %v977_v25, %v1068_v55  ;;  %v1046_v4 = vmul.u32 24, %v1045_v56  ;;  %v2472_v25 = vadd.s32 120, %v2326_v15  ;;  %v1090_v52 = vmul.u32 24, %v1089_v26 }
  0xb3   : > { %1916 = vmatmul.mubr.msk.bf16.vlgmr.msra.gmra.mrb[0].mxu1 %vm679_vm4, %v638_v5  ;;  %v1078_v5 = vshrl.u32 %v2373_v47, 4  ;;  %v2516_v47 = vadd.s32 152, %v2326_v15  ;;  %v2549_v56 = vadd.s32 136, %v2326_v15  ;;  %v1133_v26 = vshrl.u32 %v2498_v35, 4 }
  0xb4   : > { %vm1265_vm0 = vcmp.ne.s32.totalorder %v2425_v3, 0  ;;  %v2458_v17 = vsub.s32 %v975_v32, %v1046_v4  ;;  %vm1289_vm1 = vcmp.lt.s32.totalorder %v2425_v3, 0  ;;  %v2469_v22 = vadd.s32 24, %v2425_v3 }
  0xb5   : > { %v470_v6 = vpop.permute.xlu0 %469  ;;  %v472_v7 = vpop.permute.xlu1 %471  ;;  %v1079_v18 = vmul.u32 24, %v1078_v5  ;;  %v2490_v32 = vadd.s32 128, %v2326_v15  ;;  %vm2541_vm7 = vmand %vm1289_vm1, %vm1265_vm0  ;;  %v2562_v4 = vmul.u32.u64.low 2863311531, %v2516_v47  ;;  %v2563_v5 = vmul.u32.u64.high 2863311531, %v2516_v47, %v2562_v4 }
  0xb6   : > { %496 = vst.msk [vmem:[#allocation2 + $0x50] sm:$0xff] %vm485_vm2, %v470_v6  ;;  %497 = vst.msk [vmem:[#allocation2 + $0x58] sm:$0xff] %vm485_vm2, %v472_v7  ;;  %v1357_v6 = vsel %vm2393_vm9, %v2398_v58, %v2358_v39  ;;  %v1355_v7 = vsel %vm2405_vm12, %v2401_v59, %v2368_v44  ;;  %vm1263_vm2 = vcmp.ne.s32.totalorder %v2458_v17, 0  ;;  %v2494_v33 = vadd.s32 24, %v2458_v17 }
  0xb7   : > { %v2484_v30 = vsub.s32 %v2356_v38, %v1079_v18  ;;  %v2507_v38 = vmul.u32.u64.low 2863311531, %v2472_v25  ;;  %v2508_v40 = vmul.u32.u64.high 2863311531, %v2472_v25, %v2507_v38  ;;  %v1361_v35 = vsel %vm2541_vm7, %v2469_v22, %v2425_v3 }
  0xb8   : > { %v2608_v34 = vmul.u32.u64.low 2863311531, %v2549_v56  ;;  %v2609_v38 = vmul.u32.u64.high 2863311531, %v2549_v56, %v2608_v34  ;;  %v1156_v45 = vmul.u32 24, %v1155_v0  ;;  %v2730_v44 = vadd.s32 184, %v2326_v15 }
  0xb9   : > { %v603_v8 = vpop.permute.xlu0 %602  ;;  %v639_v9 = vld [vmem:[#allocation2 + $0x40] sm:$0xff]  ;;  %v605_v10 = vpop.permute.xlu1 %604  ;;  %v640_v11 = vld [vmem:[#allocation2 + $0x48] sm:$0xff]  ;;  %vm1266_vm5 = vcmp.ne.s32.totalorder %v2484_v30, 0  ;;  %vm1290_vm6 = vcmp.lt.s32.totalorder %v2484_v30, 0  ;;  %v1166_v28 = vshrl.u32 %v2508_v40, 4  ;;  %v1144_v40 = vshrl.u32 %v2513_v46, 4 }
  0xba   : > { %629 = vst.msk [vmem:[#allocation2 + $0x50] sm:$0xff] %vm618_vm3, %v603_v8  ;;  %1919 = vmatprep.mubr.msk.bf16.mxu1 %vm679_vm4, %v639_v9  ;;  %630 = vst.msk [vmem:[#allocation2 + $0x58] sm:$0xff] %vm618_vm3, %v605_v10  ;;  %v2437_v8 = vadd.s32 72, %v2326_v15  ;;  %v1056_v9 = vshrl.u32 %v2381_v51, 4  ;;  %v1111_v10 = vshrl.u32 %v2385_v53, 4  ;;  %vm1287_vm3 = vcmp.lt.s32.totalorder %v2458_v17, 0 }
  0xbb   : > { %1920 = vmatmul.mubr.msk.bf16.gmra.mrb[4].mxu1 %vm679_vm4, %v640_v11  ;;  %v1358_v11 = vsel %vm2421_vm13, %v2412_v62, %v2377_v48  ;;  %vm2573_vm0 = vmand %vm1290_vm6, %vm1266_vm5  ;;  %v1134_v34 = vmul.u32 24, %v1133_v26  ;;  %v1145_v4 = vmul.u32 24, %v1144_v40  ;;  %v3390_v48 = vmov 0 }
  0xbc   : > { %v2462_v19 = vmul.u32.u64.low 2863311531, %v2437_v8  ;;  %v2463_v20 = vmul.u32.u64.high 2863311531, %v2437_v8, %v2462_v19  ;;  %v1057_v23 = vmul.u32 24, %v1056_v9  ;;  %v3394_v51 = vmov 0 }
  0xbd   : > { %v1112_v24 = vmul.u32 24, %v1111_v10  ;;  %v3358_v10 = vmov 0  ;;  %v3360_v19 = vmov 0  ;;  %v2675_v40 = vsub.s32 %v2480_v29, %v1145_v4 }
  0xbe   : > { %v2501_v36 = vsub.s32 %v2362_v42, %v1057_v23  ;;  %v2519_v49 = vmul.u32.u64.low 2863311531, %v2487_v31  ;;  %v2520_v42 = vmul.u32.u64.high 2863311531, %v2487_v31, %v2519_v49  ;;  %v1100_v53 = vshrl.u32 %v2463_v20, 4 }
  0xbf   : > { %v2504_v37 = vsub.s32 %v2365_v43, %v1112_v24  ;;  %v2523_v43 = vmul.u32.u64.low 2863311531, %v2490_v32  ;;  %v2524_v50 = vmul.u32.u64.high 2863311531, %v2490_v32, %v2523_v43  ;;  %v3359_v10 = vsel %vm2573_vm0, 4294967295, %v3358_v10 }
  0xc0   : > { %vm1264_vm8 = vcmp.ne.s32.totalorder %v2501_v36, 0  ;;  %vm1288_vm10 = vcmp.lt.s32.totalorder %v2501_v36, 0  ;;  %v2595_v23 = vsub.s32 %v2390_v54, %v1090_v52  ;;  %v1101_v24 = vmul.u32 24, %v1100_v53 }
  0xc1   : > { %v641_v12 = vld [vmem:[#allocation2 + $0x50] sm:$0xff]  ;;  %v642_v13 = vld [vmem:[#allocation2 + $0x58] sm:$0xff]  ;;  %vm1269_vm11 = vcmp.ne.s32.totalorder %v2504_v37, 0  ;;  %vm2587_vm1 = vmand %vm1288_vm10, %vm1264_vm8  ;;  %v2592_v20 = vadd.s32 24, %v2504_v37  ;;  %v2612_v54 = vadd.s32 176, %v2326_v15  ;;  %v1199_v52 = vshrl.u32 %v2520_v42, 4 }
  0xc2   : > { %1923 = vmatprep.mubr.msk.bf16.mxu1 %vm679_vm4, %v641_v12  ;;  %v3361_v19 = vsel %vm2587_vm1, 4294967295, %v3360_v19  ;;  %v1177_v53 = vshrl.u32 %v2524_v50, 4  ;;  %v2641_v0 = vsub.s32 %v2437_v8, %v1101_v24  ;;  %vm1291_vm5 = vcmp.lt.s32.totalorder %v2595_v23, 0 }
  0xc3   : > { %1924 = vmatmul.mubr.msk.bf16.gmra.mrb[8].mxu1 %vm679_vm4, %v642_v13  ;;  %v2448_v12 = vmul.u32.u64.low 2863311531, %v2419_v1  ;;  %v2449_v13 = vmul.u32.u64.high 2863311531, %v2419_v1, %v2448_v12  ;;  %vm2530_vm4 = vmand %vm1284_vm15, %vm1260_vm14  ;;  %vm1293_vm15 = vcmp.lt.s32.totalorder %v2504_v37, 0  ;;  %v1210_v49 = vshrl.u32 %v2563_v5, 4 }
  0xc4   : > { %vm2555_vm14 = vmand %vm1287_vm3, %vm1263_vm2  ;;  %v1356_v9 = vsel %vm2530_vm4, %v2455_v16, %v2409_v61  ;;  %v2578_v12 = vadd.s32 24, %v2484_v30  ;;  %vm1267_vm3 = vcmp.ne.s32.totalorder %v2595_v23, 0  ;;  %v2654_v46 = vadd.s32 24, %v2595_v23 }
  0xc5   : > { %v1122_v41 = vshrl.u32 %v2449_v13, 4  ;;  %v2581_v13 = vadd.s32 24, %v2501_v36  ;;  %vm2602_vm2 = vmand %vm1293_vm15, %vm1269_vm11  ;;  %v2645_v42 = vmul.u32.u64.low 2863311531, %v2612_v54  ;;  %v2646_v50 = vmul.u32.u64.high 2863311531, %v2612_v54, %v2645_v42 }
  0xc6   : > { %v3363_v27 = vsel %vm2602_vm2, 4294967295, %v3362_v27  ;;  %v1200_v8 = vmul.u32 24, %v1199_v52  ;;  %v1178_v24 = vmul.u32 24, %v1177_v53  ;;  %v2667_v5 = vadd.s32 24, %v2641_v0  ;;  %vm2684_vm11 = vmand %vm1291_vm5, %vm1267_vm3 }
  0xc7   : > { %v1123_v18 = vmul.u32 24, %v1122_v41  ;;  %v1359_v41 = vsel %vm2555_vm14, %v2494_v33, %v2458_v17  ;;  %v1211_v52 = vmul.u32 24, %v1210_v49  ;;  %v2678_v53 = vadd.s32 160, %v2326_v15 }
  0xc8   : > { %v2693_v29 = vsub.s32 %v2487_v31, %v1200_v8  ;;  %vm2703_vm3 = vcmp.lt.s32.totalorder %v1357_v6, 16  ;;  %v3366_v49 = vmov 0  ;;  %vm2712_vm5 = vcmp.lt.s32.totalorder %v1355_v7, 16 }
  0xc9   : > { %v2628_v43 = vsub.s32 %v2419_v1, %v1123_v18  ;;  %v1167_v1 = vmul.u32 24, %v1166_v28  ;;  %v2650_v18 = vsub.s32 %v2452_v14, %v1156_v45  ;;  %v2663_v14 = vsub.s32 %v2466_v21, %v1134_v34 }
  0xca   : > { %v1188_v45 = vshrl.u32 %v2609_v38, 4  ;;  %v2696_v38 = vsub.s32 %v2490_v32, %v1178_v24  ;;  %v3367_v49 = vsel %vm2703_vm3, 4294967295, %v3366_v49  ;;  %v3368_v31 = vmov 0 }
  0xcb   : > { %vm1270_vm6 = vcmp.ne.s32.totalorder %v2628_v43, 0  ;;  %vm1294_vm8 = vcmp.lt.s32.totalorder %v2628_v43, 0  ;;  %v2659_v26 = vadd.s32 24, %v2628_v43  ;;  %v2670_v28 = vsub.s32 %v2472_v25, %v1167_v1 }
  0xcc   : > { %v2690_v25 = vadd.s32 24, %v2650_v18  ;;  %v3369_v31 = vsel %vm2712_vm5, 4294967295, %v3368_v31  ;;  %vm2720_vm10 = vmand %vm1294_vm8, %vm1270_vm6  ;;  %v2727_v39 = vadd.s32 24, %v2663_v14  ;;  %vm3372_vm2 = vcmp.ne.s32.totalorder %v2641_v0, 0 }
  0xcd   : > { %vm3373_vm1 = vcmp.lt.s32.totalorder %v2641_v0, 0  ;;  %v1189_v59 = vmul.u32 24, %v1188_v45  ;;  %v1243_v60 = vshrl.u32 %v2646_v50, 4  ;;  %vm3376_vm15 = vcmp.ne.s32.totalorder %v2650_v18, 0 }
  0xce   : > { %vm2736_vm0 = vmand %vm3373_vm1, %vm3372_vm2  ;;  %vm3377_vm9 = vcmp.lt.s32.totalorder %v2650_v18, 0  ;;  %v3378_v6 = vmov 0  ;;  %v2754_v7 = vsub.s32 %v2516_v47, %v1211_v52  ;;  %v2757_v32 = vadd.s32 168, %v2326_v15 }
  0xcf   : > { %vm2747_vm12 = vmand %vm3377_vm9, %vm3376_vm15  ;;  %vm2764_vm8 = vcmp.lt.s32.totalorder %v1358_v11, 16  ;;  %v3380_v4 = vmov 0  ;;  %vm2773_vm15 = vcmp.lt.s32.totalorder %v1356_v9, 16  ;;  %v3382_v47 = vmov 0 }
  0xd0   : > { %v3379_v6 = vsel %vm2747_vm12, 4294967295, %v3378_v6  ;;  %v3381_v4 = vsel %vm2764_vm8, 4294967295, %v3380_v4  ;;  %v3383_v47 = vsel %vm2773_vm15, 4294967295, %v3382_v47  ;;  %vm3384_vm9 = vcmp.ne.s32.totalorder %v2663_v14, 0 }
  0xd1   : > { %vm3385_vm2 = vcmp.lt.s32.totalorder %v2663_v14, 0  ;;  %v3386_v15 = vmov 0  ;;  %vm1277_vm13 = vcmp.ne.s32.totalorder %v2693_v29, 0  ;;  %vm1301_vm6 = vcmp.lt.s32.totalorder %v2693_v29, 0 }
  0xd2   : > { %vm2781_vm1 = vmand %vm3385_vm2, %vm3384_vm9  ;;  %vm1275_vm8 = vcmp.ne.s32.totalorder %v2696_v38, 0  ;;  %vm1299_vm4 = vcmp.lt.s32.totalorder %v2696_v38, 0  ;;  %vm3388_vm3 = vcmp.ne.s32.totalorder %v2670_v28, 0  ;;  %vm3389_vm15 = vcmp.lt.s32.totalorder %v2670_v28, 0 }
  0xd3   : > { %v3387_v15 = vsel %vm2781_vm1, 4294967295, %v3386_v15  ;;  %vm2793_vm14 = vmand %vm3389_vm15, %vm3388_vm3  ;;  %v2798_v61 = vmul.u32.u64.low 2863311531, %v2678_v53  ;;  %v2799_v62 = vmul.u32.u64.high 2863311531, %v2678_v53, %v2798_v61  ;;  %v2806_v16 = vadd.s32 24, %v2670_v28 }
  0xd4   : > { %v3391_v48 = vsel %vm2793_vm14, 4294967295, %v3390_v48  ;;  %v2802_v2 = vmul.u32.u64.low 2863311531, %v2730_v44  ;;  %v2803_v11 = vmul.u32.u64.high 2863311531, %v2730_v44, %v2802_v2  ;;  %vm3392_vm2 = vcmp.ne.s32.totalorder %v2675_v40, 0  ;;  %vm2823_vm3 = vmand %vm1301_vm6, %vm1277_vm13 }
  0xd5   : > { %vm3393_vm9 = vcmp.lt.s32.totalorder %v2675_v40, 0  ;;  %v2817_v9 = vadd.s32 24, %v2675_v40  ;;  %v2820_v34 = vsub.s32 %v2549_v56, %v1189_v59  ;;  %v1244_v1 = vmul.u32 24, %v1243_v60  ;;  %vm2855_vm6 = vmand %vm1299_vm4, %vm1275_vm8 }
  0xd6   : > { %vm2812_vm5 = vmand %vm3393_vm9, %vm3392_vm2  ;;  %v3396_v42 = vmov 0  ;;  %v2828_v50 = vadd.s32 24, %v2693_v29  ;;  %v2831_v8 = vadd.s32 24, %v2696_v38  ;;  %vm1278_vm15 = vcmp.ne.s32.totalorder %v2754_v7, 0 }
  0xd7   : > { %v3395_v51 = vsel %vm2812_vm5, 4294967295, %v3394_v51  ;;  %v3397_v42 = vsel %vm2823_vm3, 4294967295, %v3396_v42  ;;  %v3398_v59 = vmov 0  ;;  %vm2864_vm13 = vcmp.lt.s32.totalorder %v1361_v35, 16 }
  0xd8   : > { %v3399_v59 = vsel %vm2855_vm6, 4294967295, %v3398_v59  ;;  %vm2873_vm2 = vcmp.lt.s32.totalorder %v1359_v41, 16  ;;  %v2882_v3 = vadd.s32 24, %v2754_v7  ;;  %vm3405_vm7 = vcmp.lt.s32.totalorder %v2754_v7, 0 }
  0xd9   : > { %v2885_v22 = vmul.u32.u64.low 2863311531, %v2757_v32  ;;  %v2886_v35 = vmul.u32.u64.high 2863311531, %v2757_v32, %v2885_v22  ;;  %vm2901_vm8 = vmand %vm3405_vm7, %vm1278_vm15  ;;  %v2908_v41 = vsub.s32 %v2612_v54, %v1244_v1  ;;  %vm3408_vm15 = vnez %v3367_v49 }
  0xda   : > { %v3407_v63 = vsel %vm2901_vm8, 4294967295, %v3406_v63  ;;  %vm3409_vm7 = vnez %v3369_v31  ;;  %v2927_v33 = vadd.s32 24, %v2820_v34  ;;  %vm3410_vm9 = vcmask 60416  }
  0xdb   : > { %vm3411_vm4 = vnez %v3359_v10  ;;  %vm1281_vm5 = vcmp.ne.s32.totalorder %v2908_v41, 0  ;;  %vm1305_vm8 = vcmp.lt.s32.totalorder %v2908_v41, 0  ;;  %vm3428_vm1 = vcmask 64512  }
  0xdc   : > { %v3412_v52 = vsel %vm3411_vm4, %v2578_v12, %v2484_v30  ;;  %vm3419_vm4 = vcmp.ne.s32.totalorder %v2820_v34, 0  ;;  %v3421_v30 = vmov 0  ;;  %v1254_v12 = vshrl.u32 %v2803_v11, 4  ;;  %vm3430_vm12 = vmmov %vm3428_vm1 }
  0xdd   : > { %vm2936_vm6 = vcmp.lt.s32.totalorder %v3412_v52, 16 }
 0x16e   : > { %v1905_v17 = vpop.f32.mrb[0].mxu0 }
 0x16f   : > { %v1854_v2 = vpack.c.bf16 %v1905_v17, %v1905_v17  ;;  %v754_v22 = vpop.f32.mrb[1].mxu0  ;;  %v1453_v54 = vsel %vm3408_vm15, %v1905_v17, 0.0  ;;  %vm3415_vm15 = vnez %v3361_v19 }
 0x170   : > { %v1852_v1 = vpack.c.bf16 %v754_v22, %v754_v22  ;;  %v1451_v45 = vsel %vm3409_vm7, %v754_v22, 0.0  ;;  %v1906_v24 = vpop.f32.mrb[2].mxu0  ;;  %v3416_v31 = vsel %vm3415_vm15, %v2581_v13, %v2501_v36  ;;  %v1221_v36 = vshrl.u32 %v2799_v62, 4 }
 0x171   : > { %948 = vst.msk [vmem:[%s2891_s10 + $0x8] sm:$0xf] %vm3410_vm9, %v1854_v2  ;;  %v1855_v55 = vpack.c.bf16 %v1906_v24, %v1906_v24  ;;  %v757_v56 = vpop.f32.mrb[3].mxu0  ;;  %vm2945_vm7 = vcmp.lt.s32.totalorder %v3416_v31, 16  ;;  %vm3420_vm9 = vcmp.lt.s32.totalorder %v2820_v34, 0  ;;  %vm3424_vm15 = vcmask 60416  }
 0x172   : > { %vm2957_vm3 = vmand %vm3420_vm9, %vm3419_vm4  ;;  %946 = vst.msk [vmem:[%s2891_s10] sm:$0xf] %vm3424_vm15, %v1852_v1  ;;  %v1523_v13 = vmul.f32 %v1451_v45, %v1451_v45  ;;  %v1853_v19 = vpack.c.bf16 %v757_v56, %v757_v56  ;;  %v1525_v52 = vmul.f32 %v1453_v54, %v1453_v54  ;;  %vm3426_vm4 = vnez %v3381_v4 }
 0x173   : > { %v3422_v30 = vsel %vm2957_vm3, 4294967295, %v3421_v30  ;;  %vm3425_vm14 = vmmov %vm3424_vm15  ;;  %v1454_v2 = vsel %vm3426_vm4, %v1906_v24, 0.0  ;;  %vm3427_vm9 = vnez %v3383_v47  ;;  %v2974_v62 = vadd.s32 24, %v2908_v41 }
 0x174   : > { %3423 = vst [vmem:[#allocation3_spill] sm:$0xff] %v3422_v30  ;;  %949 = vst.msk [vmem:[%s2891_s10 + $0xc] sm:$0xf] %vm3425_vm14, %v1855_v55  ;;  %v1452_v22 = vsel %vm3427_vm9, %v757_v56, 0.0  ;;  %v1476_v11 = vsel %vm3428_vm1, %v1451_v45, 0.0  ;;  %v1372_v55 = vsel %vm2957_vm3, %v2927_v33, %v2820_v34  ;;  %v1222_v24 = vmul.u32 24, %v1221_v36 }
 0x175   : > { %vm3429_vm15 = vmmov %vm3425_vm14  ;;  %v1477_v1 = vsel %vm3430_vm12, %v1452_v22, 0.0  ;;  %v1524_v31 = vmul.f32 %v1452_v22, %v1452_v22  ;;  %vm3431_vm14 = vnez %v3363_v27  ;;  %v1255_v45 = vmul.u32 24, %v1254_v12 }
 0x176   : > { %947 = vst.msk [vmem:[%s2891_s10 + $0x4] sm:$0xf] %vm3429_vm15, %v1853_v19  ;;  %v1478_v4 = vadd.f32 %v1477_v1, %v1476_v11  ;;  %v3432_v47 = vsel %vm3431_vm14, %v2592_v20, %v2504_v37  ;;  %v1232_v19 = vshrl.u32 %v2886_v35, 4  ;;  %vm3435_vm12 = vmmov %vm3428_vm1  ;;  %v1547_v10 = vsel %vm3428_vm1, %v1523_v13, 0.0  ;;  %v1909_v27 = vpop.f32.mrb[4].mxu0 }
 0x177   : > { %vm2989_vm4 = vcmp.lt.s32.totalorder %v3432_v47, 16  ;;  %v1479_v22 = vsel %vm3435_vm12, %v1453_v54, 0.0  ;;  %v1526_v30 = vmul.f32 %v1454_v2, %v1454_v2  ;;  %vm3436_vm9 = vmmov %vm3428_vm1  ;;  %v3437_v37 = vsel %vm2684_vm11, %v2654_v46, %v2595_v23  ;;  %v770_v13 = vpop.f32.mrb[5].mxu0 }
 0x178   : > { %v1548_v11 = vsel %vm3436_vm9, %v1524_v31, 0.0  ;;  %vm3002_vm15 = vcmp.lt.s32.totalorder %v3437_v37, 16  ;;  %vm3440_vm14 = vmmov %vm3428_vm1  ;;  %v1480_v36 = vadd.f32 %v1479_v22, %v1478_v4  ;;  %v1858_v12 = vpack.c.bf16 %v1909_v27, %v1909_v27  ;;  %v1910_v46 = vpop.f32.mrb[6].mxu0 }
 0x179   : > { %v1550_v35 = vsel %vm3440_vm14, %v1525_v52, 0.0  ;;  %v1549_v54 = vadd.f32 %v1548_v11, %v1547_v10  ;;  %vm3441_vm12 = vmmov %vm3428_vm1  ;;  %v1457_v31 = vsel %vm2864_vm13, %v1909_v27, 0.0  ;;  %v1856_v21 = vpack.c.bf16 %v770_v13, %v770_v13  ;;  %v773_v61 = vpop.f32.mrb[7].mxu0 }
 0x17a   : > { %v1481_v1 = vsel %vm3441_vm12, %v1454_v2, 0.0  ;;  %v1455_v23 = vsel %vm2873_vm2, %v770_v13, 0.0  ;;  %vm3016_vm11 = vmand %vm1305_vm8, %vm1281_vm5  ;;  %vm3444_vm1 = vcmask 60416   ;;  %v3445_v47 = vsel %vm2720_vm10, %v2659_v26, %v2628_v43 }
 0x17b   : > { %v1551_v10 = vadd.f32 %v1550_v35, %v1549_v54  ;;  %952 = vst.msk [vmem:[%s2891_s10 + $0x18] sm:$0xf] %vm3444_vm1, %v1858_v12  ;;  %v1482_v2 = vadd.f32 %v1481_v1, %v1480_v36  ;;  %v1483_v60 = vsel %vm3436_vm9, %v1455_v23, 0.0  ;;  %v1527_v4 = vmul.f32 %v1455_v23, %v1455_v23  ;;  %vm3451_vm13 = vmmov %vm3436_vm9 }
 0x17c   : > { %vm3028_vm2 = vcmp.lt.s32.totalorder %v3445_v47, 16  ;;  %v3448_v11 = vsel %vm2736_vm0, %v2667_v5, %v2641_v0  ;;  %v1552_v37 = vsel %vm3451_vm13, %v1526_v30, 0.0  ;;  %vm3452_vm8 = vmmov %vm3444_vm1  ;;  %v1859_v57 = vpack.c.bf16 %v1910_v46, %v1910_v46 }
 0x17d   : > { %vm3037_vm5 = vcmp.lt.s32.totalorder %v3448_v11, 16  ;;  %950 = vst.msk [vmem:[%s2891_s10 + $0x10] sm:$0xf] %vm3452_vm8, %v1856_v21  ;;  %v1857_v35 = vpack.c.bf16 %v773_v61, %v773_v61  ;;  %v3045_v43 = vsub.s32 %v2678_v53, %v1222_v24  ;;  %v1484_v26 = vadd.f32 %v1483_v60, %v1482_v2  ;;  %vm3453_vm10 = vmmov %vm3436_vm9 }
 0x17e   : > { %v1553_v36 = vadd.f32 %v1552_v37, %v1551_v10  ;;  %v1554_v58 = vsel %vm3453_vm10, %v1527_v4, 0.0  ;;  %v1377_v0 = vsel %vm3016_vm11, %v2974_v62, %v2908_v41  ;;  %v1529_v5 = vmul.f32 %v1457_v31, %v1457_v31  ;;  %vm3454_vm0 = vmmov %vm3444_vm1  ;;  %v1913_v17 = vpop.f32.mrb[8].mxu0 }
 0x17f   : > { %953 = vst.msk [vmem:[%s2891_s10 + $0x1c] sm:$0xf] %vm3454_vm0, %v1859_v57  ;;  %v1458_v30 = vsel %vm2936_vm6, %v1910_v46, 0.0  ;;  %vm3455_vm14 = vmmov %vm3454_vm0  ;;  %v1456_v53 = vsel %vm2945_vm7, %v773_v61, 0.0  ;;  %v1233_v24 = vmul.u32 24, %v1232_v19  ;;  %vm3457_vm1 = vnez %v3379_v6  ;;  %v786_v46 = vpop.f32.mrb[9].mxu0 }
 0x180   : > { %951 = vst.msk [vmem:[%s2891_s10 + $0x14] sm:$0xf] %vm3455_vm14, %v1857_v35  ;;  %v1555_v54 = vadd.f32 %v1554_v58, %v1553_v36  ;;  %vm3456_vm12 = vmmov %vm3436_vm9  ;;  %v1528_v13 = vmul.f32 %v1456_v53, %v1456_v53  ;;  %v3458_v1 = vsel %vm3457_vm1, %v2690_v25, %v2650_v18  ;;  %v3071_v49 = vsub.s32 %v2730_v44, %v1255_v45  ;;  %v1914_v60 = vpop.f32.mrb[10].mxu0 }
 0x181   : > { %v1485_v12 = vsel %vm3456_vm12, %v1456_v53, 0.0  ;;  %vm3066_vm9 = vcmp.lt.s32.totalorder %v3458_v1, 16  ;;  %vm3461_vm6 = vnez %v3387_v15  ;;  %vm1279_vm13 = vcmp.ne.s32.totalorder %v3045_v43, 0  ;;  %vm3465_vm0 = vmmov %vm3453_vm10  ;;  %v789_v11 = vpop.f32.mrb[11].mxu0 }
 0x182   : > { %v1486_v23 = vadd.f32 %v1485_v12, %v1484_v26  ;;  %v3462_v19 = vsel %vm3461_vm6, %v2727_v39, %v2663_v14  ;;  %vm1303_vm8 = vcmp.lt.s32.totalorder %v3045_v43, 0  ;;  %v3085_v18 = vadd.s32 24, %v3045_v43  ;;  %vm3466_vm14 = vmmov %vm3465_vm0 }
 0x183   : > { %vm3078_vm7 = vcmp.lt.s32.totalorder %v3462_v19, 16  ;;  %v1487_v25 = vsel %vm3453_vm10, %v1457_v31, 0.0  ;;  %v1530_v44 = vmul.f32 %v1458_v30, %v1458_v30  ;;  %v1556_v15 = vsel %vm3465_vm0, %v1528_v13, 0.0  ;;  %vm3467_vm12 = vmmov %vm3465_vm0 }
 0x184   : > { %v1862_v45 = vpack.c.bf16 %v1913_v17, %v1913_v17  ;;  %v1558_v14 = vsel %vm3466_vm14, %v1529_v5, 0.0  ;;  %v1488_v39 = vadd.f32 %v1487_v25, %v1486_v23  ;;  %v1557_v10 = vadd.f32 %v1556_v15, %v1555_v54  ;;  %vm3478_vm14 = vmmov %vm3467_vm12 }
 0x185   : > { %v1461_v2 = vsel %vm2989_vm4, %v1913_v17, 0.0  ;;  %v1489_v4 = vsel %vm3467_vm12, %v1458_v30, 0.0  ;;  %vm3468_vm1 = vcmask 60416   ;;  %v1860_v31 = vpack.c.bf16 %v786_v46, %v786_v46 }
 0x186   : > { %956 = vst.msk [vmem:[%s2891_s10 + $0x28] sm:$0xf] %vm3468_vm1, %v1862_v45  ;;  %v1459_v61 = vsel %vm3002_vm15, %v786_v46, 0.0  ;;  %v1863_v47 = vpack.c.bf16 %v1914_v60, %v1914_v60  ;;  %vm3469_vm6 = vnez %v3391_v48  ;;  %vm3473_vm4 = vnez %v3395_v51  ;;  %vm3477_vm15 = vmmov %vm3467_vm12  ;;  %v1917_v13 = vpop.f32.mrb[0].mxu1 }
 0x187   : > { %v3470_v37 = vsel %vm3469_vm6, %v2806_v16, %v2670_v28  ;;  %v3474_v57 = vsel %vm3473_vm4, %v2817_v9, %v2675_v40  ;;  %v1559_v20 = vadd.f32 %v1558_v14, %v1557_v10  ;;  %v1490_v26 = vadd.f32 %v1489_v4, %v1488_v39  ;;  %vm3479_vm12 = vmmov %vm3468_vm1 }
 0x188   : > { %vm3102_vm10 = vcmp.lt.s32.totalorder %v3470_v37, 16  ;;  %vm3111_vm0 = vcmp.lt.s32.totalorder %v3474_v57, 16  ;;  %v1491_v48 = vsel %vm3477_vm15, %v1459_v61, 0.0  ;;  %v3117_v28 = vsub.s32 %v2757_v32, %v1233_v24  ;;  %954 = vst.msk [vmem:[%s2891_s10 + $0x20] sm:$0xf] %vm3479_vm12, %v1860_v31  ;;  %vm3480_vm6 = vmmov %vm3478_vm14 }
 0x189   : > { %v1560_v16 = vsel %vm3478_vm14, %v1530_v44, 0.0  ;;  %v1533_v36 = vmul.f32 %v1461_v2, %v1461_v2  ;;  %v1531_v51 = vmul.f32 %v1459_v61, %v1459_v61  ;;  %957 = vst.msk [vmem:[%s2891_s10 + $0x2c] sm:$0xf] %vm3468_vm1, %v1863_v47  ;;  %v1861_v40 = vpack.c.bf16 %v789_v11, %v789_v11  ;;  %vm3481_vm4 = vmmov %vm3468_vm1 }
 0x18a   : > { %v1492_v9 = vadd.f32 %v1491_v48, %v1490_v26  ;;  %v1561_v58 = vadd.f32 %v1560_v16, %v1559_v20  ;;  %v1462_v5 = vsel %vm3028_vm2, %v1914_v60, 0.0  ;;  %v1460_v30 = vsel %vm3037_vm5, %v789_v11, 0.0  ;;  %vm3482_vm15 = vmmov %vm3480_vm6 }
 0x18b   : > { %v1562_v32 = vsel %vm3480_vm6, %v1531_v51, 0.0  ;;  %955 = vst.msk [vmem:[%s2891_s10 + $0x24] sm:$0xf] %vm3481_vm4, %v1861_v40  ;;  %v1493_v53 = vsel %vm3482_vm15, %v1460_v30, 0.0  ;;  %v1532_v24 = vmul.f32 %v1460_v30, %v1460_v30  ;;  %vm3483_vm14 = vnez %v3397_v42  ;;  %vm3491_vm4 = vmmov %vm3482_vm15 }
 0x18c   : > { %v3484_v54 = vsel %vm3483_vm14, %v2828_v50, %v2693_v29  ;;  %vm1282_vm2 = vcmp.ne.s32.totalorder %v3071_v49, 0  ;;  %v1563_v22 = vadd.f32 %v1562_v32, %v1561_v58  ;;  %v1494_v27 = vadd.f32 %v1493_v53, %v1492_v9  ;;  %vm3492_vm15 = vmmov %vm3491_vm4 }
 0x18d   : > { %vm3137_vm12 = vcmp.lt.s32.totalorder %v3484_v54, 16  ;;  %vm3487_vm5 = vnez %v3399_v59  ;;  %vm1306_vm6 = vcmp.lt.s32.totalorder %v3071_v49, 0  ;;  %v3153_v29 = vadd.s32 24, %v3071_v49  ;;  %v802_v59 = vpop.f32.mrb[1].mxu1  ;;  %vm3161_vm14 = vmand %vm1303_vm8, %vm1279_vm13 }
 0x18e   : > { %v3488_v1 = vsel %vm3487_vm5, %v2831_v8, %v2696_v38  ;;  %v1495_v50 = vsel %vm3491_vm4, %v1461_v2, 0.0  ;;  %v1534_v23 = vmul.f32 %v1462_v5, %v1462_v5  ;;  %v1564_v17 = vsel %vm3492_vm15, %v1532_v24, 0.0  ;;  %vm3495_vm5 = vmmov %vm3491_vm4  ;;  %v1918_v45 = vpop.f32.mrb[2].mxu1 }
 0x18f   : > { %vm3147_vm1 = vcmp.lt.s32.totalorder %v3488_v1, 16  ;;  %v1866_v19 = vpack.c.bf16 %v1917_v13, %v1917_v13  ;;  %v1566_v8 = vsel %vm3495_vm5, %v1533_v36, 0.0  ;;  %v1496_v25 = vadd.f32 %v1495_v50, %v1494_v27  ;;  %v805_v2 = vpop.f32.mrb[3].mxu1  ;;  %vm3505_vm5 = vmmov %vm3491_vm4 }
 0x190   : > { %v1565_v44 = vadd.f32 %v1564_v17, %v1563_v22  ;;  %v1465_v15 = vsel %vm3066_vm9, %v1917_v13, 0.0  ;;  %v1497_v46 = vsel %vm3491_vm4, %v1462_v5, 0.0  ;;  %vm3496_vm15 = vcmask 60416   ;;  %v1921_v16 = vpop.f32.mrb[4].mxu1 }
 0x191   : > { %960 = vst.msk [vmem:[%s2891_s10 + $0x38] sm:$0xf] %vm3496_vm15, %v1866_v19  ;;  %v1864_v14 = vpack.c.bf16 %v802_v59, %v802_v59  ;;  %v1463_v39 = vsel %vm3078_vm7, %v802_v59, 0.0  ;;  %v1867_v10 = vpack.c.bf16 %v1918_v45, %v1918_v45  ;;  %vm3497_vm13 = vnez %v3407_v63  ;;  %vm3504_vm7 = vmmov %vm3491_vm4  ;;  %v818_v9 = vpop.f32.mrb[5].mxu1 }
 0x192   : > { %v3498_v60 = vsel %vm3497_vm13, %v2882_v3, %v2754_v7  ;;  %vm3187_vm9 = vcmp.lt.s32.totalorder %v1372_v55, 16  ;;  %v1567_v6 = vadd.f32 %v1566_v8, %v1565_v44  ;;  %v1498_v61 = vadd.f32 %v1497_v46, %v1496_v25  ;;  %vm3506_vm4 = vmmov %vm3496_vm15  ;;  %v1922_v62 = vpop.f32.mrb[6].mxu1 }
 0x193   : > { %vm3178_vm8 = vcmp.lt.s32.totalorder %v3498_v60, 16  ;;  %v1499_v63 = vsel %vm3504_vm7, %v1463_v39, 0.0  ;;  %v1375_v7 = vsel %vm3161_vm14, %v3085_v18, %v3045_v43  ;;  %v1568_v3 = vsel %vm3505_vm5, %v1534_v23, 0.0  ;;  %958 = vst.msk [vmem:[%s2891_s10 + $0x30] sm:$0xf] %vm3506_vm4, %v1864_v14  ;;  %vm3507_vm3 = vmmov %vm3506_vm4  ;;  %v821_v22 = vpop.f32.mrb[7].mxu1 }
 0x194   : > { %v1537_v47 = vmul.f32 %v1465_v15, %v1465_v15  ;;  %v1535_v34 = vmul.f32 %v1463_v39, %v1463_v39  ;;  %961 = vst.msk [vmem:[%s2891_s10 + $0x3c] sm:$0xf] %vm3507_vm3, %v1867_v10  ;;  %v1865_v33 = vpack.c.bf16 %v805_v2, %v805_v2  ;;  %v1500_v55 = vadd.f32 %v1499_v63, %v1498_v61  ;;  %vm3508_vm15 = vmmov %vm3505_vm5 }
 0x195   : > { %v1569_v11 = vadd.f32 %v1568_v3, %v1567_v6  ;;  %v1466_v37 = vsel %vm3102_vm10, %v1918_v45, 0.0  ;;  %v1464_v57 = vsel %vm3111_vm0, %v805_v2, 0.0  ;;  %vm3509_vm14 = vmmov %vm3507_vm3  ;;  %vm1280_vm7 = vcmp.ne.s32.totalorder %v3117_v28, 0 }
 0x196   : > { %v1570_v20 = vsel %vm3508_vm15, %v1535_v34, 0.0  ;;  %959 = vst.msk [vmem:[%s2891_s10 + $0x34] sm:$0xf] %vm3509_vm14, %v1865_v33  ;;  %vm3510_vm13 = vmmov %vm3505_vm5  ;;  %v1536_v18 = vmul.f32 %v1464_v57, %v1464_v57  ;;  %vm1304_vm5 = vcmp.lt.s32.totalorder %v3117_v28, 0  ;;  %v1352_v56 = vadd.s32 24, %v3117_v28  ;;  %v1925_v14 = vpop.f32.mrb[8].mxu1 }
 0x197   : > { %v1501_v43 = vsel %vm3510_vm13, %v1464_v57, 0.0  ;;  %v1571_v26 = vadd.f32 %v1570_v20, %v1569_v11  ;;  %vm3511_vm10 = vmmov %vm3510_vm13  ;;  %v1538_v36 = vmul.f32 %v1466_v37, %v1466_v37  ;;  %v1870_v40 = vpack.c.bf16 %v1921_v16, %v1921_v16  ;;  %v834_v4 = vpop.f32.mrb[9].mxu1 }
 0x198   : > { %v1502_v48 = vadd.f32 %v1501_v43, %v1500_v55  ;;  %v1503_v35 = vsel %vm3511_vm10, %v1465_v15, 0.0  ;;  %vm3512_vm0 = vmmov %vm3511_vm10  ;;  %vm3219_vm4 = vcmp.lt.s32.totalorder %v1377_v0, 16  ;;  %v1469_v41 = vsel %vm3137_vm12, %v1921_v16, 0.0  ;;  %v1926_v61 = vpop.f32.mrb[10].mxu1 }
 0x199   : > { %v1572_v51 = vsel %vm3512_vm0, %v1536_v18, 0.0  ;;  %vm3227_vm3 = vmand %vm1306_vm6, %vm1282_vm2  ;;  %964 = vst.msk [vmem:[%s2891_s10 + $0x48] sm:$0xf] %vm3509_vm14, %v1870_v40  ;;  %v1868_v0 = vpack.c.bf16 %v818_v9, %v818_v9  ;;  %v1467_v24 = vsel %vm3147_vm1, %v818_v9, 0.0  ;;  %v1871_v54 = vpack.c.bf16 %v1922_v62, %v1922_v62  ;;  %v837_v33 = vpop.f32.mrb[11].mxu1 }
 0x19a   : > { %vm3517_vm15 = vmmov %vm3512_vm0  ;;  %v1504_v32 = vadd.f32 %v1503_v35, %v1502_v48  ;;  %v1573_v53 = vadd.f32 %v1572_v51, %v1571_v26  ;;  %v1378_v12 = vsel %vm3227_vm3, %v3153_v29, %v3071_v49  ;;  %v1541_v23 = vmul.f32 %v1469_v41, %v1469_v41 }
 0x19b   : > { %v1574_v30 = vsel %vm3517_vm15, %v1537_v47, 0.0  ;;  %vm3518_vm11 = vmmov %vm3512_vm0  ;;  %v1539_v17 = vmul.f32 %v1467_v24, %v1467_v24  ;;  %v1869_v19 = vpack.c.bf16 %v821_v22, %v821_v22  ;;  %v1470_v49 = vsel %vm3178_vm8, %v1922_v62, 0.0 }
 0x19c   : > { %v1505_v52 = vsel %vm3518_vm11, %v1466_v37, 0.0  ;;  %v1575_v27 = vadd.f32 %v1574_v30, %v1573_v53  ;;  %vm3519_vm2 = vmmov %vm3512_vm0  ;;  %v1468_v29 = vsel %vm3187_vm9, %v821_v22, 0.0  ;;  %vm3268_vm8 = vcmp.lt.s32.totalorder %v1378_v12, 16 }
 0x19d   : > { %v1506_v13 = vadd.f32 %v1505_v52, %v1504_v32  ;;  %v1507_v1 = vsel %vm3519_vm2, %v1467_v24, 0.0  ;;  %vm3248_vm12 = vmand %vm1304_vm5, %vm1280_vm7  ;;  %v1540_v44 = vmul.f32 %v1468_v29, %v1468_v29  ;;  %v1542_v2 = vmul.f32 %v1470_v49, %v1470_v49 }
 0x19e   : > { %vm3522_vm1 = vmmov %vm3512_vm0  ;;  %v1376_v15 = vsel %vm3248_vm12, %v1352_v56, %v3117_v28  ;;  %v1874_v21 = vpack.c.bf16 %v1925_v14, %v1925_v14  ;;  %v1872_v3 = vpack.c.bf16 %v834_v4, %v834_v4  ;;  %v1875_v34 = vpack.c.bf16 %v1926_v61, %v1926_v61 }
 0x19f   : > { %v1576_v42 = vsel %vm3522_vm1, %v1538_v36, 0.0  ;;  %vm3523_vm6 = vmmov %vm3509_vm14  ;;  %v1508_v59 = vadd.f32 %v1507_v1, %v1506_v13  ;;  %vm3275_vm11 = vcmp.lt.s32.totalorder %v1376_v15, 16  ;;  %v1473_v11 = vsel %vm3219_vm4, %v1925_v14, 0.0 }
 0x1a0   : > { %962 = vst.msk [vmem:[%s2891_s10 + $0x40] sm:$0xf] %vm3523_vm6, %v1868_v0  ;;  %vm3524_vm13 = vmmov %vm3523_vm6  ;;  %v1577_v38 = vadd.f32 %v1576_v42, %v1575_v27  ;;  %v1584_v20 = vsel %vm3522_vm1, %v1542_v2, 0.0  ;;  %v1873_v18 = vpack.c.bf16 %v837_v33, %v837_v33  ;;  %v1474_v16 = vsel %vm3268_vm8, %v1926_v61, 0.0 }
 0x1a1   : > { %965 = vst.msk [vmem:[%s2891_s10 + $0x4c] sm:$0xf] %vm3524_vm13, %v1871_v54  ;;  %vm3525_vm7 = vmmov %vm3512_vm0  ;;  %v1472_v56 = vsel %vm3275_vm11, %v837_v33, 0.0  ;;  %v1545_v35 = vmul.f32 %v1473_v11, %v1473_v11  ;;  %v1546_v30 = vmul.f32 %v1474_v16, %v1474_v16  ;;  %v2117_v27 = vmov (!%p1849_p7), 0.0  }
 0x1a2   : > { %v1578_v8 = vsel %vm3525_vm7, %v1539_v17, 0.0  ;;  %vm3526_vm5 = vmmov %vm3523_vm6  ;;  %v1544_v40 = vmul.f32 %v1472_v56, %v1472_v56 }
 0x1a3   : > { %963 = vst.msk [vmem:[%s2891_s10 + $0x44] sm:$0xf] %vm3526_vm5, %v1869_v19  ;;  %vm3527_vm10 = vmmov %vm3512_vm0  ;;  %v1579_v45 = vadd.f32 %v1578_v8, %v1577_v38  ;;  %vm1399_vm0 = vcmp.lt.s32.totalorder %v1375_v7, 16 }
 0x1a4   : > { %v1509_v25 = vsel %vm3527_vm10, %v1468_v29, 0.0  ;;  %vm3530_vm9 = vmmov %vm3522_vm1  ;;  %v1471_v47 = vsel %vm1399_vm0, %v834_v4, 0.0 }
 0x1a5   : > { %v1510_v46 = vadd.f32 %v1509_v25, %v1508_v59  ;;  %v1511_v10 = vsel %vm3530_vm9, %v1469_v41, 0.0  ;;  %vm3531_vm3 = vmmov %vm3522_vm1  ;;  %v1543_v43 = vmul.f32 %v1471_v47, %v1471_v47 }
 0x1a6   : > { %v1580_v60 = vsel %vm3531_vm3, %v1540_v44, 0.0  ;;  %vm3532_vm15 = vmmov %vm3522_vm1 }
 0x1a7   : > { %v1582_v31 = vsel %vm3532_vm15, %v1541_v23, 0.0  ;;  %v1512_v28 = vadd.f32 %v1511_v10, %v1510_v46  ;;  %v1581_v6 = vadd.f32 %v1580_v60, %v1579_v45  ;;  %vm3535_vm14 = vmmov %vm3522_vm1  ;;  %vm3548_vm15 = vcmask (!%p1849_p7), 64512  }
 0x1a8   : > { %v1513_v7 = vsel %vm3535_vm14, %v1470_v49, 0.0  ;;  %vm3536_vm2 = vmmov %vm3526_vm5  ;;  %1598 = vst.msk [vmem:[%s2193_s6] sm:$0xff] (!%p1849_p7), %vm3548_vm15, %v2117_v27 }
 0x1a9   : > { %968 = vst.msk [vmem:[%s2891_s10 + $0x58] sm:$0xf] %vm3536_vm2, %v1874_v21  ;;  %v1583_v55 = vadd.f32 %v1582_v31, %v1581_v6  ;;  %v1514_v37 = vadd.f32 %v1513_v7, %v1512_v28  ;;  %vm3537_vm12 = vmmov %vm3522_vm1 }
 0x1aa   : > { %v1515_v57 = vsel %vm3537_vm12, %v1471_v47, 0.0  ;;  %vm3538_vm6 = vmmov %vm3536_vm2 }
 0x1ab   : > { %966 = vst.msk [vmem:[%s2891_s10 + $0x50] sm:$0xf] %vm3538_vm6, %v1872_v3  ;;  %vm3539_vm13 = vmmov %vm3536_vm2  ;;  %v1516_v26 = vadd.f32 %v1515_v57, %v1514_v37  ;;  %v1585_v48 = vadd.f32 %v1584_v20, %v1583_v55 }
 0x1ac   : > { %969 = vst.msk [vmem:[%s2891_s10 + $0x5c] sm:$0xf] %vm3539_vm13, %v1875_v34  ;;  %vm3540_vm4 = vmmov %vm3522_vm1 }
 0x1ad   : > { %v1586_v36 = vsel %vm3540_vm4, %v1543_v43, 0.0  ;;  %vm3541_vm7 = vmmov %vm3536_vm2 }
 0x1ae   : > { %967 = vst.msk [vmem:[%s2891_s10 + $0x54] sm:$0xf] %vm3541_vm7, %v1873_v18  ;;  %vm3542_vm5 = vmmov %vm3522_vm1  ;;  %v1587_v9 = vadd.f32 %v1586_v36, %v1585_v48 }
 0x1af   : > { %v1517_v51 = vsel %vm3542_vm5, %v1472_v56, 0.0  ;;  %vm3543_vm10 = vmmov %vm3522_vm1 }
 0x1b0   : > { %v1518_v58 = vadd.f32 %v1517_v51, %v1516_v26  ;;  %v1519_v5 = vsel %vm3543_vm10, %v1473_v11, 0.0  ;;  %vm3544_vm0 = vmmov %vm3522_vm1  ;;  %1597 = sbr.rel (%p1849_p7) target bundleno = 439 (0x1b7), region = 32 }
 0x1b1   : > { %v1588_v32 = vsel %vm3544_vm0, %v1544_v40, 0.0  ;;  %vm3545_vm8 = vmmov %vm3544_vm0 }
 0x1b2   : > { %v1520_v53 = vadd.f32 %v1519_v5, %v1518_v58  ;;  %v1589_v41 = vadd.f32 %v1588_v32, %v1587_v9  ;;  %v1590_v62 = vsel %vm3545_vm8, %v1545_v35, 0.0  ;;  %vm3546_vm9 = vmmov %vm3544_vm0 }
 0x1b3   : > { %v1521_v52 = vsel %vm3546_vm9, %v1474_v16, 0.0  ;;  %vm3547_vm3 = vmmov %vm3544_vm0 }
 0x1b4   : > { %v1522_v0 = vadd.f32 %v1521_v52, %v1520_v53  ;;  %v1591_v24 = vadd.f32 %v1590_v62, %v1589_v41  ;;  %v1592_v54 = vsel %vm3547_vm3, %v1546_v30, 0.0  ;;  %vm3549_vm11 = vmmov (!%p1849_p7), %vm3548_vm15 }
 0x1b5   : > { %1599 = vst.msk [vmem:[%s2201_s11] sm:$0xff] (!%p1849_p7), %vm3549_vm11, %v2117_v27 }
 0x1b6   : > { %v1593_v22 = vadd.f32 %v1592_v54, %v1591_v24 }
 0x1b7 PF: > { %v1600_v13 = vld [vmem:[%s2193_s6] sm:$0xff]  ;;  %vm3550_vm14 = vcmask 64512  }
 0x1b8   : > { %v1601_v12 = vadd.f32 %v1600_v13, %v1522_v0  ;;  %vm3551_vm2 = vmmov %vm3550_vm14 }
 0x1ba   : > { %1602 = vst.msk [vmem:[%s2193_s6] sm:$0xff] %vm3550_vm14, %v1601_v12 }
 0x1bc   : > { %v1603_v1 = vld [vmem:[%s2201_s11] sm:$0xff] }
 0x1bd   : > { %v1604_v50 = vadd.f32 %v1603_v1, %v1593_v22 }
 0x1bf   : > { %1605 = vst.msk [vmem:[%s2201_s11] sm:$0xff] %vm3551_vm2, %v1604_v50 }
 0x1c0 PF: > { %s15_s19 = sadd.s32 1, %s2113_s19   ;;  %s3552_s15 = smov %s2105_s17 }
 0x1c1   : > { %p12_p8 = scmp.ge.s32.totalorder %s15_s19, 6   ;;  %s3553_s16 = smov %s2109_s18 }
 0x1c2   : > { %s3554_s17 = smov %s3557_s20  ;;  %s3555_s18 = smov %s3561_s21 }
 0x1c3   :  { %14 = sbr.rel (!%p12_p8) target bundleno = 3 (0x3), region = 86 }

// kernel: unet_forward.26
= control target key start
LH: loop header
LB: loop body
LE: loop exit
PB: predicated region body
PF: predicated region fallthrough
CT: control target
= control target key end

     0   :  { %s803_s21 = smov 0   ;;  %s805_s22 = smov 0   ;;  %s919_s0 = inlined_call_operand.vmem [shape: bf16[2,8,2,6,32], index: 0, kind: input, shape index: {}]   ;;  %s920_s1 = inlined_call_operand.vmem [shape: f32[2,8,32], index: 1, kind: input, shape index: {}]   ;;  %s921_s2 = inlined_call_operand.vmem [shape: f32[2,8,32], index: 2, kind: input, shape index: {}]   ;;  %s922_s3 = inlined_call_operand.vmem [shape: f32[1,32], index: 3, kind: input, shape index: {}]   ;;  %s923_s4 = inlined_call_operand.vmem [shape: f32[1,32], index: 4, kind: input, shape index: {}]   ;;  %s924_s5 = inlined_call_operand.vmem [shape: bf16[2,8,2,4,32], index: 5, kind: output, shape index: {0}]   ;;  %s925_s6 = inlined_call_operand.vmem [shape: bf16[2,8,4,16], index: 6, kind: output, shape index: {1}]  }
   0x1   :  { %s807_s23 = smov 0   ;;  %s809_s24 = smov 0  }
   0x2   :  { %s811_s25 = smov 0  }
   0x3 LB: > { %s26_s26 = sadd.s32 1, %s756_s23  ;;  %s29_s27 = sadd.s32 1, %s760_s24  ;;  %s764_s25 = sphi %s811_s25, %s17_s25   ;;  %s760_s24 = sphi %s809_s24, %s929_s24   ;;  %s756_s23 = sphi %s807_s23, %s928_s23   ;;  %s752_s22 = sphi %s805_s22, %s927_s22   ;;  %s748_s21 = sphi %s803_s21, %s926_s21  }
   0x4   : > { %p27_p0 = scmp.ge.s32.totalorder %s26_s26, 2  ;;  %p658_p1 = scmp.ge.s32.totalorder %s764_s25, 1 }
   0x5   : > { %p239_p2 = scmp.lt.s32.totalorder %s764_s25, 5 }
   0x6   : > { %s931_s26 = smov (%p27_p0, %s26_s26), 0  ;;  %s933_s27 = smov (!%p27_p0, %s29_s27), %s760_s24 }
   0x7   : > { %p240_p3 = pnand %p658_p1, %p239_p2  ;;  %p31_p4 = scmp.ge.s32.totalorder %s933_s27, 2 }
   0x8   : > { %v320_v0 = vld [vmem:[%s920_s1] sm:$0xff] (!%p240_p3)  ;;  %v321_v1 = vld [vmem:[%s920_s1 + $0x8] sm:$0xff] (!%p240_p3)  ;;  %vm322_vm0 = vcmask (!%p240_p3), 261120   ;;  %s659_s12 = sshll.u32 (!%p240_p3), %s748_s21, 2  ;;  %p289_p5 = scmp.lt.s32.totalorder (!%p240_p3), %s752_s22, 1  ;;  %v371_v27 = vlaneseq (!%p240_p3)  ;;  %vm414_vm1 = vcmask (!%p240_p3), 254976  }
   0x9   : > { %s935_s27 = smov (%p31_p4, %s933_s27), 0  ;;  %243 = sbr.rel (%p240_p3) target bundleno = 308 (0x134), region = 40 }
   0xa   : > { %v332_v2 = vld [vmem:[%s921_s2] sm:$0xff] (!%p240_p3)  ;;  %v323_v3 = vsel (!%p240_p3), %vm322_vm0, %v320_v0, 0.0  ;;  %v324_v4 = vsel (!%p240_p3), %vm322_vm0, %v321_v1, 0.0  ;;  %v333_v5 = vld [vmem:[%s921_s2 + $0x8] sm:$0xff] (!%p240_p3)  ;;  %p291_p6 = scmp.lt.s32.totalorder (!%p240_p3), %s659_s12, 7  ;;  %v861_v28 = vshrl.u32 (!%p240_p3), %v371_v27, 7 }
   0xb   : > { %v334_v6 = vsel (!%p240_p3), %vm322_vm0, %v332_v2, 0.0  ;;  %v325_v7 = vadd.f32 (!%p240_p3), %v324_v4, %v323_v3  ;;  %v335_v8 = vsel (!%p240_p3), %vm322_vm0, %v333_v5, 0.0  ;;  %v347_v29 = vld [vmem:[%s922_s3] sm:$0x1] (!%p240_p3)  ;;  %s766_s11 = smov (!%p240_p3), 120   ;;  %vm451_vm2 = vcmask (!%p240_p3), 58368  }
   0xc   : > { %v336_v9 = vadd.f32 (!%p240_p3), %v335_v8, %v334_v6  ;;  %v373_v31 = vsub.s32 (!%p240_p3), 0, %v861_v28  ;;  %v351_v44 = vld [vmem:[%s923_s4] sm:$0x1] (!%p240_p3)  ;;  %vm500_vm3 = vcmask (!%p240_p3), 123968  }
   0xd   : > { %v326_v10 = vrot.slane (!%p240_p3), %v325_v7, 4 }
   0xe   : > { %v337_v11 = vrot.slane (!%p240_p3), %v336_v9, 4 }
   0xf   : > { %v327_v12 = vadd.f32 (!%p240_p3), %v326_v10, %v325_v7 }
  0x10   : > { %v338_v13 = vadd.f32 %v337_v11, %v336_v9  ;;  %s937_s22 = smov (!%p289_p5, %s752_s22), 1  ;;  %s939_s12 = smov (!%p291_p6, %s659_s12), 7 }
  0x11   : > { %v328_v14 = vrot.slane %v327_v12, 2  ;;  %s660_s13 = sshll.u32 %s939_s12, 1  ;;  %s661_s14 = sshll.u32 %s937_s22, 4 }
  0x12   : > { %v339_v15 = vrot.slane %v338_v13, 2  ;;  %s858_s15 = sadd.s32 %s661_s14, %s660_s13  ;;  %s668_s30 = sshll.u32 %s937_s22, 3 }
  0x13   : > { %v329_v16 = vadd.f32 %v328_v14, %v327_v12  ;;  %s662_s16 = sshll.u32 %s858_s15, 2  ;;  %s875_s7 = sadd.s32 %s668_s30, %s939_s12 }
  0x14   : > { %v340_v17 = vadd.f32 %v339_v15, %v338_v13  ;;  %s297_s19 = scalar_lea.vmem %s919_s0, %s662_s16  ;;  %s666_s8 = sshll.u32 %s858_s15, 1 }
  0x15   : > { %v330_v18 = vrot.slane %v329_v16, 1  ;;  %v354_v30 = vld [vmem:[%s297_s19] sm:$0x7]  ;;  %v355_v32 = vld [vmem:[%s297_s19 + $0x4] sm:$0x7]  ;;  %s308_s22 = scalar_lea.vmem %s924_s5, %s666_s8  ;;  %s669_s12 = sshll.u32 %s875_s7, 1 }
  0x16   : > { %v341_v19 = vrot.slane %v340_v17, 1  ;;  %v356_v33 = vld [vmem:[%s297_s19 + $0x8] sm:$0x7]  ;;  %v357_v34 = vld [vmem:[%s297_s19 + $0xc] sm:$0x7]  ;;  %v362_v41 = vunpack.c.l.bf16 %v354_v30  ;;  %v363_v42 = vunpack.c.l.bf16 %v355_v32  ;;  %s318_s15 = scalar_lea.vmem %s925_s6, %s669_s12 }
  0x17   : > { %v331_v20 = vadd.f32 %v330_v18, %v329_v16  ;;  %v358_v35 = vld [vmem:[%s297_s19 + $0x10] sm:$0x7]  ;;  %v359_v36 = vld [vmem:[%s297_s19 + $0x14] sm:$0x7]  ;;  %v360_v37 = vld [vmem:[%s297_s19 + $0x18] sm:$0x7]  ;;  %v364_v43 = vunpack.c.l.bf16 %v356_v33  ;;  %v365_v45 = vunpack.c.l.bf16 %v357_v34 }
  0x18   : > { %v342_v21 = vadd.f32 %v341_v19, %v340_v17  ;;  %v361_v39 = vld [vmem:[%s297_s19 + $0x1c] sm:$0x7]  ;;  %v366_v46 = vunpack.c.l.bf16 %v358_v35  ;;  %v367_v47 = vunpack.c.l.bf16 %v359_v36  ;;  %v368_v48 = vunpack.c.l.bf16 %v360_v37 }
  0x19   : > { %v343_v22 = vmul.f32 0.001953125, %v331_v20  ;;  %v369_v51 = vunpack.c.l.bf16 %v361_v39 }
  0x1a   : > { %v344_v23 = vmul.f32 0.001953125, %v342_v21 }
  0x1b   : > { %v345_v24 = vmul.f32 %v343_v22, %v343_v22 }
  0x1d   : > { %v346_v25 = vsub.f32 %v344_v23, %v345_v24 }
  0x1f   : > { %v348_v26 = vadd.f32 1e-05, %v346_v25 }
  0x21   : > { %724 = vrsqrt.f32 %v348_v26 }
  0x2b   : > { %v725_v38 = vpop.eup %724 }
  0x2c   : > { %v350_v40 = vmul.f32 %v725_v38, %v347_v29  ;;  %v767_v29 = vmov 1983009808  }
  0x2d   : > { %v461_v30 = vunpack.c.l.s4 %v767_v29 }
  0x2e   : > { %v352_v49 = vmul.f32 %v350_v40, %v343_v22  ;;  %v374_v50 = vrot.slane %v350_v40, %v373_v31 }
  0x30   : > { %v353_v52 = vsub.f32 %v351_v44, %v352_v49  ;;  %v376_v53 = vmul.f32 %v374_v50, %v362_v41  ;;  %v377_v54 = vmul.f32 %v374_v50, %v363_v42  ;;  %v378_v55 = vmul.f32 %v374_v50, %v364_v43 }
  0x31   : > { %v379_v56 = vmul.f32 %v374_v50, %v365_v45  ;;  %v380_v57 = vmul.f32 %v374_v50, %v366_v46  ;;  %v381_v58 = vmul.f32 %v374_v50, %v367_v47  ;;  %v382_v59 = vmul.f32 %v374_v50, %v368_v48 }
  0x32   : > { %v388_v60 = vrot.slane %v353_v52, %v373_v31  ;;  %v383_v61 = vmul.f32 %v374_v50, %v369_v51  ;;  %v462_v31 = vunpack.c.0.s8 %v461_v30 }
  0x34   : > { %v390_v62 = vadd.f32 %v388_v60, %v376_v53  ;;  %v391_v63 = vadd.f32 %v388_v60, %v377_v54  ;;  %v392_v0 = vadd.f32 %v388_v60, %v378_v55  ;;  %v393_v1 = vadd.f32 %v388_v60, %v379_v56 }
  0x35   : > { %v394_v2 = vadd.f32 %v388_v60, %v380_v57  ;;  %v395_v3 = vadd.f32 %v388_v60, %v381_v58  ;;  %v396_v4 = vadd.f32 %v388_v60, %v382_v59  ;;  %v397_v5 = vadd.f32 %v388_v60, %v383_v61 }
  0x36   : > { %v398_v6 = vmax.f32 %v390_v62, 0.0  ;;  %v399_v7 = vmax.f32 %v391_v63, 0.0  ;;  %v400_v8 = vmax.f32 %v392_v0, 0.0  ;;  %v401_v9 = vmax.f32 %v393_v1, 0.0 }
  0x37   : > { %v402_v10 = vmax.f32 %v394_v2, 0.0  ;;  %v403_v11 = vmax.f32 %v395_v3, 0.0  ;;  %v404_v12 = vmax.f32 %v396_v4, 0.0  ;;  %v405_v13 = vmax.f32 %v397_v5, 0.0 }
  0x38   : > { %v407_v14 = vpack.c.bf16 %v399_v7, %v399_v7  ;;  %v408_v15 = vpack.c.bf16 %v400_v8, %v400_v8  ;;  %v409_v16 = vpack.c.bf16 %v401_v9, %v401_v9  ;;  %v423_v17 = vmax.f32 %v398_v6, %v399_v7 }
  0x39   : > { %v424_v18 = vmax.f32 %v400_v8, %v401_v9  ;;  %v406_v19 = vpack.c.bf16 %v398_v6, %v398_v6  ;;  %v411_v20 = vpack.c.bf16 %v403_v11, %v403_v11  ;;  %v412_v21 = vpack.c.bf16 %v404_v12, %v404_v12 }
  0x3a   : > { %416 = vst.msk [vmem:[%s308_s22 + $0x2] sm:$0x3] %vm414_vm1, %v407_v14  ;;  %417 = vst.msk [vmem:[%s308_s22 + $0x4] sm:$0x3] %vm414_vm1, %v408_v15  ;;  %v413_v22 = vpack.c.bf16 %v405_v13, %v405_v13  ;;  %v425_v23 = vmax.f32 %v402_v10, %v403_v11  ;;  %v426_v24 = vmax.f32 %v404_v12, %v405_v13 }
  0x3b   : > { %418 = vst.msk [vmem:[%s308_s22 + $0x6] sm:$0x3] %vm414_vm1, %v409_v16  ;;  %v410_v25 = vpack.c.bf16 %v402_v10, %v402_v10  ;;  %v714_v26 = vpack.i.bf16 %v424_v18, %v423_v17  ;;  %415 = vst.msk [vmem:[%s308_s22] sm:$0x3] %vm414_vm1, %v406_v19  ;;  %v465_v37 = vsub.s32 %v462_v31, %v861_v28 }
  0x3c   : > { %420 = vst.msk [vmem:[%s308_s22 + $0xa] sm:$0x3] %vm414_vm1, %v411_v20  ;;  %421 = vst.msk [vmem:[%s308_s22 + $0xc] sm:$0x3] %vm414_vm1, %v412_v21  ;;  %v719_v27 = vpack.i.bf16 %v426_v24, %v425_v23 }
  0x3d   : > { %422 = vst.msk [vmem:[%s308_s22 + $0xe] sm:$0x3] %vm414_vm1, %v413_v22  ;;  %419 = vst.msk [vmem:[%s308_s22 + $0x8] sm:$0x3] %vm414_vm1, %v410_v25  ;;  %715 = vrot.lane.b32.xlu0 %v714_v26, %s766_s11 }
  0x41   : > { %720 = vrot.lane.b32.xlu0 %v719_v27, %s766_s11 }
  0xaf   : > { %v716_v32 = vpop.permute.xlu0 %715 }
  0xb0   : > { %v718_v33 = vunpack.i.h.bf16 %v716_v32  ;;  %v717_v34 = vunpack.i.l.bf16 %v716_v32 }
  0xb2   : > { %v444_v35 = vmax.f32 %v424_v18, %v718_v33  ;;  %v443_v36 = vmax.f32 %v423_v17, %v717_v34 }
  0xb3   : > { %v721_v38 = vpop.permute.xlu0 %720 }
  0xb4   : > { %v448_v39 = vpack.c.bf16 %v444_v35, %v444_v35  ;;  %v723_v40 = vunpack.i.h.bf16 %v721_v38  ;;  %v722_v41 = vunpack.i.l.bf16 %v721_v38  ;;  %v447_v42 = vpack.c.bf16 %v443_v36, %v443_v36 }
  0xb6   : > { %v446_v43 = vmax.f32 %v426_v24, %v723_v40  ;;  %v445_v44 = vmax.f32 %v425_v23, %v722_v41  ;;  %v466_v45 = vrot.slane %v447_v42, %v465_v37  ;;  %452 = vst.msk [vmem:[%s318_s15] sm:$0x3] %vm451_vm2, %v447_v42  ;;  %453 = vst.msk [vmem:[%s318_s15 + $0x2] sm:$0x3] %vm451_vm2, %v448_v39 }
  0xb7   : > { %v473_v28 = vrot.slane %v448_v39, %v465_v37 }
  0xb8   : > { %v450_v46 = vpack.c.bf16 %v446_v43, %v446_v43  ;;  %v449_v47 = vpack.c.bf16 %v445_v44, %v445_v44  ;;  %488 = vrot.lane.b32.xlu1 %v466_v45, %s766_s11 }
  0xba   : > { %v480_v48 = vrot.slane %v449_v47, %v465_v37  ;;  %454 = vst.msk [vmem:[%s318_s15 + $0x4] sm:$0x3] %vm451_vm2, %v449_v47  ;;  %455 = vst.msk [vmem:[%s318_s15 + $0x6] sm:$0x3] %vm451_vm2, %v450_v46  ;;  %v487_v49 = vrot.slane %v450_v46, %v465_v37 }
  0xbc   : > { %490 = vrot.lane.b32.xlu1 %v473_v28, %s766_s11  ;;  %492 = vrot.lane.b32.xlu0 %v480_v48, %s766_s11 }
  0xc0   : > { %494 = vrot.lane.b32.xlu1 %v487_v49, %s766_s11 }
 0x12a   : > { %v489_v50 = vpop.permute.xlu1 %488 }
 0x12b   : > { %501 = vst.msk [vmem:[%s318_s15] sm:$0x3] %vm500_vm3, %v489_v50 }
 0x12e   : > { %v491_v51 = vpop.permute.xlu1 %490  ;;  %v493_v52 = vpop.permute.xlu0 %492 }
 0x12f   : > { %502 = vst.msk [vmem:[%s318_s15 + $0x2] sm:$0x3] %vm500_vm3, %v491_v51  ;;  %503 = vst.msk [vmem:[%s318_s15 + $0x4] sm:$0x3] %vm500_vm3, %v493_v52 }
 0x132   : > { %v495_v53 = vpop.permute.xlu1 %494 }
 0x133   : > { %504 = vst.msk [vmem:[%s318_s15 + $0x6] sm:$0x3] %vm500_vm3, %v495_v53 }
 0x134 PF: > { %s17_s25 = sadd.s32 1, %s764_s25   ;;  %s926_s21 = smov %s756_s23 }
 0x135   : > { %p14_p7 = scmp.ge.s32.totalorder %s17_s25, 6   ;;  %s927_s22 = smov %s760_s24 }
 0x136   : > { %s928_s23 = smov %s931_s26  ;;  %s929_s24 = smov %s935_s27 }
 0x137   :  { %16 = sbr.rel (!%p14_p7) target bundleno = 3 (0x3), region = 82 }

// kernel: tile.124
= control target key start
LH: loop header
LB: loop body
LE: loop exit
PB: predicated region body
PF: predicated region fallthrough
CT: control target
= control target key end

     0   :  { %vm82_vm0 = vcmask 1047556   ;;  %vm84_vm1 = vcmask 130048   ;;  %s195_s9 = smov 48   ;;  %s196_s14 = smov 16   ;;  %vm103_vm2 = vcmask 523648   ;;  %vm124_vm3 = vcmask 392448   ;;  %s289_s0 = inlined_call_operand.vmem [shape: f32[2,8,4,16], index: 0, kind: input, shape index: {}]   ;;  %s290_s1 = inlined_call_operand.vmem [shape: f32[2,8,64], index: 1, kind: output, shape index: {}]  }
   0x1   :  { %v180_v0 = vld [vmem:[%s289_s0 + $0x1c] sm:$0xf]  ;;  %v181_v1 = vld [vmem:[%s289_s0 + $0x18] sm:$0xf]  ;;  %v182_v2 = vld [vmem:[%s289_s0 + $0x14] sm:$0xf] }
   0x2   :  { %48 = vst [vmem:[#allocation0 + $0x38] sm:$0xf] %v180_v0  ;;  %53 = vst [vmem:[#allocation0 + $0x30] sm:$0xf] %v181_v1  ;;  %v183_v3 = vld [vmem:[%s289_s0 + $0x10] sm:$0xf] }
   0x3   :  { %58 = vst [vmem:[#allocation0 + $0x28] sm:$0xf] %v182_v2  ;;  %v184_v4 = vld [vmem:[%s289_s0 + $0xc] sm:$0xf]  ;;  %v185_v5 = vld [vmem:[%s289_s0 + $0x8] sm:$0xf] }
   0x4   :  { %63 = vst [vmem:[#allocation0 + $0x20] sm:$0xf] %v183_v3  ;;  %68 = vst [vmem:[#allocation0 + $0x18] sm:$0xf] %v184_v4  ;;  %v186_v6 = vld [vmem:[%s289_s0 + $0x4] sm:$0xf] }
   0x5   :  { %73 = vst [vmem:[#allocation0 + $0x10] sm:$0xf] %v185_v5  ;;  %v78_v7 = vld [vmem:[%s289_s0] sm:$0xf]  ;;  %77 = vst [vmem:[#allocation0 + $0x8] sm:$0xf] %v186_v6 }
   0x6   :  { %79 = vst [vmem:[#allocation0] sm:$0xf] %v78_v7  ;;  %v172_v8 = vld [vmem:[%s289_s0 + $0x3c] sm:$0xf]  ;;  %v173_v9 = vld [vmem:[%s289_s0 + $0x38] sm:$0xf] }
   0x7   :  { %8 = vst [vmem:[#allocation0 + $0x78] sm:$0xf] %v172_v8  ;;  %13 = vst [vmem:[#allocation0 + $0x70] sm:$0xf] %v173_v9  ;;  %v174_v10 = vld [vmem:[%s289_s0 + $0x34] sm:$0xf] }
   0x8   :  { %v175_v11 = vld [vmem:[%s289_s0 + $0x30] sm:$0xf]  ;;  %v176_v12 = vld [vmem:[%s289_s0 + $0x2c] sm:$0xf]  ;;  %18 = vst [vmem:[#allocation0 + $0x68] sm:$0xf] %v174_v10 }
   0x9   :  { %23 = vst [vmem:[#allocation0 + $0x60] sm:$0xf] %v175_v11  ;;  %28 = vst [vmem:[#allocation0 + $0x58] sm:$0xf] %v176_v12  ;;  %v177_v13 = vld [vmem:[%s289_s0 + $0x28] sm:$0xf] }
   0xa   :  { %v178_v14 = vld [vmem:[%s289_s0 + $0x24] sm:$0xf]  ;;  %v179_v15 = vld [vmem:[%s289_s0 + $0x20] sm:$0xf]  ;;  %33 = vst [vmem:[#allocation0 + $0x50] sm:$0xf] %v177_v13 }
   0xb   :  { %38 = vst [vmem:[#allocation0 + $0x48] sm:$0xf] %v178_v14  ;;  %43 = vst [vmem:[#allocation0 + $0x40] sm:$0xf] %v179_v15  ;;  %s194_s0 = smov 32   ;;  %vm145_vm4 = vcmask 261248  }
   0xc   :  { %v119_v16 = vld [vmem:[#allocation0 + $0x2] ss:$8 sm:$0xf0]   ;;  %v98_v17 = vld [vmem:[#allocation0 + $0x3] ss:$8 sm:$0xf0]  }
   0xd   :  { %v117_v18 = vld [vmem:[#allocation0 + $0x2] ss:$8 sm:$0xf]   ;;  %v96_v19 = vld [vmem:[#allocation0 + $0x3] ss:$8 sm:$0xf]  }
   0xe   :  { %v121_v20 = vsel %vm82_vm0, %v119_v16, %v117_v18  ;;  %v100_v21 = vsel %vm82_vm0, %v98_v17, %v96_v19  ;;  %v138_v24 = vld [vmem:[#allocation0 + $0x1] ss:$8 sm:$0xf]   ;;  %v80_v32 = vld [vmem:[#allocation0] ss:$8 sm:$0xf]  }
   0xf   :  { %122 = vrot.lane.b32.xlu1 %v121_v20, %s194_s0  ;;  %101 = vrot.lane.b32.xlu0 %v100_v21, %s195_s9  ;;  %v140_v25 = vld [vmem:[#allocation0 + $0x1] ss:$8 sm:$0xf0]   ;;  %v81_v33 = vld [vmem:[#allocation0] ss:$8 sm:$0xf0]  }
  0x10   :  { %v129_v22 = vld [vmem:[#allocation0 + $0x42] ss:$8 sm:$0xf0]   ;;  %v108_v23 = vld [vmem:[#allocation0 + $0x43] ss:$8 sm:$0xf0]   ;;  %v83_v34 = vsel %vm82_vm0, %v81_v33, %v80_v32  ;;  %v142_v38 = vsel %vm82_vm0, %v140_v25, %v138_v24 }
  0x11   :  { %v150_v31 = vld [vmem:[#allocation0 + $0x41] ss:$8 sm:$0xf0]   ;;  %v89_v36 = vld [vmem:[#allocation0 + $0x40] ss:$8 sm:$0xf0]  }
  0x12   :  { %v127_v26 = vld [vmem:[#allocation0 + $0x42] ss:$8 sm:$0xf]   ;;  %v106_v27 = vld [vmem:[#allocation0 + $0x43] ss:$8 sm:$0xf]  }
  0x13   :  { %v131_v28 = vsel %vm82_vm0, %v129_v22, %v127_v26  ;;  %v110_v29 = vsel %vm82_vm0, %v108_v23, %v106_v27  ;;  %v148_v30 = vld [vmem:[#allocation0 + $0x41] ss:$8 sm:$0xf]   ;;  %v87_v35 = vld [vmem:[#allocation0 + $0x40] ss:$8 sm:$0xf]  }
  0x14   :  { %132 = vrot.lane.b32.xlu1 %v131_v28, %s194_s0  ;;  %111 = vrot.lane.b32.xlu0 %v110_v29, %s195_s9  ;;  %v152_v37 = vsel %vm82_vm0, %v150_v31, %v148_v30  ;;  %85 = vst.msk [vmem:[%s290_s1] sm:$0xff] %vm84_vm1, %v83_v34   ;;  %v91_v39 = vsel %vm82_vm0, %v89_v36, %v87_v35 }
  0x15   :  { %187 = vst.msk [vmem:[%s290_s1 + $0x8] sm:$0xff] %vm84_vm1, %v91_v39  }
  0x18   :  { %153 = vrot.lane.b32.xlu1 %v152_v37, %s196_s14  ;;  %143 = vrot.lane.b32.xlu0 %v142_v38, %s196_s14 }
  0x81   :  { %v123_v40 = vpop.permute.xlu1 %122   ;;  %v102_v41 = vpop.permute.xlu0 %101  }
  0x82   :  { %104 = vst.msk [vmem:[%s290_s1] sm:$0xff] %vm103_vm2, %v102_v41  }
  0x83   :  { %125 = vst.msk [vmem:[%s290_s1] sm:$0xff] %vm124_vm3, %v123_v40  }
  0x86   :  { %v133_v42 = vpop.permute.xlu1 %132   ;;  %v112_v43 = vpop.permute.xlu0 %111  }
  0x87   :  { %188 = vst.msk [vmem:[%s290_s1 + $0x8] sm:$0xff] %vm103_vm2, %v112_v43  }
  0x88   :  { %189 = vst.msk [vmem:[%s290_s1 + $0x8] sm:$0xff] %vm124_vm3, %v133_v42  }
  0x8a   :  { %v154_v44 = vpop.permute.xlu1 %153   ;;  %v144_v45 = vpop.permute.xlu0 %143  }
  0x8b   :  { %190 = vst.msk [vmem:[%s290_s1 + $0x8] sm:$0xff] %vm145_vm4, %v154_v44   ;;  %146 = vst.msk [vmem:[%s290_s1] sm:$0xff] %vm145_vm4, %v144_v45  }

// kernel: unet_forward.28
= control target key start
LH: loop header
LB: loop body
LE: loop exit
PB: predicated region body
PF: predicated region fallthrough
CT: control target
= control target key end

     0   :  { %s537_s18 = smov 0   ;;  %s539_s19 = smov 0   ;;  %s604_s0 = inlined_call_operand.vmem [shape: bf16[2,8,4,64], index: 0, kind: input, shape index: {}]   ;;  %s605_s1 = inlined_call_operand.vmem [shape: f32[2,8,64], index: 1, kind: input, shape index: {}]   ;;  %s606_s2 = inlined_call_operand.vmem [shape: f32[2,8,64], index: 2, kind: input, shape index: {}]   ;;  %s607_s3 = inlined_call_operand.vmem [shape: f32[1,64], index: 3, kind: input, shape index: {}]   ;;  %s608_s4 = inlined_call_operand.vmem [shape: f32[1,64], index: 4, kind: input, shape index: {}]   ;;  %s609_s5 = inlined_call_operand.vmem [shape: bf16[2,8,2,64], index: 5, kind: output, shape index: {}]  }
   0x1   :  { %s541_s20 = smov 0  }
   0x2 LB: > { %s27_s21 = sadd.s32 1, %s501_s19  ;;  %p450_p0 = scmp.ge.s32.totalorder %s505_s20, 1  ;;  %s505_s20 = sphi %s541_s20, %s15_s20   ;;  %s501_s19 = sphi %s539_s19, %s611_s19   ;;  %s497_s18 = sphi %s537_s18, %s610_s18  }
   0x3   : > { %p29_p1 = scmp.ge.s32.totalorder %s27_s21, 2  ;;  %p208_p2 = scmp.lt.s32.totalorder %s505_s20, 3 }
   0x5   : > { %s613_s21 = smov (%p29_p1, %s27_s21), 0  ;;  %p209_p3 = pnand %p450_p0, %p208_p2 }
   0x6   : > { %v262_v0 = vld [vmem:[%s605_s1] sm:$0xff] (!%p209_p3)  ;;  %v263_v1 = vld [vmem:[%s605_s1 + $0x8] sm:$0xff] (!%p209_p3)  ;;  %vm264_vm0 = vcmask (!%p209_p3), 523264   ;;  %p244_p4 = scmp.lt.s32.totalorder (!%p209_p3), %s497_s18, 1  ;;  %v313_v27 = vlaneseq (!%p209_p3)  ;;  %vm356_vm1 = vcmask (!%p209_p3), 516096  }
   0x7   : > { %212 = sbr.rel (%p209_p3) target bundleno = 59 (0x3b), region = 40  ;;  %v274_v2 = vld [vmem:[%s606_s2] sm:$0xff] (!%p209_p3)  ;;  %v265_v3 = vsel (!%p209_p3), %vm264_vm0, %v262_v0, 0.0  ;;  %v266_v4 = vsel (!%p209_p3), %vm264_vm0, %v263_v1, 0.0  ;;  %v275_v5 = vld [vmem:[%s606_s2 + $0x8] sm:$0xff] (!%p209_p3) }
   0x8   : > { %v276_v6 = vsel (!%p209_p3), %vm264_vm0, %v274_v2, 0.0  ;;  %v267_v7 = vadd.f32 (!%p209_p3), %v266_v4, %v265_v3  ;;  %v277_v8 = vsel (!%p209_p3), %vm264_vm0, %v275_v5, 0.0  ;;  %v314_v28 = vshrl.u32 (!%p209_p3), %v313_v27, 7  ;;  %v289_v29 = vld [vmem:[%s607_s3] sm:$0x1] (!%p209_p3) }
   0x9   : > { %v278_v9 = vadd.f32 (!%p209_p3), %v277_v8, %v276_v6  ;;  %v293_v44 = vld [vmem:[%s608_s4] sm:$0x1] (!%p209_p3) }
   0xa   : > { %v268_v10 = vrot.slane (!%p209_p3), %v267_v7, 4  ;;  %v315_v31 = vsub.s32 (!%p209_p3), 0, %v314_v28 }
   0xb   : > { %v279_v11 = vrot.slane (!%p209_p3), %v278_v9, 4 }
   0xc   : > { %v269_v12 = vadd.f32 (!%p209_p3), %v268_v10, %v267_v7 }
   0xd   : > { %v280_v13 = vadd.f32 (!%p209_p3), %v279_v11, %v278_v9 }
   0xe   : > { %v270_v14 = vrot.slane %v269_v12, 2  ;;  %s615_s18 = smov (!%p244_p4, %s497_s18), 1 }
   0xf   : > { %v281_v15 = vrot.slane %v280_v13, 2  ;;  %s456_s30 = sshll.u32 %s615_s18, 4  ;;  %s453_s13 = sshll.u32 %s615_s18, 3 }
  0x10   : > { %v271_v16 = vadd.f32 %v270_v14, %v269_v12  ;;  %s251_s8 = scalar_lea.vmem %s604_s0, %s456_s30  ;;  %s260_s16 = scalar_lea.vmem %s609_s5, %s453_s13 }
  0x11   : > { %v282_v17 = vadd.f32 %v281_v15, %v280_v13  ;;  %v296_v30 = vld [vmem:[%s251_s8] sm:$0x3]  ;;  %v297_v32 = vld [vmem:[%s251_s8 + $0x2] sm:$0x3]  ;;  %v298_v33 = vld [vmem:[%s251_s8 + $0x4] sm:$0x3] }
  0x12   : > { %v272_v18 = vrot.slane %v271_v16, 1  ;;  %v299_v34 = vld [vmem:[%s251_s8 + $0x6] sm:$0x3]  ;;  %v300_v35 = vld [vmem:[%s251_s8 + $0x8] sm:$0x3]  ;;  %v304_v41 = vunpack.c.l.bf16 %v296_v30  ;;  %v305_v42 = vunpack.c.l.bf16 %v297_v32  ;;  %v306_v43 = vunpack.c.l.bf16 %v298_v33 }
  0x13   : > { %v283_v19 = vrot.slane %v282_v17, 1  ;;  %v301_v36 = vld [vmem:[%s251_s8 + $0xa] sm:$0x3]  ;;  %v302_v37 = vld [vmem:[%s251_s8 + $0xc] sm:$0x3]  ;;  %v307_v45 = vunpack.c.l.bf16 %v299_v34  ;;  %v308_v46 = vunpack.c.l.bf16 %v300_v35 }
  0x14   : > { %v273_v20 = vadd.f32 %v272_v18, %v271_v16  ;;  %v303_v39 = vld [vmem:[%s251_s8 + $0xe] sm:$0x3]  ;;  %v309_v47 = vunpack.c.l.bf16 %v301_v36  ;;  %v310_v48 = vunpack.c.l.bf16 %v302_v37 }
  0x15   : > { %v284_v21 = vadd.f32 %v283_v19, %v282_v17  ;;  %v311_v51 = vunpack.c.l.bf16 %v303_v39 }
  0x16   : > { %v285_v22 = vmul.f32 0.0078125, %v273_v20 }
  0x17   : > { %v286_v23 = vmul.f32 0.0078125, %v284_v21 }
  0x18   : > { %v287_v24 = vmul.f32 %v285_v22, %v285_v22 }
  0x1a   : > { %v288_v25 = vsub.f32 %v286_v23, %v287_v24 }
  0x1c   : > { %v290_v26 = vadd.f32 1e-05, %v288_v25 }
  0x1e   : > { %481 = vrsqrt.f32 %v290_v26 }
  0x28   : > { %v482_v38 = vpop.eup %481 }
  0x29   : > { %v292_v40 = vmul.f32 %v482_v38, %v289_v29 }
  0x2b   : > { %v294_v49 = vmul.f32 %v292_v40, %v285_v22  ;;  %v316_v50 = vrot.slane %v292_v40, %v315_v31 }
  0x2d   : > { %v295_v52 = vsub.f32 %v293_v44, %v294_v49  ;;  %v318_v53 = vmul.f32 %v316_v50, %v304_v41  ;;  %v319_v54 = vmul.f32 %v316_v50, %v305_v42  ;;  %v320_v55 = vmul.f32 %v316_v50, %v306_v43 }
  0x2e   : > { %v321_v56 = vmul.f32 %v316_v50, %v307_v45  ;;  %v322_v57 = vmul.f32 %v316_v50, %v308_v46  ;;  %v323_v58 = vmul.f32 %v316_v50, %v309_v47  ;;  %v324_v59 = vmul.f32 %v316_v50, %v310_v48 }
  0x2f   : > { %v330_v60 = vrot.slane %v295_v52, %v315_v31  ;;  %v325_v61 = vmul.f32 %v316_v50, %v311_v51 }
  0x31   : > { %v332_v62 = vadd.f32 %v330_v60, %v318_v53  ;;  %v333_v63 = vadd.f32 %v330_v60, %v319_v54  ;;  %v334_v0 = vadd.f32 %v330_v60, %v320_v55  ;;  %v335_v1 = vadd.f32 %v330_v60, %v321_v56 }
  0x32   : > { %v336_v2 = vadd.f32 %v330_v60, %v322_v57  ;;  %v337_v3 = vadd.f32 %v330_v60, %v323_v58  ;;  %v338_v4 = vadd.f32 %v330_v60, %v324_v59  ;;  %v339_v5 = vadd.f32 %v330_v60, %v325_v61 }
  0x33   : > { %v340_v6 = vmax.f32 %v332_v62, 0.0  ;;  %v341_v7 = vmax.f32 %v333_v63, 0.0  ;;  %v342_v8 = vmax.f32 %v334_v0, 0.0  ;;  %v343_v9 = vmax.f32 %v335_v1, 0.0 }
  0x34   : > { %v344_v10 = vmax.f32 %v336_v2, 0.0  ;;  %v345_v11 = vmax.f32 %v337_v3, 0.0  ;;  %v346_v12 = vmax.f32 %v338_v4, 0.0  ;;  %v347_v13 = vmax.f32 %v339_v5, 0.0 }
  0x35   : > { %v348_v14 = vpack.c.bf16 %v340_v6, %v340_v6  ;;  %v349_v15 = vpack.c.bf16 %v341_v7, %v341_v7  ;;  %v350_v16 = vpack.c.bf16 %v342_v8, %v342_v8  ;;  %v351_v17 = vpack.c.bf16 %v343_v9, %v343_v9 }
  0x36   : > { %v352_v18 = vpack.c.bf16 %v344_v10, %v344_v10  ;;  %v353_v19 = vpack.c.bf16 %v345_v11, %v345_v11  ;;  %v354_v20 = vpack.c.bf16 %v346_v12, %v346_v12  ;;  %v355_v21 = vpack.c.bf16 %v347_v13, %v347_v13 }
  0x37   : > { %357 = vst.msk [vmem:[%s260_s16] sm:$0x1] %vm356_vm1, %v348_v14  ;;  %358 = vst.msk [vmem:[%s260_s16 + $0x1] sm:$0x1] %vm356_vm1, %v349_v15 }
  0x38   : > { %359 = vst.msk [vmem:[%s260_s16 + $0x2] sm:$0x1] %vm356_vm1, %v350_v16  ;;  %360 = vst.msk [vmem:[%s260_s16 + $0x3] sm:$0x1] %vm356_vm1, %v351_v17 }
  0x39   : > { %361 = vst.msk [vmem:[%s260_s16 + $0x4] sm:$0x1] %vm356_vm1, %v352_v18  ;;  %362 = vst.msk [vmem:[%s260_s16 + $0x5] sm:$0x1] %vm356_vm1, %v353_v19 }
  0x3a   : > { %363 = vst.msk [vmem:[%s260_s16 + $0x6] sm:$0x1] %vm356_vm1, %v354_v20  ;;  %364 = vst.msk [vmem:[%s260_s16 + $0x7] sm:$0x1] %vm356_vm1, %v355_v21 }
  0x3b PF: > { %s15_s20 = sadd.s32 1, %s505_s20   ;;  %s610_s18 = smov %s501_s19 }
  0x3c   : > { %p12_p5 = scmp.ge.s32.totalorder %s15_s20, 4   ;;  %s611_s19 = smov %s613_s21 }
  0x3e   :  { %14 = sbr.rel (!%p12_p5) target bundleno = 2 (0x2), region = 70 }

// kernel: unet_forward.27
= control target key start
LH: loop header
LB: loop body
LE: loop exit
PB: predicated region body
PF: predicated region fallthrough
CT: control target
= control target key end

     0   :  { %s1518_s15 = smov 0   ;;  %s1520_s16 = smov 0   ;;  %s1715_s0 = inlined_call_operand.vmem [shape: bf16[2,1,160,24], index: 0, kind: input, shape index: {}]   ;;  %s1716_s1 = inlined_call_operand.vmem [shape: bf16[72,16], index: 1, kind: input, shape index: {}]   ;;  %s1717_s2 = inlined_call_operand.vmem [shape: bf16[2,1,128,16], index: 2, kind: output, shape index: {0}]   ;;  %s1718_s3 = inlined_call_operand.vmem [shape: f32[2,8,16], index: 3, kind: output, shape index: {1}]   ;;  %s1719_s4 = inlined_call_operand.vmem [shape: f32[2,8,16], index: 4, kind: output, shape index: {2}]  }
   0x1   :  { %s1522_s17 = smov 0  }
   0x2 LB: > { %s27_s18 = sadd.s32 1, %s1484_s16  ;;  %p1280_p0 = scmp.ge.s32.totalorder %s1488_s17, 1  ;;  %s1488_s17 = sphi %s1522_s17, %s15_s17   ;;  %s1484_s16 = sphi %s1520_s16, %s1721_s16   ;;  %s1480_s15 = sphi %s1518_s15, %s1720_s15  }
   0x3   : > { %p29_p1 = scmp.ge.s32.totalorder %s27_s18, 2  ;;  %p187_p2 = scmp.lt.s32.totalorder %s1488_s17, 3 }
   0x5   : > { %s1723_s18 = smov (%p29_p1, %s27_s18), 0  ;;  %p188_p3 = pnand %p1280_p0, %p187_p2 }
   0x6   : > { %p229_p4 = scmp.lt.s32.totalorder (!%p188_p3), %s1480_s15, 1  ;;  %v1453_v0 = vld [vmem:[%s1716_s1] sm:$0xff] (!%p188_p3)   ;;  %v1454_v1 = vld [vmem:[%s1716_s1 + $0x8] sm:$0xff] (!%p188_p3)   ;;  %v1456_v2 = vld [vmem:[%s1716_s1 + $0x10] sm:$0xff] (!%p188_p3)   ;;  %s1490_s5 = smov (!%p188_p3), 48   ;;  %vm576_vm0 = vcmask (!%p188_p3), 1043456  }
   0x7   : > { %191 = sbr.rel (%p188_p3) target bundleno = 394 (0x18a), region = 28  ;;  %1371 = vmatprep.subr.bf16.mxu0 (!%p188_p3), %v1453_v0  ;;  %1397 = vmatprep.subr.bf16.mxu1 (!%p188_p3), %v1453_v0  ;;  %v1458_v4 = vld [vmem:[%s1716_s1 + $0x18] sm:$0xff] (!%p188_p3)   ;;  %s1491_s6 = smov (!%p188_p3), 24   ;;  %v1461_v8 = vld [vmem:[%s1716_s1 + $0x20] ss:$0 sps:$4 sm:$0xff] (!%p188_p3)   ;;  %vm320_vm1 = vcmask (!%p188_p3), 195584  }
   0x8   : > { %1372 = vmatpush3.bf16.msra.mxu0 (!%p188_p3), %v1453_v0  ;;  %1402 = vmatpush3.bf16.msra.mxu1 (!%p188_p3), %v1453_v0  ;;  %v578_v12 = vsel (!%p188_p3), %vm576_vm0, %v1461_v8, 0  ;;  %vm409_vm2 = vcmask (!%p188_p3), 392384   ;;  %vm498_vm3 = vcmask (!%p188_p3), 589184   ;;  %vm551_vm4 = vcmask (!%p188_p3), 588800  }
   0x9   : > { %1373 = vmatprep.subr.bf16.mxu0 (!%p188_p3), %v1454_v1  ;;  %1398 = vmatprep.subr.bf16.mxu1 (!%p188_p3), %v1454_v1  ;;  %vm1031_vm5 = vcmask (!%p188_p3), 130048   ;;  %v1492_v54 = vmov (!%p188_p3), 0.0   ;;  %vm741_vm6 = vcmask (!%p188_p3), 125952  }
   0xc   : > { %1374 = vmatpush3.bf16.msra.mxu0 (!%p188_p3), %v1454_v1  ;;  %1403 = vmatpush3.bf16.msra.mxu1 (!%p188_p3), %v1454_v1 }
   0xd   : > { %1375 = vmatprep.subr.bf16.mxu0 (!%p188_p3), %v1456_v2  ;;  %1399 = vmatprep.subr.bf16.mxu1 (!%p188_p3), %v1456_v2 }
   0xe   : > { %s1725_s15 = smov (!%p229_p4, %s1480_s15), 1 }
   0xf   : > { %s1409_s23 = smul.u32 80, %s1725_s15  ;;  %s1284_s9 = sshll.u32 %s1725_s15, 3 }
  0x10   : > { %1376 = vmatpush3.bf16.msra.mxu0 %v1456_v2  ;;  %1404 = vmatpush3.bf16.msra.mxu1 %v1456_v2  ;;  %s1635_s12 = scalar_lea.vmem %s1718_s3, %s1284_s9  ;;  %s1642_s19 = scalar_lea.vmem %s1719_s4, %s1284_s9 }
  0x11   : > { %s1551_s28 = scalar_lea.vmem %s1715_s0, %s1409_s23  ;;  %1377 = vmatprep.subr.bf16.mxu0 %v1458_v4  ;;  %1400 = vmatprep.subr.bf16.mxu1 %v1458_v4  ;;  %1114 = vst.msk [vmem:[%s1635_s12] sm:$0xff] %vm1031_vm5, %v1492_v54  ;;  %1115 = vst.msk [vmem:[%s1642_s19] sm:$0xff] %vm1031_vm5, %v1492_v54  ;;  %s1341_s20 = sshll.u32 %s1725_s15, 6 }
  0x12   : > { %v1437_v3 = vld [vmem:[%s1551_s28 + $0x10] sm:$0xff]   ;;  %v1438_v5 = vld [vmem:[%s1551_s28 + $0x8] sm:$0xff]   ;;  %v1439_v6 = vld [vmem:[%s1551_s28 + $0x18] sm:$0xff]   ;;  %s1650_s23 = scalar_lea.vmem %s1717_s2, %s1341_s20 }
  0x13   : > { %474 = vrot.lane.b32.xlu1 %v1437_v3, %s1490_s5  ;;  %385 = vrot.lane.b32.xlu0 %v1438_v5, %s1491_s6  ;;  %v1440_v7 = vld [vmem:[%s1551_s28 + $0x10] sm:$0xff]   ;;  %v1441_v9 = vld [vmem:[%s1551_s28 + $0x28] sm:$0xff]  }
  0x14   : > { %v1442_v10 = vld [vmem:[%s1551_s28 + $0x18] sm:$0xff]   ;;  %1378 = vmatpush3.bf16.msra.mxu0 %v1458_v4  ;;  %1405 = vmatpush3.bf16.msra.mxu1 %v1458_v4  ;;  %v1443_v11 = vld [vmem:[%s1551_s28 + $0x30] sm:$0xff]   ;;  %v1444_v13 = vld [vmem:[%s1551_s28 + $0x20] sm:$0xff]  }
  0x15   : > { %1407 = vmatprep.subr.msk.bf16.mxu0 %vm576_vm0, %v1461_v8  ;;  %1408 = vmatprep.subr.msk.bf16.mxu1 %vm576_vm0, %v1461_v8  ;;  %v1445_v14 = vld [vmem:[%s1551_s28 + $0x30] sm:$0xff]   ;;  %v1446_v15 = vld [vmem:[%s1551_s28 + $0x20] sm:$0xff]   ;;  %v1447_v16 = vld [vmem:[%s1551_s28 + $0x38] sm:$0xff]  }
  0x16   : > { %v1455_v17 = vld [vmem:[%s1551_s28] sm:$0xff]   ;;  %v1448_v18 = vld [vmem:[%s1551_s28 + $0x28] sm:$0xff]   ;;  %v1460_v21 = vld [vmem:[%s1551_s28 + $0x10] sm:$0xff]  }
  0x17   : > { %476 = vrot.lane.b32.xlu1 %v1439_v6, %s1490_s5  ;;  %387 = vrot.lane.b32.xlu0 %v1440_v7, %s1491_s6  ;;  %v1457_v19 = vld [vmem:[%s1551_s28 + $0x8] sm:$0xff]   ;;  %321 = vst.msk [vmem:[#allocation2] sm:$0xff] %vm320_vm1, %v1455_v17  ;;  %v1459_v20 = vld [vmem:[%s1551_s28 + $0x20] sm:$0xff]   ;;  %323 = vst.msk [vmem:[#allocation2 + $0x10] sm:$0xff] %vm320_vm1, %v1460_v21 }
  0x18   : > { %1380 = vmatpush3.bf16.msra.mxu0 %v578_v12  ;;  %1406 = vmatpush3.bf16.msra.mxu1 %v578_v12  ;;  %322 = vst.msk [vmem:[#allocation2 + $0x8] sm:$0xff] %vm320_vm1, %v1457_v19  ;;  %v1450_v22 = vld [vmem:[%s1551_s28 + $0x40] sm:$0xff]   ;;  %325 = vst.msk [vmem:[#allocation2 + $0x20] sm:$0xff] %vm320_vm1, %v1459_v20  ;;  %v1462_v23 = vld [vmem:[%s1551_s28 + $0x28] sm:$0xff]  }
  0x19   : > { %v1449_v24 = vld [vmem:[%s1551_s28 + $0x38] sm:$0xff]   ;;  %326 = vst.msk [vmem:[#allocation2 + $0x28] sm:$0xff] %vm320_vm1, %v1462_v23  ;;  %v1464_v26 = vld [vmem:[%s1551_s28 + $0x30] sm:$0xff]   ;;  %v1452_v28 = vld [vmem:[%s1551_s28 + $0x48] sm:$0xff]  }
  0x1a   : > { %v1463_v25 = vld [vmem:[%s1551_s28 + $0x18] sm:$0xff]   ;;  %327 = vst.msk [vmem:[#allocation2 + $0x30] sm:$0xff] %vm320_vm1, %v1464_v26  ;;  %v1451_v29 = vld [vmem:[%s1551_s28 + $0x40] sm:$0xff]  }
  0x1b   : > { %393 = vrot.lane.b32.xlu1 %v1441_v9, %s1491_s6  ;;  %389 = vrot.lane.b32.xlu0 %v1442_v10, %s1491_s6  ;;  %324 = vst.msk [vmem:[#allocation2 + $0x18] sm:$0xff] %vm320_vm1, %v1463_v25  ;;  %v1465_v27 = vld [vmem:[%s1551_s28 + $0x38] sm:$0xff]  }
  0x1c   : > { %328 = vst.msk [vmem:[#allocation2 + $0x38] sm:$0xff] %vm320_vm1, %v1465_v27 }
  0x1f   : > { %395 = vrot.lane.b32.xlu1 %v1443_v11, %s1491_s6  ;;  %391 = vrot.lane.b32.xlu0 %v1444_v13, %s1491_s6 }
  0x23   : > { %482 = vrot.lane.b32.xlu1 %v1445_v14, %s1490_s5  ;;  %478 = vrot.lane.b32.xlu0 %v1446_v15, %s1490_s5 }
  0x27   : > { %484 = vrot.lane.b32.xlu1 %v1447_v16, %s1490_s5  ;;  %480 = vrot.lane.b32.xlu0 %v1448_v18, %s1490_s5 }
  0x2b   : > { %399 = vrot.lane.b32.xlu1 %v1450_v22, %s1491_s6  ;;  %397 = vrot.lane.b32.xlu0 %v1449_v24, %s1491_s6 }
  0x2f   : > { %488 = vrot.lane.b32.xlu1 %v1452_v28, %s1490_s5  ;;  %486 = vrot.lane.b32.xlu0 %v1451_v29, %s1490_s5 }
  0x85   : > { %v475_v30 = vpop.permute.xlu1 %474  ;;  %v386_v31 = vpop.permute.xlu0 %385 }
  0x86   : > { %410 = vst.msk [vmem:[#allocation2] sm:$0xff] %vm409_vm2, %v386_v31 }
  0x87   : > { %499 = vst.msk [vmem:[#allocation2] sm:$0xff] %vm498_vm3, %v475_v30 }
  0x89   : > { %v477_v32 = vpop.permute.xlu1 %476  ;;  %v388_v33 = vpop.permute.xlu0 %387 }
  0x8a   : > { %411 = vst.msk [vmem:[#allocation2 + $0x8] sm:$0xff] %vm409_vm2, %v388_v33 }
  0x8b   : > { %500 = vst.msk [vmem:[#allocation2 + $0x8] sm:$0xff] %vm498_vm3, %v477_v32 }
  0x8d   : > { %v394_v34 = vpop.permute.xlu1 %393  ;;  %v390_v35 = vpop.permute.xlu0 %389 }
  0x8e   : > { %414 = vst.msk [vmem:[#allocation2 + $0x20] sm:$0xff] %vm409_vm2, %v394_v34  ;;  %412 = vst.msk [vmem:[#allocation2 + $0x10] sm:$0xff] %vm409_vm2, %v390_v35  ;;  %v507_v36 = vld [vmem:[#allocation2] sm:$0xff] }
  0x8f   : > { %1381 = vmatprep.mubr.msk.bf16.mxu0 %vm551_vm4, %v507_v36 }
  0x91   : > { %v396_v37 = vpop.permute.xlu1 %395  ;;  %v392_v38 = vpop.permute.xlu0 %391 }
  0x92   : > { %415 = vst.msk [vmem:[#allocation2 + $0x28] sm:$0xff] %vm409_vm2, %v396_v37  ;;  %413 = vst.msk [vmem:[#allocation2 + $0x18] sm:$0xff] %vm409_vm2, %v392_v38  ;;  %v508_v39 = vld [vmem:[#allocation2 + $0x8] sm:$0xff] }
  0x93   : > { %1382 = vmatmul.mubr.msk.bf16.vlgmr.msra.gmra.mrb[0].mxu0 %vm551_vm4, %v508_v39 }
  0x95   : > { %v483_v40 = vpop.permute.xlu1 %482  ;;  %v479_v41 = vpop.permute.xlu0 %478 }
  0x96   : > { %503 = vst.msk [vmem:[#allocation2 + $0x20] sm:$0xff] %vm498_vm3, %v483_v40  ;;  %501 = vst.msk [vmem:[#allocation2 + $0x10] sm:$0xff] %vm498_vm3, %v479_v41 }
  0x99   : > { %v485_v42 = vpop.permute.xlu1 %484  ;;  %v481_v43 = vpop.permute.xlu0 %480 }
  0x9a   : > { %504 = vst.msk [vmem:[#allocation2 + $0x28] sm:$0xff] %vm498_vm3, %v485_v42  ;;  %502 = vst.msk [vmem:[#allocation2 + $0x18] sm:$0xff] %vm498_vm3, %v481_v43 }
  0x9d   : > { %v400_v44 = vpop.permute.xlu1 %399  ;;  %v511_v45 = vld [vmem:[#allocation2 + $0x20] sm:$0xff]  ;;  %v398_v46 = vpop.permute.xlu0 %397  ;;  %v509_v47 = vld [vmem:[#allocation2 + $0x10] sm:$0xff] }
  0x9e   : > { %417 = vst.msk [vmem:[#allocation2 + $0x38] sm:$0xff] %vm409_vm2, %v400_v44  ;;  %1389 = vmatprep.mubr.msk.bf16.mxu1 %vm551_vm4, %v511_v45  ;;  %416 = vst.msk [vmem:[#allocation2 + $0x30] sm:$0xff] %vm409_vm2, %v398_v46  ;;  %1385 = vmatprep.mubr.msk.bf16.mxu0 %vm551_vm4, %v509_v47 }
  0xa1   : > { %v489_v48 = vpop.permute.xlu1 %488  ;;  %v512_v49 = vld [vmem:[#allocation2 + $0x28] sm:$0xff]  ;;  %v487_v50 = vpop.permute.xlu0 %486  ;;  %v510_v51 = vld [vmem:[#allocation2 + $0x18] sm:$0xff] }
  0xa2   : > { %506 = vst.msk [vmem:[#allocation2 + $0x38] sm:$0xff] %vm498_vm3, %v489_v48  ;;  %1390 = vmatmul.mubr.msk.bf16.vlgmr.msra.gmra.mrb[0].mxu1 %vm551_vm4, %v512_v49  ;;  %505 = vst.msk [vmem:[#allocation2 + $0x30] sm:$0xff] %vm498_vm3, %v487_v50  ;;  %1386 = vmatmul.mubr.msk.bf16.gmra.mrb[4].mxu0 %vm551_vm4, %v510_v51 }
  0xa9   : > { %v514_v52 = vld [vmem:[#allocation2 + $0x38] sm:$0xff]  ;;  %v513_v53 = vld [vmem:[#allocation2 + $0x30] sm:$0xff] }
  0xaa   : > { %1393 = vmatprep.mubr.msk.bf16.mxu1 %vm551_vm4, %v513_v53 }
  0xab   : > { %1394 = vmatmul.mubr.msk.bf16.gmra.mrb[4].mxu1 %vm551_vm4, %v514_v52 }
 0x166   : > { %v1383_v55 = vpop.f32.mrb[0].mxu0 }
 0x167   : > { %v1344_v56 = vpack.c.bf16 %v1383_v55, %v1383_v55  ;;  %v1035_v57 = vsel %vm1031_vm5, %v1383_v55, 0.0  ;;  %v1065_v58 = vmul.f32 %v1383_v55, %v1383_v55  ;;  %v614_v59 = vpop.f32.mrb[1].mxu0 }
 0x168   : > { %v1342_v60 = vpack.c.bf16 %v614_v59, %v614_v59  ;;  %v1032_v61 = vsel %vm1031_vm5, %v614_v59, 0.0  ;;  %v1063_v62 = vmul.f32 %v614_v59, %v614_v59  ;;  %v1384_v63 = vpop.f32.mrb[2].mxu0 }
 0x169   : > { %744 = vst.msk [vmem:[%s1650_s23 + $0x8] sm:$0xf] %vm741_vm6, %v1344_v56  ;;  %v1082_v0 = vsel %vm1031_vm5, %v1065_v58, 0.0  ;;  %v1036_v1 = vadd.f32 %v1035_v57, %v1032_v61  ;;  %v1345_v2 = vpack.c.bf16 %v1384_v63, %v1384_v63  ;;  %v617_v3 = vpop.f32.mrb[3].mxu0  ;;  %v1116_v56 = vld [vmem:[%s1635_s12] sm:$0xff] }
 0x16a   : > { %742 = vst.msk [vmem:[%s1650_s23] sm:$0xf] %vm741_vm6, %v1342_v60  ;;  %v1079_v4 = vsel %vm1031_vm5, %v1063_v62, 0.0  ;;  %v1343_v5 = vpack.c.bf16 %v617_v3, %v617_v3  ;;  %v1119_v61 = vld [vmem:[%s1642_s19] sm:$0xff] }
 0x16b   : > { %v1083_v6 = vadd.f32 %v1082_v0, %v1079_v4  ;;  %745 = vst.msk [vmem:[%s1650_s23 + $0xc] sm:$0xf] %vm741_vm6, %v1345_v2 }
 0x16c   : > { %743 = vst.msk [vmem:[%s1650_s23 + $0x4] sm:$0xf] %vm741_vm6, %v1343_v5 }
 0x175   : > { %v1391_v7 = vpop.f32.mrb[0].mxu1  ;;  %v1387_v8 = vpop.f32.mrb[4].mxu0 }
 0x176   : > { %v1352_v9 = vpack.c.bf16 %v1391_v7, %v1391_v7  ;;  %v646_v10 = vpop.f32.mrb[1].mxu1  ;;  %v1348_v11 = vpack.c.bf16 %v1387_v8, %v1387_v8  ;;  %v630_v12 = vpop.f32.mrb[5].mxu0  ;;  %v1069_v15 = vmul.f32 %v1387_v8, %v1387_v8  ;;  %v1043_v21 = vsel %vm1031_vm5, %v1387_v8, 0.0 }
 0x177   : > { %v1350_v13 = vpack.c.bf16 %v646_v10, %v646_v10  ;;  %v1392_v14 = vpop.f32.mrb[2].mxu1  ;;  %v1346_v16 = vpack.c.bf16 %v630_v12, %v630_v12  ;;  %v1039_v17 = vsel %vm1031_vm5, %v630_v12, 0.0  ;;  %v1067_v18 = vmul.f32 %v630_v12, %v630_v12  ;;  %v1388_v19 = vpop.f32.mrb[6].mxu0 }
 0x178   : > { %752 = vst.msk [vmem:[%s1650_s23 + $0x28] sm:$0xf] %vm741_vm6, %v1352_v9  ;;  %v649_v20 = vpop.f32.mrb[3].mxu1  ;;  %748 = vst.msk [vmem:[%s1650_s23 + $0x18] sm:$0xf] %vm741_vm6, %v1348_v11  ;;  %v1040_v22 = vadd.f32 %v1039_v17, %v1036_v1  ;;  %v1071_v23 = vmul.f32 %v646_v10, %v646_v10  ;;  %v633_v24 = vpop.f32.mrb[7].mxu0  ;;  %v1349_v26 = vpack.c.bf16 %v1388_v19, %v1388_v19 }
 0x179   : > { %750 = vst.msk [vmem:[%s1650_s23 + $0x20] sm:$0xf] %vm741_vm6, %v1350_v13  ;;  %746 = vst.msk [vmem:[%s1650_s23 + $0x10] sm:$0xf] %vm741_vm6, %v1346_v16  ;;  %v1086_v25 = vsel %vm1031_vm5, %v1067_v18, 0.0  ;;  %v1353_v27 = vpack.c.bf16 %v1392_v14, %v1392_v14  ;;  %v1347_v28 = vpack.c.bf16 %v633_v24, %v633_v24  ;;  %v1351_v31 = vpack.c.bf16 %v649_v20, %v649_v20 }
 0x17a   : > { %v1087_v29 = vadd.f32 %v1086_v25, %v1083_v6  ;;  %v1044_v30 = vadd.f32 %v1043_v21, %v1040_v22  ;;  %v1090_v32 = vsel %vm1031_vm5, %v1069_v15, 0.0  ;;  %v1073_v33 = vmul.f32 %v1391_v7, %v1391_v7  ;;  %749 = vst.msk [vmem:[%s1650_s23 + $0x1c] sm:$0xf] %vm741_vm6, %v1349_v26 }
 0x17b   : > { %v1047_v34 = vsel %vm1031_vm5, %v646_v10, 0.0  ;;  %753 = vst.msk [vmem:[%s1650_s23 + $0x2c] sm:$0xf] %vm741_vm6, %v1353_v27  ;;  %747 = vst.msk [vmem:[%s1650_s23 + $0x14] sm:$0xf] %vm741_vm6, %v1347_v28  ;;  %v1051_v37 = vsel %vm1031_vm5, %v1391_v7, 0.0 }
 0x17c   : > { %v1048_v35 = vadd.f32 %v1047_v34, %v1044_v30  ;;  %v1091_v36 = vadd.f32 %v1090_v32, %v1087_v29  ;;  %751 = vst.msk [vmem:[%s1650_s23 + $0x24] sm:$0xf] %vm741_vm6, %v1351_v31  ;;  %v1094_v38 = vsel %vm1031_vm5, %v1071_v23, 0.0  ;;  %v1098_v42 = vsel %vm1031_vm5, %v1073_v33, 0.0 }
 0x17e   : > { %v1095_v39 = vadd.f32 %v1094_v38, %v1091_v36  ;;  %v1395_v40 = vpop.f32.mrb[4].mxu1  ;;  %v1052_v41 = vadd.f32 %v1051_v37, %v1048_v35 }
 0x17f   : > { %v1356_v43 = vpack.c.bf16 %v1395_v40, %v1395_v40  ;;  %v1077_v44 = vmul.f32 %v1395_v40, %v1395_v40  ;;  %v662_v45 = vpop.f32.mrb[5].mxu1  ;;  %v1059_v54 = vsel %vm1031_vm5, %v1395_v40, 0.0 }
 0x180   : > { %v1354_v46 = vpack.c.bf16 %v662_v45, %v662_v45  ;;  %v1055_v47 = vsel %vm1031_vm5, %v662_v45, 0.0  ;;  %v1075_v48 = vmul.f32 %v662_v45, %v662_v45  ;;  %v1099_v49 = vadd.f32 %v1098_v42, %v1095_v39  ;;  %v1396_v50 = vpop.f32.mrb[6].mxu1 }
 0x181   : > { %756 = vst.msk [vmem:[%s1650_s23 + $0x38] sm:$0xf] %vm741_vm6, %v1356_v43  ;;  %v1056_v51 = vadd.f32 %v1055_v47, %v1052_v41  ;;  %v1357_v52 = vpack.c.bf16 %v1396_v50, %v1396_v50  ;;  %v665_v53 = vpop.f32.mrb[7].mxu1  ;;  %v1106_v60 = vsel %vm1031_vm5, %v1077_v44, 0.0 }
 0x182   : > { %754 = vst.msk [vmem:[%s1650_s23 + $0x30] sm:$0xf] %vm741_vm6, %v1354_v46  ;;  %v1102_v55 = vsel %vm1031_vm5, %v1075_v48, 0.0  ;;  %v1355_v57 = vpack.c.bf16 %v665_v53, %v665_v53 }
 0x183   : > { %v1060_v58 = vadd.f32 %v1059_v54, %v1056_v51  ;;  %v1103_v59 = vadd.f32 %v1102_v55, %v1099_v49  ;;  %757 = vst.msk [vmem:[%s1650_s23 + $0x3c] sm:$0xf] %vm741_vm6, %v1357_v52 }
 0x184   : > { %755 = vst.msk [vmem:[%s1650_s23 + $0x34] sm:$0xf] %vm741_vm6, %v1355_v57 }
 0x185   : > { %v1107_v62 = vadd.f32 %v1106_v60, %v1103_v59  ;;  %v1117_v63 = vadd.f32 %v1116_v56, %v1060_v58 }
 0x187   : > { %1118 = vst.msk [vmem:[%s1635_s12] sm:$0xff] %vm1031_vm5, %v1117_v63  ;;  %v1120_v0 = vadd.f32 %v1119_v61, %v1107_v62 }
 0x189   : > { %1121 = vst.msk [vmem:[%s1642_s19] sm:$0xff] %vm1031_vm5, %v1120_v0 }
 0x18a PF: > { %s15_s17 = sadd.s32 1, %s1488_s17   ;;  %s1720_s15 = smov %s1484_s16 }
 0x18b   : > { %p12_p5 = scmp.ge.s32.totalorder %s15_s17, 4   ;;  %s1721_s16 = smov %s1723_s18 }
 0x18d   :  { %14 = sbr.rel (!%p12_p5) target bundleno = 2 (0x2), region = 86 }

// kernel: unet_forward.29
= control target key start
LH: loop header
LB: loop body
LE: loop exit
PB: predicated region body
PF: predicated region fallthrough
CT: control target
= control target key end

     0   :  { %s1542_s15 = smov 0   ;;  %s1544_s16 = smov 0   ;;  %s1777_s0 = inlined_call_operand.vmem [shape: bf16[2,1,160,48], index: 0, kind: input, shape index: {}]   ;;  %s1778_s1 = inlined_call_operand.vmem [shape: bf16[144,16], index: 1, kind: input, shape index: {}]   ;;  %s1779_s2 = inlined_call_operand.vmem [shape: bf16[2,1,128,16], index: 2, kind: output, shape index: {0}]   ;;  %s1780_s3 = inlined_call_operand.vmem [shape: f32[2,8,16], index: 3, kind: output, shape index: {1}]   ;;  %s1781_s4 = inlined_call_operand.vmem [shape: f32[2,8,16], index: 4, kind: output, shape index: {2}]  }
   0x1   :  { %s1546_s17 = smov 0  }
   0x2 LB: > { %s27_s18 = sadd.s32 1, %s1507_s16  ;;  %p1327_p0 = scmp.ge.s32.totalorder %s1511_s17, 1  ;;  %s1511_s17 = sphi %s1546_s17, %s15_s17   ;;  %s1507_s16 = sphi %s1544_s16, %s1783_s16   ;;  %s1503_s15 = sphi %s1542_s15, %s1782_s15  }
   0x3   : > { %p29_p1 = scmp.ge.s32.totalorder %s27_s18, 2  ;;  %p187_p2 = scmp.lt.s32.totalorder %s1511_s17, 3 }
   0x5   : > { %s1785_s18 = smov (%p29_p1, %s27_s18), 0  ;;  %p188_p3 = pnand %p1327_p0, %p187_p2 }
   0x6   : > { %p229_p4 = scmp.lt.s32.totalorder (!%p188_p3), %s1503_s15, 1  ;;  %v1472_v0 = vld [vmem:[%s1778_s1] sm:$0xff] (!%p188_p3)   ;;  %v1513_v1 = vmov (!%p188_p3), 0   ;;  %v1473_v2 = vld [vmem:[%s1778_s1 + $0x8] sm:$0xff] (!%p188_p3)   ;;  %v1474_v3 = vld [vmem:[%s1778_s1 + $0x10] sm:$0xff] (!%p188_p3)   ;;  %s1514_s5 = smov (!%p188_p3), 48  }
   0x7   : > { %191 = sbr.rel (%p188_p3) target bundleno = 401 (0x191), region = 28  ;;  %628 = vmatprep.subr.bf16.mxu0 (!%p188_p3), %v1513_v1  ;;  %1409 = vmatprep.subr.bf16.mxu1 (!%p188_p3), %v1513_v1  ;;  %v1475_v6 = vld [vmem:[%s1778_s1 + $0x18] sm:$0xff] (!%p188_p3)   ;;  %v1476_v9 = vld [vmem:[%s1778_s1 + $0x20] sm:$0xff] (!%p188_p3)   ;;  %s1515_s8 = smov (!%p188_p3), 96   ;;  %v1477_v12 = vld [vmem:[%s1778_s1 + $0x28] sm:$0xff] (!%p188_p3)   ;;  %vm320_vm0 = vcmask (!%p188_p3), 392192  }
   0x8   : > { %629 = vmatpush1.bf16.msra.mxu0 (!%p188_p3), %v1472_v0  ;;  %1418 = vmatpush1.bf16.msra.mxu1 (!%p188_p3), %v1472_v0  ;;  %v1480_v21 = vld [vmem:[%s1778_s1 + $0x30] sm:$0xff] (!%p188_p3)   ;;  %v1482_v24 = vld [vmem:[%s1778_s1 + $0x38] sm:$0xff] (!%p188_p3)   ;;  %v1483_v26 = vld [vmem:[%s1778_s1 + $0x40] sm:$0xff] (!%p188_p3)   ;;  %vm409_vm1 = vcmask (!%p188_p3), 785792   ;;  %vm498_vm2 = vcmask (!%p188_p3), 1048320   ;;  %vm500_vm3 = vcmask (!%p188_p3), 130048  }
   0x9   : > { %630 = vmatprep.subr.bf16.mxu0 (!%p188_p3), %v1513_v1  ;;  %1410 = vmatprep.subr.bf16.mxu1 (!%p188_p3), %v1513_v1  ;;  %vm789_vm4 = vcmask (!%p188_p3), 125952  }
   0xc   : > { %631 = vmatpush1.bf16.msra.mxu0 (!%p188_p3), %v1473_v2  ;;  %1419 = vmatpush1.bf16.msra.mxu1 (!%p188_p3), %v1473_v2  ;;  %v1516_v2 = vmov (!%p188_p3), 0.0  }
   0xd   : > { %632 = vmatprep.subr.bf16.mxu0 (!%p188_p3), %v1513_v1  ;;  %1411 = vmatprep.subr.bf16.mxu1 (!%p188_p3), %v1513_v1 }
   0xe   : > { %s1787_s15 = smov (!%p229_p4, %s1503_s15), 1 }
   0xf   : > { %s1427_s23 = smul.u32 80, %s1787_s15  ;;  %s1331_s21 = sshll.u32 %s1787_s15, 3 }
  0x10   : > { %633 = vmatpush1.bf16.msra.mxu0 %v1474_v3  ;;  %1420 = vmatpush1.bf16.msra.mxu1 %v1474_v3  ;;  %s1697_s24 = scalar_lea.vmem %s1780_s3, %s1331_s21  ;;  %s1704_s27 = scalar_lea.vmem %s1781_s4, %s1331_s21 }
  0x11   : > { %s1576_s26 = scalar_lea.vmem %s1777_s0, %s1427_s23  ;;  %634 = vmatprep.subr.bf16.mxu0 %v1513_v1  ;;  %1412 = vmatprep.subr.bf16.mxu1 %v1513_v1  ;;  %1161 = vst.msk [vmem:[%s1697_s24] sm:$0xff] %vm500_vm3, %v1516_v2  ;;  %1162 = vst.msk [vmem:[%s1704_s27] sm:$0xff] %vm500_vm3, %v1516_v2  ;;  %s1392_s28 = sshll.u32 %s1787_s15, 6 }
  0x12   : > { %v1456_v4 = vld [vmem:[%s1576_s26 + $0x10] sm:$0xff]   ;;  %v1457_v5 = vld [vmem:[%s1576_s26 + $0x8] sm:$0xff]   ;;  %v1462_v11 = vld [vmem:[%s1576_s26 + $0x18] sm:$0xff]  }
  0x13   : > { %387 = vrot.lane.b32.xlu1 %v1456_v4, %s1514_s5  ;;  %v1458_v7 = vld [vmem:[%s1576_s26 + $0x28] sm:$0xff]   ;;  %385 = vrot.lane.b32.xlu0 %v1457_v5, %s1514_s5  ;;  %v1459_v8 = vld [vmem:[%s1576_s26 + $0x10] sm:$0xff]  }
  0x14   : > { %v1460_v10 = vld [vmem:[%s1576_s26 + $0x30] sm:$0xff]   ;;  %635 = vmatpush1.bf16.msra.mxu0 %v1475_v6  ;;  %1421 = vmatpush1.bf16.msra.mxu1 %v1475_v6  ;;  %v1464_v14 = vld [vmem:[%s1576_s26 + $0x18] sm:$0xff]   ;;  %v1466_v16 = vld [vmem:[%s1576_s26 + $0x20] sm:$0xff]  }
  0x15   : > { %636 = vmatprep.subr.bf16.mxu0 %v1513_v1  ;;  %1413 = vmatprep.subr.bf16.mxu1 %v1513_v1  ;;  %v1461_v13 = vld [vmem:[%s1576_s26 + $0x30] sm:$0xff]   ;;  %v1463_v15 = vld [vmem:[%s1576_s26 + $0x38] sm:$0xff]   ;;  %v1478_v18 = vld [vmem:[%s1576_s26 + $0x8] sm:$0xff]  }
  0x16   : > { %v1465_v17 = vld [vmem:[%s1576_s26 + $0x38] sm:$0xff]   ;;  %v1468_v19 = vld [vmem:[%s1576_s26 + $0x20] sm:$0xff]   ;;  %322 = vst.msk [vmem:[#allocation2 + $0x10] sm:$0xff] %vm320_vm0, %v1478_v18  ;;  %v1469_v25 = vld [vmem:[%s1576_s26 + $0x28] sm:$0xff]  }
  0x17   : > { %393 = vrot.lane.b32.xlu1 %v1458_v7, %s1514_s5  ;;  %474 = vrot.lane.b32.xlu0 %v1459_v8, %s1515_s8  ;;  %v1479_v20 = vld [vmem:[%s1576_s26] sm:$0xff]   ;;  %v1484_v27 = vld [vmem:[%s1576_s26 + $0x28] sm:$0xff]  }
  0x18   : > { %637 = vmatpush1.bf16.msra.mxu0 %v1476_v9  ;;  %1422 = vmatpush1.bf16.msra.mxu1 %v1476_v9  ;;  %321 = vst.msk [vmem:[#allocation2] sm:$0xff] %vm320_vm0, %v1479_v20  ;;  %v1481_v22 = vld [vmem:[%s1576_s26 + $0x20] sm:$0xff]   ;;  %v1485_v28 = vld [vmem:[%s1576_s26 + $0x10] sm:$0xff]   ;;  %326 = vst.msk [vmem:[#allocation2 + $0x50] sm:$0xff] %vm320_vm0, %v1484_v27 }
  0x19   : > { %638 = vmatprep.subr.bf16.mxu0 %v1513_v1  ;;  %1414 = vmatprep.subr.bf16.mxu1 %v1513_v1  ;;  %v1467_v23 = vld [vmem:[%s1576_s26 + $0x40] sm:$0xff]   ;;  %325 = vst.msk [vmem:[#allocation2 + $0x40] sm:$0xff] %vm320_vm0, %v1481_v22  ;;  %v1486_v29 = vld [vmem:[%s1576_s26 + $0x30] sm:$0xff]   ;;  %323 = vst.msk [vmem:[#allocation2 + $0x20] sm:$0xff] %vm320_vm0, %v1485_v28 }
  0x1a   : > { %v1487_v30 = vld [vmem:[%s1576_s26 + $0x18] sm:$0xff]   ;;  %v1470_v31 = vld [vmem:[%s1576_s26 + $0x48] sm:$0xff]   ;;  %327 = vst.msk [vmem:[#allocation2 + $0x60] sm:$0xff] %vm320_vm0, %v1486_v29  ;;  %v1471_v33 = vld [vmem:[%s1576_s26 + $0x40] sm:$0xff]  }
  0x1b   : > { %482 = vrot.lane.b32.xlu1 %v1460_v10, %s1515_s8  ;;  %476 = vrot.lane.b32.xlu0 %v1462_v11, %s1515_s8  ;;  %v1488_v32 = vld [vmem:[%s1576_s26 + $0x38] sm:$0xff]   ;;  %324 = vst.msk [vmem:[#allocation2 + $0x30] sm:$0xff] %vm320_vm0, %v1487_v30 }
  0x1c   : > { %639 = vmatpush1.bf16.msra.mxu0 %v1477_v12  ;;  %1423 = vmatpush1.bf16.msra.mxu1 %v1477_v12  ;;  %328 = vst.msk [vmem:[#allocation2 + $0x70] sm:$0xff] %vm320_vm0, %v1488_v32 }
  0x1d   : > { %640 = vmatprep.subr.bf16.mxu0 %v1513_v1  ;;  %1415 = vmatprep.subr.bf16.mxu1 %v1513_v1 }
  0x1f   : > { %395 = vrot.lane.b32.xlu1 %v1461_v13, %s1514_s5  ;;  %389 = vrot.lane.b32.xlu0 %v1464_v14, %s1514_s5 }
  0x20   : > { %641 = vmatpush1.bf16.msra.mxu0 %v1480_v21  ;;  %1424 = vmatpush1.bf16.msra.mxu1 %v1480_v21 }
  0x21   : > { %642 = vmatprep.subr.bf16.mxu0 %v1513_v1  ;;  %1416 = vmatprep.subr.bf16.mxu1 %v1513_v1 }
  0x23   : > { %484 = vrot.lane.b32.xlu1 %v1463_v15, %s1515_s8  ;;  %478 = vrot.lane.b32.xlu0 %v1466_v16, %s1515_s8 }
  0x24   : > { %643 = vmatpush1.bf16.msra.mxu0 %v1482_v24  ;;  %1425 = vmatpush1.bf16.msra.mxu1 %v1482_v24 }
  0x25   : > { %644 = vmatprep.subr.bf16.mxu0 %v1513_v1  ;;  %1417 = vmatprep.subr.bf16.mxu1 %v1513_v1 }
  0x27   : > { %397 = vrot.lane.b32.xlu1 %v1465_v17, %s1514_s5  ;;  %391 = vrot.lane.b32.xlu0 %v1468_v19, %s1514_s5 }
  0x28   : > { %645 = vmatpush1.bf16.msra.mxu0 %v1483_v26  ;;  %1426 = vmatpush1.bf16.msra.mxu1 %v1483_v26 }
  0x2b   : > { %486 = vrot.lane.b32.xlu1 %v1467_v23, %s1515_s8  ;;  %480 = vrot.lane.b32.xlu0 %v1469_v25, %s1515_s8 }
  0x2f   : > { %488 = vrot.lane.b32.xlu1 %v1470_v31, %s1515_s8  ;;  %399 = vrot.lane.b32.xlu0 %v1471_v33, %s1514_s5  ;;  %s1712_s5 = scalar_lea.vmem %s1779_s2, %s1392_s28 }
  0x85   : > { %v388_v34 = vpop.permute.xlu1 %387  ;;  %v386_v35 = vpop.permute.xlu0 %385 }
  0x86   : > { %411 = vst.msk [vmem:[#allocation2 + $0x10] sm:$0xff] %vm409_vm1, %v388_v34  ;;  %410 = vst.msk [vmem:[#allocation2] sm:$0xff] %vm409_vm1, %v386_v35 }
  0x89   : > { %v394_v36 = vpop.permute.xlu1 %393  ;;  %v475_v37 = vpop.permute.xlu0 %474 }
  0x8a   : > { %414 = vst.msk [vmem:[#allocation2 + $0x40] sm:$0xff] %vm409_vm1, %v394_v36 }
  0x8b   : > { %499 = vst.msk [vmem:[#allocation2] sm:$0xff] %vm498_vm2, %v475_v37 }
  0x8c   : > { %501 = vst.msk [vmem:[#allocation2 + $0x8] sm:$0xff] %vm500_vm3, %v475_v37 }
  0x8d   : > { %v483_v38 = vpop.permute.xlu1 %482  ;;  %v477_v39 = vpop.permute.xlu0 %476 }
  0x8e   : > { %508 = vst.msk [vmem:[#allocation2 + $0x40] sm:$0xff] %vm498_vm2, %v483_v38  ;;  %502 = vst.msk [vmem:[#allocation2 + $0x10] sm:$0xff] %vm498_vm2, %v477_v39 }
  0x8f   : > { %509 = vst.msk [vmem:[#allocation2 + $0x48] sm:$0xff] %vm500_vm3, %v483_v38  ;;  %503 = vst.msk [vmem:[#allocation2 + $0x18] sm:$0xff] %vm500_vm3, %v477_v39 }
  0x91   : > { %v396_v40 = vpop.permute.xlu1 %395  ;;  %v390_v43 = vpop.permute.xlu0 %389 }
  0x92   : > { %415 = vst.msk [vmem:[#allocation2 + $0x50] sm:$0xff] %vm409_vm1, %v396_v40  ;;  %v516_v42 = vld [vmem:[#allocation2] sm:$0xff]  ;;  %412 = vst.msk [vmem:[#allocation2 + $0x20] sm:$0xff] %vm409_vm1, %v390_v43 }
  0x93   : > { %v517_v41 = vld [vmem:[#allocation2 + $0x8] sm:$0xff] }
  0x94   : > { %1366 = vmatprep.mubr.msk.bf16.mxu0 %vm500_vm3, %v517_v41 }
  0x95   : > { %661 = vmatmul.mubr.bf16.vlgmr.msra.gmra.mrb[0].mxu0 %v516_v42  ;;  %v485_v44 = vpop.permute.xlu1 %484  ;;  %v524_v46 = vld [vmem:[#allocation2 + $0x40] sm:$0xff]  ;;  %v479_v47 = vpop.permute.xlu0 %478  ;;  %v518_v50 = vld [vmem:[#allocation2 + $0x10] sm:$0xff] }
  0x96   : > { %v525_v45 = vld [vmem:[#allocation2 + $0x48] sm:$0xff]  ;;  %510 = vst.msk [vmem:[#allocation2 + $0x50] sm:$0xff] %vm498_vm2, %v485_v44  ;;  %v519_v48 = vld [vmem:[#allocation2 + $0x18] sm:$0xff]  ;;  %504 = vst.msk [vmem:[#allocation2 + $0x20] sm:$0xff] %vm498_vm2, %v479_v47 }
  0x97   : > { %511 = vst.msk [vmem:[#allocation2 + $0x58] sm:$0xff] %vm500_vm3, %v485_v44  ;;  %1370 = vmatprep.mubr.msk.bf16.mxu1 %vm500_vm3, %v525_v45  ;;  %505 = vst.msk [vmem:[#allocation2 + $0x28] sm:$0xff] %vm500_vm3, %v479_v47  ;;  %1367 = vmatprep.mubr.msk.bf16.mxu0 %vm500_vm3, %v519_v48 }
  0x98   : > { %693 = vmatmul.mubr.bf16.vlgmr.msra.gmra.mrb[0].mxu1 %v524_v46 }
  0x99   : > { %v398_v49 = vpop.permute.xlu1 %397  ;;  %v392_v51 = vpop.permute.xlu0 %391 }
  0x9a   : > { %416 = vst.msk [vmem:[#allocation2 + $0x60] sm:$0xff] %vm409_vm1, %v398_v49  ;;  %413 = vst.msk [vmem:[#allocation2 + $0x30] sm:$0xff] %vm409_vm1, %v392_v51 }
  0x9d   : > { %669 = vmatmul.mubr.bf16.gmra.mrb[4].mxu0 %v518_v50  ;;  %v487_v52 = vpop.permute.xlu1 %486  ;;  %v526_v54 = vld [vmem:[#allocation2 + $0x50] sm:$0xff]  ;;  %v481_v55 = vpop.permute.xlu0 %480  ;;  %v520_v57 = vld [vmem:[#allocation2 + $0x20] sm:$0xff] }
  0x9e   : > { %v527_v53 = vld [vmem:[#allocation2 + $0x58] sm:$0xff]  ;;  %512 = vst.msk [vmem:[#allocation2 + $0x60] sm:$0xff] %vm498_vm2, %v487_v52  ;;  %v521_v56 = vld [vmem:[#allocation2 + $0x28] sm:$0xff]  ;;  %506 = vst.msk [vmem:[#allocation2 + $0x30] sm:$0xff] %vm498_vm2, %v481_v55 }
  0x9f   : > { %513 = vst.msk [vmem:[#allocation2 + $0x68] sm:$0xff] %vm500_vm3, %v487_v52  ;;  %1371 = vmatprep.mubr.msk.bf16.mxu1 %vm500_vm3, %v527_v53  ;;  %507 = vst.msk [vmem:[#allocation2 + $0x38] sm:$0xff] %vm500_vm3, %v481_v55  ;;  %1368 = vmatprep.mubr.msk.bf16.mxu0 %vm500_vm3, %v521_v56 }
  0xa0   : > { %701 = vmatmul.mubr.bf16.gmra.mrb[4].mxu1 %v526_v54 }
  0xa1   : > { %v489_v58 = vpop.permute.xlu1 %488  ;;  %v400_v59 = vpop.permute.xlu0 %399 }
  0xa2   : > { %515 = vst.msk [vmem:[#allocation2 + $0x78] sm:$0xff] %vm500_vm3, %v489_v58 }
  0xa3   : > { %417 = vst.msk [vmem:[#allocation2 + $0x70] sm:$0xff] %vm409_vm1, %v400_v59 }
  0xa4   : > { %514 = vst.msk [vmem:[#allocation2 + $0x70] sm:$0xff] %vm498_vm2, %v489_v58 }
  0xa5   : > { %677 = vmatmul.mubr.bf16.gmra.mrb[8].mxu0 %v520_v57  ;;  %v528_v61 = vld [vmem:[#allocation2 + $0x60] sm:$0xff]  ;;  %v522_v63 = vld [vmem:[#allocation2 + $0x30] sm:$0xff] }
  0xa6   : > { %v529_v60 = vld [vmem:[#allocation2 + $0x68] sm:$0xff]  ;;  %v523_v62 = vld [vmem:[#allocation2 + $0x38] sm:$0xff] }
  0xa7   : > { %1372 = vmatprep.mubr.msk.bf16.mxu1 %vm500_vm3, %v529_v60  ;;  %1369 = vmatprep.mubr.msk.bf16.mxu0 %vm500_vm3, %v523_v62 }
  0xa8   : > { %709 = vmatmul.mubr.bf16.gmra.mrb[8].mxu1 %v528_v61 }
  0xa9   : > { %v531_v0 = vld [vmem:[#allocation2 + $0x78] sm:$0xff] }
  0xaa   : > { %1373 = vmatprep.mubr.msk.bf16.mxu1 %vm500_vm3, %v531_v0 }
  0xab   : > { %v530_v1 = vld [vmem:[#allocation2 + $0x70] sm:$0xff] }
  0xad   : > { %685 = vmatmul.mubr.bf16.gmra.mrb[12].mxu0 %v522_v63 }
  0xb0   : > { %717 = vmatmul.mubr.bf16.gmra.mrb[12].mxu1 %v530_v1 }
 0x168   : > { %v662_v3 = vpop.f32.mrb[0].mxu0 }
 0x169   : > { %v1393_v4 = vpack.c.bf16 %v662_v3, %v662_v3  ;;  %v664_v5 = vpop.f32.mrb[1].mxu0  ;;  %v1110_v15 = vmul.f32 %v662_v3, %v662_v3  ;;  %v1079_v17 = vsel %vm500_vm3, %v662_v3, 0.0 }
 0x16a   : > { %v665_v6 = vpop.f32.mrb[2].mxu0 }
 0x16b   : > { %790 = vst.msk [vmem:[%s1712_s5] sm:$0xf] %vm789_vm4, %v1393_v4  ;;  %v1394_v7 = vpack.c.bf16 %v665_v6, %v665_v6  ;;  %v667_v8 = vpop.f32.mrb[3].mxu0  ;;  %v694_v9 = vpop.f32.mrb[0].mxu1  ;;  %v1126_v24 = vsel %vm500_vm3, %v1110_v15, 0.0 }
 0x16c   : > { %v1401_v10 = vpack.c.bf16 %v694_v9, %v694_v9  ;;  %v696_v11 = vpop.f32.mrb[1].mxu1  ;;  %v1118_v53 = vmul.f32 %v694_v9, %v694_v9  ;;  %v1094_v60 = vsel %vm500_vm3, %v694_v9, 0.0 }
 0x16d   : > { %791 = vst.msk [vmem:[%s1712_s5 + $0x4] sm:$0xf] %vm789_vm4, %v1394_v7  ;;  %v697_v12 = vpop.f32.mrb[2].mxu1 }
 0x16e   : > { %798 = vst.msk [vmem:[%s1712_s5 + $0x20] sm:$0xf] %vm789_vm4, %v1401_v10  ;;  %v1402_v13 = vpack.c.bf16 %v697_v12, %v697_v12  ;;  %v699_v14 = vpop.f32.mrb[3].mxu1  ;;  %v1141_v6 = vsel %vm500_vm3, %v1118_v53, 0.0 }
 0x170   : > { %799 = vst.msk [vmem:[%s1712_s5 + $0x24] sm:$0xf] %vm789_vm4, %v1402_v13  ;;  %v670_v16 = vpop.f32.mrb[4].mxu0 }
 0x171   : > { %v1395_v18 = vpack.c.bf16 %v670_v16, %v670_v16  ;;  %v1082_v19 = vsel %vm500_vm3, %v670_v16, 0.0  ;;  %v1112_v20 = vmul.f32 %v670_v16, %v670_v16  ;;  %v672_v21 = vpop.f32.mrb[5].mxu0 }
 0x172   : > { %v1083_v22 = vadd.f32 %v1082_v19, %v1079_v17  ;;  %v673_v23 = vpop.f32.mrb[6].mxu0 }
 0x173   : > { %792 = vst.msk [vmem:[%s1712_s5 + $0x8] sm:$0xf] %vm789_vm4, %v1395_v18  ;;  %v1129_v25 = vsel %vm500_vm3, %v1112_v20, 0.0  ;;  %v1396_v26 = vpack.c.bf16 %v673_v23, %v673_v23  ;;  %v675_v27 = vpop.f32.mrb[7].mxu0  ;;  %v702_v28 = vpop.f32.mrb[4].mxu1 }
 0x174   : > { %v1130_v29 = vadd.f32 %v1129_v25, %v1126_v24  ;;  %v1403_v30 = vpack.c.bf16 %v702_v28, %v702_v28  ;;  %v704_v31 = vpop.f32.mrb[5].mxu1  ;;  %v1120_v61 = vmul.f32 %v702_v28, %v702_v28  ;;  %v1098_v7 = vsel %vm500_vm3, %v702_v28, 0.0  ;;  %v1166_v25 = vld [vmem:[%s1704_s27] sm:$0xff] }
 0x175   : > { %793 = vst.msk [vmem:[%s1712_s5 + $0xc] sm:$0xf] %vm789_vm4, %v1396_v26  ;;  %v705_v32 = vpop.f32.mrb[6].mxu1 }
 0x176   : > { %800 = vst.msk [vmem:[%s1712_s5 + $0x28] sm:$0xf] %vm789_vm4, %v1403_v30  ;;  %v1404_v33 = vpack.c.bf16 %v705_v32, %v705_v32  ;;  %v707_v34 = vpop.f32.mrb[7].mxu1  ;;  %v1145_v15 = vsel %vm500_vm3, %v1120_v61, 0.0 }
 0x178   : > { %801 = vst.msk [vmem:[%s1712_s5 + $0x2c] sm:$0xf] %vm789_vm4, %v1404_v33  ;;  %v678_v35 = vpop.f32.mrb[8].mxu0 }
 0x179   : > { %v1397_v36 = vpack.c.bf16 %v678_v35, %v678_v35  ;;  %v1086_v37 = vsel %vm500_vm3, %v678_v35, 0.0  ;;  %v1114_v38 = vmul.f32 %v678_v35, %v678_v35  ;;  %v680_v39 = vpop.f32.mrb[9].mxu0 }
 0x17a   : > { %v1087_v40 = vadd.f32 %v1086_v37, %v1083_v22  ;;  %v681_v41 = vpop.f32.mrb[10].mxu0  ;;  %v1163_v22 = vld [vmem:[%s1697_s24] sm:$0xff] }
 0x17b   : > { %794 = vst.msk [vmem:[%s1712_s5 + $0x10] sm:$0xf] %vm789_vm4, %v1397_v36  ;;  %v1133_v42 = vsel %vm500_vm3, %v1114_v38, 0.0  ;;  %v1398_v43 = vpack.c.bf16 %v681_v41, %v681_v41  ;;  %v683_v44 = vpop.f32.mrb[11].mxu0  ;;  %v710_v45 = vpop.f32.mrb[8].mxu1 }
 0x17c   : > { %v1134_v46 = vadd.f32 %v1133_v42, %v1130_v29  ;;  %v1405_v47 = vpack.c.bf16 %v710_v45, %v710_v45  ;;  %v712_v48 = vpop.f32.mrb[9].mxu1  ;;  %v1122_v8 = vmul.f32 %v710_v45, %v710_v45  ;;  %v1102_v16 = vsel %vm500_vm3, %v710_v45, 0.0 }
 0x17d   : > { %795 = vst.msk [vmem:[%s1712_s5 + $0x14] sm:$0xf] %vm789_vm4, %v1398_v43  ;;  %v713_v49 = vpop.f32.mrb[10].mxu1 }
 0x17e   : > { %802 = vst.msk [vmem:[%s1712_s5 + $0x30] sm:$0xf] %vm789_vm4, %v1405_v47  ;;  %v1406_v50 = vpack.c.bf16 %v713_v49, %v713_v49  ;;  %v715_v51 = vpop.f32.mrb[11].mxu1  ;;  %v1149_v20 = vsel %vm500_vm3, %v1122_v8, 0.0 }
 0x180   : > { %803 = vst.msk [vmem:[%s1712_s5 + $0x34] sm:$0xf] %vm789_vm4, %v1406_v50  ;;  %v686_v52 = vpop.f32.mrb[12].mxu0 }
 0x181   : > { %v1399_v54 = vpack.c.bf16 %v686_v52, %v686_v52  ;;  %v1090_v55 = vsel %vm500_vm3, %v686_v52, 0.0  ;;  %v1116_v56 = vmul.f32 %v686_v52, %v686_v52  ;;  %v688_v57 = vpop.f32.mrb[13].mxu0 }
 0x182   : > { %v1091_v58 = vadd.f32 %v1090_v55, %v1087_v40  ;;  %v689_v59 = vpop.f32.mrb[14].mxu0 }
 0x183   : > { %796 = vst.msk [vmem:[%s1712_s5 + $0x18] sm:$0xf] %vm789_vm4, %v1399_v54  ;;  %v1137_v62 = vsel %vm500_vm3, %v1116_v56, 0.0  ;;  %v1400_v63 = vpack.c.bf16 %v689_v59, %v689_v59  ;;  %v691_v0 = vpop.f32.mrb[15].mxu0  ;;  %v718_v1 = vpop.f32.mrb[12].mxu1 }
 0x184   : > { %v1095_v2 = vadd.f32 %v1094_v60, %v1091_v58  ;;  %v1138_v3 = vadd.f32 %v1137_v62, %v1134_v46  ;;  %v1407_v4 = vpack.c.bf16 %v718_v1, %v718_v1  ;;  %v720_v5 = vpop.f32.mrb[13].mxu1  ;;  %v1124_v9 = vmul.f32 %v718_v1, %v718_v1 }
 0x185   : > { %797 = vst.msk [vmem:[%s1712_s5 + $0x1c] sm:$0xf] %vm789_vm4, %v1400_v63  ;;  %v721_v10 = vpop.f32.mrb[14].mxu1  ;;  %v1106_v17 = vsel %vm500_vm3, %v718_v1, 0.0 }
 0x186   : > { %v1142_v11 = vadd.f32 %v1141_v6, %v1138_v3  ;;  %804 = vst.msk [vmem:[%s1712_s5 + $0x38] sm:$0xf] %vm789_vm4, %v1407_v4  ;;  %v1099_v12 = vadd.f32 %v1098_v7, %v1095_v2  ;;  %v1408_v13 = vpack.c.bf16 %v721_v10, %v721_v10  ;;  %v723_v14 = vpop.f32.mrb[15].mxu1  ;;  %v1153_v21 = vsel %vm500_vm3, %v1124_v9, 0.0 }
 0x188   : > { %v1103_v18 = vadd.f32 %v1102_v16, %v1099_v12  ;;  %v1146_v19 = vadd.f32 %v1145_v15, %v1142_v11  ;;  %805 = vst.msk [vmem:[%s1712_s5 + $0x3c] sm:$0xf] %vm789_vm4, %v1408_v13 }
 0x18a   : > { %v1107_v23 = vadd.f32 %v1106_v17, %v1103_v18  ;;  %v1150_v24 = vadd.f32 %v1149_v20, %v1146_v19 }
 0x18c   : > { %v1154_v26 = vadd.f32 %v1153_v21, %v1150_v24  ;;  %v1164_v27 = vadd.f32 %v1163_v22, %v1107_v23 }
 0x18e   : > { %1165 = vst.msk [vmem:[%s1697_s24] sm:$0xff] %vm500_vm3, %v1164_v27  ;;  %v1167_v28 = vadd.f32 %v1166_v25, %v1154_v26 }
 0x190   : > { %1168 = vst.msk [vmem:[%s1704_s27] sm:$0xff] %vm500_vm3, %v1167_v28 }
 0x191 PF: > { %s15_s17 = sadd.s32 1, %s1511_s17   ;;  %s1782_s15 = smov %s1507_s16 }
 0x192   : > { %p12_p5 = scmp.ge.s32.totalorder %s15_s17, 4   ;;  %s1783_s16 = smov %s1785_s18 }
 0x194   :  { %14 = sbr.rel (!%p12_p5) target bundleno = 2 (0x2), region = 86 }

// kernel: tile.144
= control target key start
LH: loop header
LB: loop body
LE: loop exit
PB: predicated region body
PF: predicated region fallthrough
CT: control target
= control target key end

     0   :  { %vm82_vm0 = vcmask 1047556   ;;  %vm84_vm1 = vcmask 261120   ;;  %s195_s9 = smov 96   ;;  %s196_s14 = smov 32   ;;  %vm103_vm2 = vcmask 1048320   ;;  %vm124_vm3 = vcmask 785920   ;;  %s289_s0 = inlined_call_operand.vmem [shape: f32[2,8,4,32], index: 0, kind: input, shape index: {}]   ;;  %s290_s1 = inlined_call_operand.vmem [shape: f32[2,8,128], index: 1, kind: output, shape index: {}]  }
   0x1   :  { %v180_v0 = vld [vmem:[%s289_s0 + $0x1c] sm:$0xf]  ;;  %v181_v1 = vld [vmem:[%s289_s0 + $0x18] sm:$0xf]  ;;  %v182_v2 = vld [vmem:[%s289_s0 + $0x14] sm:$0xf] }
   0x2   :  { %48 = vst [vmem:[#allocation0 + $0x38] sm:$0xf] %v180_v0  ;;  %53 = vst [vmem:[#allocation0 + $0x30] sm:$0xf] %v181_v1  ;;  %v183_v3 = vld [vmem:[%s289_s0 + $0x10] sm:$0xf] }
   0x3   :  { %58 = vst [vmem:[#allocation0 + $0x28] sm:$0xf] %v182_v2  ;;  %v184_v4 = vld [vmem:[%s289_s0 + $0xc] sm:$0xf]  ;;  %v185_v5 = vld [vmem:[%s289_s0 + $0x8] sm:$0xf] }
   0x4   :  { %63 = vst [vmem:[#allocation0 + $0x20] sm:$0xf] %v183_v3  ;;  %68 = vst [vmem:[#allocation0 + $0x18] sm:$0xf] %v184_v4  ;;  %v186_v6 = vld [vmem:[%s289_s0 + $0x4] sm:$0xf] }
   0x5   :  { %73 = vst [vmem:[#allocation0 + $0x10] sm:$0xf] %v185_v5  ;;  %v78_v7 = vld [vmem:[%s289_s0] sm:$0xf]  ;;  %77 = vst [vmem:[#allocation0 + $0x8] sm:$0xf] %v186_v6 }
   0x6   :  { %79 = vst [vmem:[#allocation0] sm:$0xf] %v78_v7  ;;  %v172_v8 = vld [vmem:[%s289_s0 + $0x3c] sm:$0xf]  ;;  %v173_v9 = vld [vmem:[%s289_s0 + $0x38] sm:$0xf] }
   0x7   :  { %8 = vst [vmem:[#allocation0 + $0x78] sm:$0xf] %v172_v8  ;;  %13 = vst [vmem:[#allocation0 + $0x70] sm:$0xf] %v173_v9  ;;  %v174_v10 = vld [vmem:[%s289_s0 + $0x34] sm:$0xf] }
   0x8   :  { %v175_v11 = vld [vmem:[%s289_s0 + $0x30] sm:$0xf]  ;;  %v176_v12 = vld [vmem:[%s289_s0 + $0x2c] sm:$0xf]  ;;  %18 = vst [vmem:[#allocation0 + $0x68] sm:$0xf] %v174_v10 }
   0x9   :  { %23 = vst [vmem:[#allocation0 + $0x60] sm:$0xf] %v175_v11  ;;  %28 = vst [vmem:[#allocation0 + $0x58] sm:$0xf] %v176_v12  ;;  %v177_v13 = vld [vmem:[%s289_s0 + $0x28] sm:$0xf] }
   0xa   :  { %v178_v14 = vld [vmem:[%s289_s0 + $0x24] sm:$0xf]  ;;  %v179_v15 = vld [vmem:[%s289_s0 + $0x20] sm:$0xf]  ;;  %33 = vst [vmem:[#allocation0 + $0x50] sm:$0xf] %v177_v13 }
   0xb   :  { %38 = vst [vmem:[#allocation0 + $0x48] sm:$0xf] %v178_v14  ;;  %43 = vst [vmem:[#allocation0 + $0x40] sm:$0xf] %v179_v15  ;;  %s194_s0 = smov 64   ;;  %vm145_vm4 = vcmask 523520  }
   0xc   :  { %v119_v16 = vld [vmem:[#allocation0 + $0x2] ss:$8 sm:$0xf0]   ;;  %v98_v17 = vld [vmem:[#allocation0 + $0x3] ss:$8 sm:$0xf0]  }
   0xd   :  { %v117_v18 = vld [vmem:[#allocation0 + $0x2] ss:$8 sm:$0xf]   ;;  %v96_v19 = vld [vmem:[#allocation0 + $0x3] ss:$8 sm:$0xf]  }
   0xe   :  { %v121_v20 = vsel %vm82_vm0, %v119_v16, %v117_v18  ;;  %v100_v21 = vsel %vm82_vm0, %v98_v17, %v96_v19  ;;  %v138_v24 = vld [vmem:[#allocation0 + $0x1] ss:$8 sm:$0xf]   ;;  %v80_v32 = vld [vmem:[#allocation0] ss:$8 sm:$0xf]  }
   0xf   :  { %122 = vrot.lane.b32.xlu1 %v121_v20, %s194_s0  ;;  %101 = vrot.lane.b32.xlu0 %v100_v21, %s195_s9  ;;  %v140_v25 = vld [vmem:[#allocation0 + $0x1] ss:$8 sm:$0xf0]   ;;  %v81_v33 = vld [vmem:[#allocation0] ss:$8 sm:$0xf0]  }
  0x10   :  { %v129_v22 = vld [vmem:[#allocation0 + $0x42] ss:$8 sm:$0xf0]   ;;  %v108_v23 = vld [vmem:[#allocation0 + $0x43] ss:$8 sm:$0xf0]   ;;  %v83_v34 = vsel %vm82_vm0, %v81_v33, %v80_v32  ;;  %v142_v38 = vsel %vm82_vm0, %v140_v25, %v138_v24 }
  0x11   :  { %v150_v31 = vld [vmem:[#allocation0 + $0x41] ss:$8 sm:$0xf0]   ;;  %v89_v36 = vld [vmem:[#allocation0 + $0x40] ss:$8 sm:$0xf0]  }
  0x12   :  { %v127_v26 = vld [vmem:[#allocation0 + $0x42] ss:$8 sm:$0xf]   ;;  %v106_v27 = vld [vmem:[#allocation0 + $0x43] ss:$8 sm:$0xf]  }
  0x13   :  { %v131_v28 = vsel %vm82_vm0, %v129_v22, %v127_v26  ;;  %v110_v29 = vsel %vm82_vm0, %v108_v23, %v106_v27  ;;  %v148_v30 = vld [vmem:[#allocation0 + $0x41] ss:$8 sm:$0xf]   ;;  %v87_v35 = vld [vmem:[#allocation0 + $0x40] ss:$8 sm:$0xf]  }
  0x14   :  { %132 = vrot.lane.b32.xlu1 %v131_v28, %s194_s0  ;;  %111 = vrot.lane.b32.xlu0 %v110_v29, %s195_s9  ;;  %v152_v37 = vsel %vm82_vm0, %v150_v31, %v148_v30  ;;  %85 = vst.msk [vmem:[%s290_s1] sm:$0xff] %vm84_vm1, %v83_v34   ;;  %v91_v39 = vsel %vm82_vm0, %v89_v36, %v87_v35 }
  0x15   :  { %187 = vst.msk [vmem:[%s290_s1 + $0x8] sm:$0xff] %vm84_vm1, %v91_v39  }
  0x18   :  { %153 = vrot.lane.b32.xlu1 %v152_v37, %s196_s14  ;;  %143 = vrot.lane.b32.xlu0 %v142_v38, %s196_s14 }
  0x81   :  { %v123_v40 = vpop.permute.xlu1 %122   ;;  %v102_v41 = vpop.permute.xlu0 %101  }
  0x82   :  { %104 = vst.msk [vmem:[%s290_s1] sm:$0xff] %vm103_vm2, %v102_v41  }
  0x83   :  { %125 = vst.msk [vmem:[%s290_s1] sm:$0xff] %vm124_vm3, %v123_v40  }
  0x86   :  { %v133_v42 = vpop.permute.xlu1 %132   ;;  %v112_v43 = vpop.permute.xlu0 %111  }
  0x87   :  { %188 = vst.msk [vmem:[%s290_s1 + $0x8] sm:$0xff] %vm103_vm2, %v112_v43  }
  0x88   :  { %189 = vst.msk [vmem:[%s290_s1 + $0x8] sm:$0xff] %vm124_vm3, %v133_v42  }
  0x8a   :  { %v154_v44 = vpop.permute.xlu1 %153   ;;  %v144_v45 = vpop.permute.xlu0 %143  }
  0x8b   :  { %190 = vst.msk [vmem:[%s290_s1 + $0x8] sm:$0xff] %vm145_vm4, %v154_v44   ;;  %146 = vst.msk [vmem:[%s290_s1] sm:$0xff] %vm145_vm4, %v144_v45  }

// kernel: unet_forward.30
= control target key start
LH: loop header
LB: loop body
LE: loop exit
PB: predicated region body
PF: predicated region fallthrough
CT: control target
= control target key end

     0   :  { %s774_s21 = smov 0   ;;  %s776_s22 = smov 0   ;;  %s869_s0 = inlined_call_operand.vmem [shape: bf16[2,4,2,4,64], index: 0, kind: input, shape index: {}]   ;;  %s870_s1 = inlined_call_operand.vmem [shape: f32[2,8,64], index: 1, kind: input, shape index: {}]   ;;  %s871_s2 = inlined_call_operand.vmem [shape: f32[2,8,64], index: 2, kind: input, shape index: {}]   ;;  %s872_s3 = inlined_call_operand.vmem [shape: f32[1,64], index: 3, kind: input, shape index: {}]   ;;  %s873_s4 = inlined_call_operand.vmem [shape: f32[1,64], index: 4, kind: input, shape index: {}]   ;;  %s874_s5 = inlined_call_operand.vmem [shape: bf16[2,4,2,2,64], index: 5, kind: output, shape index: {0}]   ;;  %s875_s6 = inlined_call_operand.vmem [shape: bf16[2,4,2,32], index: 6, kind: output, shape index: {1}]  }
   0x1   :  { %s778_s23 = smov 0  }
   0x2 LB: > { %s29_s24 = sadd.s32 1, %s731_s22  ;;  %p667_p0 = scmp.ge.s32.totalorder %s735_s23, 1  ;;  %s735_s23 = sphi %s778_s23, %s17_s23   ;;  %s731_s22 = sphi %s776_s22, %s877_s22   ;;  %s727_s21 = sphi %s774_s21, %s876_s21  }
   0x3   : > { %p31_p1 = scmp.ge.s32.totalorder %s29_s24, 2  ;;  %p239_p2 = scmp.lt.s32.totalorder %s735_s23, 3 }
   0x5   : > { %s879_s24 = smov (%p31_p1, %s29_s24), 0  ;;  %p240_p3 = pnand %p667_p0, %p239_p2 }
   0x6   : > { %v316_v0 = vld [vmem:[%s870_s1] sm:$0xff] (!%p240_p3)  ;;  %v317_v1 = vld [vmem:[%s870_s1 + $0x8] sm:$0xff] (!%p240_p3)  ;;  %vm318_vm0 = vcmask (!%p240_p3), 523264   ;;  %p287_p4 = scmp.lt.s32.totalorder (!%p240_p3), %s727_s21, 1  ;;  %v367_v27 = vlaneseq (!%p240_p3)  ;;  %vm410_vm1 = vcmask (!%p240_p3), 516096   ;;  %s737_s25 = smov (!%p240_p3), 112  }
   0x7   : > { %243 = sbr.rel (%p240_p3) target bundleno = 307 (0x133), region = 40  ;;  %v328_v2 = vld [vmem:[%s871_s2] sm:$0xff] (!%p240_p3)  ;;  %v319_v3 = vsel (!%p240_p3), %vm318_vm0, %v316_v0, 0.0  ;;  %v320_v4 = vsel (!%p240_p3), %vm318_vm0, %v317_v1, 0.0  ;;  %v329_v5 = vld [vmem:[%s871_s2 + $0x8] sm:$0xff] (!%p240_p3)  ;;  %vm447_vm2 = vcmask (!%p240_p3), 122880  }
   0x8   : > { %v330_v6 = vsel (!%p240_p3), %vm318_vm0, %v328_v2, 0.0  ;;  %v321_v7 = vadd.f32 (!%p240_p3), %v320_v4, %v319_v3  ;;  %v331_v8 = vsel (!%p240_p3), %vm318_vm0, %v329_v5, 0.0  ;;  %v811_v28 = vshrl.u32 (!%p240_p3), %v367_v27, 7  ;;  %v343_v29 = vld [vmem:[%s872_s3] sm:$0x1] (!%p240_p3) }
   0x9   : > { %v332_v9 = vadd.f32 (!%p240_p3), %v331_v8, %v330_v6  ;;  %v347_v44 = vld [vmem:[%s873_s4] sm:$0x1] (!%p240_p3)  ;;  %vm524_vm3 = vcmask (!%p240_p3), 254080  }
   0xa   : > { %v322_v10 = vrot.slane (!%p240_p3), %v321_v7, 4  ;;  %v369_v31 = vsub.s32 (!%p240_p3), 0, %v811_v28 }
   0xb   : > { %v333_v11 = vrot.slane (!%p240_p3), %v332_v9, 4 }
   0xc   : > { %v323_v12 = vadd.f32 (!%p240_p3), %v322_v10, %v321_v7 }
   0xd   : > { %v334_v13 = vadd.f32 (!%p240_p3), %v333_v11, %v332_v9 }
   0xe   : > { %v324_v14 = vrot.slane %v323_v12, 2  ;;  %s881_s21 = smov (!%p287_p4, %s727_s21), 1 }
   0xf   : > { %v335_v15 = vrot.slane %v334_v13, 2  ;;  %s674_s9 = sshll.u32 %s881_s21, 4  ;;  %s670_s17 = sshll.u32 %s881_s21, 3 }
  0x10   : > { %v325_v16 = vadd.f32 %v324_v14, %v323_v12  ;;  %s295_s12 = scalar_lea.vmem %s869_s0, %s674_s9  ;;  %s305_s20 = scalar_lea.vmem %s874_s5, %s670_s17 }
  0x11   : > { %v336_v17 = vadd.f32 %v335_v15, %v334_v13  ;;  %v350_v30 = vld [vmem:[%s295_s12] sm:$0x3]  ;;  %v351_v32 = vld [vmem:[%s295_s12 + $0x2] sm:$0x3]  ;;  %v352_v33 = vld [vmem:[%s295_s12 + $0x4] sm:$0x3] }
  0x12   : > { %v326_v18 = vrot.slane %v325_v16, 1  ;;  %v353_v34 = vld [vmem:[%s295_s12 + $0x6] sm:$0x3]  ;;  %v354_v35 = vld [vmem:[%s295_s12 + $0x8] sm:$0x3]  ;;  %v358_v41 = vunpack.c.l.bf16 %v350_v30  ;;  %v359_v42 = vunpack.c.l.bf16 %v351_v32  ;;  %v360_v43 = vunpack.c.l.bf16 %v352_v33  ;;  %s671_s26 = sshll.u32 %s881_s21, 2 }
  0x13   : > { %v337_v19 = vrot.slane %v336_v17, 1  ;;  %v355_v36 = vld [vmem:[%s295_s12 + $0xa] sm:$0x3]  ;;  %v356_v37 = vld [vmem:[%s295_s12 + $0xc] sm:$0x3]  ;;  %v361_v45 = vunpack.c.l.bf16 %v353_v34  ;;  %v362_v46 = vunpack.c.l.bf16 %v354_v35  ;;  %s842_s29 = scalar_lea.vmem %s875_s6, %s671_s26 }
  0x14   : > { %v327_v20 = vadd.f32 %v326_v18, %v325_v16  ;;  %v357_v39 = vld [vmem:[%s295_s12 + $0xe] sm:$0x3]  ;;  %v363_v47 = vunpack.c.l.bf16 %v355_v36  ;;  %v364_v48 = vunpack.c.l.bf16 %v356_v37 }
  0x15   : > { %v338_v21 = vadd.f32 %v337_v19, %v336_v17  ;;  %v365_v51 = vunpack.c.l.bf16 %v357_v39 }
  0x16   : > { %v339_v22 = vmul.f32 0.0078125, %v327_v20 }
  0x17   : > { %v340_v23 = vmul.f32 0.0078125, %v338_v21 }
  0x18   : > { %v341_v24 = vmul.f32 %v339_v22, %v339_v22 }
  0x1a   : > { %v342_v25 = vsub.f32 %v340_v23, %v341_v24 }
  0x1c   : > { %v344_v26 = vadd.f32 1e-05, %v342_v25 }
  0x1e   : > { %711 = vrsqrt.f32 %v344_v26 }
  0x28   : > { %v712_v38 = vpop.eup %711 }
  0x29   : > { %v346_v40 = vmul.f32 %v712_v38, %v343_v29  ;;  %v738_v29 = vmov 1966171168  }
  0x2a   : > { %v457_v30 = vunpack.c.l.s4 %v738_v29 }
  0x2b   : > { %v348_v49 = vmul.f32 %v346_v40, %v339_v22  ;;  %v370_v50 = vrot.slane %v346_v40, %v369_v31 }
  0x2d   : > { %v349_v52 = vsub.f32 %v347_v44, %v348_v49  ;;  %v372_v53 = vmul.f32 %v370_v50, %v358_v41  ;;  %v373_v54 = vmul.f32 %v370_v50, %v359_v42  ;;  %v374_v55 = vmul.f32 %v370_v50, %v360_v43 }
  0x2e   : > { %v375_v56 = vmul.f32 %v370_v50, %v361_v45  ;;  %v376_v57 = vmul.f32 %v370_v50, %v362_v46  ;;  %v377_v58 = vmul.f32 %v370_v50, %v363_v47  ;;  %v378_v59 = vmul.f32 %v370_v50, %v364_v48 }
  0x2f   : > { %v384_v60 = vrot.slane %v349_v52, %v369_v31  ;;  %v379_v61 = vmul.f32 %v370_v50, %v365_v51  ;;  %v458_v31 = vunpack.c.0.s8 %v457_v30 }
  0x31   : > { %v386_v62 = vadd.f32 %v384_v60, %v372_v53  ;;  %v387_v63 = vadd.f32 %v384_v60, %v373_v54  ;;  %v388_v0 = vadd.f32 %v384_v60, %v374_v55  ;;  %v389_v1 = vadd.f32 %v384_v60, %v375_v56 }
  0x32   : > { %v390_v2 = vadd.f32 %v384_v60, %v376_v57  ;;  %v391_v3 = vadd.f32 %v384_v60, %v377_v58  ;;  %v392_v4 = vadd.f32 %v384_v60, %v378_v59  ;;  %v393_v5 = vadd.f32 %v384_v60, %v379_v61 }
  0x33   : > { %v394_v6 = vmax.f32 %v386_v62, 0.0  ;;  %v395_v7 = vmax.f32 %v387_v63, 0.0  ;;  %v396_v8 = vmax.f32 %v388_v0, 0.0  ;;  %v397_v9 = vmax.f32 %v389_v1, 0.0 }
  0x34   : > { %v398_v10 = vmax.f32 %v390_v2, 0.0  ;;  %v399_v11 = vmax.f32 %v391_v3, 0.0  ;;  %v400_v12 = vmax.f32 %v392_v4, 0.0  ;;  %v401_v13 = vmax.f32 %v393_v5, 0.0 }
  0x35   : > { %v403_v14 = vpack.c.bf16 %v395_v7, %v395_v7  ;;  %v404_v15 = vpack.c.bf16 %v396_v8, %v396_v8  ;;  %v405_v16 = vpack.c.bf16 %v397_v9, %v397_v9  ;;  %v419_v17 = vmax.f32 %v394_v6, %v395_v7 }
  0x36   : > { %v420_v18 = vmax.f32 %v396_v8, %v397_v9  ;;  %v402_v19 = vpack.c.bf16 %v394_v6, %v394_v6  ;;  %v407_v20 = vpack.c.bf16 %v399_v11, %v399_v11  ;;  %v408_v21 = vpack.c.bf16 %v400_v12, %v400_v12 }
  0x37   : > { %412 = vst.msk [vmem:[%s305_s20 + $0x1] sm:$0x1] %vm410_vm1, %v403_v14  ;;  %413 = vst.msk [vmem:[%s305_s20 + $0x2] sm:$0x1] %vm410_vm1, %v404_v15  ;;  %v409_v22 = vpack.c.bf16 %v401_v13, %v401_v13  ;;  %v421_v23 = vmax.f32 %v398_v10, %v399_v11  ;;  %v422_v24 = vmax.f32 %v400_v12, %v401_v13 }
  0x38   : > { %414 = vst.msk [vmem:[%s305_s20 + $0x3] sm:$0x1] %vm410_vm1, %v405_v16  ;;  %v406_v25 = vpack.c.bf16 %v398_v10, %v398_v10  ;;  %v701_v26 = vpack.i.bf16 %v420_v18, %v419_v17  ;;  %411 = vst.msk [vmem:[%s305_s20] sm:$0x1] %vm410_vm1, %v402_v19  ;;  %v461_v37 = vsub.s32 %v458_v31, %v811_v28 }
  0x39   : > { %416 = vst.msk [vmem:[%s305_s20 + $0x5] sm:$0x1] %vm410_vm1, %v407_v20  ;;  %417 = vst.msk [vmem:[%s305_s20 + $0x6] sm:$0x1] %vm410_vm1, %v408_v21  ;;  %v706_v27 = vpack.i.bf16 %v422_v24, %v421_v23 }
  0x3a   : > { %418 = vst.msk [vmem:[%s305_s20 + $0x7] sm:$0x1] %vm410_vm1, %v409_v22  ;;  %415 = vst.msk [vmem:[%s305_s20 + $0x4] sm:$0x1] %vm410_vm1, %v406_v25  ;;  %702 = vrot.lane.b32.xlu0 %v701_v26, %s737_s25 }
  0x3e   : > { %707 = vrot.lane.b32.xlu0 %v706_v27, %s737_s25 }
  0xac   : > { %v703_v32 = vpop.permute.xlu0 %702 }
  0xad   : > { %v705_v33 = vunpack.i.h.bf16 %v703_v32  ;;  %v704_v34 = vunpack.i.l.bf16 %v703_v32 }
  0xaf   : > { %v440_v35 = vmax.f32 %v420_v18, %v705_v33  ;;  %v439_v36 = vmax.f32 %v419_v17, %v704_v34 }
  0xb0   : > { %v708_v38 = vpop.permute.xlu0 %707 }
  0xb1   : > { %v444_v39 = vpack.c.bf16 %v440_v35, %v440_v35  ;;  %v443_v40 = vpack.c.bf16 %v439_v36, %v439_v36  ;;  %v710_v41 = vunpack.i.h.bf16 %v708_v38  ;;  %v709_v42 = vunpack.i.l.bf16 %v708_v38 }
  0xb3   : > { %v442_v43 = vmax.f32 %v422_v24, %v710_v41  ;;  %v441_v44 = vmax.f32 %v421_v23, %v709_v42  ;;  %v462_v45 = vrot.slane %v443_v40, %v461_v37  ;;  %448 = vst.msk [vmem:[%s842_s29] sm:$0x1] %vm447_vm2, %v443_v40  ;;  %449 = vst.msk [vmem:[%s842_s29 + $0x1] sm:$0x1] %vm447_vm2, %v444_v39 }
  0xb4   : > { %v476_v48 = vrot.slane %v444_v39, %v461_v37 }
  0xb5   : > { %v446_v28 = vpack.c.bf16 %v442_v43, %v442_v43  ;;  %v445_v46 = vpack.c.bf16 %v441_v44, %v441_v44  ;;  %v469_v47 = vrot.slane %v462_v45, %v461_v37 }
  0xb6   : > { %v483_v51 = vrot.slane %v476_v48, %v461_v37 }
  0xb7   : > { %512 = vrot.lane.b32.xlu1 %v469_v47, %s737_s25  ;;  %v490_v49 = vrot.slane %v445_v46, %v461_v37  ;;  %v504_v50 = vrot.slane %v446_v28, %v461_v37  ;;  %450 = vst.msk [vmem:[%s842_s29 + $0x2] sm:$0x1] %vm447_vm2, %v445_v46  ;;  %451 = vst.msk [vmem:[%s842_s29 + $0x3] sm:$0x1] %vm447_vm2, %v446_v28 }
  0xb9   : > { %v497_v52 = vrot.slane %v490_v49, %v461_v37  ;;  %v511_v53 = vrot.slane %v504_v50, %v461_v37 }
  0xbb   : > { %514 = vrot.lane.b32.xlu1 %v483_v51, %s737_s25  ;;  %516 = vrot.lane.b32.xlu0 %v497_v52, %s737_s25 }
  0xbf   : > { %518 = vrot.lane.b32.xlu1 %v511_v53, %s737_s25 }
 0x129   : > { %v513_v54 = vpop.permute.xlu1 %512 }
 0x12a   : > { %525 = vst.msk [vmem:[%s842_s29] sm:$0x1] %vm524_vm3, %v513_v54 }
 0x12d   : > { %v515_v55 = vpop.permute.xlu1 %514  ;;  %v517_v56 = vpop.permute.xlu0 %516 }
 0x12e   : > { %526 = vst.msk [vmem:[%s842_s29 + $0x1] sm:$0x1] %vm524_vm3, %v515_v55  ;;  %527 = vst.msk [vmem:[%s842_s29 + $0x2] sm:$0x1] %vm524_vm3, %v517_v56 }
 0x131   : > { %v519_v57 = vpop.permute.xlu1 %518 }
 0x132   : > { %528 = vst.msk [vmem:[%s842_s29 + $0x3] sm:$0x1] %vm524_vm3, %v519_v57 }
 0x133 PF: > { %s17_s23 = sadd.s32 1, %s735_s23   ;;  %s876_s21 = smov %s731_s22 }
 0x134   : > { %p14_p5 = scmp.ge.s32.totalorder %s17_s23, 4   ;;  %s877_s22 = smov %s879_s24 }
 0x136   :  { %16 = sbr.rel (!%p14_p5) target bundleno = 2 (0x2), region = 82 }

// kernel: unet_forward.32
= control target key start
LH: loop header
LB: loop body
LE: loop exit
PB: predicated region body
PF: predicated region fallthrough
CT: control target
= control target key end

     0   :  { %s506_s18 = smov 0   ;;  %s508_s19 = smov 0   ;;  %s576_s0 = inlined_call_operand.vmem [shape: bf16[2,4,2,128], index: 0, kind: input, shape index: {}]   ;;  %s577_s1 = inlined_call_operand.vmem [shape: f32[2,8,128], index: 1, kind: input, shape index: {}]   ;;  %s578_s2 = inlined_call_operand.vmem [shape: f32[2,8,128], index: 2, kind: input, shape index: {}]   ;;  %s579_s3 = inlined_call_operand.vmem [shape: f32[1,128], index: 3, kind: input, shape index: {}]   ;;  %s580_s4 = inlined_call_operand.vmem [shape: f32[1,128], index: 4, kind: input, shape index: {}]   ;;  %s581_s5 = inlined_call_operand.vmem [shape: bf16[2,4,1,128], index: 5, kind: output, shape index: {}]  }
   0x1   :  { %s510_s20 = smov 0  }
   0x2 LB: > { %s27_s21 = sadd.s32 1, %s470_s19  ;;  %p421_p0 = scmp.ge.s32.totalorder %s474_s20, 1  ;;  %s474_s20 = sphi %s510_s20, %s15_s20   ;;  %s470_s19 = sphi %s508_s19, %s585_s19   ;;  %s466_s18 = sphi %s506_s18, %s584_s18  }
   0x3   : > { %p29_p1 = scmp.ge.s32.totalorder %s27_s21, 2  ;;  %p207_p2 = scmp.lt.s32.totalorder %s474_s20, 3 }
   0x5   : > { %s587_s21 = smov (%p29_p1, %s27_s21), 0  ;;  %p208_p3 = pnand %p421_p0, %p207_p2 }
   0x6   : > { %v259_v0 = vld [vmem:[%s577_s1] sm:$0xff] (!%p208_p3)  ;;  %v260_v1 = vld [vmem:[%s577_s1 + $0x8] sm:$0xff] (!%p208_p3)  ;;  %p242_p4 = scmp.lt.s32.totalorder (!%p208_p3), %s466_s18, 1  ;;  %v297_v23 = vlaneseq (!%p208_p3)  ;;  %vm324_vm0 = vcmask (!%p208_p3), 1040384   ;;  %vm325_vm1 = vsmask.f32 (!%p208_p3), 256 }
   0x7   : > { %211 = sbr.rel (%p208_p3) target bundleno = 57 (0x39), region = 40  ;;  %v268_v2 = vld [vmem:[%s578_s2] sm:$0xff] (!%p208_p3)  ;;  %v261_v3 = vadd.f32 (!%p208_p3), %v260_v1, %v259_v0  ;;  %v269_v4 = vld [vmem:[%s578_s2 + $0x8] sm:$0xff] (!%p208_p3)  ;;  %vm555_vm2 = vmand (!%p208_p3), %vm324_vm0, %vm325_vm1 }
   0x8   : > { %v270_v5 = vadd.f32 (!%p208_p3), %v269_v4, %v268_v2  ;;  %v298_v24 = vshrl.u32 (!%p208_p3), %v297_v23, 7  ;;  %v281_v25 = vld [vmem:[%s579_s3] sm:$0x1] (!%p208_p3) }
   0x9   : > { %v262_v6 = vrot.slane (!%p208_p3), %v261_v3, 4  ;;  %v285_v36 = vld [vmem:[%s580_s4] sm:$0x1] (!%p208_p3) }
   0xa   : > { %v271_v7 = vrot.slane (!%p208_p3), %v270_v5, 4  ;;  %v299_v29 = vsub.s32 (!%p208_p3), 0, %v298_v24 }
   0xb   : > { %v263_v8 = vadd.f32 (!%p208_p3), %v262_v6, %v261_v3 }
   0xc   : > { %v272_v9 = vadd.f32 (!%p208_p3), %v271_v7, %v270_v5 }
   0xd   : > { %v264_v10 = vrot.slane (!%p208_p3), %v263_v8, 2 }
   0xe   : > { %v273_v11 = vrot.slane %v272_v9, 2  ;;  %s589_s18 = smov (!%p242_p4, %s466_s18), 1 }
   0xf   : > { %v265_v12 = vadd.f32 %v264_v10, %v263_v8  ;;  %s422_s30 = sshll.u32 %s589_s18, 2 }
  0x10   : > { %v274_v13 = vadd.f32 %v273_v11, %v272_v9  ;;  %s248_s8 = scalar_lea.vmem %s576_s0, %s422_s30  ;;  %s257_s15 = scalar_lea.vmem %s581_s5, %s422_s30 }
  0x11   : > { %v266_v14 = vrot.slane %v265_v12, 1  ;;  %v288_v26 = vld [vmem:[%s248_s8] sm:$0x1]  ;;  %v289_v27 = vld [vmem:[%s248_s8 + $0x1] sm:$0x1] }
  0x12   : > { %v275_v15 = vrot.slane %v274_v13, 1  ;;  %v290_v28 = vld [vmem:[%s248_s8 + $0x2] sm:$0x1]  ;;  %v291_v30 = vld [vmem:[%s248_s8 + $0x3] sm:$0x1]  ;;  %v292_v33 = vunpack.c.l.bf16 %v288_v26  ;;  %v293_v34 = vunpack.c.l.bf16 %v289_v27 }
  0x13   : > { %v267_v16 = vadd.f32 %v266_v14, %v265_v12  ;;  %v294_v35 = vunpack.c.l.bf16 %v290_v28  ;;  %v295_v37 = vunpack.c.l.bf16 %v291_v30  ;;  %v327_v52 = vld [vmem:[%s257_s15] sm:$0x1]  ;;  %v330_v56 = vld [vmem:[%s257_s15 + $0x1] sm:$0x1]  ;;  %v333_v57 = vld [vmem:[%s257_s15 + $0x2] sm:$0x1] }
  0x14   : > { %v276_v17 = vadd.f32 %v275_v15, %v274_v13  ;;  %v336_v58 = vld [vmem:[%s257_s15 + $0x3] sm:$0x1] }
  0x15   : > { %v277_v18 = vmul.f32 0.03125, %v267_v16 }
  0x16   : > { %v278_v19 = vmul.f32 0.03125, %v276_v17 }
  0x17   : > { %v279_v20 = vmul.f32 %v277_v18, %v277_v18 }
  0x19   : > { %v280_v21 = vsub.f32 %v278_v19, %v279_v20 }
  0x1b   : > { %v282_v22 = vadd.f32 1e-05, %v280_v21 }
  0x1d   : > { %450 = vrsqrt.f32 %v282_v22 }
  0x27   : > { %v451_v31 = vpop.eup %450 }
  0x28   : > { %v284_v32 = vmul.f32 %v451_v31, %v281_v25 }
  0x2a   : > { %v286_v38 = vmul.f32 %v284_v32, %v277_v18  ;;  %v300_v39 = vrot.slane %v284_v32, %v299_v29 }
  0x2c   : > { %v287_v40 = vsub.f32 %v285_v36, %v286_v38  ;;  %v302_v41 = vmul.f32 %v300_v39, %v292_v33  ;;  %v303_v42 = vmul.f32 %v300_v39, %v293_v34  ;;  %v304_v43 = vmul.f32 %v300_v39, %v294_v35 }
  0x2d   : > { %v305_v44 = vmul.f32 %v300_v39, %v295_v37 }
  0x2e   : > { %v310_v45 = vrot.slane %v287_v40, %v299_v29 }
  0x30   : > { %v312_v46 = vadd.f32 %v310_v45, %v302_v41  ;;  %v313_v47 = vadd.f32 %v310_v45, %v303_v42  ;;  %v314_v48 = vadd.f32 %v310_v45, %v304_v43  ;;  %v315_v49 = vadd.f32 %v310_v45, %v305_v44 }
  0x32   : > { %v316_v50 = vmax.f32 %v312_v46, 0.0  ;;  %v317_v53 = vmax.f32 %v313_v47, 0.0  ;;  %v318_v54 = vmax.f32 %v314_v48, 0.0  ;;  %v319_v55 = vmax.f32 %v315_v49, 0.0 }
  0x34   : > { %v320_v59 = vpack.c.bf16 %v316_v50, %v316_v50  ;;  %v321_v60 = vpack.c.bf16 %v317_v53, %v317_v53  ;;  %v322_v61 = vpack.c.bf16 %v318_v54, %v318_v54  ;;  %v323_v62 = vpack.c.bf16 %v319_v55, %v319_v55 }
  0x36   : > { %v328_v63 = vsel %vm555_vm2, %v320_v59, %v327_v52  ;;  %v331_v0 = vsel %vm555_vm2, %v321_v60, %v330_v56  ;;  %v334_v1 = vsel %vm555_vm2, %v322_v61, %v333_v57  ;;  %v337_v2 = vsel %vm555_vm2, %v323_v62, %v336_v58 }
  0x37   : > { %329 = vst [vmem:[%s257_s15] sm:$0x1] %v328_v63  ;;  %332 = vst [vmem:[%s257_s15 + $0x1] sm:$0x1] %v331_v0 }
  0x38   : > { %335 = vst [vmem:[%s257_s15 + $0x2] sm:$0x1] %v334_v1  ;;  %338 = vst [vmem:[%s257_s15 + $0x3] sm:$0x1] %v337_v2 }
  0x39 PF: > { %s15_s20 = sadd.s32 1, %s474_s20   ;;  %s584_s18 = smov %s470_s19 }
  0x3a   : > { %p12_p5 = scmp.ge.s32.totalorder %s15_s20, 4   ;;  %s585_s19 = smov %s587_s21 }
  0x3c   :  { %14 = sbr.rel (!%p12_p5) target bundleno = 2 (0x2), region = 70 }

// kernel: unet_forward.31
= control target key start
LH: loop header
LB: loop body
LE: loop exit
PB: predicated region body
PF: predicated region fallthrough
CT: control target
= control target key end

     0   :  { %s883_s15 = smov 0   ;;  %s885_s16 = smov 0   ;;  %s980_s0 = inlined_call_operand.vmem [shape: bf16[2,1,48,48], index: 0, kind: input, shape index: {}]   ;;  %s981_s1 = inlined_call_operand.vmem [shape: bf16[144,32], index: 1, kind: input, shape index: {}]   ;;  %s982_s2 = inlined_call_operand.vmem [shape: bf16[2,1,32,32], index: 2, kind: output, shape index: {0}]   ;;  %s983_s3 = inlined_call_operand.vmem [shape: f32[2,8,32], index: 3, kind: output, shape index: {1}]   ;;  %s984_s4 = inlined_call_operand.vmem [shape: f32[2,8,32], index: 4, kind: output, shape index: {2}]  }
   0x1   :  { %s887_s17 = smov 0  }
   0x2 LB: > { %s27_s18 = sadd.s32 1, %s848_s16  ;;  %p734_p0 = scmp.ge.s32.totalorder %s852_s17, 1  ;;  %s852_s17 = sphi %s887_s17, %s15_s17   ;;  %s848_s16 = sphi %s885_s16, %s986_s16   ;;  %s844_s15 = sphi %s883_s15, %s985_s15  }
   0x3   : > { %p29_p1 = scmp.ge.s32.totalorder %s27_s18, 2  ;;  %p187_p2 = scmp.lt.s32.totalorder %s852_s17, 3 }
   0x5   : > { %s988_s18 = smov (%p29_p1, %s27_s18), 0  ;;  %p188_p3 = pnand %p734_p0, %p187_p2 }
   0x6   : > { %p229_p4 = scmp.lt.s32.totalorder (!%p188_p3), %s844_s15, 1  ;;  %v819_v0 = vld [vmem:[%s981_s1] sm:$0xff] (!%p188_p3)   ;;  %v854_v1 = vmov (!%p188_p3), 0   ;;  %v820_v2 = vld [vmem:[%s981_s1 + $0x8] sm:$0xff] (!%p188_p3)   ;;  %v821_v3 = vld [vmem:[%s981_s1 + $0x10] sm:$0xff] (!%p188_p3)   ;;  %s855_s5 = smov (!%p188_p3), 48   ;;  %v476_v25 = vlaneseq (!%p188_p3) }
   0x7   : > { %191 = sbr.rel (%p188_p3) target bundleno = 375 (0x177), region = 28  ;;  %406 = vmatprep.subr.bf16.mxu0 (!%p188_p3), %v854_v1  ;;  %768 = vmatprep.subr.bf16.mxu1 (!%p188_p3), %v854_v1  ;;  %v822_v6 = vld [vmem:[%s981_s1 + $0x18] sm:$0xff] (!%p188_p3)   ;;  %vm272_vm0 = vcmask (!%p188_p3), 392192   ;;  %s856_s6 = smov (!%p188_p3), 96   ;;  %v823_v11 = vld [vmem:[%s981_s1 + $0x20] sm:$0xff] (!%p188_p3)   ;;  %v824_v12 = vld [vmem:[%s981_s1 + $0x28] sm:$0xff] (!%p188_p3)  }
   0x8   : > { %407 = vmatpush1.bf16.msra.mxu0 (!%p188_p3), %v819_v0  ;;  %777 = vmatpush1.bf16.msra.mxu1 (!%p188_p3), %v819_v0  ;;  %v827_v13 = vld [vmem:[%s981_s1 + $0x30] sm:$0xff] (!%p188_p3)   ;;  %v828_v14 = vld [vmem:[%s981_s1 + $0x38] sm:$0xff] (!%p188_p3)   ;;  %v829_v15 = vld [vmem:[%s981_s1 + $0x40] sm:$0xff] (!%p188_p3)   ;;  %vm295_vm1 = vcmask (!%p188_p3), 785792   ;;  %vm318_vm2 = vcmask (!%p188_p3), 1048320   ;;  %vm320_vm3 = vcmask (!%p188_p3), 130048  }
   0x9   : > { %408 = vmatprep.subr.bf16.mxu0 (!%p188_p3), %v854_v1  ;;  %769 = vmatprep.subr.bf16.mxu1 (!%p188_p3), %v854_v1  ;;  %vm545_vm4 = vcmask (!%p188_p3), 261120   ;;  %v857_v24 = vmov (!%p188_p3), 0.0   ;;  %v477_v26 = vshrl.u32 (!%p188_p3), %v476_v25, 7  ;;  %vm471_vm7 = vcmask (!%p188_p3), 257024  }
   0xb   : > { %v479_v27 = vadd.s32 (!%p188_p3), 16, %v477_v26  ;;  %v478_v28 = vadd.s32 (!%p188_p3), 8, %v477_v26  ;;  %v480_v29 = vadd.s32 (!%p188_p3), 24, %v477_v26  ;;  %v485_v31 = vand.u32 (!%p188_p3), 7, %v477_v26 }
   0xc   : > { %409 = vmatpush1.bf16.msra.mxu0 (!%p188_p3), %v820_v2  ;;  %778 = vmatpush1.bf16.msra.mxu1 (!%p188_p3), %v820_v2 }
   0xd   : > { %410 = vmatprep.subr.bf16.mxu0 (!%p188_p3), %v854_v1  ;;  %770 = vmatprep.subr.bf16.mxu1 (!%p188_p3), %v854_v1  ;;  %v499_v30 = vand.u32 (!%p188_p3), 7, %v479_v27  ;;  %v492_v32 = vand.u32 (!%p188_p3), 7, %v478_v28  ;;  %v506_v33 = vand.u32 (!%p188_p3), 7, %v480_v29  ;;  %vm529_vm6 = vcmp.lt.s32.totalorder (!%p188_p3), %v485_v31, 4 }
   0xe   : > { %s990_s15 = smov (!%p229_p4, %s844_s15), 1 }
   0xf   : > { %s786_s23 = smul.u32 24, %s990_s15  ;;  %s738_s21 = sshll.u32 %s990_s15, 3  ;;  %vm531_vm5 = vcmp.lt.s32.totalorder %v499_v30, 4  ;;  %vm530_vm8 = vcmp.lt.s32.totalorder %v492_v32, 4  ;;  %vm532_vm9 = vcmp.lt.s32.totalorder %v506_v33, 4 }
  0x10   : > { %411 = vmatpush1.bf16.msra.mxu0 %v821_v3  ;;  %779 = vmatpush1.bf16.msra.mxu1 %v821_v3  ;;  %s938_s24 = scalar_lea.vmem %s983_s3, %s738_s21  ;;  %s945_s27 = scalar_lea.vmem %s984_s4, %s738_s21 }
  0x11   : > { %s237_s26 = scalar_lea.vmem %s980_s0, %s786_s23  ;;  %412 = vmatprep.subr.bf16.mxu0 %v854_v1  ;;  %771 = vmatprep.subr.bf16.mxu1 %v854_v1  ;;  %568 = vst.msk [vmem:[%s938_s24] sm:$0xff] %vm545_vm4, %v857_v24  ;;  %569 = vst.msk [vmem:[%s945_s27] sm:$0xff] %vm545_vm4, %v857_v24  ;;  %s763_s28 = sshll.u32 %s990_s15, 4 }
  0x12   : > { %v815_v4 = vld [vmem:[%s237_s26 + $0xc] sm:$0xff]   ;;  %v816_v5 = vld [vmem:[%s237_s26 + $0x4] sm:$0xff]  }
  0x13   : > { %291 = vrot.lane.b32.xlu1 %v815_v4, %s855_s5  ;;  %v817_v7 = vld [vmem:[%s237_s26 + $0x10] sm:$0xff]   ;;  %289 = vrot.lane.b32.xlu0 %v816_v5, %s855_s5  ;;  %v818_v8 = vld [vmem:[%s237_s26 + $0x8] sm:$0xff]   ;;  %s246_s5 = scalar_lea.vmem %s982_s2, %s763_s28 }
  0x14   : > { %v825_v9 = vld [vmem:[%s237_s26 + $0x8] sm:$0xff]   ;;  %v826_v10 = vld [vmem:[%s237_s26] sm:$0xff]   ;;  %413 = vmatpush1.bf16.msra.mxu0 %v822_v6  ;;  %780 = vmatpush1.bf16.msra.mxu1 %v822_v6 }
  0x15   : > { %274 = vst.msk [vmem:[#allocation2 + $0x10] sm:$0xff] %vm272_vm0, %v825_v9  ;;  %273 = vst.msk [vmem:[#allocation2] sm:$0xff] %vm272_vm0, %v826_v10  ;;  %414 = vmatprep.subr.bf16.mxu0 %v854_v1  ;;  %772 = vmatprep.subr.bf16.mxu1 %v854_v1 }
  0x17   : > { %314 = vrot.lane.b32.xlu1 %v817_v7, %s856_s6  ;;  %312 = vrot.lane.b32.xlu0 %v818_v8, %s856_s6 }
  0x18   : > { %415 = vmatpush1.bf16.msra.mxu0 %v823_v11  ;;  %781 = vmatpush1.bf16.msra.mxu1 %v823_v11  ;;  %v570_v0 = vld [vmem:[%s938_s24] sm:$0xff] }
  0x19   : > { %416 = vmatprep.subr.bf16.mxu0 %v854_v1  ;;  %773 = vmatprep.subr.bf16.mxu1 %v854_v1  ;;  %v573_v4 = vld [vmem:[%s945_s27] sm:$0xff] }
  0x1c   : > { %417 = vmatpush1.bf16.msra.mxu0 %v824_v12  ;;  %782 = vmatpush1.bf16.msra.mxu1 %v824_v12 }
  0x1d   : > { %418 = vmatprep.subr.bf16.mxu0 %v854_v1  ;;  %774 = vmatprep.subr.bf16.mxu1 %v854_v1 }
  0x20   : > { %419 = vmatpush1.bf16.msra.mxu0 %v827_v13  ;;  %783 = vmatpush1.bf16.msra.mxu1 %v827_v13 }
  0x21   : > { %420 = vmatprep.subr.bf16.mxu0 %v854_v1  ;;  %775 = vmatprep.subr.bf16.mxu1 %v854_v1 }
  0x24   : > { %421 = vmatpush1.bf16.msra.mxu0 %v828_v14  ;;  %784 = vmatpush1.bf16.msra.mxu1 %v828_v14 }
  0x25   : > { %422 = vmatprep.subr.bf16.mxu0 %v854_v1  ;;  %776 = vmatprep.subr.bf16.mxu1 %v854_v1 }
  0x28   : > { %423 = vmatpush1.bf16.msra.mxu0 %v829_v15  ;;  %785 = vmatpush1.bf16.msra.mxu1 %v829_v15 }
  0x85   : > { %v292_v16 = vpop.permute.xlu1 %291  ;;  %v290_v17 = vpop.permute.xlu0 %289 }
  0x86   : > { %297 = vst.msk [vmem:[#allocation2 + $0x10] sm:$0xff] %vm295_vm1, %v292_v16  ;;  %296 = vst.msk [vmem:[#allocation2] sm:$0xff] %vm295_vm1, %v290_v17 }
  0x89   : > { %v315_v18 = vpop.permute.xlu1 %314  ;;  %v313_v19 = vpop.permute.xlu0 %312 }
  0x8a   : > { %322 = vst.msk [vmem:[#allocation2 + $0x10] sm:$0xff] %vm318_vm2, %v315_v18  ;;  %319 = vst.msk [vmem:[#allocation2] sm:$0xff] %vm318_vm2, %v313_v19 }
  0x8b   : > { %323 = vst.msk [vmem:[#allocation2 + $0x18] sm:$0xff] %vm320_vm3, %v315_v18  ;;  %321 = vst.msk [vmem:[#allocation2 + $0x8] sm:$0xff] %vm320_vm3, %v313_v19 }
  0x91   : > { %v326_v21 = vld [vmem:[#allocation2 + $0x10] sm:$0xff]  ;;  %v324_v23 = vld [vmem:[#allocation2] sm:$0xff] }
  0x92   : > { %v327_v20 = vld [vmem:[#allocation2 + $0x18] sm:$0xff]  ;;  %v325_v22 = vld [vmem:[#allocation2 + $0x8] sm:$0xff] }
  0x93   : > { %756 = vmatprep.mubr.msk.bf16.mxu1 %vm320_vm3, %v327_v20  ;;  %755 = vmatprep.mubr.msk.bf16.mxu0 %vm320_vm3, %v325_v22 }
  0x94   : > { %447 = vmatmul.mubr.bf16.vlgmr.msra.gmra.mrb[0].mxu1 %v326_v21  ;;  %439 = vmatmul.mubr.bf16.vlgmr.msra.gmra.mrb[0].mxu0 %v324_v23 }
 0x167   : > { %v448_v34 = vpop.f32.mrb[0].mxu1  ;;  %v440_v35 = vpop.f32.mrb[0].mxu0 }
 0x168   : > { %v766_v36 = vpack.c.bf16 %v448_v34, %v448_v34  ;;  %v543_v37 = vsel %vm531_vm5, %v448_v34, 0.0  ;;  %v450_v38 = vpop.f32.mrb[1].mxu1  ;;  %v764_v39 = vpack.c.bf16 %v440_v35, %v440_v35  ;;  %v541_v40 = vsel %vm529_vm6, %v440_v35, 0.0  ;;  %v442_v41 = vpop.f32.mrb[1].mxu0 }
 0x169   : > { %v451_v42 = vpop.f32.mrb[2].mxu1  ;;  %v553_v43 = vmul.f32 %v541_v40, %v541_v40  ;;  %v555_v44 = vmul.f32 %v543_v37, %v543_v37  ;;  %v443_v45 = vpop.f32.mrb[2].mxu0  ;;  %v546_v52 = vsel %vm545_vm4, %v541_v40, 0.0  ;;  %v549_v53 = vsel %vm545_vm4, %v543_v37, 0.0 }
 0x16a   : > { %474 = vst.msk [vmem:[%s246_s5 + $0x8] sm:$0xf] %vm471_vm7, %v766_v36  ;;  %v767_v46 = vpack.c.bf16 %v451_v42, %v451_v42  ;;  %v453_v47 = vpop.f32.mrb[3].mxu1  ;;  %472 = vst.msk [vmem:[%s246_s5] sm:$0xf] %vm471_vm7, %v764_v39  ;;  %v765_v48 = vpack.c.bf16 %v443_v45, %v443_v45  ;;  %v542_v49 = vsel %vm530_vm8, %v443_v45, 0.0 }
 0x16b   : > { %v544_v50 = vsel %vm532_vm9, %v451_v42, 0.0  ;;  %v445_v51 = vpop.f32.mrb[3].mxu0  ;;  %v547_v54 = vsel %vm545_vm4, %v542_v49, 0.0  ;;  %v554_v55 = vmul.f32 %v542_v49, %v542_v49  ;;  %v557_v57 = vsel %vm545_vm4, %v553_v43, 0.0 }
 0x16c   : > { %475 = vst.msk [vmem:[%s246_s5 + $0xc] sm:$0xf] %vm471_vm7, %v767_v46  ;;  %473 = vst.msk [vmem:[%s246_s5 + $0x4] sm:$0xf] %vm471_vm7, %v765_v48  ;;  %v548_v56 = vadd.f32 %v547_v54, %v546_v52  ;;  %v560_v58 = vsel %vm545_vm4, %v555_v44, 0.0  ;;  %v556_v60 = vmul.f32 %v544_v50, %v544_v50  ;;  %v551_v63 = vsel %vm545_vm4, %v544_v50, 0.0 }
 0x16d   : > { %v558_v59 = vsel %vm545_vm4, %v554_v55, 0.0 }
 0x16e   : > { %v559_v61 = vadd.f32 %v558_v59, %v557_v57  ;;  %v550_v62 = vadd.f32 %v549_v53, %v548_v56  ;;  %v562_v3 = vsel %vm545_vm4, %v556_v60, 0.0 }
 0x170   : > { %v552_v1 = vadd.f32 %v551_v63, %v550_v62  ;;  %v561_v2 = vadd.f32 %v560_v58, %v559_v61 }
 0x172   : > { %v563_v5 = vadd.f32 %v562_v3, %v561_v2  ;;  %v571_v6 = vadd.f32 %v570_v0, %v552_v1 }
 0x174   : > { %572 = vst.msk [vmem:[%s938_s24] sm:$0xff] %vm545_vm4, %v571_v6  ;;  %v574_v7 = vadd.f32 %v573_v4, %v563_v5 }
 0x176   : > { %575 = vst.msk [vmem:[%s945_s27] sm:$0xff] %vm545_vm4, %v574_v7 }
 0x177 PF: > { %s15_s17 = sadd.s32 1, %s852_s17   ;;  %s985_s15 = smov %s848_s16 }
 0x178   : > { %p12_p5 = scmp.ge.s32.totalorder %s15_s17, 4   ;;  %s986_s16 = smov %s988_s18 }
 0x17a   :  { %14 = sbr.rel (!%p12_p5) target bundleno = 2 (0x2), region = 86 }

// kernel: unet_forward.35
= control target key start
LH: loop header
LB: loop body
LE: loop exit
PB: predicated region body
PF: predicated region fallthrough
CT: control target
= control target key end

     0   :  { %s389_s12 = smov 0   ;;  %s415_s0 = inlined_call_operand.vmem [shape: bf16[2,16,32], index: 0, kind: input, shape index: {}]   ;;  %s416_s1 = inlined_call_operand.vmem [shape: bf16[32,64], index: 1, kind: input, shape index: {}]   ;;  %s417_s2 = inlined_call_operand.vmem [shape: f32[1,64], index: 2, kind: input, shape index: {}]   ;;  %s418_s3 = inlined_call_operand.vmem [shape: bf16[2,16,64], index: 3, kind: output, shape index: {}]  }
   0x1 LB: > { %s313_s13 = sadd.s32 4294967295, %s365_s12   ;;  %p317_p0 = scmp.ge.s32.totalorder %s365_s12, 1  ;;  %s365_s12 = sphi %s389_s12, %s13_s12  }
   0x2   : > { %p137_p1 = scmp.lt.s32.totalorder %s365_s12, 3 }
   0x4   : > { %p138_p2 = pnand %p317_p0, %p137_p1 }
   0x5   : > { %v356_v0 = vld [vmem:[%s416_s1] sm:$0xff] (!%p138_p2)   ;;  %v367_v1 = vmov (!%p138_p2), 0.0   ;;  %v357_v2 = vld [vmem:[%s416_s1 + $0x8] sm:$0xff] (!%p138_p2)   ;;  %vm368_vm0 = vmmov (!%p138_p2), 0   ;;  %p161_p3 = scmp.lt.s32.totalorder (!%p138_p2), %s313_s13, 1  ;;  %vm202_vm1 = vcmask (!%p138_p2), 261120  }
   0x6   : > { %141 = sbr.rel (%p138_p2) target bundleno = 236 (0xec), region = 32  ;;  %338 = vmatprep.subr.bf16.mxu0 (!%p138_p2), %v367_v1  ;;  %342 = vmatprep.mubr.msk.bf16.mxu0 (!%p138_p2), %vm368_vm0, %v367_v1  ;;  %v322_v4 = vld [vmem:[%s417_s2] ss:$0 sm:$0xff] (!%p138_p2)  ;;  %vm255_vm2 = vcmask (!%p138_p2), 519168  }
   0x7   : > { %339 = vmatpush3.bf16.msra.mxu0 (!%p138_p2), %v356_v0 }
   0x8   : > { %340 = vmatprep.subr.bf16.mxu0 (!%p138_p2), %v367_v1 }
   0xb   : > { %341 = vmatpush3.bf16.msra.mxu0 (!%p138_p2), %v357_v2 }
   0xd   : > { %s420_s13 = smov (!%p161_p3, %s313_s13), 1 }
   0xe   : > { %s331_s18 = sshll.u32 %s420_s13, 3 }
   0xf   : > { %s165_s21 = scalar_lea.vmem %s415_s0, %s331_s18  ;;  %s170_s26 = scalar_lea.vmem %s418_s3, %s331_s18 }
  0x10   : > { %v358_v3 = vld [vmem:[%s165_s21] sm:$0xff]  }
  0x11   : > { %343 = vmatmul.mubr.msk.bf16.vlgmr.msra.gmra.mrb[0].mxu0 %vm202_vm1, %v358_v3 }
  0xe4   : > { %v240_v5 = vpop.f32.mrb[0].mxu0 }
  0xe5   : > { %v241_v6 = vadd.f32 %v322_v4, %v240_v5  ;;  %v344_v7 = vpop.f32.mrb[1].mxu0 }
  0xe6   : > { %v243_v8 = vpop.f32.mrb[2].mxu0 }
  0xe7   : > { %v333_v9 = vpack.c.bf16 %v241_v6, %v241_v6  ;;  %v244_v10 = vadd.f32 %v322_v4, %v243_v8  ;;  %v345_v11 = vpop.f32.mrb[3].mxu0 }
  0xe9   : > { %256 = vst.msk [vmem:[%s170_s26] sm:$0xf] %vm255_vm2, %v333_v9  ;;  %v334_v12 = vpack.c.bf16 %v244_v10, %v244_v10 }
  0xeb   : > { %257 = vst.msk [vmem:[%s170_s26 + $0x4] sm:$0xf] %vm255_vm2, %v334_v12 }
  0xec PF: > { %s13_s12 = sadd.s32 1, %s365_s12  }
  0xed   : > { %p10_p4 = scmp.ge.s32.totalorder %s13_s12, 4  }
  0xef   :  { %12 = sbr.rel (!%p10_p4) target bundleno = 1 (0x1), region = 62 }

// kernel: unet_forward.33
= control target key start
LH: loop header
LB: loop body
LE: loop exit
PB: predicated region body
PF: predicated region fallthrough
CT: control target
= control target key end

     0   :  { %s1046_s15 = smov 0   ;;  %s1048_s16 = smov 0   ;;  %s1180_s0 = inlined_call_operand.vmem [shape: bf16[2,1,48,96], index: 0, kind: input, shape index: {}]   ;;  %s1181_s1 = inlined_call_operand.vmem [shape: bf16[288,32], index: 1, kind: input, shape index: {}]   ;;  %s1182_s2 = inlined_call_operand.vmem [shape: bf16[2,1,32,32], index: 2, kind: output, shape index: {0}]   ;;  %s1183_s3 = inlined_call_operand.vmem [shape: f32[2,8,32], index: 3, kind: output, shape index: {1}]   ;;  %s1184_s4 = inlined_call_operand.vmem [shape: f32[2,8,32], index: 4, kind: output, shape index: {2}]  }
   0x1   :  { %s1050_s17 = smov 0  }
   0x2 LB: > { %s27_s18 = sadd.s32 1, %s1012_s16  ;;  %p859_p0 = scmp.ge.s32.totalorder %s1016_s17, 1  ;;  %s1016_s17 = sphi %s1050_s17, %s15_s17   ;;  %s1012_s16 = sphi %s1048_s16, %s1186_s16   ;;  %s1008_s15 = sphi %s1046_s15, %s1185_s15  }
   0x3   : > { %p29_p1 = scmp.ge.s32.totalorder %s27_s18, 2  ;;  %p187_p2 = scmp.lt.s32.totalorder %s1016_s17, 3 }
   0x5   : > { %s1188_s18 = smov (%p29_p1, %s27_s18), 0  ;;  %p188_p3 = pnand %p859_p0, %p187_p2 }
   0x6   : > { %p229_p4 = scmp.lt.s32.totalorder (!%p188_p3), %s1008_s15, 1  ;;  %v974_v0 = vld [vmem:[%s1181_s1 + $0x40] sm:$0xff] (!%p188_p3)   ;;  %v976_v2 = vld [vmem:[%s1181_s1 + $0x48] sm:$0xff] (!%p188_p3)   ;;  %v978_v4 = vld [vmem:[%s1181_s1 + $0x50] sm:$0xff] (!%p188_p3)   ;;  %s1018_s9 = smov (!%p188_p3), 96   ;;  %vm272_vm0 = vcmask (!%p188_p3), 785408   ;;  %v602_v35 = vlaneseq (!%p188_p3) }
   0x7   : > { %191 = sbr.rel (%p188_p3) target bundleno = 383 (0x17f), region = 28  ;;  %v975_v1 = vld [vmem:[%s1181_s1] sm:$0xff] (!%p188_p3)   ;;  %902 = vmatprep.subr.bf16.mxu0 (!%p188_p3), %v974_v0  ;;  %v977_v3 = vld [vmem:[%s1181_s1 + $0x8] sm:$0xff] (!%p188_p3)   ;;  %v979_v5 = vld [vmem:[%s1181_s1 + $0x10] sm:$0xff] (!%p188_p3)   ;;  %s1019_s14 = smov (!%p188_p3), 64   ;;  %vm295_vm1 = vcmask (!%p188_p3), 1048320  }
   0x8   : > { %903 = vmatpush3.bf16.msra.mxu0 (!%p188_p3), %v975_v1  ;;  %v980_v10 = vld [vmem:[%s1181_s1 + $0x58] sm:$0xff] (!%p188_p3)   ;;  %v982_v12 = vld [vmem:[%s1181_s1 + $0x60] sm:$0xff] (!%p188_p3)   ;;  %v985_v15 = vld [vmem:[%s1181_s1 + $0x68] sm:$0xff] (!%p188_p3)   ;;  %vm297_vm2 = vcmask (!%p188_p3), 523264   ;;  %vm321_vm3 = vcmask (!%p188_p3), 1048064   ;;  %vm323_vm4 = vcmask (!%p188_p3), 261120  }
   0x9   : > { %904 = vmatprep.subr.bf16.mxu0 (!%p188_p3), %v976_v2  ;;  %v981_v11 = vld [vmem:[%s1181_s1 + $0x18] sm:$0xff] (!%p188_p3)   ;;  %v983_v14 = vld [vmem:[%s1181_s1 + $0x20] sm:$0xff] (!%p188_p3)   ;;  %v986_v17 = vld [vmem:[%s1181_s1 + $0x28] sm:$0xff] (!%p188_p3)   ;;  %v1020_v34 = vmov (!%p188_p3), 0.0   ;;  %v603_v36 = vshrl.u32 (!%p188_p3), %v602_v35, 7  ;;  %vm597_vm6 = vcmask (!%p188_p3), 257024  }
   0xa   : > { %v988_v18 = vld [vmem:[%s1181_s1 + $0x70] sm:$0xff] (!%p188_p3)   ;;  %v990_v19 = vld [vmem:[%s1181_s1 + $0x80] sm:$0xff] (!%p188_p3)   ;;  %v993_v21 = vld [vmem:[%s1181_s1 + $0x88] sm:$0xff] (!%p188_p3)  }
   0xb   : > { %934 = vmatprep.subr.bf16.mxu1 (!%p188_p3), %v990_v19  ;;  %v989_v20 = vld [vmem:[%s1181_s1 + $0x30] sm:$0xff] (!%p188_p3)   ;;  %v991_v22 = vld [vmem:[%s1181_s1 + $0x78] sm:$0xff] (!%p188_p3)   ;;  %v604_v37 = vadd.s32 (!%p188_p3), 8, %v603_v36  ;;  %v611_v38 = vand.u32 (!%p188_p3), 7, %v603_v36  ;;  %v605_v49 = vadd.s32 (!%p188_p3), 16, %v603_v36  ;;  %v606_v52 = vadd.s32 (!%p188_p3), 24, %v603_v36 }
   0xc   : > { %905 = vmatpush3.bf16.msra.mxu0 (!%p188_p3), %v977_v3  ;;  %935 = vmatpush3.bf16.msra.mxu1 (!%p188_p3), %v990_v19  ;;  %v992_v23 = vld [vmem:[%s1181_s1 + $0x38] sm:$0xff] (!%p188_p3)  }
   0xd   : > { %906 = vmatprep.subr.bf16.mxu0 (!%p188_p3), %v978_v4  ;;  %936 = vmatprep.subr.bf16.mxu1 (!%p188_p3), %v993_v21  ;;  %v618_v43 = vand.u32 (!%p188_p3), 7, %v604_v37  ;;  %vm655_vm5 = vcmp.lt.s32.totalorder (!%p188_p3), %v611_v38, 4  ;;  %v625_v57 = vand.u32 (!%p188_p3), 7, %v605_v49  ;;  %v632_v1 = vand.u32 (!%p188_p3), 7, %v606_v52 }
   0xe   : > { %s1190_s15 = smov (!%p229_p4, %s1008_s15), 1 }
   0xf   : > { %s942_s25 = smul.u32 24, %s1190_s15  ;;  %s863_s13 = sshll.u32 %s1190_s15, 3  ;;  %vm656_vm7 = vcmp.lt.s32.totalorder %v618_v43, 4  ;;  %vm657_vm8 = vcmp.lt.s32.totalorder %v625_v57, 4  ;;  %vm658_vm9 = vcmp.lt.s32.totalorder %v632_v1, 4 }
  0x10   : > { %907 = vmatpush3.bf16.msra.mxu0 %v979_v5  ;;  %937 = vmatpush3.bf16.msra.mxu1 %v993_v21  ;;  %s1132_s20 = scalar_lea.vmem %s1183_s3, %s863_s13  ;;  %s1139_s23 = scalar_lea.vmem %s1184_s4, %s863_s13 }
  0x11   : > { %s237_s6 = scalar_lea.vmem %s1180_s0, %s942_s25  ;;  %908 = vmatprep.subr.bf16.mxu0 %v980_v10  ;;  %693 = vst.msk [vmem:[%s1132_s20] sm:$0xff] %vm323_vm4, %v1020_v34  ;;  %694 = vst.msk [vmem:[%s1139_s23] sm:$0xff] %vm323_vm4, %v1020_v34  ;;  %s897_s24 = sshll.u32 %s1190_s15, 4 }
  0x12   : > { %v970_v6 = vld [vmem:[%s237_s6 + $0x4] sm:$0xff]   ;;  %v971_v7 = vld [vmem:[%s237_s6 + $0xc] sm:$0xff]   ;;  %s1147_s27 = scalar_lea.vmem %s1182_s2, %s897_s24 }
  0x13   : > { %289 = vrot.lane.b32.xlu0 %v970_v6, %s1018_s9  ;;  %v972_v8 = vld [vmem:[%s237_s6 + $0x8] sm:$0xff]   ;;  %291 = vrot.lane.b32.xlu1 %v971_v7, %s1018_s9  ;;  %v973_v9 = vld [vmem:[%s237_s6 + $0x10] sm:$0xff]  }
  0x14   : > { %v984_v13 = vld [vmem:[%s237_s6] sm:$0xff]   ;;  %909 = vmatpush3.bf16.msra.mxu0 %v981_v11  ;;  %v987_v16 = vld [vmem:[%s237_s6 + $0x8] sm:$0xff]  }
  0x15   : > { %910 = vmatprep.subr.bf16.mxu0 %v982_v12  ;;  %273 = vst.msk [vmem:[#allocation2] sm:$0xff] %vm272_vm0, %v984_v13  ;;  %274 = vst.msk [vmem:[#allocation2 + $0x18] sm:$0xff] %vm272_vm0, %v987_v16 }
  0x17   : > { %315 = vrot.lane.b32.xlu0 %v972_v8, %s1019_s14  ;;  %317 = vrot.lane.b32.xlu1 %v973_v9, %s1019_s14 }
  0x18   : > { %911 = vmatpush3.bf16.msra.mxu0 %v983_v14 }
  0x19   : > { %912 = vmatprep.subr.bf16.mxu0 %v985_v15 }
  0x1c   : > { %913 = vmatpush3.bf16.msra.mxu0 %v986_v17 }
  0x1d   : > { %914 = vmatprep.subr.bf16.mxu0 %v988_v18 }
  0x20   : > { %915 = vmatpush3.bf16.msra.mxu0 %v989_v20 }
  0x21   : > { %916 = vmatprep.subr.bf16.mxu0 %v991_v22  ;;  %v695_v22 = vld [vmem:[%s1132_s20] sm:$0xff] }
  0x24   : > { %917 = vmatpush3.bf16.msra.mxu0 %v992_v23 }
  0x85   : > { %v290_v24 = vpop.permute.xlu0 %289  ;;  %v292_v25 = vpop.permute.xlu1 %291 }
  0x86   : > { %296 = vst.msk [vmem:[#allocation2] sm:$0xff] %vm295_vm1, %v290_v24  ;;  %299 = vst.msk [vmem:[#allocation2 + $0x18] sm:$0xff] %vm295_vm1, %v292_v25 }
  0x87   : > { %298 = vst.msk [vmem:[#allocation2 + $0x8] sm:$0xff] %vm297_vm2, %v290_v24  ;;  %300 = vst.msk [vmem:[#allocation2 + $0x20] sm:$0xff] %vm297_vm2, %v292_v25 }
  0x89   : > { %v316_v26 = vpop.permute.xlu0 %315  ;;  %v318_v27 = vpop.permute.xlu1 %317 }
  0x8a   : > { %322 = vst.msk [vmem:[#allocation2 + $0x8] sm:$0xff] %vm321_vm3, %v316_v26  ;;  %325 = vst.msk [vmem:[#allocation2 + $0x20] sm:$0xff] %vm321_vm3, %v318_v27 }
  0x8b   : > { %324 = vst.msk [vmem:[#allocation2 + $0x10] sm:$0xff] %vm323_vm4, %v316_v26  ;;  %326 = vst.msk [vmem:[#allocation2 + $0x28] sm:$0xff] %vm323_vm4, %v318_v27  ;;  %v698_v26 = vld [vmem:[%s1139_s23] sm:$0xff] }
  0x8d   : > { %v327_v30 = vld [vmem:[#allocation2] sm:$0xff]  ;;  %v330_v33 = vld [vmem:[#allocation2 + $0x18] sm:$0xff] }
  0x91   : > { %v328_v28 = vld [vmem:[#allocation2 + $0x8] sm:$0xff]  ;;  %v331_v32 = vld [vmem:[#allocation2 + $0x20] sm:$0xff] }
  0x92   : > { %v329_v29 = vld [vmem:[#allocation2 + $0x10] sm:$0xff]  ;;  %515 = vmatprep.mubr.bf16.mxu0 %v328_v28  ;;  %v332_v31 = vld [vmem:[#allocation2 + $0x28] sm:$0xff] }
  0x93   : > { %938 = vmatprep.mubr.msk.bf16.mxu1 %vm323_vm4, %v329_v29  ;;  %516 = vmatmul.mubr.bf16.vlgmr.msra.gmra.mrb[0].mxu0 %v327_v30 }
  0x94   : > { %939 = vmatmul.mubr.msk.bf16.vlgmr.msra.gmra.mrb[0].mxu1 %vm323_vm4, %v332_v31  ;;  %523 = vmatprep.mubr.bf16.mxu0 %v331_v32 }
  0x9b   : > { %524 = vmatmul.mubr.bf16.gmra.mrb[4].mxu0 %v330_v33 }
 0x166   : > { %v918_v39 = vpop.f32.mrb[0].mxu0 }
 0x167   : > { %v940_v40 = vpop.f32.mrb[0].mxu1  ;;  %v919_v41 = vpop.f32.mrb[1].mxu0 }
 0x168   : > { %v566_v42 = vpop.f32.mrb[1].mxu1  ;;  %v920_v44 = vadd.f32 %v919_v41, %v918_v39  ;;  %v921_v45 = vpop.f32.mrb[2].mxu0 }
 0x169   : > { %v941_v46 = vpop.f32.mrb[2].mxu1  ;;  %v922_v47 = vpop.f32.mrb[3].mxu0 }
 0x16a   : > { %v569_v48 = vpop.f32.mrb[3].mxu1  ;;  %v923_v50 = vadd.f32 %v922_v47, %v921_v45  ;;  %v567_v51 = vadd.f32 %v920_v44, %v566_v42 }
 0x16c   : > { %v898_v53 = vpack.c.bf16 %v567_v51, %v567_v51  ;;  %v667_v54 = vsel %vm655_vm5, %v567_v51, 0.0  ;;  %v570_v55 = vadd.f32 %v923_v50, %v569_v48 }
 0x16d   : > { %v678_v56 = vmul.f32 %v667_v54, %v667_v54  ;;  %v671_v61 = vsel %vm323_vm4, %v667_v54, 0.0 }
 0x16e   : > { %598 = vst.msk [vmem:[%s1147_s27] sm:$0xf] %vm597_vm6, %v898_v53  ;;  %v899_v58 = vpack.c.bf16 %v570_v55, %v570_v55  ;;  %v668_v59 = vsel %vm656_vm7, %v570_v55, 0.0  ;;  %v924_v60 = vpop.f32.mrb[4].mxu0 }
 0x16f   : > { %v672_v62 = vsel %vm323_vm4, %v668_v59, 0.0  ;;  %v679_v63 = vmul.f32 %v668_v59, %v668_v59  ;;  %v925_v0 = vpop.f32.mrb[5].mxu0  ;;  %v682_v5 = vsel %vm323_vm4, %v678_v56, 0.0 }
 0x170   : > { %599 = vst.msk [vmem:[%s1147_s27 + $0x4] sm:$0xf] %vm597_vm6, %v899_v58  ;;  %v673_v2 = vadd.f32 %v672_v62, %v671_v61  ;;  %v926_v3 = vadd.f32 %v925_v0, %v924_v60  ;;  %v927_v4 = vpop.f32.mrb[6].mxu0 }
 0x171   : > { %v683_v6 = vsel %vm323_vm4, %v679_v63, 0.0  ;;  %v928_v7 = vpop.f32.mrb[7].mxu0 }
 0x172   : > { %v684_v8 = vadd.f32 %v683_v6, %v682_v5  ;;  %v575_v9 = vadd.f32 %v940_v40, %v926_v3  ;;  %v929_v10 = vadd.f32 %v928_v7, %v927_v4 }
 0x174   : > { %v900_v11 = vpack.c.bf16 %v575_v9, %v575_v9  ;;  %v669_v12 = vsel %vm657_vm8, %v575_v9, 0.0  ;;  %v578_v13 = vadd.f32 %v941_v46, %v929_v10 }
 0x175   : > { %v674_v14 = vsel %vm323_vm4, %v669_v12, 0.0  ;;  %v680_v15 = vmul.f32 %v669_v12, %v669_v12 }
 0x176   : > { %600 = vst.msk [vmem:[%s1147_s27 + $0x8] sm:$0xf] %vm597_vm6, %v900_v11  ;;  %v675_v16 = vadd.f32 %v674_v14, %v673_v2  ;;  %v901_v17 = vpack.c.bf16 %v578_v13, %v578_v13  ;;  %v670_v18 = vsel %vm658_vm9, %v578_v13, 0.0 }
 0x177   : > { %v685_v19 = vsel %vm323_vm4, %v680_v15, 0.0  ;;  %v676_v20 = vsel %vm323_vm4, %v670_v18, 0.0  ;;  %v681_v21 = vmul.f32 %v670_v18, %v670_v18 }
 0x178   : > { %v686_v23 = vadd.f32 %v685_v19, %v684_v8  ;;  %601 = vst.msk [vmem:[%s1147_s27 + $0xc] sm:$0xf] %vm597_vm6, %v901_v17  ;;  %v677_v24 = vadd.f32 %v676_v20, %v675_v16 }
 0x179   : > { %v687_v25 = vsel %vm323_vm4, %v681_v21, 0.0 }
 0x17a   : > { %v688_v27 = vadd.f32 %v687_v25, %v686_v23  ;;  %v696_v28 = vadd.f32 %v695_v22, %v677_v24 }
 0x17c   : > { %697 = vst.msk [vmem:[%s1132_s20] sm:$0xff] %vm323_vm4, %v696_v28  ;;  %v699_v29 = vadd.f32 %v698_v26, %v688_v27 }
 0x17e   : > { %700 = vst.msk [vmem:[%s1139_s23] sm:$0xff] %vm323_vm4, %v699_v29 }
 0x17f PF: > { %s15_s17 = sadd.s32 1, %s1016_s17   ;;  %s1185_s15 = smov %s1012_s16 }
 0x180   : > { %p12_p5 = scmp.ge.s32.totalorder %s15_s17, 4   ;;  %s1186_s16 = smov %s1188_s18 }
 0x182   :  { %14 = sbr.rel (!%p12_p5) target bundleno = 2 (0x2), region = 86 }

// kernel: unet_forward.40
= control target key start
LH: loop header
LB: loop body
LE: loop exit
PB: predicated region body
PF: predicated region fallthrough
CT: control target
= control target key end

     0   :  { %s486_s12 = smov 0   ;;  %s517_s0 = inlined_call_operand.vmem [shape: bf16[2,64,16], index: 0, kind: input, shape index: {}]   ;;  %s518_s1 = inlined_call_operand.vmem [shape: bf16[16,32], index: 1, kind: input, shape index: {}]   ;;  %s519_s2 = inlined_call_operand.vmem [shape: f32[1,32], index: 2, kind: input, shape index: {}]   ;;  %s520_s3 = inlined_call_operand.vmem [shape: bf16[2,64,32], index: 3, kind: output, shape index: {}]  }
   0x1 LB: > { %s389_s13 = sadd.s32 4294967295, %s464_s12   ;;  %p393_p0 = scmp.ge.s32.totalorder %s464_s12, 1  ;;  %s464_s12 = sphi %s486_s12, %s13_s12  }
   0x2   : > { %p137_p1 = scmp.lt.s32.totalorder %s464_s12, 3 }
   0x4   : > { %p138_p2 = pnand %p393_p0, %p137_p1 }
   0x5   : > { %v453_v0 = vld [vmem:[%s518_s1] sm:$0xff] (!%p138_p2)   ;;  %p161_p3 = scmp.lt.s32.totalorder (!%p138_p2), %s389_s13, 1  ;;  %vm215_vm0 = vcmask (!%p138_p2), 130048   ;;  %vm325_vm1 = vcmask (!%p138_p2), 257024  }
   0x6   : > { %141 = sbr.rel (%p138_p2) target bundleno = 238 (0xee), region = 32  ;;  %433 = vmatprep.subr.bf16.mxu0 (!%p138_p2), %v453_v0  ;;  %443 = vmatprep.subr.bf16.mxu1 (!%p138_p2), %v453_v0  ;;  %v398_v5 = vld [vmem:[%s519_s2] ss:$0 sm:$0xff] (!%p138_p2) }
   0x7   : > { %434 = vmatpush3.bf16.msra.mxu0 (!%p138_p2), %v453_v0  ;;  %444 = vmatpush3.bf16.msra.mxu1 (!%p138_p2), %v453_v0 }
   0xd   : > { %s522_s13 = smov (!%p161_p3, %s389_s13), 1 }
   0xe   : > { %s418_s16 = sshll.u32 %s522_s13, 5 }
   0xf   : > { %s165_s19 = scalar_lea.vmem %s517_s0, %s418_s16  ;;  %s170_s24 = scalar_lea.vmem %s520_s3, %s418_s16 }
  0x10   : > { %v454_v1 = vld [vmem:[%s165_s19] sm:$0xff]   ;;  %v455_v2 = vld [vmem:[%s165_s19 + $0x10] sm:$0xff]   ;;  %v456_v3 = vld [vmem:[%s165_s19 + $0x8] sm:$0xff]  }
  0x11   : > { %435 = vmatprep.mubr.msk.bf16.mxu0 %vm215_vm0, %v454_v1  ;;  %439 = vmatprep.mubr.msk.bf16.mxu1 %vm215_vm0, %v455_v2  ;;  %v457_v4 = vld [vmem:[%s165_s19 + $0x18] sm:$0xff]  }
  0x12   : > { %436 = vmatmul.mubr.msk.bf16.vlgmr.msra.gmra.mrb[0].mxu0 %vm215_vm0, %v456_v3  ;;  %440 = vmatmul.mubr.msk.bf16.vlgmr.msra.gmra.mrb[0].mxu1 %vm215_vm0, %v457_v4 }
  0xe5   : > { %v437_v6 = vpop.f32.mrb[0].mxu0  ;;  %v441_v8 = vpop.f32.mrb[0].mxu1 }
  0xe6   : > { %v271_v7 = vadd.f32 %v437_v6, %v398_v5  ;;  %v262_v9 = vpop.f32.mrb[1].mxu0  ;;  %v287_v10 = vadd.f32 %v441_v8, %v398_v5  ;;  %v278_v12 = vpop.f32.mrb[1].mxu1 }
  0xe7   : > { %v263_v11 = vadd.f32 %v398_v5, %v262_v9  ;;  %v438_v13 = vpop.f32.mrb[2].mxu0  ;;  %v279_v15 = vadd.f32 %v398_v5, %v278_v12  ;;  %v442_v17 = vpop.f32.mrb[2].mxu1 }
  0xe8   : > { %v422_v14 = vpack.c.bf16 %v271_v7, %v271_v7  ;;  %v274_v16 = vadd.f32 %v438_v13, %v398_v5  ;;  %v265_v18 = vpop.f32.mrb[3].mxu0  ;;  %v426_v19 = vpack.c.bf16 %v287_v10, %v287_v10  ;;  %v290_v21 = vadd.f32 %v442_v17, %v398_v5  ;;  %v281_v23 = vpop.f32.mrb[3].mxu1 }
  0xe9   : > { %v420_v20 = vpack.c.bf16 %v263_v11, %v263_v11  ;;  %v266_v22 = vadd.f32 %v398_v5, %v265_v18  ;;  %v424_v24 = vpack.c.bf16 %v279_v15, %v279_v15  ;;  %v282_v26 = vadd.f32 %v398_v5, %v281_v23 }
  0xea   : > { %328 = vst.msk [vmem:[%s170_s24 + $0x8] sm:$0xf] %vm325_vm1, %v422_v14  ;;  %v423_v25 = vpack.c.bf16 %v274_v16, %v274_v16  ;;  %332 = vst.msk [vmem:[%s170_s24 + $0x18] sm:$0xf] %vm325_vm1, %v426_v19  ;;  %v427_v27 = vpack.c.bf16 %v290_v21, %v290_v21 }
  0xeb   : > { %326 = vst.msk [vmem:[%s170_s24] sm:$0xf] %vm325_vm1, %v420_v20  ;;  %v421_v28 = vpack.c.bf16 %v266_v22, %v266_v22  ;;  %330 = vst.msk [vmem:[%s170_s24 + $0x10] sm:$0xf] %vm325_vm1, %v424_v24  ;;  %v425_v29 = vpack.c.bf16 %v282_v26, %v282_v26 }
  0xec   : > { %329 = vst.msk [vmem:[%s170_s24 + $0xc] sm:$0xf] %vm325_vm1, %v423_v25  ;;  %333 = vst.msk [vmem:[%s170_s24 + $0x1c] sm:$0xf] %vm325_vm1, %v427_v27 }
  0xed   : > { %327 = vst.msk [vmem:[%s170_s24 + $0x4] sm:$0xf] %vm325_vm1, %v421_v28  ;;  %331 = vst.msk [vmem:[%s170_s24 + $0x14] sm:$0xf] %vm325_vm1, %v425_v29 }
  0xee PF: > { %s13_s12 = sadd.s32 1, %s464_s12  }
  0xef   : > { %p10_p4 = scmp.ge.s32.totalorder %s13_s12, 4  }
  0xf1   :  { %12 = sbr.rel (!%p10_p4) target bundleno = 1 (0x1), region = 62 }

// kernel: unet_forward.36
= control target key start
LH: loop header
LB: loop body
LE: loop exit
PB: predicated region body
PF: predicated region fallthrough
CT: control target
= control target key end

     0   :  { %s2245_s18 = smov 0   ;;  %s2247_s19 = smov 0   ;;  %s2590_s0 = inlined_call_operand.vmem [shape: bf16[2,1,160,48], index: 0, kind: input, shape index: {}]   ;;  %s2591_s1 = inlined_call_operand.vmem [shape: bf16[2,1,160,48], index: 1, kind: input, shape index: {}]   ;;  %s2592_s2 = inlined_call_operand.vmem [shape: bf16[288,16], index: 2, kind: input, shape index: {}]   ;;  %s2593_s3 = inlined_call_operand.vmem [shape: bf16[2,1,128,16], index: 3, kind: output, shape index: {0}]   ;;  %s2594_s4 = inlined_call_operand.vmem [shape: f32[2,8,16], index: 4, kind: output, shape index: {1}]   ;;  %s2595_s5 = inlined_call_operand.vmem [shape: f32[2,8,16], index: 5, kind: output, shape index: {2}]  }
   0x1   :  { %s2249_s20 = smov 0  }
   0x2 LB: > { %s28_s21 = sadd.s32 1, %s2203_s19  ;;  %p1862_p0 = scmp.ge.s32.totalorder %s2207_s20, 1  ;;  %s2207_s20 = sphi %s2249_s20, %s16_s20   ;;  %s2203_s19 = sphi %s2247_s19, %s2597_s19   ;;  %s2199_s18 = sphi %s2245_s18, %s2596_s18  }
   0x3   : > { %p30_p1 = scmp.ge.s32.totalorder %s28_s21, 2  ;;  %p228_p2 = scmp.lt.s32.totalorder %s2207_s20, 3 }
   0x5   : > { %s2599_s21 = smov (%p30_p1, %s28_s21), 0  ;;  %p229_p3 = pnand %p1862_p0, %p228_p2 }
   0x6   : > { %p281_p4 = scmp.lt.s32.totalorder (!%p229_p3), %s2199_s18, 1  ;;  %v2159_v0 = vld [vmem:[%s2592_s2 + $0x40] sm:$0xff] (!%p229_p3)   ;;  %v2161_v2 = vld [vmem:[%s2592_s2 + $0x48] sm:$0xff] (!%p229_p3)   ;;  %v2163_v4 = vld [vmem:[%s2592_s2 + $0x50] sm:$0xff] (!%p229_p3)   ;;  %s2209_s16 = smov (!%p229_p3), 64   ;;  %vm381_vm0 = vcmask (!%p229_p3), 392192  }
   0x7   : > { %232 = sbr.rel (%p229_p3) target bundleno = 451 (0x1c3), region = 32  ;;  %v2160_v1 = vld [vmem:[%s2592_s2] sm:$0xff] (!%p229_p3)   ;;  %1978 = vmatprep.subr.bf16.mxu0 (!%p229_p3), %v2159_v0  ;;  %2072 = vmatprep.subr.bf16.mxu1 (!%p229_p3), %v2159_v0  ;;  %v2162_v3 = vld [vmem:[%s2592_s2 + $0x8] sm:$0xff] (!%p229_p3)   ;;  %v2164_v5 = vld [vmem:[%s2592_s2 + $0x10] sm:$0xff] (!%p229_p3)   ;;  %s2210_s17 = smov (!%p229_p3), 96   ;;  %vm561_vm1 = vcmask (!%p229_p3), 130048  }
   0x8   : > { %1979 = vmatpush3.bf16.msra.mxu0 (!%p229_p3), %v2160_v1  ;;  %2080 = vmatpush3.bf16.msra.mxu1 (!%p229_p3), %v2160_v1  ;;  %s2211_s22 = smov (!%p229_p3), 48   ;;  %s2212_s23 = smov (!%p229_p3), 16   ;;  %v2165_v29 = vld [vmem:[%s2592_s2 + $0x58] sm:$0xff] (!%p229_p3)   ;;  %v2167_v32 = vld [vmem:[%s2592_s2 + $0x60] sm:$0xff] (!%p229_p3)   ;;  %v2170_v36 = vld [vmem:[%s2592_s2 + $0x68] sm:$0xff] (!%p229_p3)   ;;  %vm470_vm2 = vcmask (!%p229_p3), 785792  }
   0x9   : > { %1980 = vmatprep.subr.bf16.mxu0 (!%p229_p3), %v2161_v2  ;;  %2073 = vmatprep.subr.bf16.mxu1 (!%p229_p3), %v2161_v2  ;;  %s2213_s24 = smov (!%p229_p3), 112   ;;  %v2166_v31 = vld [vmem:[%s2592_s2 + $0x18] sm:$0xff] (!%p229_p3)   ;;  %v2168_v33 = vld [vmem:[%s2592_s2 + $0x20] sm:$0xff] (!%p229_p3)   ;;  %v2171_v38 = vld [vmem:[%s2592_s2 + $0x28] sm:$0xff] (!%p229_p3)   ;;  %vm657_vm3 = vcmask (!%p229_p3), 523392   ;;  %vm559_vm4 = vcmask (!%p229_p3), 1048320  }
   0xa   : > { %v2172_v40 = vld [vmem:[%s2592_s2 + $0x70] sm:$0xff] (!%p229_p3)   ;;  %v2174_v43 = vld [vmem:[%s2592_s2 + $0x78] sm:$0xff] (!%p229_p3)   ;;  %v2396_v52 = vld [vmem:[%s2592_s2 + $0x80] sm:$0xff] (!%p229_p3)   ;;  %vm746_vm5 = vcmask (!%p229_p3), 916992   ;;  %vm835_vm6 = vcmask (!%p229_p3), 1048448   ;;  %vm837_vm7 = vcmask (!%p229_p3), 261120  }
   0xb   : > { %v2173_v42 = vld [vmem:[%s2592_s2 + $0x30] sm:$0xff] (!%p229_p3)   ;;  %v2175_v50 = vld [vmem:[%s2592_s2 + $0x38] sm:$0xff] (!%p229_p3)   ;;  %vm1303_vm8 = vcmask (!%p229_p3), 125952  }
   0xc   : > { %1981 = vmatpush3.bf16.msra.mxu0 (!%p229_p3), %v2162_v3  ;;  %2081 = vmatpush3.bf16.msra.mxu1 (!%p229_p3), %v2162_v3 }
   0xd   : > { %1982 = vmatprep.subr.bf16.mxu0 (!%p229_p3), %v2163_v4  ;;  %2074 = vmatprep.subr.bf16.mxu1 (!%p229_p3), %v2163_v4 }
   0xe   : > { %s2601_s18 = smov (!%p281_p4, %s2199_s18), 1 }
   0xf   : > { %s2088_s28 = smul.u32 80, %s2601_s18  ;;  %s1961_s11 = sshll.u32 %s2601_s18, 6 }
  0x10   : > { %1983 = vmatpush3.bf16.msra.mxu0 %v2164_v5  ;;  %2082 = vmatpush3.bf16.msra.mxu1 %v2164_v5  ;;  %s2521_s15 = scalar_lea.vmem %s2593_s3, %s1961_s11 }
  0x11   : > { %s2284_s10 = scalar_lea.vmem %s2591_s1, %s2088_s28  ;;  %s2289_s13 = scalar_lea.vmem %s2590_s0, %s2088_s28  ;;  %1984 = vmatprep.subr.bf16.mxu0 %v2165_v29  ;;  %2075 = vmatprep.subr.bf16.mxu1 %v2165_v29 }
  0x12   : > { %v2119_v6 = vld [vmem:[%s2284_s10 + $0x8] sm:$0xff]   ;;  %v2120_v7 = vld [vmem:[%s2289_s13 + $0x10] sm:$0xff]   ;;  %v2121_v8 = vld [vmem:[%s2284_s10] sm:$0xff]  }
  0x13   : > { %722 = vrot.lane.b32.xlu1 %v2119_v6, %s2209_s16  ;;  %535 = vrot.lane.b32.xlu0 %v2120_v7, %s2210_s17  ;;  %v2122_v9 = vld [vmem:[%s2289_s13 + $0x8] sm:$0xff]   ;;  %v2124_v10 = vld [vmem:[%s2289_s13 + $0x40] sm:$0xff]  }
  0x14   : > { %v2123_v11 = vld [vmem:[%s2284_s10 + $0x10] sm:$0xff]   ;;  %v2126_v12 = vld [vmem:[%s2284_s10 + $0x38] sm:$0xff]   ;;  %v2128_v14 = vld [vmem:[%s2284_s10 + $0x40] sm:$0xff]   ;;  %1985 = vmatpush3.bf16.msra.mxu0 %v2166_v31  ;;  %2083 = vmatpush3.bf16.msra.mxu1 %v2166_v31 }
  0x15   : > { %v2125_v13 = vld [vmem:[%s2284_s10 + $0x30] sm:$0xff]   ;;  %v2127_v15 = vld [vmem:[%s2289_s13 + $0x38] sm:$0xff]   ;;  %v2130_v16 = vld [vmem:[%s2284_s10 + $0x8] sm:$0xff]   ;;  %1986 = vmatprep.subr.bf16.mxu0 %v2167_v32  ;;  %2076 = vmatprep.subr.bf16.mxu1 %v2167_v32 }
  0x16   : > { %v2129_v17 = vld [vmem:[%s2289_s13 + $0x18] sm:$0xff]   ;;  %v2132_v18 = vld [vmem:[%s2289_s13 + $0x10] sm:$0xff]   ;;  %v2134_v20 = vld [vmem:[%s2289_s13 + $0x48] sm:$0xff]  }
  0x17   : > { %446 = vrot.lane.b32.xlu1 %v2122_v9, %s2211_s22  ;;  %633 = vrot.lane.b32.xlu0 %v2121_v8, %s2212_s23  ;;  %v2131_v19 = vld [vmem:[%s2284_s10 + $0x10] sm:$0xff]   ;;  %v2133_v21 = vld [vmem:[%s2284_s10 + $0x18] sm:$0xff]  }
  0x18   : > { %v2136_v22 = vld [vmem:[%s2284_s10 + $0x40] sm:$0xff]   ;;  %v2135_v23 = vld [vmem:[%s2284_s10 + $0x38] sm:$0xff]   ;;  %v2138_v24 = vld [vmem:[%s2284_s10 + $0x48] sm:$0xff]   ;;  %1987 = vmatpush3.bf16.msra.mxu0 %v2168_v33  ;;  %2084 = vmatpush3.bf16.msra.mxu1 %v2168_v33 }
  0x19   : > { %v2137_v25 = vld [vmem:[%s2289_s13 + $0x40] sm:$0xff]   ;;  %v2140_v26 = vld [vmem:[%s2284_s10 + $0x10] sm:$0xff]   ;;  %v2142_v28 = vld [vmem:[%s2289_s13 + $0x18] sm:$0xff]   ;;  %1988 = vmatprep.subr.bf16.mxu0 %v2170_v36  ;;  %2077 = vmatprep.subr.bf16.mxu1 %v2170_v36 }
  0x1a   : > { %v2139_v27 = vld [vmem:[%s2289_s13 + $0x20] sm:$0xff]   ;;  %v2141_v30 = vld [vmem:[%s2284_s10 + $0x18] sm:$0xff]   ;;  %v2144_v37 = vld [vmem:[%s2289_s13 + $0x28] sm:$0xff]  }
  0x1b   : > { %547 = vrot.lane.b32.xlu1 %v2124_v10, %s2210_s17  ;;  %811 = vrot.lane.b32.xlu0 %v2123_v11, %s2213_s24  ;;  %v2169_v34 = vld [vmem:[%s2289_s13] sm:$0xff]   ;;  %v2145_v41 = vld [vmem:[%s2284_s10 + $0x18] sm:$0xff]  }
  0x1c   : > { %v2143_v35 = vld [vmem:[%s2284_s10 + $0x20] sm:$0xff]   ;;  %382 = vst.msk [vmem:[#allocation2] sm:$0xff] %vm381_vm0, %v2169_v34  ;;  %1989 = vmatpush3.bf16.msra.mxu0 %v2171_v38  ;;  %v2176_v44 = vld [vmem:[%s2289_s13 + $0x30] sm:$0xff]   ;;  %v2148_v45 = vld [vmem:[%s2284_s10 + $0x28] sm:$0xff]   ;;  %2085 = vmatpush3.bf16.msra.mxu1 %v2171_v38 }
  0x1d   : > { %v2146_v39 = vld [vmem:[%s2284_s10 + $0x20] sm:$0xff]   ;;  %1990 = vmatprep.subr.bf16.mxu0 %v2172_v40  ;;  %v2177_v46 = vld [vmem:[%s2289_s13 + $0x8] sm:$0xff]   ;;  %388 = vst.msk [vmem:[#allocation2 + $0x90] sm:$0xff] %vm381_vm0, %v2176_v44  ;;  %v2178_v48 = vld [vmem:[%s2289_s13 + $0x38] sm:$0xff]   ;;  %2078 = vmatprep.subr.bf16.mxu1 %v2172_v40 }
  0x1e   : > { %v2147_v47 = vld [vmem:[%s2289_s13 + $0x20] sm:$0xff]   ;;  %383 = vst.msk [vmem:[#allocation2 + $0x18] sm:$0xff] %vm381_vm0, %v2177_v46  ;;  %v2179_v49 = vld [vmem:[%s2289_s13 + $0x10] sm:$0xff]   ;;  %389 = vst.msk [vmem:[#allocation2 + $0xa8] sm:$0xff] %vm381_vm0, %v2178_v48 }
  0x1f   : > { %734 = vrot.lane.b32.xlu1 %v2126_v12, %s2209_s16  ;;  %645 = vrot.lane.b32.xlu0 %v2125_v13, %s2212_s23  ;;  %v2150_v51 = vld [vmem:[%s2284_s10 + $0x20] sm:$0xff]   ;;  %384 = vst.msk [vmem:[#allocation2 + $0x30] sm:$0xff] %vm381_vm0, %v2179_v49  ;;  %v2182_v53 = vld [vmem:[%s2289_s13 + $0x18] sm:$0xff]  }
  0x20   : > { %1991 = vmatpush3.bf16.msra.mxu0 %v2173_v42  ;;  %2086 = vmatpush3.bf16.msra.mxu1 %v2173_v42  ;;  %v2183_v54 = vld [vmem:[%s2289_s13 + $0x20] sm:$0xff]   ;;  %v2149_v55 = vld [vmem:[%s2289_s13 + $0x30] sm:$0xff]   ;;  %385 = vst.msk [vmem:[#allocation2 + $0x48] sm:$0xff] %vm381_vm0, %v2182_v53  ;;  %v2152_v56 = vld [vmem:[%s2289_s13 + $0x28] sm:$0xff]  }
  0x21   : > { %1992 = vmatprep.subr.bf16.mxu0 %v2174_v43  ;;  %2079 = vmatprep.subr.bf16.mxu1 %v2174_v43  ;;  %386 = vst.msk [vmem:[#allocation2 + $0x60] sm:$0xff] %vm381_vm0, %v2183_v54  ;;  %v2151_v57 = vld [vmem:[%s2284_s10 + $0x28] sm:$0xff]   ;;  %v2154_v59 = vld [vmem:[%s2289_s13 + $0x38] sm:$0xff]   ;;  %v2153_v60 = vld [vmem:[%s2284_s10 + $0x30] sm:$0xff]  }
  0x22   : > { %v2184_v58 = vld [vmem:[%s2289_s13 + $0x28] sm:$0xff]   ;;  %v2155_v62 = vld [vmem:[%s2284_s10 + $0x38] sm:$0xff]   ;;  %v2158_v63 = vld [vmem:[%s2289_s13 + $0x30] sm:$0xff]  }
  0x23   : > { %823 = vrot.lane.b32.xlu1 %v2128_v14, %s2213_s24  ;;  %458 = vrot.lane.b32.xlu0 %v2127_v15, %s2211_s22  ;;  %387 = vst.msk [vmem:[#allocation2 + $0x78] sm:$0xff] %vm381_vm0, %v2184_v58  ;;  %v2156_v61 = vld [vmem:[%s2284_s10 + $0x28] sm:$0xff]   ;;  %v2157_v0 = vld [vmem:[%s2284_s10 + $0x30] sm:$0xff]  }
  0x24   : > { %1993 = vmatpush3.bf16.msra.mxu0 %v2175_v50  ;;  %2087 = vmatpush3.bf16.msra.mxu1 %v2175_v50 }
  0x25   : > { %2052 = vmatprep.subr.bf16.mxu1 %v2396_v52 }
  0x27   : > { %635 = vrot.lane.b32.xlu1 %v2130_v16, %s2212_s23  ;;  %537 = vrot.lane.b32.xlu0 %v2129_v17, %s2210_s17 }
  0x2b   : > { %448 = vrot.lane.b32.xlu1 %v2132_v18, %s2211_s22  ;;  %724 = vrot.lane.b32.xlu0 %v2131_v19, %s2209_s16  ;;  %v2181_v18 = vld [vmem:[%s2592_s2 + $0x88] sm:$0xff]  }
  0x2f   : > { %549 = vrot.lane.b32.xlu1 %v2134_v20, %s2210_s17  ;;  %813 = vrot.lane.b32.xlu0 %v2133_v21, %s2213_s24 }
  0x33   : > { %736 = vrot.lane.b32.xlu1 %v2136_v22, %s2209_s16  ;;  %647 = vrot.lane.b32.xlu0 %v2135_v23, %s2212_s23 }
  0x37   : > { %825 = vrot.lane.b32.xlu1 %v2138_v24, %s2213_s24  ;;  %460 = vrot.lane.b32.xlu0 %v2137_v25, %s2211_s22 }
  0x3b   : > { %637 = vrot.lane.b32.xlu1 %v2140_v26, %s2212_s23  ;;  %539 = vrot.lane.b32.xlu0 %v2139_v27, %s2210_s17 }
  0x3f   : > { %450 = vrot.lane.b32.xlu1 %v2142_v28, %s2211_s22  ;;  %726 = vrot.lane.b32.xlu0 %v2141_v30, %s2209_s16 }
  0x43   : > { %541 = vrot.lane.b32.xlu1 %v2144_v37, %s2210_s17  ;;  %815 = vrot.lane.b32.xlu0 %v2143_v35, %s2213_s24 }
  0x47   : > { %728 = vrot.lane.b32.xlu1 %v2146_v39, %s2209_s16  ;;  %639 = vrot.lane.b32.xlu0 %v2145_v41, %s2212_s23 }
  0x4b   : > { %817 = vrot.lane.b32.xlu1 %v2148_v45, %s2213_s24  ;;  %452 = vrot.lane.b32.xlu0 %v2147_v47, %s2211_s22 }
  0x4f   : > { %641 = vrot.lane.b32.xlu1 %v2150_v51, %s2212_s23  ;;  %543 = vrot.lane.b32.xlu0 %v2149_v55, %s2210_s17 }
  0x53   : > { %454 = vrot.lane.b32.xlu1 %v2152_v56, %s2211_s22  ;;  %730 = vrot.lane.b32.xlu0 %v2151_v57, %s2209_s16 }
  0x57   : > { %545 = vrot.lane.b32.xlu1 %v2154_v59, %s2210_s17  ;;  %819 = vrot.lane.b32.xlu0 %v2153_v60, %s2213_s24 }
  0x5b   : > { %643 = vrot.lane.b32.xlu1 %v2156_v61, %s2212_s23  ;;  %821 = vrot.lane.b32.xlu0 %v2155_v62, %s2213_s24 }
  0x5f   : > { %456 = vrot.lane.b32.xlu1 %v2158_v63, %s2211_s22  ;;  %732 = vrot.lane.b32.xlu0 %v2157_v0, %s2209_s16  ;;  %s1867_s16 = sshll.u32 %s2601_s18, 3 }
  0x60   : > { %s2498_s23 = scalar_lea.vmem %s2594_s4, %s1867_s16  ;;  %s2503_s9 = scalar_lea.vmem %s2595_s5, %s1867_s16 }
  0x85   : > { %v723_v1 = vpop.permute.xlu1 %722  ;;  %v536_v2 = vpop.permute.xlu0 %535 }
  0x86   : > { %562 = vst.msk [vmem:[#allocation2 + $0x8] sm:$0xff] %vm561_vm1, %v536_v2 }
  0x89   : > { %v447_v3 = vpop.permute.xlu1 %446  ;;  %v634_v4 = vpop.permute.xlu0 %633 }
  0x8a   : > { %471 = vst.msk [vmem:[#allocation2] sm:$0xff] %vm470_vm2, %v447_v3 }
  0x8b   : > { %658 = vst.msk [vmem:[#allocation2 + $0x8] sm:$0xff] %vm657_vm3, %v634_v4 }
  0x8c   : > { %560 = vst.msk [vmem:[#allocation2] sm:$0xff] %vm559_vm4, %v536_v2  ;;  %v2214_v2 = vmov 0.0  }
  0x8d   : > { %747 = vst.msk [vmem:[#allocation2 + $0x8] sm:$0xff] %vm746_vm5, %v723_v1  ;;  %v548_v5 = vpop.permute.xlu1 %547  ;;  %v812_v6 = vpop.permute.xlu0 %811 }
  0x8e   : > { %574 = vst.msk [vmem:[#allocation2 + $0x98] sm:$0xff] %vm561_vm1, %v548_v5  ;;  %1675 = vst.msk [vmem:[%s2498_s23] sm:$0xff] %vm561_vm1, %v2214_v2 }
  0x8f   : > { %836 = vst.msk [vmem:[#allocation2 + $0x8] sm:$0xff] %vm835_vm6, %v812_v6 }
  0x90   : > { %838 = vst.msk [vmem:[#allocation2 + $0x10] sm:$0xff] %vm837_vm7, %v812_v6 }
  0x91   : > { %v735_v7 = vpop.permute.xlu1 %734  ;;  %v646_v8 = vpop.permute.xlu0 %645  ;;  %1676 = vst.msk [vmem:[%s2503_s9] sm:$0xff] %vm561_vm1, %v2214_v2 }
  0x92   : > { %664 = vst.msk [vmem:[#allocation2 + $0x98] sm:$0xff] %vm657_vm3, %v646_v8 }
  0x93   : > { %753 = vst.msk [vmem:[#allocation2 + $0x98] sm:$0xff] %vm746_vm5, %v735_v7  ;;  %v853_v12 = vld [vmem:[#allocation2] sm:$0xff] }
  0x95   : > { %v824_v9 = vpop.permute.xlu1 %823  ;;  %v459_v10 = vpop.permute.xlu0 %458 }
  0x96   : > { %849 = vst.msk [vmem:[#allocation2 + $0x98] sm:$0xff] %vm835_vm6, %v824_v9  ;;  %v854_v11 = vld [vmem:[#allocation2 + $0x8] sm:$0xff] }
  0x97   : > { %850 = vst.msk [vmem:[#allocation2 + $0xa0] sm:$0xff] %vm837_vm7, %v824_v9  ;;  %1077 = vmatprep.mubr.bf16.mxu0 %v854_v11  ;;  %v855_v34 = vld [vmem:[#allocation2 + $0x10] sm:$0xff] }
  0x98   : > { %477 = vst.msk [vmem:[#allocation2 + $0x90] sm:$0xff] %vm470_vm2, %v459_v10  ;;  %1078 = vmatmul.mubr.bf16.vlgmr.msra.gmra.mrb[0].mxu0 %v853_v12 }
  0x99   : > { %573 = vst.msk [vmem:[#allocation2 + $0x90] sm:$0xff] %vm559_vm4, %v548_v5  ;;  %v636_v13 = vpop.permute.xlu1 %635  ;;  %v538_v14 = vpop.permute.xlu0 %537 }
  0x9a   : > { %564 = vst.msk [vmem:[#allocation2 + $0x20] sm:$0xff] %vm561_vm1, %v538_v14 }
  0x9b   : > { %659 = vst.msk [vmem:[#allocation2 + $0x20] sm:$0xff] %vm657_vm3, %v636_v13 }
  0x9d   : > { %v449_v15 = vpop.permute.xlu1 %448  ;;  %v872_v16 = vld [vmem:[#allocation2 + $0x98] sm:$0xff]  ;;  %v725_v17 = vpop.permute.xlu0 %724 }
  0x9e   : > { %472 = vst.msk [vmem:[#allocation2 + $0x18] sm:$0xff] %vm470_vm2, %v449_v15  ;;  %1125 = vmatprep.mubr.bf16.mxu1 %v872_v16  ;;  %v873_v62 = vld [vmem:[#allocation2 + $0xa0] sm:$0xff] }
  0x9f   : > { %748 = vst.msk [vmem:[#allocation2 + $0x20] sm:$0xff] %vm746_vm5, %v725_v17 }
  0xa0   : > { %563 = vst.msk [vmem:[#allocation2 + $0x18] sm:$0xff] %vm559_vm4, %v538_v14  ;;  %v871_v19 = vld [vmem:[#allocation2 + $0x90] sm:$0xff] }
  0xa1   : > { %1126 = vmatmul.mubr.bf16.vlgmr.msra.gmra.mrb[0].mxu1 %v871_v19  ;;  %v550_v20 = vpop.permute.xlu1 %549  ;;  %v814_v21 = vpop.permute.xlu0 %813 }
  0xa2   : > { %2053 = vmatpush3.bf16.msra.mxu1 %v2396_v52  ;;  %576 = vst.msk [vmem:[#allocation2 + $0xb0] sm:$0xff] %vm561_vm1, %v550_v20 }
  0xa3   : > { %2054 = vmatprep.subr.bf16.mxu1 %v2181_v18  ;;  %839 = vst.msk [vmem:[#allocation2 + $0x20] sm:$0xff] %vm835_vm6, %v814_v21 }
  0xa4   : > { %840 = vst.msk [vmem:[#allocation2 + $0x28] sm:$0xff] %vm837_vm7, %v814_v21 }
  0xa5   : > { %v737_v22 = vpop.permute.xlu1 %736  ;;  %v648_v23 = vpop.permute.xlu0 %647 }
  0xa6   : > { %2055 = vmatpush3.bf16.msra.mxu1 %v2181_v18  ;;  %665 = vst.msk [vmem:[#allocation2 + $0xb0] sm:$0xff] %vm657_vm3, %v648_v23 }
  0xa7   : > { %754 = vst.msk [vmem:[#allocation2 + $0xb0] sm:$0xff] %vm746_vm5, %v737_v22  ;;  %v856_v27 = vld [vmem:[#allocation2 + $0x18] sm:$0xff] }
  0xa9   : > { %v826_v24 = vpop.permute.xlu1 %825  ;;  %v461_v25 = vpop.permute.xlu0 %460 }
  0xaa   : > { %851 = vst.msk [vmem:[#allocation2 + $0xb0] sm:$0xff] %vm835_vm6, %v826_v24  ;;  %v857_v26 = vld [vmem:[#allocation2 + $0x20] sm:$0xff] }
  0xab   : > { %852 = vst.msk [vmem:[#allocation2 + $0xb8] sm:$0xff] %vm837_vm7, %v826_v24  ;;  %1085 = vmatprep.mubr.bf16.mxu0 %v857_v26  ;;  %v858_v39 = vld [vmem:[#allocation2 + $0x28] sm:$0xff] }
  0xac   : > { %478 = vst.msk [vmem:[#allocation2 + $0xa8] sm:$0xff] %vm470_vm2, %v461_v25  ;;  %1086 = vmatmul.mubr.bf16.gmra.mrb[4].mxu0 %v856_v27 }
  0xad   : > { %575 = vst.msk [vmem:[#allocation2 + $0xa8] sm:$0xff] %vm559_vm4, %v550_v20  ;;  %v638_v28 = vpop.permute.xlu1 %637  ;;  %v540_v29 = vpop.permute.xlu0 %539 }
  0xae   : > { %566 = vst.msk [vmem:[#allocation2 + $0x38] sm:$0xff] %vm561_vm1, %v540_v29 }
  0xaf   : > { %660 = vst.msk [vmem:[#allocation2 + $0x38] sm:$0xff] %vm657_vm3, %v638_v28 }
  0xb1   : > { %v451_v30 = vpop.permute.xlu1 %450  ;;  %v875_v31 = vld [vmem:[#allocation2 + $0xb0] sm:$0xff]  ;;  %v727_v32 = vpop.permute.xlu0 %726 }
  0xb2   : > { %473 = vst.msk [vmem:[#allocation2 + $0x30] sm:$0xff] %vm470_vm2, %v451_v30  ;;  %1133 = vmatprep.mubr.bf16.mxu1 %v875_v31  ;;  %v876_v1 = vld [vmem:[#allocation2 + $0xb8] sm:$0xff] }
  0xb3   : > { %749 = vst.msk [vmem:[#allocation2 + $0x38] sm:$0xff] %vm746_vm5, %v727_v32 }
  0xb4   : > { %565 = vst.msk [vmem:[#allocation2 + $0x30] sm:$0xff] %vm559_vm4, %v540_v29  ;;  %v874_v33 = vld [vmem:[#allocation2 + $0xa8] sm:$0xff] }
  0xb5   : > { %1134 = vmatmul.mubr.bf16.gmra.mrb[4].mxu1 %v874_v33  ;;  %v542_v35 = vpop.permute.xlu1 %541  ;;  %v816_v36 = vpop.permute.xlu0 %815 }
  0xb6   : > { %2056 = vmatprep.mubr.msk.bf16.mxu1 %vm837_vm7, %v855_v34  ;;  %568 = vst.msk [vmem:[#allocation2 + $0x50] sm:$0xff] %vm561_vm1, %v542_v35 }
  0xb7   : > { %841 = vst.msk [vmem:[#allocation2 + $0x38] sm:$0xff] %vm835_vm6, %v816_v36 }
  0xb8   : > { %842 = vst.msk [vmem:[#allocation2 + $0x40] sm:$0xff] %vm837_vm7, %v816_v36 }
  0xb9   : > { %v729_v37 = vpop.permute.xlu1 %728  ;;  %v640_v38 = vpop.permute.xlu0 %639 }
  0xba   : > { %661 = vst.msk [vmem:[#allocation2 + $0x50] sm:$0xff] %vm657_vm3, %v640_v38 }
  0xbb   : > { %750 = vst.msk [vmem:[#allocation2 + $0x50] sm:$0xff] %vm746_vm5, %v729_v37  ;;  %v859_v44 = vld [vmem:[#allocation2 + $0x30] sm:$0xff] }
  0xbd   : > { %2057 = vmatmul.mubr.msk.bf16.vlgmr.msra.gmra.mrb[8].mxu1 %vm837_vm7, %v858_v39  ;;  %v818_v40 = vpop.permute.xlu1 %817  ;;  %v453_v41 = vpop.permute.xlu0 %452 }
  0xbe   : > { %843 = vst.msk [vmem:[#allocation2 + $0x50] sm:$0xff] %vm835_vm6, %v818_v40  ;;  %v860_v42 = vld [vmem:[#allocation2 + $0x38] sm:$0xff] }
  0xbf   : > { %844 = vst.msk [vmem:[#allocation2 + $0x58] sm:$0xff] %vm837_vm7, %v818_v40  ;;  %v861_v43 = vld [vmem:[#allocation2 + $0x40] sm:$0xff]  ;;  %1093 = vmatprep.mubr.bf16.mxu0 %v860_v42 }
  0xc0   : > { %474 = vst.msk [vmem:[#allocation2 + $0x48] sm:$0xff] %vm470_vm2, %v453_v41  ;;  %2060 = vmatprep.mubr.msk.bf16.mxu1 %vm837_vm7, %v861_v43  ;;  %1094 = vmatmul.mubr.bf16.gmra.mrb[8].mxu0 %v859_v44 }
  0xc1   : > { %567 = vst.msk [vmem:[#allocation2 + $0x48] sm:$0xff] %vm559_vm4, %v542_v35  ;;  %v642_v45 = vpop.permute.xlu1 %641  ;;  %v544_v46 = vpop.permute.xlu0 %543 }
  0xc2   : > { %570 = vst.msk [vmem:[#allocation2 + $0x68] sm:$0xff] %vm561_vm1, %v544_v46 }
  0xc3   : > { %662 = vst.msk [vmem:[#allocation2 + $0x68] sm:$0xff] %vm657_vm3, %v642_v45 }
  0xc5   : > { %v455_v47 = vpop.permute.xlu1 %454  ;;  %v863_v48 = vld [vmem:[#allocation2 + $0x50] sm:$0xff]  ;;  %v731_v50 = vpop.permute.xlu0 %730 }
  0xc6   : > { %v864_v49 = vld [vmem:[#allocation2 + $0x58] sm:$0xff]  ;;  %475 = vst.msk [vmem:[#allocation2 + $0x60] sm:$0xff] %vm470_vm2, %v455_v47  ;;  %1101 = vmatprep.mubr.bf16.mxu0 %v863_v48 }
  0xc7   : > { %2061 = vmatmul.mubr.msk.bf16.gmra.mrb[12].mxu1 %vm837_vm7, %v864_v49  ;;  %751 = vst.msk [vmem:[#allocation2 + $0x68] sm:$0xff] %vm746_vm5, %v731_v50 }
  0xc8   : > { %569 = vst.msk [vmem:[#allocation2 + $0x60] sm:$0xff] %vm559_vm4, %v544_v46  ;;  %v862_v51 = vld [vmem:[#allocation2 + $0x48] sm:$0xff] }
  0xc9   : > { %1102 = vmatmul.mubr.bf16.gmra.mrb[12].mxu0 %v862_v51  ;;  %v546_v52 = vpop.permute.xlu1 %545  ;;  %v820_v53 = vpop.permute.xlu0 %819 }
  0xca   : > { %572 = vst.msk [vmem:[#allocation2 + $0x80] sm:$0xff] %vm561_vm1, %v546_v52 }
  0xcb   : > { %845 = vst.msk [vmem:[#allocation2 + $0x68] sm:$0xff] %vm835_vm6, %v820_v53 }
  0xcc   : > { %846 = vst.msk [vmem:[#allocation2 + $0x70] sm:$0xff] %vm837_vm7, %v820_v53 }
  0xcd   : > { %v644_v54 = vpop.permute.xlu1 %643  ;;  %v822_v55 = vpop.permute.xlu0 %821 }
  0xce   : > { %663 = vst.msk [vmem:[#allocation2 + $0x80] sm:$0xff] %vm657_vm3, %v644_v54 }
  0xcf   : > { %848 = vst.msk [vmem:[#allocation2 + $0x88] sm:$0xff] %vm837_vm7, %v822_v55  ;;  %v865_v60 = vld [vmem:[#allocation2 + $0x60] sm:$0xff] }
  0xd1   : > { %v457_v56 = vpop.permute.xlu1 %456  ;;  %v733_v57 = vpop.permute.xlu0 %732 }
  0xd2   : > { %476 = vst.msk [vmem:[#allocation2 + $0x78] sm:$0xff] %vm470_vm2, %v457_v56  ;;  %v866_v58 = vld [vmem:[#allocation2 + $0x68] sm:$0xff] }
  0xd3   : > { %v867_v59 = vld [vmem:[#allocation2 + $0x70] sm:$0xff]  ;;  %752 = vst.msk [vmem:[#allocation2 + $0x80] sm:$0xff] %vm746_vm5, %v733_v57  ;;  %1109 = vmatprep.mubr.bf16.mxu0 %v866_v58 }
  0xd4   : > { %571 = vst.msk [vmem:[#allocation2 + $0x78] sm:$0xff] %vm559_vm4, %v546_v52  ;;  %2064 = vmatprep.mubr.msk.bf16.mxu1 %vm837_vm7, %v867_v59  ;;  %1110 = vmatmul.mubr.bf16.gmra.mrb[16].mxu0 %v865_v60 }
  0xd5   : > { %847 = vst.msk [vmem:[#allocation2 + $0x80] sm:$0xff] %vm835_vm6, %v822_v55 }
  0xd6   : > { %v870_v61 = vld [vmem:[#allocation2 + $0x88] sm:$0xff] }
  0xd7   : > { %2065 = vmatmul.mubr.msk.bf16.gmra.mrb[16].mxu1 %vm837_vm7, %v870_v61 }
  0xd8   : > { %2068 = vmatprep.mubr.msk.bf16.mxu1 %vm837_vm7, %v873_v62 }
  0xdb   : > { %v868_v63 = vld [vmem:[#allocation2 + $0x78] sm:$0xff] }
  0xdc   : > { %v869_v0 = vld [vmem:[#allocation2 + $0x80] sm:$0xff] }
  0xdd   : > { %1117 = vmatprep.mubr.bf16.mxu0 %v869_v0 }
  0xde   : > { %1118 = vmatmul.mubr.bf16.gmra.mrb[20].mxu0 %v868_v63 }
  0xdf   : > { %2069 = vmatmul.mubr.msk.bf16.gmra.mrb[20].mxu1 %vm837_vm7, %v876_v1 }
 0x16b   : > { %v1994_v3 = vpop.f32.mrb[0].mxu0 }
 0x16c   : > { %v1995_v4 = vpop.f32.mrb[1].mxu0 }
 0x16d   : > { %v1996_v5 = vadd.f32 %v1995_v4, %v1994_v3  ;;  %v1997_v6 = vpop.f32.mrb[2].mxu0 }
 0x16e   : > { %v1998_v7 = vpop.f32.mrb[3].mxu0 }
 0x16f   : > { %v1999_v8 = vadd.f32 %v1998_v7, %v1997_v6 }
 0x174   : > { %v2030_v9 = vpop.f32.mrb[0].mxu1 }
 0x175   : > { %v2031_v10 = vpop.f32.mrb[1].mxu1 }
 0x176   : > { %v2509_v11 = vadd.f32 %v2031_v10, %v2030_v9  ;;  %v2033_v12 = vpop.f32.mrb[2].mxu1 }
 0x177   : > { %v2034_v13 = vpop.f32.mrb[3].mxu1 }
 0x178   : > { %v2511_v14 = vadd.f32 %v2034_v13, %v2033_v12 }
 0x17f   : > { %v2000_v15 = vpop.f32.mrb[4].mxu0 }
 0x180   : > { %v2001_v16 = vpop.f32.mrb[5].mxu0 }
 0x181   : > { %v2002_v17 = vadd.f32 %v2001_v16, %v2000_v15  ;;  %v2003_v18 = vpop.f32.mrb[6].mxu0 }
 0x182   : > { %v2004_v19 = vpop.f32.mrb[7].mxu0 }
 0x183   : > { %v2005_v20 = vadd.f32 %v2004_v19, %v2003_v18 }
 0x188   : > { %v2036_v21 = vpop.f32.mrb[4].mxu1 }
 0x189   : > { %v2037_v22 = vpop.f32.mrb[5].mxu1 }
 0x18a   : > { %v2513_v23 = vadd.f32 %v2037_v22, %v2036_v21  ;;  %v2039_v24 = vpop.f32.mrb[6].mxu1 }
 0x18b   : > { %v2040_v25 = vpop.f32.mrb[7].mxu1 }
 0x18c   : > { %v2515_v26 = vadd.f32 %v2040_v25, %v2039_v24 }
 0x190   : > { %v2058_v27 = vpop.f32.mrb[8].mxu1 }
 0x191   : > { %v1185_v28 = vadd.f32 %v2058_v27, %v2002_v17  ;;  %v1176_v29 = vpop.f32.mrb[9].mxu1 }
 0x192   : > { %v1177_v30 = vadd.f32 %v1996_v5, %v1176_v29  ;;  %v2059_v31 = vpop.f32.mrb[10].mxu1 }
 0x193   : > { %v1964_v32 = vpack.c.bf16 %v1185_v28, %v1185_v28  ;;  %v1596_v33 = vsel %vm561_vm1, %v1185_v28, 0.0  ;;  %v1626_v34 = vmul.f32 %v1185_v28, %v1185_v28  ;;  %v1188_v35 = vadd.f32 %v2059_v31, %v2005_v20  ;;  %v1179_v36 = vpop.f32.mrb[11].mxu1  ;;  %v2006_v41 = vpop.f32.mrb[8].mxu0 }
 0x194   : > { %v1962_v37 = vpack.c.bf16 %v1177_v30, %v1177_v30  ;;  %v1593_v38 = vsel %vm561_vm1, %v1177_v30, 0.0  ;;  %v1624_v39 = vmul.f32 %v1177_v30, %v1177_v30  ;;  %v1180_v40 = vadd.f32 %v1999_v8, %v1179_v36  ;;  %v2007_v45 = vpop.f32.mrb[9].mxu0 }
 0x195   : > { %1306 = vst.msk [vmem:[%s2521_s15 + $0x8] sm:$0xf] %vm1303_vm8, %v1964_v32  ;;  %v1643_v42 = vsel %vm561_vm1, %v1626_v34, 0.0  ;;  %v1597_v43 = vadd.f32 %v1596_v33, %v1593_v38  ;;  %v1965_v44 = vpack.c.bf16 %v1188_v35, %v1188_v35  ;;  %v2008_v48 = vadd.f32 %v2007_v45, %v2006_v41  ;;  %v2009_v49 = vpop.f32.mrb[10].mxu0 }
 0x196   : > { %1304 = vst.msk [vmem:[%s2521_s15] sm:$0xf] %vm1303_vm8, %v1962_v37  ;;  %v1640_v46 = vsel %vm561_vm1, %v1624_v39, 0.0  ;;  %v1963_v47 = vpack.c.bf16 %v1180_v40, %v1180_v40  ;;  %v2010_v51 = vpop.f32.mrb[11].mxu0 }
 0x197   : > { %v1644_v50 = vadd.f32 %v1643_v42, %v1640_v46  ;;  %1307 = vst.msk [vmem:[%s2521_s15 + $0xc] sm:$0xf] %vm1303_vm8, %v1965_v44  ;;  %v2011_v52 = vadd.f32 %v2010_v51, %v2009_v49 }
 0x198   : > { %1305 = vst.msk [vmem:[%s2521_s15 + $0x4] sm:$0xf] %vm1303_vm8, %v1963_v47 }
 0x19a   : > { %v2062_v53 = vpop.f32.mrb[12].mxu1 }
 0x19b   : > { %v1192_v54 = vpop.f32.mrb[13].mxu1 }
 0x19c   : > { %v2012_v55 = vpop.f32.mrb[12].mxu0  ;;  %v1193_v56 = vadd.f32 %v2008_v48, %v1192_v54  ;;  %v2063_v57 = vpop.f32.mrb[14].mxu1 }
 0x19d   : > { %v2013_v58 = vpop.f32.mrb[13].mxu0  ;;  %v1195_v59 = vpop.f32.mrb[15].mxu1 }
 0x19e   : > { %v1966_v60 = vpack.c.bf16 %v1193_v56, %v1193_v56  ;;  %v1600_v61 = vsel %vm561_vm1, %v1193_v56, 0.0  ;;  %v1628_v62 = vmul.f32 %v1193_v56, %v1193_v56  ;;  %v2014_v63 = vadd.f32 %v2013_v58, %v2012_v55  ;;  %v2015_v0 = vpop.f32.mrb[14].mxu0 }
 0x19f   : > { %v1601_v1 = vadd.f32 %v1600_v61, %v1597_v43  ;;  %v1196_v2 = vadd.f32 %v2011_v52, %v1195_v59  ;;  %v2016_v3 = vpop.f32.mrb[15].mxu0 }
 0x1a0   : > { %1308 = vst.msk [vmem:[%s2521_s15 + $0x10] sm:$0xf] %vm1303_vm8, %v1966_v60  ;;  %v1647_v4 = vsel %vm561_vm1, %v1628_v62, 0.0  ;;  %v1201_v5 = vadd.f32 %v2062_v53, %v2014_v63  ;;  %v2017_v6 = vadd.f32 %v2016_v3, %v2015_v0 }
 0x1a1   : > { %v1648_v7 = vadd.f32 %v1647_v4, %v1644_v50  ;;  %v1967_v8 = vpack.c.bf16 %v1196_v2, %v1196_v2 }
 0x1a2   : > { %v1968_v9 = vpack.c.bf16 %v1201_v5, %v1201_v5  ;;  %v1604_v10 = vsel %vm561_vm1, %v1201_v5, 0.0  ;;  %v1630_v12 = vmul.f32 %v1201_v5, %v1201_v5  ;;  %v1204_v13 = vadd.f32 %v2063_v57, %v2017_v6  ;;  %v1677_v5 = vld [vmem:[%s2498_s23] sm:$0xff] }
 0x1a3   : > { %1309 = vst.msk [vmem:[%s2521_s15 + $0x14] sm:$0xf] %vm1303_vm8, %v1967_v8  ;;  %v1605_v15 = vadd.f32 %v1604_v10, %v1601_v1  ;;  %v1680_v10 = vld [vmem:[%s2503_s9] sm:$0xff] }
 0x1a4   : > { %1310 = vst.msk [vmem:[%s2521_s15 + $0x18] sm:$0xf] %vm1303_vm8, %v1968_v9  ;;  %v1651_v16 = vsel %vm561_vm1, %v1630_v12, 0.0  ;;  %v1969_v17 = vpack.c.bf16 %v1204_v13, %v1204_v13 }
 0x1a5   : > { %v1652_v18 = vadd.f32 %v1651_v16, %v1648_v7 }
 0x1a6   : > { %1311 = vst.msk [vmem:[%s2521_s15 + $0x1c] sm:$0xf] %vm1303_vm8, %v1969_v17 }
 0x1a7   : > { %v2018_v19 = vpop.f32.mrb[16].mxu0 }
 0x1a8   : > { %v2019_v20 = vpop.f32.mrb[17].mxu0 }
 0x1a9   : > { %v2020_v21 = vadd.f32 %v2019_v20, %v2018_v19  ;;  %v2021_v22 = vpop.f32.mrb[18].mxu0 }
 0x1aa   : > { %v2022_v24 = vpop.f32.mrb[19].mxu0  ;;  %v2066_v25 = vpop.f32.mrb[16].mxu1 }
 0x1ab   : > { %v2023_v27 = vadd.f32 %v2022_v24, %v2021_v22  ;;  %v1208_v28 = vpop.f32.mrb[17].mxu1 }
 0x1ac   : > { %v1209_v29 = vadd.f32 %v2020_v21, %v1208_v28  ;;  %v2067_v30 = vpop.f32.mrb[18].mxu1 }
 0x1ad   : > { %v1211_v31 = vpop.f32.mrb[19].mxu1 }
 0x1ae   : > { %v1970_v32 = vpack.c.bf16 %v1209_v29, %v1209_v29  ;;  %v1608_v33 = vsel %vm561_vm1, %v1209_v29, 0.0  ;;  %v1632_v34 = vmul.f32 %v1209_v29, %v1209_v29  ;;  %v1212_v35 = vadd.f32 %v2023_v27, %v1211_v31 }
 0x1af   : > { %v1609_v36 = vadd.f32 %v1608_v33, %v1605_v15 }
 0x1b0   : > { %1312 = vst.msk [vmem:[%s2521_s15 + $0x20] sm:$0xf] %vm1303_vm8, %v1970_v32  ;;  %v1655_v37 = vsel %vm561_vm1, %v1632_v34, 0.0  ;;  %v1971_v38 = vpack.c.bf16 %v1212_v35, %v1212_v35 }
 0x1b1   : > { %v2024_v39 = vpop.f32.mrb[20].mxu0  ;;  %v1656_v40 = vadd.f32 %v1655_v37, %v1652_v18 }
 0x1b2   : > { %v2025_v41 = vpop.f32.mrb[21].mxu0  ;;  %1313 = vst.msk [vmem:[%s2521_s15 + $0x24] sm:$0xf] %vm1303_vm8, %v1971_v38  ;;  %v2070_v44 = vpop.f32.mrb[20].mxu1 }
 0x1b3   : > { %v2026_v42 = vadd.f32 %v2025_v41, %v2024_v39  ;;  %v2027_v43 = vpop.f32.mrb[22].mxu0  ;;  %v1233_v45 = vadd.f32 %v2070_v44, %v2513_v23  ;;  %v1224_v47 = vpop.f32.mrb[21].mxu1 }
 0x1b4   : > { %v2028_v46 = vpop.f32.mrb[23].mxu0  ;;  %v1225_v50 = vadd.f32 %v2509_v11, %v1224_v47  ;;  %v2071_v51 = vpop.f32.mrb[22].mxu1 }
 0x1b5   : > { %v1217_v48 = vadd.f32 %v2066_v25, %v2026_v42  ;;  %v2029_v49 = vadd.f32 %v2028_v46, %v2027_v43  ;;  %v1976_v52 = vpack.c.bf16 %v1233_v45, %v1233_v45  ;;  %v1236_v53 = vadd.f32 %v2071_v51, %v2515_v26  ;;  %v1227_v54 = vpop.f32.mrb[23].mxu1 }
 0x1b6   : > { %v1638_v23 = vmul.f32 %v1233_v45, %v1233_v45  ;;  %v1974_v59 = vpack.c.bf16 %v1225_v50, %v1225_v50  ;;  %v1616_v11 = vsel %vm561_vm1, %v1225_v50, 0.0  ;;  %v1636_v62 = vmul.f32 %v1225_v50, %v1225_v50 }
 0x1b7   : > { %v1972_v55 = vpack.c.bf16 %v1217_v48, %v1217_v48  ;;  %v1612_v56 = vsel %vm561_vm1, %v1217_v48, 0.0  ;;  %v1634_v57 = vmul.f32 %v1217_v48, %v1217_v48  ;;  %v1220_v58 = vadd.f32 %v2067_v30, %v2029_v49  ;;  %1318 = vst.msk [vmem:[%s2521_s15 + $0x38] sm:$0xf] %vm1303_vm8, %v1976_v52 }
 0x1b8   : > { %v1613_v60 = vadd.f32 %v1612_v56, %v1609_v36  ;;  %v1977_v63 = vpack.c.bf16 %v1236_v53, %v1236_v53  ;;  %1316 = vst.msk [vmem:[%s2521_s15 + $0x30] sm:$0xf] %vm1303_vm8, %v1974_v59  ;;  %v1228_v2 = vadd.f32 %v2511_v14, %v1227_v54  ;;  %v1620_v3 = vsel %vm561_vm1, %v1233_v45, 0.0 }
 0x1b9   : > { %1314 = vst.msk [vmem:[%s2521_s15 + $0x28] sm:$0xf] %vm1303_vm8, %v1972_v55  ;;  %v1659_v26 = vsel %vm561_vm1, %v1634_v57, 0.0  ;;  %v1973_v61 = vpack.c.bf16 %v1220_v58, %v1220_v58  ;;  %v1663_v4 = vsel %vm561_vm1, %v1636_v62, 0.0  ;;  %v1667_v9 = vsel %vm561_vm1, %v1638_v23, 0.0 }
 0x1ba   : > { %v1617_v0 = vadd.f32 %v1616_v11, %v1613_v60  ;;  %v1660_v1 = vadd.f32 %v1659_v26, %v1656_v40  ;;  %1319 = vst.msk [vmem:[%s2521_s15 + $0x3c] sm:$0xf] %vm1303_vm8, %v1977_v63  ;;  %v1975_v8 = vpack.c.bf16 %v1228_v2, %v1228_v2 }
 0x1bb   : > { %1315 = vst.msk [vmem:[%s2521_s15 + $0x2c] sm:$0xf] %vm1303_vm8, %v1973_v61 }
 0x1bc   : > { %v1621_v6 = vadd.f32 %v1620_v3, %v1617_v0  ;;  %v1664_v7 = vadd.f32 %v1663_v4, %v1660_v1  ;;  %1317 = vst.msk [vmem:[%s2521_s15 + $0x34] sm:$0xf] %vm1303_vm8, %v1975_v8 }
 0x1be   : > { %v1668_v12 = vadd.f32 %v1667_v9, %v1664_v7  ;;  %v1678_v13 = vadd.f32 %v1677_v5, %v1621_v6 }
 0x1c0   : > { %1679 = vst.msk [vmem:[%s2498_s23] sm:$0xff] %vm561_vm1, %v1678_v13  ;;  %v1681_v14 = vadd.f32 %v1680_v10, %v1668_v12 }
 0x1c2   : > { %1682 = vst.msk [vmem:[%s2503_s9] sm:$0xff] %vm561_vm1, %v1681_v14 }
 0x1c3 PF: > { %s16_s20 = sadd.s32 1, %s2207_s20   ;;  %s2596_s18 = smov %s2203_s19 }
 0x1c4   : > { %p13_p5 = scmp.ge.s32.totalorder %s16_s20, 4   ;;  %s2597_s19 = smov %s2599_s21 }
 0x1c6   :  { %15 = sbr.rel (!%p13_p5) target bundleno = 2 (0x2), region = 93 }

// kernel: unet_forward.45
= control target key start
LH: loop header
LB: loop body
LE: loop exit
PB: predicated region body
PF: predicated region fallthrough
CT: control target
= control target key end

     0   :  { %s1291_s12 = smov 0   ;;  %s1804_s0 = inlined_call_operand.vmem [shape: bf16[2,256,8], index: 0, kind: input, shape index: {}]   ;;  %s1805_s1 = inlined_call_operand.vmem [shape: bf16[8,2], index: 1, kind: input, shape index: {}]   ;;  %s1806_s2 = inlined_call_operand.vmem [shape: f32[1,2], index: 2, kind: input, shape index: {}]   ;;  %s1807_s3 = inlined_call_operand.vmem [shape: f32[2,256,2], index: 3, kind: output, shape index: {}]  }
   0x1 LB: > { %s1010_s13 = sadd.s32 4294967295, %s1269_s12   ;;  %p1014_p0 = scmp.ge.s32.totalorder %s1269_s12, 1  ;;  %s1269_s12 = sphi %s1291_s12, %s13_s12  }
   0x2   : > { %p137_p1 = scmp.lt.s32.totalorder %s1269_s12, 3 }
   0x4   : > { %p138_p2 = pnand %p1014_p0, %p137_p1 }
   0x6   : > { %141 = sbr.rel (%p138_p2) target bundleno = 618 (0x26a), region = 32 }
   0xd   : > { %v204_v0 = vld [vmem:[%s1805_s1] sm:$0xf]  ;;  %vm341_vm0 = vcmask 1043456   ;;  %p161_p3 = scmp.lt.s32.totalorder %s1010_s13, 1  ;;  %vm292_vm1 = vcmask 64512   ;;  %vm506_vm2 = vcmask 15360  }
   0xe   : > { %1109 = vmatprep.subr.msk.bf16.mxu0 %vm341_vm0, %v204_v0  ;;  %1110 = vmatprep.subr.msk.bf16.mxu1 %vm341_vm0, %v204_v0  ;;  %v343_v1 = vsel %vm341_vm0, %v204_v0, 0  ;;  %v1345_v18 = vld [vmem:[%s1806_s2] ss:$0 sm:$0xff] }
   0xf   : > { %1074 = vmatpush3.bf16.msra.mxu0 %v343_v1  ;;  %1108 = vmatpush3.bf16.msra.mxu1 %v343_v1  ;;  %s1854_s13 = smov (!%p161_p3, %s1010_s13), 1 }
  0x10   : > { %s1054_s16 = sshll.u32 %s1854_s13, 7  ;;  %s1055_s22 = sshll.u32 %s1854_s13, 8 }
  0x11   : > { %s1308_s19 = scalar_lea.vmem %s1804_s0, %s1054_s16  ;;  %s1672_s25 = scalar_lea.vmem %s1807_s3, %s1055_s22 }
  0x12   : > { %v1119_v2 = vld [vmem:[%s1308_s19] sm:$0xff]   ;;  %v1121_v4 = vld [vmem:[%s1308_s19 + $0x8] sm:$0xff]   ;;  %v1123_v6 = vld [vmem:[%s1308_s19 + $0x10] sm:$0xff]  }
  0x13   : > { %v1120_v3 = vld [vmem:[%s1308_s19 + $0x40] sm:$0xff]   ;;  %1075 = vmatprep.mubr.msk.bf16.mxu0 %vm292_vm1, %v1119_v2  ;;  %v1122_v5 = vld [vmem:[%s1308_s19 + $0x48] sm:$0xff]   ;;  %v1125_v7 = vld [vmem:[%s1308_s19 + $0x50] sm:$0xff]  }
  0x14   : > { %1091 = vmatprep.mubr.msk.bf16.mxu1 %vm292_vm1, %v1120_v3  ;;  %1076 = vmatmul.mubr.msk.bf16.vlgmr.msra.gmra.mrb[0].mxu0 %vm292_vm1, %v1121_v4  ;;  %v1124_v8 = vld [vmem:[%s1308_s19 + $0x18] sm:$0xff]   ;;  %v1127_v10 = vld [vmem:[%s1308_s19 + $0x20] sm:$0xff]   ;;  %v1128_v12 = vld [vmem:[%s1308_s19 + $0x28] sm:$0xff]  }
  0x15   : > { %1092 = vmatmul.mubr.msk.bf16.vlgmr.msra.gmra.mrb[0].mxu1 %vm292_vm1, %v1122_v5  ;;  %1079 = vmatprep.mubr.msk.bf16.mxu0 %vm292_vm1, %v1123_v6  ;;  %v1126_v9 = vld [vmem:[%s1308_s19 + $0x58] sm:$0xff]   ;;  %v1129_v11 = vld [vmem:[%s1308_s19 + $0x60] sm:$0xff]   ;;  %v1130_v13 = vld [vmem:[%s1308_s19 + $0x68] sm:$0xff]  }
  0x16   : > { %1095 = vmatprep.mubr.msk.bf16.mxu1 %vm292_vm1, %v1125_v7  ;;  %v1131_v14 = vld [vmem:[%s1308_s19 + $0x30] sm:$0xff]   ;;  %v1132_v16 = vld [vmem:[%s1308_s19 + $0x38] sm:$0xff]  }
  0x17   : > { %v1133_v15 = vld [vmem:[%s1308_s19 + $0x70] sm:$0xff]   ;;  %v1134_v17 = vld [vmem:[%s1308_s19 + $0x78] sm:$0xff]  }
  0x1c   : > { %1080 = vmatmul.mubr.msk.bf16.gmra.mrb[4].mxu0 %vm292_vm1, %v1124_v8 }
  0x1d   : > { %1096 = vmatmul.mubr.msk.bf16.gmra.mrb[4].mxu1 %vm292_vm1, %v1126_v9  ;;  %1083 = vmatprep.mubr.msk.bf16.mxu0 %vm292_vm1, %v1127_v10 }
  0x1e   : > { %1099 = vmatprep.mubr.msk.bf16.mxu1 %vm292_vm1, %v1129_v11 }
  0x24   : > { %1084 = vmatmul.mubr.msk.bf16.gmra.mrb[8].mxu0 %vm292_vm1, %v1128_v12 }
  0x25   : > { %1100 = vmatmul.mubr.msk.bf16.gmra.mrb[8].mxu1 %vm292_vm1, %v1130_v13  ;;  %1087 = vmatprep.mubr.msk.bf16.mxu0 %vm292_vm1, %v1131_v14 }
  0x26   : > { %1103 = vmatprep.mubr.msk.bf16.mxu1 %vm292_vm1, %v1133_v15 }
  0x2c   : > { %1088 = vmatmul.mubr.msk.bf16.gmra.mrb[12].mxu0 %vm292_vm1, %v1132_v16 }
  0x2d   : > { %1104 = vmatmul.mubr.msk.bf16.gmra.mrb[12].mxu1 %vm292_vm1, %v1134_v17 }
  0xe7   : > { %v1077_v19 = vpop.f32.mrb[0].mxu0 }
  0xe8   : > { %v1348_v20 = vadd.f32 %v1077_v19, %v1345_v18  ;;  %v1093_v21 = vpop.f32.mrb[0].mxu1  ;;  %v379_v22 = vpop.f32.mrb[1].mxu0 }
  0xe9   : > { %v1351_v23 = vadd.f32 %v1093_v21, %v1345_v18  ;;  %v443_v24 = vpop.f32.mrb[1].mxu1  ;;  %v1078_v25 = vpop.f32.mrb[2].mxu0  ;;  %v1359_v30 = vadd.f32 %v1345_v18, %v379_v22 }
  0xea   : > { %v1354_v26 = vadd.f32 %v1078_v25, %v1345_v18  ;;  %v1094_v27 = vpop.f32.mrb[2].mxu1  ;;  %v382_v28 = vpop.f32.mrb[3].mxu0  ;;  %v513_v29 = vsel %vm506_vm2, %v1348_v20, -inf  ;;  %v1369_v35 = vadd.f32 %v1345_v18, %v443_v24 }
  0xeb   : > { %v446_v31 = vpop.f32.mrb[3].mxu1  ;;  %v561_v32 = vsel %vm506_vm2, %v1351_v23, -inf  ;;  %514 = vmax.xlane.f32.xlu1 %v513_v29  ;;  %v1364_v33 = vadd.f32 %v1094_v27, %v1345_v18  ;;  %v507_v36 = vsel %vm506_vm2, %v1359_v30, -inf  ;;  %v1379_v46 = vadd.f32 %v1345_v18, %v382_v28 }
  0xec   : > { %562 = vmax.xlane.f32.xlu0 %v561_v32  ;;  %v516_v34 = vsel %vm506_vm2, %v1354_v26, -inf  ;;  %v1374_v42 = vadd.f32 %v1345_v18, %v446_v31  ;;  %v555_v47 = vsel %vm506_vm2, %v1369_v35, -inf }
  0xed   : > { %v564_v43 = vsel %vm506_vm2, %v1364_v33, -inf  ;;  %v510_v52 = vsel %vm506_vm2, %v1379_v46, -inf }
  0xee   : > { %v558_v51 = vsel %vm506_vm2, %v1374_v42, -inf }
  0xef   : > { %517 = vmax.xlane.f32.xlu1 %v516_v34  ;;  %v1081_v37 = vpop.f32.mrb[4].mxu0 }
  0xf0   : > { %508 = vmax.xlane.f32.xlu0 %v507_v36  ;;  %v395_v38 = vpop.f32.mrb[5].mxu0  ;;  %v1097_v39 = vpop.f32.mrb[4].mxu1  ;;  %v1387_v50 = vadd.f32 %v1081_v37, %v1345_v18 }
  0xf1   : > { %v1082_v40 = vpop.f32.mrb[6].mxu0  ;;  %v459_v41 = vpop.f32.mrb[5].mxu1  ;;  %v1399_v58 = vadd.f32 %v1097_v39, %v1345_v18  ;;  %v1411_v4 = vadd.f32 %v1345_v18, %v395_v38 }
  0xf2   : > { %v398_v44 = vpop.f32.mrb[7].mxu0  ;;  %v1098_v45 = vpop.f32.mrb[6].mxu1  ;;  %v1384_v49 = vadd.f32 %v1082_v40, %v1345_v18  ;;  %v525_v59 = vsel %vm506_vm2, %v1387_v50, -inf  ;;  %v1419_v14 = vadd.f32 %v1345_v18, %v459_v41 }
  0xf3   : > { %565 = vmax.xlane.f32.xlu1 %v564_v43  ;;  %v462_v48 = vpop.f32.mrb[7].mxu1  ;;  %v1394_v54 = vadd.f32 %v1098_v45, %v1345_v18  ;;  %v573_v2 = vsel %vm506_vm2, %v1399_v58, -inf  ;;  %v1408_v3 = vadd.f32 %v1345_v18, %v398_v44  ;;  %v519_v15 = vsel %vm506_vm2, %v1411_v4, -inf }
  0xf4   : > { %556 = vmax.xlane.f32.xlu0 %v555_v47  ;;  %v528_v55 = vsel %vm506_vm2, %v1384_v49, -inf  ;;  %v1414_v10 = vadd.f32 %v1345_v18, %v462_v48  ;;  %v567_v22 = vsel %vm506_vm2, %v1419_v14, -inf }
  0xf5   : > { %v576_v1 = vsel %vm506_vm2, %v1394_v54, -inf  ;;  %v522_v11 = vsel %vm506_vm2, %v1408_v3, -inf }
  0xf6   : > { %v570_v21 = vsel %vm506_vm2, %v1414_v10, -inf }
  0xf7   : > { %559 = vmax.xlane.f32.xlu1 %v558_v51  ;;  %v1085_v53 = vpop.f32.mrb[8].mxu0 }
  0xf8   : > { %511 = vmax.xlane.f32.xlu0 %v510_v52  ;;  %v411_v56 = vpop.f32.mrb[9].mxu0  ;;  %v1101_v57 = vpop.f32.mrb[8].mxu1  ;;  %v1427_v19 = vadd.f32 %v1085_v53, %v1345_v18 }
  0xf9   : > { %v1086_v60 = vpop.f32.mrb[10].mxu0  ;;  %v475_v61 = vpop.f32.mrb[9].mxu1  ;;  %v1439_v27 = vadd.f32 %v1101_v57, %v1345_v18  ;;  %v1451_v34 = vadd.f32 %v1345_v18, %v411_v56 }
  0xfa   : > { %v414_v62 = vpop.f32.mrb[11].mxu0  ;;  %v1102_v63 = vpop.f32.mrb[10].mxu1  ;;  %v1424_v17 = vadd.f32 %v1086_v60, %v1345_v18  ;;  %v537_v28 = vsel %vm506_vm2, %v1427_v19, -inf  ;;  %v1459_v38 = vadd.f32 %v1345_v18, %v475_v61 }
  0xfb   : > { %529 = vmax.xlane.f32.xlu1 %v528_v55  ;;  %v478_v0 = vpop.f32.mrb[11].mxu1  ;;  %v1434_v24 = vadd.f32 %v1102_v63, %v1345_v18  ;;  %v585_v31 = vsel %vm506_vm2, %v1439_v27, -inf  ;;  %v1448_v32 = vadd.f32 %v1345_v18, %v414_v62  ;;  %v531_v39 = vsel %vm506_vm2, %v1451_v34, -inf }
  0xfc   : > { %526 = vmax.xlane.f32.xlu0 %v525_v59  ;;  %1823 = vst [vmem:[#allocation2_spill] sm:$0xff] %v1424_v17  ;;  %v540_v25 = vsel %vm506_vm2, %v1424_v17, -inf  ;;  %v1454_v36 = vadd.f32 %v1345_v18, %v478_v0  ;;  %v579_v44 = vsel %vm506_vm2, %v1459_v38, -inf }
  0xfd   : > { %1824 = vst [vmem:[#allocation3_spill] sm:$0xff] %v1434_v24  ;;  %v588_v29 = vsel %vm506_vm2, %v1434_v24, -inf  ;;  %1825 = vst [vmem:[#allocation4_spill] sm:$0xff] %v1448_v32  ;;  %v534_v37 = vsel %vm506_vm2, %v1448_v32, -inf }
  0xfe   : > { %1826 = vst [vmem:[#allocation5_spill] sm:$0xff] %v1454_v36  ;;  %v582_v43 = vsel %vm506_vm2, %v1454_v36, -inf }
  0xff   : > { %577 = vmax.xlane.f32.xlu1 %v576_v1  ;;  %v1089_v5 = vpop.f32.mrb[12].mxu0 }
 0x100   : > { %574 = vmax.xlane.f32.xlu0 %v573_v2  ;;  %v427_v6 = vpop.f32.mrb[13].mxu0  ;;  %v1105_v7 = vpop.f32.mrb[12].mxu1  ;;  %v1467_v41 = vadd.f32 %v1089_v5, %v1345_v18 }
 0x101   : > { %v1090_v8 = vpop.f32.mrb[14].mxu0  ;;  %v491_v9 = vpop.f32.mrb[13].mxu1  ;;  %v1481_v51 = vadd.f32 %v1345_v18, %v427_v6  ;;  %v1501_v61 = vadd.f32 %v1105_v7, %v1345_v18 }
 0x102   : > { %v430_v12 = vpop.f32.mrb[15].mxu0  ;;  %v1106_v13 = vpop.f32.mrb[14].mxu1  ;;  %v1464_v40 = vadd.f32 %v1090_v8, %v1345_v18  ;;  %v549_v47 = vsel %vm506_vm2, %v1467_v41, -inf  ;;  %v1487_v53 = vadd.f32 %v1345_v18, %v491_v9 }
 0x103   : > { %523 = vmax.xlane.f32.xlu1 %v522_v11  ;;  %v494_v16 = vpop.f32.mrb[15].mxu1  ;;  %v1478_v48 = vadd.f32 %v1345_v18, %v430_v12  ;;  %v543_v56 = vsel %vm506_vm2, %v1481_v51, -inf  ;;  %v1498_v60 = vadd.f32 %v1106_v13, %v1345_v18  ;;  %v597_v63 = vsel %vm506_vm2, %v1501_v61, -inf }
 0x104   : > { %520 = vmax.xlane.f32.xlu0 %v519_v15  ;;  %1827 = vst [vmem:[#allocation6_spill] sm:$0xff] %v1464_v40  ;;  %v552_v45 = vsel %vm506_vm2, %v1464_v40, -inf  ;;  %v1484_v52 = vadd.f32 %v1345_v18, %v494_v16  ;;  %v591_v59 = vsel %vm506_vm2, %v1487_v53, -inf }
 0x105   : > { %1828 = vst [vmem:[#allocation7_spill] sm:$0xff] %v1478_v48  ;;  %v546_v55 = vsel %vm506_vm2, %v1478_v48, -inf  ;;  %1830 = vst [vmem:[#allocation9_spill] sm:$0xff] %v1498_v60  ;;  %v600_v62 = vsel %vm506_vm2, %v1498_v60, -inf }
 0x106   : > { %1829 = vst [vmem:[#allocation8_spill] sm:$0xff] %v1484_v52  ;;  %v594_v57 = vsel %vm506_vm2, %v1484_v52, -inf }
 0x107   : > { %571 = vmax.xlane.f32.xlu1 %v570_v21 }
 0x108   : > { %568 = vmax.xlane.f32.xlu0 %v567_v22 }
 0x10b   : > { %541 = vmax.xlane.f32.xlu1 %v540_v25 }
 0x10c   : > { %538 = vmax.xlane.f32.xlu0 %v537_v28 }
 0x10f   : > { %589 = vmax.xlane.f32.xlu1 %v588_v29 }
 0x110   : > { %586 = vmax.xlane.f32.xlu0 %v585_v31 }
 0x113   : > { %535 = vmax.xlane.f32.xlu1 %v534_v37 }
 0x114   : > { %532 = vmax.xlane.f32.xlu0 %v531_v39 }
 0x117   : > { %583 = vmax.xlane.f32.xlu1 %v582_v43 }
 0x118   : > { %580 = vmax.xlane.f32.xlu0 %v579_v44 }
 0x11b   : > { %553 = vmax.xlane.f32.xlu1 %v552_v45 }
 0x11c   : > { %550 = vmax.xlane.f32.xlu0 %v549_v47 }
 0x11f   : > { %547 = vmax.xlane.f32.xlu1 %v546_v55 }
 0x120   : > { %544 = vmax.xlane.f32.xlu0 %v543_v56 }
 0x123   : > { %595 = vmax.xlane.f32.xlu1 %v594_v57 }
 0x124   : > { %592 = vmax.xlane.f32.xlu0 %v591_v59 }
 0x127   : > { %601 = vmax.xlane.f32.xlu1 %v600_v62 }
 0x128   : > { %598 = vmax.xlane.f32.xlu0 %v597_v63 }
 0x178   : > { %v1507_v0 = vpop.xlane.xlu1 %514 }
 0x179   : > { %v1509_v1 = vpop.xlane.xlu0 %562  ;;  %v605_v2 = vsub.f32 %v1348_v20, %v1507_v0 }
 0x17a   : > { %v621_v18 = vsub.f32 %v1351_v23, %v1509_v1 }
 0x17b   : > { %v639_v5 = vmul.f32 1.442695, %v605_v2 }
 0x17c   : > { %v671_v6 = vmul.f32 1.442695, %v621_v18  ;;  %v1515_v7 = vpop.xlane.xlu1 %517 }
 0x17d   : > { %1135 = vpow2.f32 %v639_v5  ;;  %v606_v8 = vsub.f32 %v1354_v26, %v1515_v7  ;;  %v1519_v9 = vpop.xlane.xlu0 %508 }
 0x17e   : > { %v603_v11 = vsub.f32 %v1359_v30, %v1519_v9  ;;  %1137 = vpow2.f32 %v671_v6 }
 0x17f   : > { %v641_v12 = vmul.f32 1.442695, %v606_v8 }
 0x180   : > { %v635_v13 = vmul.f32 1.442695, %v603_v11  ;;  %v1523_v15 = vpop.xlane.xlu1 %565 }
 0x181   : > { %1139 = vpow2.f32 %v641_v12  ;;  %v622_v16 = vsub.f32 %v1364_v33, %v1523_v15  ;;  %v1527_v21 = vpop.xlane.xlu0 %556 }
 0x182   : > { %v619_v22 = vsub.f32 %v1369_v35, %v1527_v21  ;;  %1141 = vpow2.f32 %v635_v13 }
 0x183   : > { %v673_v25 = vmul.f32 1.442695, %v622_v16 }
 0x184   : > { %v667_v28 = vmul.f32 1.442695, %v619_v22  ;;  %v1531_v29 = vpop.xlane.xlu1 %559 }
 0x185   : > { %1143 = vpow2.f32 %v673_v25  ;;  %v620_v31 = vsub.f32 %v1374_v42, %v1531_v29  ;;  %v1535_v37 = vpop.xlane.xlu0 %511 }
 0x186   : > { %v604_v39 = vsub.f32 %v1379_v46, %v1535_v37  ;;  %1145 = vpow2.f32 %v667_v28 }
 0x187   : > { %v1136_v43 = vpop.eup %1135  ;;  %v669_v44 = vmul.f32 1.442695, %v620_v31 }
 0x188   : > { %v637_v45 = vmul.f32 1.442695, %v604_v39  ;;  %v1539_v47 = vpop.xlane.xlu1 %529  ;;  %v705_v55 = vsel %vm506_vm2, %v1136_v43, 0.0  ;;  %v1138_v56 = vpop.eup %1137 }
 0x189   : > { %v610_v57 = vsub.f32 %v1384_v49, %v1539_v47  ;;  %v1544_v59 = vpop.xlane.xlu0 %526  ;;  %706 = vadd.xlane.f32.xlu0 %v705_v55  ;;  %v753_v8 = vsel %vm506_vm2, %v1138_v56, 0.0 }
 0x18a   : > { %1147 = vpow2.f32 %v637_v45  ;;  %v609_v62 = vsub.f32 %v1387_v50, %v1544_v59 }
 0x18b   : > { %v1140_v63 = vpop.eup %1139  ;;  %v649_v2 = vmul.f32 1.442695, %v610_v57  ;;  %1149 = vpow2.f32 %v669_v44 }
 0x18c   : > { %v647_v18 = vmul.f32 1.442695, %v609_v62  ;;  %v1548_v5 = vpop.xlane.xlu1 %577  ;;  %v708_v6 = vsel %vm506_vm2, %v1140_v63, 0.0  ;;  %v1142_v11 = vpop.eup %1141 }
 0x18d   : > { %v626_v12 = vsub.f32 %v1394_v54, %v1548_v5  ;;  %v1554_v13 = vpop.xlane.xlu0 %574  ;;  %709 = vadd.xlane.f32.xlu1 %v708_v6  ;;  %754 = vadd.xlane.f32.xlu0 %v753_v8  ;;  %v699_v43 = vsel %vm506_vm2, %v1142_v11, 0.0 }
 0x18e   : > { %1151 = vpow2.f32 %v647_v18  ;;  %v625_v16 = vsub.f32 %v1399_v58, %v1554_v13 }
 0x18f   : > { %v1144_v22 = vpop.eup %1143  ;;  %1153 = vpow2.f32 %v649_v2  ;;  %v681_v25 = vmul.f32 1.442695, %v626_v12 }
 0x190   : > { %v679_v28 = vmul.f32 1.442695, %v625_v16  ;;  %v1558_v31 = vpop.xlane.xlu1 %523  ;;  %v756_v39 = vsel %vm506_vm2, %v1144_v22, 0.0  ;;  %v1146_v44 = vpop.eup %1145 }
 0x191   : > { %v608_v45 = vsub.f32 %v1408_v3, %v1558_v31  ;;  %v1564_v55 = vpop.xlane.xlu0 %520  ;;  %757 = vadd.xlane.f32.xlu1 %v756_v39  ;;  %700 = vadd.xlane.f32.xlu0 %v699_v43  ;;  %v747_v18 = vsel %vm506_vm2, %v1146_v44, 0.0 }
 0x192   : > { %1155 = vpow2.f32 %v679_v28  ;;  %v607_v56 = vsub.f32 %v1411_v4, %v1564_v55 }
 0x193   : > { %1157 = vpow2.f32 %v681_v25  ;;  %v645_v62 = vmul.f32 1.442695, %v608_v45 }
 0x194   : > { %v1148_v57 = vpop.eup %1147  ;;  %v643_v63 = vmul.f32 1.442695, %v607_v56  ;;  %v1568_v2 = vpop.xlane.xlu1 %571 }
 0x195   : > { %v624_v6 = vsub.f32 %v1414_v10, %v1568_v2  ;;  %v1573_v8 = vpop.xlane.xlu0 %568  ;;  %748 = vadd.xlane.f32.xlu0 %v747_v18  ;;  %v702_v11 = vsel %vm506_vm2, %v1148_v57, 0.0  ;;  %v1150_v12 = vpop.eup %1149 }
 0x196   : > { %1159 = vpow2.f32 %v643_v63  ;;  %v623_v16 = vsub.f32 %v1419_v14, %v1573_v8  ;;  %703 = vadd.xlane.f32.xlu1 %v702_v11  ;;  %v750_v56 = vsel %vm506_vm2, %v1150_v12, 0.0 }
 0x197   : > { %1161 = vpow2.f32 %v645_v62  ;;  %v677_v25 = vmul.f32 1.442695, %v624_v6 }
 0x198   : > { %v1152_v22 = vpop.eup %1151  ;;  %v675_v28 = vmul.f32 1.442695, %v623_v16  ;;  %v1578_v39 = vpop.xlane.xlu1 %541 }
 0x199   : > { %v1154_v43 = vpop.eup %1153  ;;  %v614_v44 = vsub.f32 %v1424_v17, %v1578_v39  ;;  %v1582_v45 = vpop.xlane.xlu0 %538  ;;  %v717_v57 = vsel %vm506_vm2, %v1152_v22, 0.0 }
 0x19a   : > { %1163 = vpow2.f32 %v675_v28  ;;  %v613_v63 = vsub.f32 %v1427_v19, %v1582_v45  ;;  %751 = vadd.xlane.f32.xlu1 %v750_v56  ;;  %718 = vadd.xlane.f32.xlu0 %v717_v57  ;;  %v720_v12 = vsel %vm506_vm2, %v1154_v43, 0.0 }
 0x19b   : > { %1165 = vpow2.f32 %v677_v25  ;;  %v657_v18 = vmul.f32 1.442695, %v614_v44 }
 0x19c   : > { %v1156_v62 = vpop.eup %1155  ;;  %v655_v6 = vmul.f32 1.442695, %v613_v63  ;;  %v1588_v11 = vpop.xlane.xlu1 %589 }
 0x19d   : > { %1831 = vst [vmem:[#allocation10_spill] sm:$0xff] %v1588_v11  ;;  %v630_v16 = vsub.f32 %v1434_v24, %v1588_v11  ;;  %v1592_v17 = vpop.xlane.xlu0 %586  ;;  %v765_v22 = vsel %vm506_vm2, %v1156_v62, 0.0  ;;  %v1158_v28 = vpop.eup %1157 }
 0x19e   : > { %1167 = vpow2.f32 %v655_v6  ;;  %v629_v56 = vsub.f32 %v1439_v27, %v1592_v17  ;;  %721 = vadd.xlane.f32.xlu1 %v720_v12  ;;  %766 = vadd.xlane.f32.xlu0 %v765_v22  ;;  %v768_v43 = vsel %vm506_vm2, %v1158_v28, 0.0 }
 0x19f   : > { %1169 = vpow2.f32 %v657_v18  ;;  %v689_v44 = vmul.f32 1.442695, %v630_v16 }
 0x1a0   : > { %v1160_v25 = vpop.eup %1159  ;;  %v687_v57 = vmul.f32 1.442695, %v629_v56  ;;  %v1598_v63 = vpop.xlane.xlu1 %535 }
 0x1a1   : > { %1832 = vst [vmem:[#allocation11_spill] sm:$0xff] %v1598_v63  ;;  %v612_v24 = vsub.f32 %v1448_v32, %v1598_v63  ;;  %v1602_v11 = vpop.xlane.xlu0 %532  ;;  %v711_v62 = vsel %vm506_vm2, %v1160_v25, 0.0  ;;  %v1162_v6 = vpop.eup %1161 }
 0x1a2   : > { %1171 = vpow2.f32 %v687_v57  ;;  %v611_v12 = vsub.f32 %v1451_v34, %v1602_v11  ;;  %769 = vadd.xlane.f32.xlu1 %v768_v43  ;;  %712 = vadd.xlane.f32.xlu0 %v711_v62  ;;  %v714_v28 = vsel %vm506_vm2, %v1162_v6, 0.0 }
 0x1a3   : > { %1173 = vpow2.f32 %v689_v44  ;;  %v653_v16 = vmul.f32 1.442695, %v612_v24 }
 0x1a4   : > { %v1164_v18 = vpop.eup %1163  ;;  %v651_v22 = vmul.f32 1.442695, %v611_v12  ;;  %v1608_v56 = vpop.xlane.xlu1 %583 }
 0x1a5   : > { %1833 = vst [vmem:[#allocation12_spill] sm:$0xff] %v1608_v56  ;;  %v628_v32 = vsub.f32 %v1454_v36, %v1608_v56  ;;  %v1612_v63 = vpop.xlane.xlu0 %580  ;;  %v759_v25 = vsel %vm506_vm2, %v1164_v18, 0.0  ;;  %v1166_v57 = vpop.eup %1165 }
 0x1a6   : > { %1175 = vpow2.f32 %v651_v22  ;;  %v627_v43 = vsub.f32 %v1459_v38, %v1612_v63  ;;  %715 = vadd.xlane.f32.xlu1 %v714_v28  ;;  %760 = vadd.xlane.f32.xlu0 %v759_v25  ;;  %v762_v6 = vsel %vm506_vm2, %v1166_v57, 0.0 }
 0x1a7   : > { %1177 = vpow2.f32 %v653_v16  ;;  %v685_v44 = vmul.f32 1.442695, %v628_v32 }
 0x1a8   : > { %v1168_v24 = vpop.eup %1167  ;;  %v683_v62 = vmul.f32 1.442695, %v627_v43  ;;  %v1618_v12 = vpop.xlane.xlu1 %553 }
 0x1a9   : > { %1834 = vst [vmem:[#allocation13_spill] sm:$0xff] %v1618_v12  ;;  %v618_v36 = vsub.f32 %v1464_v40, %v1618_v12  ;;  %v1622_v56 = vpop.xlane.xlu0 %550  ;;  %v729_v18 = vsel %vm506_vm2, %v1168_v24, 0.0  ;;  %v1170_v22 = vpop.eup %1169 }
 0x1aa   : > { %1179 = vpow2.f32 %v683_v62  ;;  %v617_v28 = vsub.f32 %v1467_v41, %v1622_v56  ;;  %763 = vadd.xlane.f32.xlu1 %v762_v6  ;;  %730 = vadd.xlane.f32.xlu0 %v729_v18  ;;  %v732_v57 = vsel %vm506_vm2, %v1170_v22, 0.0 }
 0x1ab   : > { %1181 = vpow2.f32 %v685_v44  ;;  %v665_v16 = vmul.f32 1.442695, %v618_v36 }
 0x1ac   : > { %v1172_v32 = vpop.eup %1171  ;;  %v663_v25 = vmul.f32 1.442695, %v617_v28  ;;  %v1628_v43 = vpop.xlane.xlu1 %547 }
 0x1ad   : > { %1835 = vst [vmem:[#allocation14_spill] sm:$0xff] %v1628_v43  ;;  %v616_v40 = vsub.f32 %v1478_v48, %v1628_v43  ;;  %v1632_v12 = vpop.xlane.xlu0 %544  ;;  %v777_v24 = vsel %vm506_vm2, %v1172_v32, 0.0  ;;  %v1174_v62 = vpop.eup %1173 }
 0x1ae   : > { %1183 = vpow2.f32 %v663_v25  ;;  %v615_v6 = vsub.f32 %v1481_v51, %v1632_v12  ;;  %733 = vadd.xlane.f32.xlu1 %v732_v57  ;;  %778 = vadd.xlane.f32.xlu0 %v777_v24  ;;  %v780_v22 = vsel %vm506_vm2, %v1174_v62, 0.0 }
 0x1af   : > { %1185 = vpow2.f32 %v665_v16  ;;  %v661_v44 = vmul.f32 1.442695, %v616_v40 }
 0x1b0   : > { %v1176_v36 = vpop.eup %1175  ;;  %v659_v18 = vmul.f32 1.442695, %v615_v6  ;;  %v1638_v28 = vpop.xlane.xlu1 %595 }
 0x1b1   : > { %1836 = vst [vmem:[#allocation15_spill] sm:$0xff] %v1638_v28  ;;  %v632_v48 = vsub.f32 %v1484_v52, %v1638_v28  ;;  %v1642_v43 = vpop.xlane.xlu0 %592  ;;  %v723_v32 = vsel %vm506_vm2, %v1176_v36, 0.0  ;;  %v1178_v25 = vpop.eup %1177 }
 0x1b2   : > { %1187 = vpow2.f32 %v659_v18  ;;  %v631_v57 = vsub.f32 %v1487_v53, %v1642_v43  ;;  %781 = vadd.xlane.f32.xlu1 %v780_v22  ;;  %724 = vadd.xlane.f32.xlu0 %v723_v32  ;;  %v726_v62 = vsel %vm506_vm2, %v1178_v25, 0.0 }
 0x1b3   : > { %1189 = vpow2.f32 %v661_v44  ;;  %v693_v16 = vmul.f32 1.442695, %v632_v48 }
 0x1b4   : > { %v1180_v40 = vpop.eup %1179  ;;  %v691_v24 = vmul.f32 1.442695, %v631_v57  ;;  %v1648_v6 = vpop.xlane.xlu1 %601 }
 0x1b5   : > { %1837 = vst [vmem:[#allocation16_spill] sm:$0xff] %v1648_v6  ;;  %v634_v52 = vsub.f32 %v1498_v60, %v1648_v6  ;;  %v1652_v28 = vpop.xlane.xlu0 %598  ;;  %v771_v36 = vsel %vm506_vm2, %v1180_v40, 0.0  ;;  %v1182_v18 = vpop.eup %1181 }
 0x1b6   : > { %1191 = vpow2.f32 %v691_v24  ;;  %v633_v22 = vsub.f32 %v1501_v61, %v1652_v28  ;;  %727 = vadd.xlane.f32.xlu1 %v726_v62  ;;  %772 = vadd.xlane.f32.xlu0 %v771_v36  ;;  %v774_v57 = vsel %vm506_vm2, %v1182_v18, 0.0 }
 0x1b7   : > { %1193 = vpow2.f32 %v693_v16  ;;  %v697_v44 = vmul.f32 1.442695, %v634_v52 }
 0x1b8   : > { %v1184_v48 = vpop.eup %1183  ;;  %v695_v32 = vmul.f32 1.442695, %v633_v22 }
 0x1b9   : > { %v741_v60 = vsel %vm506_vm2, %v1184_v48, 0.0  ;;  %v1186_v6 = vpop.eup %1185 }
 0x1ba   : > { %1195 = vpow2.f32 %v695_v32  ;;  %775 = vadd.xlane.f32.xlu1 %v774_v57  ;;  %742 = vadd.xlane.f32.xlu0 %v741_v60  ;;  %v744_v40 = vsel %vm506_vm2, %v1186_v6, 0.0 }
 0x1bb   : > { %1197 = vpow2.f32 %v697_v44 }
 0x1bc   : > { %v1188_v25 = vpop.eup %1187 }
 0x1bd   : > { %v735_v24 = vsel %vm506_vm2, %v1188_v25, 0.0  ;;  %v1190_v62 = vpop.eup %1189 }
 0x1be   : > { %745 = vadd.xlane.f32.xlu1 %v744_v40  ;;  %736 = vadd.xlane.f32.xlu0 %v735_v24  ;;  %v738_v52 = vsel %vm506_vm2, %v1190_v62, 0.0 }
 0x1c0   : > { %v1192_v16 = vpop.eup %1191 }
 0x1c1   : > { %v783_v36 = vsel %vm506_vm2, %v1192_v16, 0.0  ;;  %v1194_v18 = vpop.eup %1193 }
 0x1c2   : > { %739 = vadd.xlane.f32.xlu1 %v738_v52  ;;  %784 = vadd.xlane.f32.xlu0 %v783_v36  ;;  %v786_v60 = vsel %vm506_vm2, %v1194_v18, 0.0 }
 0x1c4   : > { %v1196_v22 = vpop.eup %1195 }
 0x1c5   : > { %v789_v48 = vsel %vm506_vm2, %v1196_v22, 0.0  ;;  %v1198_v44 = vpop.eup %1197 }
 0x1c6   : > { %787 = vadd.xlane.f32.xlu1 %v786_v60  ;;  %790 = vadd.xlane.f32.xlu0 %v789_v48  ;;  %v792_v6 = vsel %vm506_vm2, %v1198_v44, 0.0 }
 0x1ca   : > { %793 = vadd.xlane.f32.xlu1 %v792_v6 }
 0x216   : > { %v707_v32 = vpop.xlane.xlu0 %706 }
 0x217   : > { %1199 = vlog2.f32 %v707_v32 }
 0x21a   : > { %v710_v57 = vpop.xlane.xlu1 %709  ;;  %v755_v25 = vpop.xlane.xlu0 %754 }
 0x21b   : > { %1201 = vlog2.f32 %v710_v57 }
 0x21c   : > { %1203 = vlog2.f32 %v755_v25 }
 0x21e   : > { %v758_v40 = vpop.xlane.xlu1 %757  ;;  %v701_v24 = vpop.xlane.xlu0 %700 }
 0x21f   : > { %1205 = vlog2.f32 %v758_v40 }
 0x220   : > { %1207 = vlog2.f32 %v701_v24 }
 0x221   : > { %v1200_v62 = vpop.eup %1199 }
 0x222   : > { %v800_v16 = vmul.f32 0.6931472, %v1200_v62  ;;  %v749_v52 = vpop.xlane.xlu0 %748 }
 0x223   : > { %v704_v36 = vpop.xlane.xlu1 %703  ;;  %1209 = vlog2.f32 %v749_v52 }
 0x224   : > { %v861_v18 = vadd.f32 %v800_v16, %v1507_v0  ;;  %1211 = vlog2.f32 %v704_v36 }
 0x225   : > { %v1202_v22 = vpop.eup %1201 }
 0x226   : > { %v1204_v60 = vpop.eup %1203  ;;  %v893_v48 = vsub.f32 %v1348_v20, %v861_v18  ;;  %v802_v44 = vmul.f32 0.6931472, %v1202_v22 }
 0x227   : > { %v832_v6 = vmul.f32 0.6931472, %v1204_v60  ;;  %v752_v32 = vpop.xlane.xlu1 %751  ;;  %v719_v57 = vpop.xlane.xlu0 %718 }
 0x228   : > { %925 = vst.msk [vmem:[%s1672_s25 + $0x10] sm:$0xff] %vm506_vm2, %v893_v48  ;;  %v862_v0 = vadd.f32 %v802_v44, %v1515_v7  ;;  %1213 = vlog2.f32 %v752_v32 }
 0x229   : > { %v1206_v25 = vpop.eup %1205  ;;  %v877_v40 = vadd.f32 %v832_v6, %v1509_v1  ;;  %1215 = vlog2.f32 %v719_v57 }
 0x22a   : > { %v1208_v24 = vpop.eup %1207  ;;  %v894_v62 = vsub.f32 %v1354_v26, %v862_v0  ;;  %v834_v16 = vmul.f32 0.6931472, %v1206_v25 }
 0x22b   : > { %v909_v20 = vsub.f32 %v1351_v23, %v877_v40  ;;  %v796_v52 = vmul.f32 0.6931472, %v1208_v24  ;;  %v722_v36 = vpop.xlane.xlu1 %721  ;;  %v767_v18 = vpop.xlane.xlu0 %766 }
 0x22c   : > { %926 = vst.msk [vmem:[%s1672_s25 + $0x18] sm:$0xff] %vm506_vm2, %v894_v62  ;;  %v878_v7 = vadd.f32 %v834_v16, %v1523_v15  ;;  %1217 = vlog2.f32 %v722_v36 }
 0x22d   : > { %v1210_v22 = vpop.eup %1209  ;;  %941 = vst.msk [vmem:[%s1672_s25 + $0x90] sm:$0xff] %vm506_vm2, %v909_v20  ;;  %v859_v1 = vadd.f32 %v796_v52, %v1519_v9  ;;  %1219 = vlog2.f32 %v767_v18 }
 0x22e   : > { %v1212_v26 = vpop.eup %1211  ;;  %v910_v60 = vsub.f32 %v1364_v33, %v878_v7  ;;  %v828_v23 = vmul.f32 0.6931472, %v1210_v22 }
 0x22f   : > { %v891_v48 = vsub.f32 %v1359_v30, %v859_v1  ;;  %v798_v44 = vmul.f32 0.6931472, %v1212_v26  ;;  %v770_v6 = vpop.xlane.xlu1 %769  ;;  %v713_v32 = vpop.xlane.xlu0 %712 }
 0x230   : > { %942 = vst.msk [vmem:[%s1672_s25 + $0x98] sm:$0xff] %vm506_vm2, %v910_v60  ;;  %v875_v15 = vadd.f32 %v828_v23, %v1527_v21  ;;  %1221 = vlog2.f32 %v770_v6 }
 0x231   : > { %923 = vst.msk [vmem:[%s1672_s25] sm:$0xff] %vm506_vm2, %v891_v48  ;;  %v860_v9 = vadd.f32 %v798_v44, %v1535_v37  ;;  %1223 = vlog2.f32 %v713_v32 }
 0x232   : > { %v1214_v57 = vpop.eup %1213  ;;  %v907_v33 = vsub.f32 %v1369_v35, %v875_v15 }
 0x233   : > { %v1216_v0 = vpop.eup %1215  ;;  %v892_v30 = vsub.f32 %v1379_v46, %v860_v9  ;;  %v830_v25 = vmul.f32 0.6931472, %v1214_v57  ;;  %v716_v40 = vpop.xlane.xlu1 %715 }
 0x234   : > { %v761_v24 = vpop.xlane.xlu0 %760  ;;  %939 = vst.msk [vmem:[%s1672_s25 + $0x80] sm:$0xff] %vm506_vm2, %v907_v33  ;;  %v808_v62 = vmul.f32 0.6931472, %v1216_v0  ;;  %1225 = vlog2.f32 %v716_v40 }
 0x235   : > { %924 = vst.msk [vmem:[%s1672_s25 + $0x8] sm:$0xff] %vm506_vm2, %v892_v30  ;;  %v876_v21 = vadd.f32 %v830_v25, %v1531_v29  ;;  %1227 = vlog2.f32 %v761_v24 }
 0x236   : > { %v1218_v37 = vpop.eup %1217  ;;  %v865_v35 = vadd.f32 %v808_v62, %v1544_v59 }
 0x237   : > { %v1220_v16 = vpop.eup %1219  ;;  %v908_v46 = vsub.f32 %v1374_v42, %v876_v21  ;;  %v810_v20 = vmul.f32 0.6931472, %v1218_v37  ;;  %v764_v52 = vpop.xlane.xlu1 %763 }
 0x238   : > { %v731_v36 = vpop.xlane.xlu0 %730  ;;  %v897_v18 = vsub.f32 %v1387_v50, %v865_v35  ;;  %v840_v7 = vmul.f32 0.6931472, %v1220_v16  ;;  %1229 = vlog2.f32 %v764_v52  ;;  %v1838_v52 = vld [vmem:[#allocation2_spill] sm:$0xff] }
 0x239   : > { %940 = vst.msk [vmem:[%s1672_s25 + $0x88] sm:$0xff] %vm506_vm2, %v908_v46  ;;  %v866_v29 = vadd.f32 %v810_v20, %v1539_v47  ;;  %1231 = vlog2.f32 %v731_v36 }
 0x23a   : > { %v1222_v22 = vpop.eup %1221  ;;  %929 = vst.msk [vmem:[%s1672_s25 + $0x30] sm:$0xff] %vm506_vm2, %v897_v18  ;;  %v881_v59 = vadd.f32 %v840_v7, %v1554_v13 }
 0x23b   : > { %v1224_v42 = vpop.eup %1223  ;;  %v898_v1 = vsub.f32 %v1384_v49, %v866_v29  ;;  %v842_v26 = vmul.f32 0.6931472, %v1222_v22  ;;  %v734_v60 = vpop.xlane.xlu1 %733 }
 0x23c   : > { %v779_v50 = vpop.xlane.xlu0 %778  ;;  %v913_v23 = vsub.f32 %v1399_v58, %v881_v59  ;;  %v804_v48 = vmul.f32 0.6931472, %v1224_v42  ;;  %1233 = vlog2.f32 %v734_v60 }
 0x23d   : > { %930 = vst.msk [vmem:[%s1672_s25 + $0x38] sm:$0xff] %vm506_vm2, %v898_v1  ;;  %v882_v47 = vadd.f32 %v842_v26, %v1548_v5  ;;  %1235 = vlog2.f32 %v779_v50  ;;  %v1840_v26 = vld [vmem:[#allocation3_spill] sm:$0xff] }
 0x23e   : > { %v1226_v44 = vpop.eup %1225  ;;  %945 = vst.msk [vmem:[%s1672_s25 + $0xb0] sm:$0xff] %vm506_vm2, %v913_v23  ;;  %v863_v13 = vadd.f32 %v804_v48, %v1564_v55 }
 0x23f   : > { %v1228_v49 = vpop.eup %1227  ;;  %v914_v6 = vsub.f32 %v1394_v54, %v882_v47  ;;  %v806_v32 = vmul.f32 0.6931472, %v1226_v44  ;;  %v782_v15 = vpop.xlane.xlu1 %781  ;;  %v1841_v44 = vld [vmem:[#allocation11_spill] sm:$0xff] }
 0x240   : > { %v725_v58 = vpop.xlane.xlu0 %724  ;;  %v895_v9 = vsub.f32 %v1411_v4, %v863_v13  ;;  %v836_v57 = vmul.f32 0.6931472, %v1228_v49  ;;  %1237 = vlog2.f32 %v782_v15 }
 0x241   : > { %946 = vst.msk [vmem:[%s1672_s25 + $0xb8] sm:$0xff] %vm506_vm2, %v914_v6  ;;  %v864_v5 = vadd.f32 %v806_v32, %v1558_v31  ;;  %1239 = vlog2.f32 %v725_v58  ;;  %v1842_v32 = vld [vmem:[#allocation4_spill] sm:$0xff] }
 0x242   : > { %v1230_v33 = vpop.eup %1229  ;;  %927 = vst.msk [vmem:[%s1672_s25 + $0x20] sm:$0xff] %vm506_vm2, %v895_v9  ;;  %v879_v55 = vadd.f32 %v836_v57, %v1573_v8 }
 0x243   : > { %v1232_v54 = vpop.eup %1231  ;;  %v896_v0 = vsub.f32 %v1408_v3, %v864_v5  ;;  %v838_v30 = vmul.f32 0.6931472, %v1230_v33  ;;  %v728_v25 = vpop.xlane.xlu1 %727  ;;  %v1843_v33 = vld [vmem:[#allocation12_spill] sm:$0xff] }
 0x244   : > { %v773_v4 = vpop.xlane.xlu0 %772  ;;  %v911_v40 = vsub.f32 %v1419_v14, %v879_v55  ;;  %v816_v24 = vmul.f32 0.6931472, %v1232_v54  ;;  %1241 = vlog2.f32 %v728_v25 }
 0x245   : > { %928 = vst.msk [vmem:[%s1672_s25 + $0x28] sm:$0xff] %vm506_vm2, %v896_v0  ;;  %v880_v31 = vadd.f32 %v838_v30, %v1568_v2  ;;  %1243 = vlog2.f32 %v773_v4  ;;  %v1844_v30 = vld [vmem:[#allocation5_spill] sm:$0xff] }
 0x246   : > { %v1234_v62 = vpop.eup %1233  ;;  %943 = vst.msk [vmem:[%s1672_s25 + $0xa0] sm:$0xff] %vm506_vm2, %v911_v40  ;;  %v869_v8 = vadd.f32 %v816_v24, %v1582_v45 }
 0x247   : > { %v1236_v3 = vpop.eup %1235  ;;  %v912_v21 = vsub.f32 %v1414_v10, %v880_v31  ;;  %v818_v37 = vmul.f32 0.6931472, %v1234_v62  ;;  %v776_v35 = vpop.xlane.xlu1 %775  ;;  %v1845_v31 = vld [vmem:[#allocation13_spill] sm:$0xff] }
 0x248   : > { %v743_v14 = vpop.xlane.xlu0 %742  ;;  %v901_v16 = vsub.f32 %v1427_v19, %v869_v8  ;;  %v848_v46 = vmul.f32 0.6931472, %v1236_v3  ;;  %1245 = vlog2.f32 %v776_v35 }
 0x249   : > { %944 = vst.msk [vmem:[%s1672_s25 + $0xa8] sm:$0xff] %vm506_vm2, %v912_v21  ;;  %v870_v2 = vadd.f32 %v818_v37, %v1578_v39  ;;  %1247 = vlog2.f32 %v743_v14  ;;  %v1839_v39 = vld [vmem:[#allocation10_spill] sm:$0xff] }
 0x24a   : > { %v1238_v20 = vpop.eup %1237  ;;  %933 = vst.msk [vmem:[%s1672_s25 + $0x50] sm:$0xff] %vm506_vm2, %v901_v16  ;;  %v885_v45 = vadd.f32 %v848_v46, %v1592_v17  ;;  %v1846_v21 = vld [vmem:[#allocation6_spill] sm:$0xff] }
 0x24b   : > { %v1240_v10 = vpop.eup %1239  ;;  %v902_v36 = vsub.f32 %v1838_v52, %v870_v2  ;;  %v850_v18 = vmul.f32 0.6931472, %v1238_v20  ;;  %v746_v7 = vpop.xlane.xlu1 %745  ;;  %v1847_v16 = vld [vmem:[#allocation14_spill] sm:$0xff] }
 0x24c   : > { %v737_v19 = vpop.xlane.xlu0 %736  ;;  %v917_v29 = vsub.f32 %v1439_v27, %v885_v45  ;;  %v812_v22 = vmul.f32 0.6931472, %v1240_v10  ;;  %1249 = vlog2.f32 %v746_v7  ;;  %v1848_v45 = vld [vmem:[#allocation7_spill] sm:$0xff] }
 0x24d   : > { %934 = vst.msk [vmem:[%s1672_s25 + $0x58] sm:$0xff] %vm506_vm2, %v902_v36  ;;  %v886_v59 = vadd.f32 %v850_v18, %v1839_v39  ;;  %1251 = vlog2.f32 %v737_v19  ;;  %v1849_v18 = vld [vmem:[#allocation15_spill] sm:$0xff] }
 0x24e   : > { %v1242_v42 = vpop.eup %1241  ;;  %949 = vst.msk [vmem:[%s1672_s25 + $0xd0] sm:$0xff] %vm506_vm2, %v917_v29  ;;  %v867_v17 = vadd.f32 %v812_v22, %v1602_v11  ;;  %v1850_v22 = vld [vmem:[#allocation8_spill] sm:$0xff] }
 0x24f   : > { %v1244_v1 = vpop.eup %1243  ;;  %v918_v60 = vsub.f32 %v1840_v26, %v886_v59  ;;  %v814_v50 = vmul.f32 0.6931472, %v1242_v42  ;;  %v740_v23 = vpop.xlane.xlu1 %739  ;;  %v1851_v42 = vld [vmem:[#allocation16_spill] sm:$0xff] }
 0x250   : > { %v785_v27 = vpop.xlane.xlu0 %784  ;;  %v899_v48 = vsub.f32 %v1451_v34, %v867_v17  ;;  %v844_v47 = vmul.f32 0.6931472, %v1244_v1  ;;  %1253 = vlog2.f32 %v740_v23 }
 0x251   : > { %950 = vst.msk [vmem:[%s1672_s25 + $0xd8] sm:$0xff] %vm506_vm2, %v918_v60  ;;  %v868_v13 = vadd.f32 %v814_v50, %v1841_v44  ;;  %1255 = vlog2.f32 %v785_v27 }
 0x252   : > { %v1246_v49 = vpop.eup %1245  ;;  %931 = vst.msk [vmem:[%s1672_s25 + $0x40] sm:$0xff] %vm506_vm2, %v899_v48  ;;  %v883_v11 = vadd.f32 %v844_v47, %v1612_v63 }
 0x253   : > { %v1248_v6 = vpop.eup %1247  ;;  %v900_v15 = vsub.f32 %v1842_v32, %v868_v13  ;;  %v846_v58 = vmul.f32 0.6931472, %v1246_v49  ;;  %v788_v9 = vpop.xlane.xlu1 %787 }
 0x254   : > { %v791_v34 = vpop.xlane.xlu0 %790  ;;  %v915_v57 = vsub.f32 %v1459_v38, %v883_v11  ;;  %v824_v5 = vmul.f32 0.6931472, %v1248_v6  ;;  %1257 = vlog2.f32 %v788_v9 }
 0x255   : > { %932 = vst.msk [vmem:[%s1672_s25 + $0x48] sm:$0xff] %vm506_vm2, %v900_v15  ;;  %v884_v55 = vadd.f32 %v846_v58, %v1843_v33  ;;  %1259 = vlog2.f32 %v791_v34 }
 0x256   : > { %v1250_v54 = vpop.eup %1249  ;;  %947 = vst.msk [vmem:[%s1672_s25 + $0xc0] sm:$0xff] %vm506_vm2, %v915_v57  ;;  %v873_v63 = vadd.f32 %v824_v5, %v1622_v56 }
 0x257   : > { %v1252_v0 = vpop.eup %1251  ;;  %v916_v25 = vsub.f32 %v1844_v30, %v884_v55  ;;  %v826_v4 = vmul.f32 0.6931472, %v1250_v54  ;;  %v794_v38 = vpop.xlane.xlu1 %793 }
 0x258   : > { %v905_v40 = vsub.f32 %v1467_v41, %v873_v63  ;;  %v820_v24 = vmul.f32 0.6931472, %v1252_v0  ;;  %1261 = vlog2.f32 %v794_v38 }
 0x259   : > { %948 = vst.msk [vmem:[%s1672_s25 + $0xc8] sm:$0xff] %vm506_vm2, %v916_v25  ;;  %v874_v62 = vadd.f32 %v826_v4, %v1845_v31 }
 0x25a   : > { %v1254_v8 = vpop.eup %1253  ;;  %937 = vst.msk [vmem:[%s1672_s25 + $0x70] sm:$0xff] %vm506_vm2, %v905_v40  ;;  %v871_v56 = vadd.f32 %v820_v24, %v1632_v12 }
 0x25b   : > { %v1256_v3 = vpop.eup %1255  ;;  %v906_v37 = vsub.f32 %v1846_v21, %v874_v62  ;;  %v822_v35 = vmul.f32 0.6931472, %v1254_v8 }
 0x25c   : > { %v903_v41 = vsub.f32 %v1481_v51, %v871_v56  ;;  %v852_v14 = vmul.f32 0.6931472, %v1256_v3 }
 0x25d   : > { %938 = vst.msk [vmem:[%s1672_s25 + $0x78] sm:$0xff] %vm506_vm2, %v906_v37  ;;  %v872_v46 = vadd.f32 %v822_v35, %v1847_v16 }
 0x25e   : > { %v1258_v2 = vpop.eup %1257  ;;  %935 = vst.msk [vmem:[%s1672_s25 + $0x60] sm:$0xff] %vm506_vm2, %v903_v41  ;;  %v887_v20 = vadd.f32 %v852_v14, %v1642_v43 }
 0x25f   : > { %v1260_v12 = vpop.eup %1259  ;;  %v904_v10 = vsub.f32 %v1848_v45, %v872_v46  ;;  %v854_v52 = vmul.f32 0.6931472, %v1258_v2 }
 0x260   : > { %v919_v36 = vsub.f32 %v1487_v53, %v887_v20  ;;  %v856_v51 = vmul.f32 0.6931472, %v1260_v12  ;;  %v1852_v53 = vld [vmem:[#allocation9_spill] sm:$0xff] }
 0x261   : > { %936 = vst.msk [vmem:[%s1672_s25 + $0x68] sm:$0xff] %vm506_vm2, %v904_v10  ;;  %v888_v7 = vadd.f32 %v854_v52, %v1849_v18 }
 0x262   : > { %v1262_v19 = vpop.eup %1261  ;;  %951 = vst.msk [vmem:[%s1672_s25 + $0xe0] sm:$0xff] %vm506_vm2, %v919_v36  ;;  %v889_v29 = vadd.f32 %v856_v51, %v1652_v28 }
 0x263   : > { %v920_v43 = vsub.f32 %v1850_v22, %v888_v7  ;;  %v858_v39 = vmul.f32 0.6931472, %v1262_v19 }
 0x264   : > { %v921_v59 = vsub.f32 %v1501_v61, %v889_v29 }
 0x265   : > { %952 = vst.msk [vmem:[%s1672_s25 + $0xe8] sm:$0xff] %vm506_vm2, %v920_v43  ;;  %v890_v17 = vadd.f32 %v858_v39, %v1851_v42 }
 0x266   : > { %953 = vst.msk [vmem:[%s1672_s25 + $0xf0] sm:$0xff] %vm506_vm2, %v921_v59 }
 0x267   : > { %v922_v1 = vsub.f32 %v1852_v53, %v890_v17 }
 0x269   : > { %954 = vst.msk [vmem:[%s1672_s25 + $0xf8] sm:$0xff] %vm506_vm2, %v922_v1 }
 0x26a PF: > { %s13_s12 = sadd.s32 1, %s1269_s12  }
 0x26b   : > { %p10_p4 = scmp.ge.s32.totalorder %s13_s12, 4  }
 0x26d   :  { %12 = sbr.rel (!%p10_p4) target bundleno = 1 (0x1), region = 62 }

// kernel: unet_forward.41
= control target key start
LH: loop header
LB: loop body
LE: loop exit
PB: predicated region body
PF: predicated region fallthrough
CT: control target
= control target key end

     0   :  { %s2729_s18 = smov 0   ;;  %s2731_s19 = smov 0   ;;  %s3727_s0 = inlined_call_operand.vmem [shape: bf16[2,2,240,24], index: 0, kind: input, shape index: {}]   ;;  %s3728_s1 = inlined_call_operand.vmem [shape: bf16[2,2,240,24], index: 1, kind: input, shape index: {}]   ;;  %s3729_s2 = inlined_call_operand.vmem [shape: bf16[144,8], index: 2, kind: input, shape index: {}]   ;;  %s3730_s3 = inlined_call_operand.vmem [shape: bf16[2,2,192,8], index: 3, kind: output, shape index: {0}]   ;;  %s3731_s4 = inlined_call_operand.vmem [shape: f32[2,8,8], index: 4, kind: output, shape index: {1}]   ;;  %s3732_s5 = inlined_call_operand.vmem [shape: f32[2,8,8], index: 5, kind: output, shape index: {2}]  }
   0x1   :  { %s2733_s20 = smov 0   ;;  %s2735_s21 = smov 0  }
   0x2   :  { %s2737_s22 = smov 0  }
   0x3 LB: > { %s25_s23 = sadd.s32 1, %s2682_s20  ;;  %s28_s24 = sadd.s32 1, %s2686_s21  ;;  %s2690_s22 = sphi %s2737_s22, %s16_s22   ;;  %s2686_s21 = sphi %s2735_s21, %s3810_s21   ;;  %s2682_s20 = sphi %s2733_s20, %s3809_s20   ;;  %s2678_s19 = sphi %s2731_s19, %s3808_s19   ;;  %s2674_s18 = sphi %s2729_s18, %s3807_s18  }
   0x4   : > { %p26_p0 = scmp.ge.s32.totalorder %s25_s23, 2  ;;  %p2304_p1 = scmp.ge.s32.totalorder %s2690_s22, 1 }
   0x5   : > { %p228_p2 = scmp.lt.s32.totalorder %s2690_s22, 5 }
   0x6   : > { %s3812_s23 = smov (%p26_p0, %s25_s23), 0  ;;  %s3814_s24 = smov (!%p26_p0, %s28_s24), %s2686_s21 }
   0x7   : > { %p229_p3 = pnand %p2304_p1, %p228_p2  ;;  %p30_p4 = scmp.ge.s32.totalorder %s3814_s24, 2 }
   0x8   : > { %p281_p5 = scmp.lt.s32.totalorder (!%p229_p3), %s2678_s19, 1  ;;  %p283_p6 = scmp.lt.s32.totalorder (!%p229_p3), %s2674_s18, 1  ;;  %v2621_v0 = vld [vmem:[%s3729_s2] sm:$0xff] (!%p229_p3)   ;;  %v2692_v1 = vmov (!%p229_p3), 0   ;;  %v2624_v2 = vld [vmem:[%s3729_s2 + $0x8] sm:$0xff] (!%p229_p3)   ;;  %v2627_v3 = vld [vmem:[%s3729_s2 + $0x10] sm:$0xff] (!%p229_p3)  }
   0x9   : > { %s3816_s24 = smov (%p30_p4, %s3814_s24), 0  ;;  %232 = sbr.rel (%p229_p3) target bundleno = 491 (0x1eb), region = 32 }
   0xa   : > { %1236 = vmatprep.subr.bf16.mxu0 (!%p229_p3), %v2692_v1  ;;  %2454 = vmatprep.subr.bf16.mxu1 (!%p229_p3), %v2692_v1  ;;  %v2630_v4 = vld [vmem:[%s3729_s2 + $0x18] sm:$0xff] (!%p229_p3)   ;;  %v2633_v9 = vld [vmem:[%s3729_s2 + $0x20] sm:$0xff] (!%p229_p3)   ;;  %s2695_s15 = smov (!%p229_p3), 96   ;;  %v2637_v12 = vld [vmem:[%s3729_s2 + $0x28] sm:$0xff] (!%p229_p3)   ;;  %s2697_s26 = smov (!%p229_p3), 120   ;;  %vm413_vm0 = vcmask (!%p229_p3), 195584  }
   0xb   : > { %1237 = vmatpush1.bf16.msra.mxu0 (!%p229_p3), %v2621_v0  ;;  %2463 = vmatpush1.bf16.msra.mxu1 (!%p229_p3), %v2621_v0  ;;  %v2638_v15 = vld [vmem:[%s3729_s2 + $0x30] sm:$0xff] (!%p229_p3)   ;;  %v2640_v44 = vld [vmem:[%s3729_s2 + $0x38] sm:$0xff] (!%p229_p3)   ;;  %v2641_v45 = vld [vmem:[%s3729_s2 + $0x40] sm:$0xff] (!%p229_p3)   ;;  %vm546_vm1 = vcmask (!%p229_p3), 392384   ;;  %vm679_vm2 = vcmask (!%p229_p3), 589184   ;;  %vm812_vm3 = vcmask (!%p229_p3), 785984  }
   0xc   : > { %1238 = vmatprep.subr.bf16.mxu0 (!%p229_p3), %v2692_v1  ;;  %2455 = vmatprep.subr.bf16.mxu1 (!%p229_p3), %v2692_v1  ;;  %vm945_vm4 = vcmask (!%p229_p3), 982784   ;;  %vm1078_vm5 = vcmask (!%p229_p3), 1048512   ;;  %vm1080_vm6 = vcmask (!%p229_p3), 130048   ;;  %p2427_p7 = scmp.ne.s32.totalorder (!%p229_p3), %s2674_s18, 0 }
   0xf   : > { %1239 = vmatpush1.bf16.msra.mxu0 (!%p229_p3), %v2624_v2  ;;  %2464 = vmatpush1.bf16.msra.mxu1 (!%p229_p3), %v2624_v2 }
  0x10   : > { %s3818_s19 = smov (!%p281_p5, %s2678_s19), 1  ;;  %1240 = vmatprep.subr.bf16.mxu0 %v2692_v1  ;;  %2456 = vmatprep.subr.bf16.mxu1 %v2692_v1 }
  0x11   : > { %s2773_s29 = scalar_select %p283_p6, %s2674_s18, 1 }
  0x12   : > { %s2473_s30 = smul.u32 60, %s3818_s19  ;;  %s2308_s6 = sshll.u32 %s3818_s19, 3 }
  0x13   : > { %s2472_s7 = smul.u32 30, %s2773_s29  ;;  %s2783_s10 = scalar_lea.vmem %s3731_s4, %s2308_s6  ;;  %1241 = vmatpush1.bf16.msra.mxu0 %v2627_v3  ;;  %2465 = vmatpush1.bf16.msra.mxu1 %v2627_v3 }
  0x14   : > { %s2788_s13 = scalar_lea.vmem %s3732_s5, %s2308_s6  ;;  %1242 = vmatprep.subr.bf16.mxu0 %v2692_v1  ;;  %2457 = vmatprep.subr.bf16.mxu1 %v2692_v1 }
  0x15   : > { %s287_s16 = sadd.s32 %s2473_s30, %s2472_s7  ;;  %s2693_s30 = smov 72  }
  0x16   : > { %s2305_s17 = sshll.u32 %s287_s16, 2  ;;  %s2694_s7 = smov 24  }
  0x17   : > { %s2798_s27 = scalar_lea.vmem %s3728_s1, %s2305_s17  ;;  %s2803_s8 = scalar_lea.vmem %s3727_s0, %s2305_s17  ;;  %1243 = vmatpush1.bf16.msra.mxu0 %v2630_v4  ;;  %2466 = vmatpush1.bf16.msra.mxu1 %v2630_v4 }
  0x18   : > { %v2571_v5 = vld [vmem:[%s2798_s27] sm:$0xff]   ;;  %v2572_v6 = vld [vmem:[%s2803_s8 + $0xc] sm:$0xff]   ;;  %v2574_v8 = vld [vmem:[%s2803_s8 + $0x18] sm:$0xff]   ;;  %1244 = vmatprep.subr.bf16.mxu0 %v2692_v1  ;;  %2458 = vmatprep.subr.bf16.mxu1 %v2692_v1  ;;  %s2696_s16 = smov 48  }
  0x19   : > { %776 = vrot.lane.b32.xlu1 %v2571_v5, %s2693_s30  ;;  %v2573_v7 = vld [vmem:[%s2798_s27 + $0xc] sm:$0xff]   ;;  %510 = vrot.lane.b32.xlu0 %v2572_v6, %s2694_s7  ;;  %v2575_v10 = vld [vmem:[%s2803_s8 + $0x14] sm:$0xff]  }
  0x1a   : > { %v2576_v11 = vld [vmem:[%s2798_s27 + $0x18] sm:$0xff]   ;;  %v2577_v13 = vld [vmem:[%s2798_s27 + $0x8] sm:$0xff]   ;;  %v2578_v14 = vld [vmem:[%s2803_s8 + $0x20] sm:$0xff]  }
  0x1b   : > { %1245 = vmatpush1.bf16.msra.mxu0 %v2633_v9  ;;  %2467 = vmatpush1.bf16.msra.mxu1 %v2633_v9  ;;  %v2579_v16 = vld [vmem:[%s2798_s27 + $0x20] sm:$0xff]   ;;  %v2580_v17 = vld [vmem:[%s2798_s27 + $0x14] sm:$0xff]   ;;  %v2581_v18 = vld [vmem:[%s2803_s8 + $0x28] sm:$0xff]  }
  0x1c   : > { %1246 = vmatprep.subr.bf16.mxu0 %v2692_v1  ;;  %2459 = vmatprep.subr.bf16.mxu1 %v2692_v1  ;;  %v2582_v19 = vld [vmem:[%s2803_s8 + $0x1c] sm:$0xff]   ;;  %v2584_v21 = vld [vmem:[%s2798_s27 + $0x10] sm:$0xff]   ;;  %v2585_v22 = vld [vmem:[%s2803_s8 + $0x24] sm:$0xff]  }
  0x1d   : > { %909 = vrot.lane.b32.xlu1 %v2573_v7, %s2695_s15  ;;  %643 = vrot.lane.b32.xlu0 %v2574_v8, %s2696_s16  ;;  %v2583_v20 = vld [vmem:[%s2798_s27 + $0x1c] sm:$0xff]   ;;  %v2586_v23 = vld [vmem:[%s2798_s27 + $0x28] sm:$0xff]  }
  0x1e   : > { %v2587_v24 = vld [vmem:[%s2803_s8 + $0x30] sm:$0xff]   ;;  %v2588_v25 = vld [vmem:[%s2803_s8 + $0x3c] sm:$0xff]   ;;  %v2590_v27 = vld [vmem:[%s2803_s8 + $0x48] sm:$0xff]  }
  0x1f   : > { %1247 = vmatpush1.bf16.msra.mxu0 %v2637_v12  ;;  %2468 = vmatpush1.bf16.msra.mxu1 %v2637_v12  ;;  %v2589_v26 = vld [vmem:[%s2798_s27 + $0x18] sm:$0xff]   ;;  %v2591_v28 = vld [vmem:[%s2798_s27 + $0x24] sm:$0xff]   ;;  %v2592_v29 = vld [vmem:[%s2798_s27 + $0x30] sm:$0xff]  }
  0x20   : > { %1248 = vmatprep.subr.bf16.mxu0 %v2692_v1  ;;  %2460 = vmatprep.subr.bf16.mxu1 %v2692_v1  ;;  %v2593_v30 = vld [vmem:[%s2798_s27 + $0x30] sm:$0xff]   ;;  %v2594_v31 = vld [vmem:[%s2798_s27 + $0x3c] sm:$0xff]   ;;  %v2596_v33 = vld [vmem:[%s2798_s27 + $0x48] sm:$0xff]  }
  0x21   : > { %512 = vrot.lane.b32.xlu1 %v2575_v10, %s2694_s7  ;;  %1042 = vrot.lane.b32.xlu0 %v2576_v11, %s2697_s26  ;;  %v2595_v32 = vld [vmem:[%s2803_s8 + $0x2c] sm:$0xff]   ;;  %v2597_v34 = vld [vmem:[%s2803_s8 + $0x38] sm:$0xff]  }
  0x22   : > { %v2598_v35 = vld [vmem:[%s2803_s8 + $0x44] sm:$0xff]   ;;  %v2600_v37 = vld [vmem:[%s2803_s8 + $0x50] sm:$0xff]   ;;  %v2602_v40 = vld [vmem:[%s2798_s27 + $0x38] sm:$0xff]  }
  0x23   : > { %1249 = vmatpush1.bf16.msra.mxu0 %v2638_v15  ;;  %2469 = vmatpush1.bf16.msra.mxu1 %v2638_v15  ;;  %v2599_v36 = vld [vmem:[%s2798_s27 + $0x20] sm:$0xff]   ;;  %v2601_v38 = vld [vmem:[%s2798_s27 + $0x2c] sm:$0xff]   ;;  %v2603_v41 = vld [vmem:[%s2798_s27 + $0x38] sm:$0xff]  }
  0x24   : > { %1250 = vmatprep.subr.bf16.mxu0 %v2692_v1  ;;  %2461 = vmatprep.subr.bf16.mxu1 %v2692_v1  ;;  %v2634_v39 = vld [vmem:[%s2803_s8] sm:$0xff]   ;;  %v2639_v43 = vld [vmem:[%s2803_s8 + $0x8] sm:$0xff]   ;;  %v2605_v46 = vld [vmem:[%s2803_s8 + $0x34] sm:$0xff]  }
  0x25   : > { %778 = vrot.lane.b32.xlu1 %v2577_v13, %s2693_s30  ;;  %645 = vrot.lane.b32.xlu0 %v2578_v14, %s2696_s16  ;;  %414 = vst.msk [vmem:[#allocation2] sm:$0xff] %vm413_vm0, %v2634_v39  ;;  %v2604_v42 = vld [vmem:[%s2798_s27 + $0x44] sm:$0xff]   ;;  %415 = vst.msk [vmem:[#allocation2 + $0x10] sm:$0xff] %vm413_vm0, %v2639_v43  ;;  %v2642_v47 = vld [vmem:[%s2803_s8 + $0x10] sm:$0xff]  }
  0x26   : > { %v2606_v48 = vld [vmem:[%s2798_s27 + $0x50] sm:$0xff]   ;;  %v2643_v49 = vld [vmem:[%s2803_s8 + $0x18] sm:$0xff]   ;;  %416 = vst.msk [vmem:[#allocation2 + $0x20] sm:$0xff] %vm413_vm0, %v2642_v47  ;;  %v2645_v51 = vld [vmem:[%s2803_s8 + $0x20] sm:$0xff]  }
  0x27   : > { %1251 = vmatpush1.bf16.msra.mxu0 %v2640_v44  ;;  %2470 = vmatpush1.bf16.msra.mxu1 %v2640_v44  ;;  %v2644_v50 = vld [vmem:[%s2803_s8 + $0x30] sm:$0xff]   ;;  %417 = vst.msk [vmem:[#allocation2 + $0x30] sm:$0xff] %vm413_vm0, %v2643_v49  ;;  %v2607_v52 = vld [vmem:[%s2803_s8 + $0x40] sm:$0xff]   ;;  %v2646_v53 = vld [vmem:[%s2803_s8 + $0x38] sm:$0xff]  }
  0x28   : > { %1252 = vmatprep.subr.bf16.mxu0 %v2692_v1  ;;  %2462 = vmatprep.subr.bf16.mxu1 %v2692_v1  ;;  %420 = vst.msk [vmem:[#allocation2 + $0x60] sm:$0xff] %vm413_vm0, %v2644_v50  ;;  %v2608_v54 = vld [vmem:[%s2803_s8 + $0x4c] sm:$0xff]   ;;  %418 = vst.msk [vmem:[#allocation2 + $0x40] sm:$0xff] %vm413_vm0, %v2645_v51  ;;  %v2648_v56 = vld [vmem:[%s2803_s8 + $0x40] sm:$0xff]  }
  0x29   : > { %1044 = vrot.lane.b32.xlu1 %v2579_v16, %s2697_s26  ;;  %911 = vrot.lane.b32.xlu0 %v2580_v17, %s2695_s15  ;;  %v2647_v55 = vld [vmem:[%s2803_s8 + $0x28] sm:$0xff]   ;;  %421 = vst.msk [vmem:[#allocation2 + $0x70] sm:$0xff] %vm413_vm0, %v2646_v53  ;;  %422 = vst.msk [vmem:[#allocation2 + $0x80] sm:$0xff] %vm413_vm0, %v2648_v56  ;;  %v2610_v58 = vld [vmem:[%s2803_s8 + $0x58] sm:$0xff]  }
  0x2a   : > { %419 = vst.msk [vmem:[#allocation2 + $0x50] sm:$0xff] %vm413_vm0, %v2647_v55  ;;  %v2609_v57 = vld [vmem:[%s2798_s27 + $0x28] sm:$0xff]   ;;  %v2611_v60 = vld [vmem:[%s2798_s27 + $0x34] sm:$0xff]   ;;  %v2612_v61 = vld [vmem:[%s2798_s27 + $0x40] sm:$0xff]  }
  0x2b   : > { %1253 = vmatpush1.bf16.msra.mxu0 %v2641_v45  ;;  %2471 = vmatpush1.bf16.msra.mxu1 %v2641_v45  ;;  %v2649_v59 = vld [vmem:[%s2803_s8 + $0x48] sm:$0xff]   ;;  %v2613_v62 = vld [vmem:[%s2798_s27 + $0x40] sm:$0xff]   ;;  %v2615_v0 = vld [vmem:[%s2803_s8 + $0x54] sm:$0xff]  }
  0x2c   : > { %423 = vst.msk [vmem:[#allocation2 + $0x90] sm:$0xff] %vm413_vm0, %v2649_v59  ;;  %v2614_v63 = vld [vmem:[%s2798_s27 + $0x4c] sm:$0xff]   ;;  %v2616_v1 = vld [vmem:[%s2798_s27 + $0x58] sm:$0xff]   ;;  %v2618_v4 = vld [vmem:[%s2803_s8 + $0x60] sm:$0xff]  }
  0x2d   : > { %647 = vrot.lane.b32.xlu1 %v2581_v18, %s2696_s16  ;;  %514 = vrot.lane.b32.xlu0 %v2582_v19, %s2694_s7  ;;  %v2650_v2 = vld [vmem:[%s2803_s8 + $0x50] sm:$0xff]   ;;  %v2617_v3 = vld [vmem:[%s2798_s27 + $0x48] sm:$0xff]  }
  0x2e   : > { %424 = vst.msk [vmem:[#allocation2 + $0xa0] sm:$0xff] %vm413_vm0, %v2650_v2  ;;  %v2619_v5 = vld [vmem:[%s2798_s27 + $0x60] sm:$0xff]   ;;  %v2620_v6 = vld [vmem:[%s2798_s27 + $0x54] sm:$0xff]   ;;  %v2622_v8 = vld [vmem:[%s2803_s8 + $0x68] sm:$0xff]  }
  0x2f   : > { %v2651_v7 = vld [vmem:[%s2803_s8 + $0x58] sm:$0xff]   ;;  %v2626_v11 = vld [vmem:[%s2798_s27 + $0x50] sm:$0xff]   ;;  %v2628_v12 = vld [vmem:[%s2803_s8 + $0x64] sm:$0xff]  }
  0x30   : > { %425 = vst.msk [vmem:[#allocation2 + $0xb0] sm:$0xff] %vm413_vm0, %v2651_v7  ;;  %v2623_v9 = vld [vmem:[%s2803_s8 + $0x5c] sm:$0xff]   ;;  %v2629_v13 = vld [vmem:[%s2798_s27 + $0x68] sm:$0xff]   ;;  %v2632_v15 = vld [vmem:[%s2803_s8 + $0x70] sm:$0xff]   ;;  %s2475_s8 = smul.u32 48, %s3818_s19 }
  0x31   : > { %913 = vrot.lane.b32.xlu1 %v2583_v20, %s2695_s15  ;;  %780 = vrot.lane.b32.xlu0 %v2584_v21, %s2693_s30  ;;  %v2625_v10 = vld [vmem:[%s2798_s27 + $0x5c] sm:$0xff]   ;;  %v2635_v16 = vld [vmem:[%s2798_s27 + $0x70] sm:$0xff]  }
  0x32   : > { %v2631_v14 = vld [vmem:[%s2798_s27 + $0x58] sm:$0xff]   ;;  %v2636_v17 = vld [vmem:[%s2798_s27 + $0x64] sm:$0xff]   ;;  %s2474_s27 = smul.u32 24, %s2773_s29 }
  0x35   : > { %516 = vrot.lane.b32.xlu1 %v2585_v22, %s2694_s7  ;;  %1046 = vrot.lane.b32.xlu0 %v2586_v23, %s2697_s26 }
  0x39   : > { %649 = vrot.lane.b32.xlu1 %v2587_v24, %s2696_s16  ;;  %522 = vrot.lane.b32.xlu0 %v2588_v25, %s2694_s7 }
  0x3d   : > { %782 = vrot.lane.b32.xlu1 %v2589_v26, %s2693_s30  ;;  %655 = vrot.lane.b32.xlu0 %v2590_v27, %s2696_s16 }
  0x41   : > { %915 = vrot.lane.b32.xlu1 %v2591_v28, %s2695_s15  ;;  %788 = vrot.lane.b32.xlu0 %v2592_v29, %s2693_s30 }
  0x45   : > { %1048 = vrot.lane.b32.xlu1 %v2593_v30, %s2697_s26  ;;  %921 = vrot.lane.b32.xlu0 %v2594_v31, %s2695_s15 }
  0x49   : > { %518 = vrot.lane.b32.xlu1 %v2595_v32, %s2694_s7  ;;  %1054 = vrot.lane.b32.xlu0 %v2596_v33, %s2697_s26 }
  0x4d   : > { %651 = vrot.lane.b32.xlu1 %v2597_v34, %s2696_s16  ;;  %524 = vrot.lane.b32.xlu0 %v2598_v35, %s2694_s7 }
  0x51   : > { %784 = vrot.lane.b32.xlu1 %v2599_v36, %s2693_s30  ;;  %657 = vrot.lane.b32.xlu0 %v2600_v37, %s2696_s16 }
  0x55   : > { %917 = vrot.lane.b32.xlu1 %v2601_v38, %s2695_s15  ;;  %790 = vrot.lane.b32.xlu0 %v2602_v40, %s2693_s30 }
  0x59   : > { %1050 = vrot.lane.b32.xlu1 %v2603_v41, %s2697_s26  ;;  %923 = vrot.lane.b32.xlu0 %v2604_v42, %s2695_s15 }
  0x5d   : > { %520 = vrot.lane.b32.xlu1 %v2605_v46, %s2694_s7  ;;  %1056 = vrot.lane.b32.xlu0 %v2606_v48, %s2697_s26 }
  0x61   : > { %653 = vrot.lane.b32.xlu1 %v2607_v52, %s2696_s16  ;;  %526 = vrot.lane.b32.xlu0 %v2608_v54, %s2694_s7 }
  0x65   : > { %786 = vrot.lane.b32.xlu1 %v2609_v57, %s2693_s30  ;;  %659 = vrot.lane.b32.xlu0 %v2610_v58, %s2696_s16 }
  0x69   : > { %919 = vrot.lane.b32.xlu1 %v2611_v60, %s2695_s15  ;;  %792 = vrot.lane.b32.xlu0 %v2612_v61, %s2693_s30 }
  0x6d   : > { %1052 = vrot.lane.b32.xlu1 %v2613_v62, %s2697_s26  ;;  %925 = vrot.lane.b32.xlu0 %v2614_v63, %s2695_s15 }
  0x71   : > { %528 = vrot.lane.b32.xlu1 %v2615_v0, %s2694_s7  ;;  %1058 = vrot.lane.b32.xlu0 %v2616_v1, %s2697_s26 }
  0x75   : > { %794 = vrot.lane.b32.xlu1 %v2617_v3, %s2693_s30  ;;  %661 = vrot.lane.b32.xlu0 %v2618_v4, %s2696_s16 }
  0x79   : > { %1060 = vrot.lane.b32.xlu1 %v2619_v5, %s2697_s26  ;;  %927 = vrot.lane.b32.xlu0 %v2620_v6, %s2695_s15 }
  0x7d   : > { %663 = vrot.lane.b32.xlu1 %v2622_v8, %s2696_s16  ;;  %530 = vrot.lane.b32.xlu0 %v2623_v9, %s2694_s7 }
  0x81   : > { %929 = vrot.lane.b32.xlu1 %v2625_v10, %s2695_s15  ;;  %796 = vrot.lane.b32.xlu0 %v2626_v11, %s2693_s30 }
  0x85   : > { %532 = vrot.lane.b32.xlu1 %v2628_v12, %s2694_s7  ;;  %1062 = vrot.lane.b32.xlu0 %v2629_v13, %s2697_s26 }
  0x89   : > { %798 = vrot.lane.b32.xlu1 %v2631_v14, %s2693_s30  ;;  %665 = vrot.lane.b32.xlu0 %v2632_v15, %s2696_s16  ;;  %s305_s30 = sadd.s32 %s2475_s8, %s2474_s27 }
  0x8a   : > { %s2307_s19 = sshll.u32 %s305_s30, 2 }
  0x8b   : > { %v777_v18 = vpop.permute.xlu1 %776  ;;  %v511_v19 = vpop.permute.xlu0 %510 }
  0x8c   : > { %547 = vst.msk [vmem:[#allocation2] sm:$0xff] %vm546_vm1, %v511_v19 }
  0x8d   : > { %1064 = vrot.lane.b32.xlu1 %v2635_v16, %s2697_s26  ;;  %931 = vrot.lane.b32.xlu0 %v2636_v17, %s2695_s15  ;;  %s3117_s15 = scalar_lea.vmem %s3730_s3, %s2307_s19 }
  0x8f   : > { %v910_v20 = vpop.permute.xlu1 %909  ;;  %v644_v21 = vpop.permute.xlu0 %643 }
  0x90   : > { %680 = vst.msk [vmem:[#allocation2] sm:$0xff] %vm679_vm2, %v644_v21 }
  0x91   : > { %813 = vst.msk [vmem:[#allocation2] sm:$0xff] %vm812_vm3, %v777_v18 }
  0x92   : > { %946 = vst.msk [vmem:[#allocation2] sm:$0xff] %vm945_vm4, %v910_v20 }
  0x93   : > { %v513_v22 = vpop.permute.xlu1 %512  ;;  %v1043_v23 = vpop.permute.xlu0 %1042 }
  0x94   : > { %548 = vst.msk [vmem:[#allocation2 + $0x10] sm:$0xff] %vm546_vm1, %v513_v22 }
  0x95   : > { %1079 = vst.msk [vmem:[#allocation2] sm:$0xff] %vm1078_vm5, %v1043_v23 }
  0x96   : > { %1081 = vst.msk [vmem:[#allocation2 + $0x8] sm:$0xff] %vm1080_vm6, %v1043_v23 }
  0x97   : > { %v779_v24 = vpop.permute.xlu1 %778  ;;  %v646_v25 = vpop.permute.xlu0 %645 }
  0x98   : > { %681 = vst.msk [vmem:[#allocation2 + $0x10] sm:$0xff] %vm679_vm2, %v646_v25 }
  0x99   : > { %814 = vst.msk [vmem:[#allocation2 + $0x10] sm:$0xff] %vm812_vm3, %v779_v24 }
  0x9b   : > { %v1045_v26 = vpop.permute.xlu1 %1044  ;;  %v912_v27 = vpop.permute.xlu0 %911 }
  0x9c   : > { %1083 = vst.msk [vmem:[#allocation2 + $0x18] sm:$0xff] %vm1080_vm6, %v1045_v26  ;;  %v1104_v29 = vld [vmem:[#allocation2] sm:$0xff] }
  0x9d   : > { %v1105_v28 = vld [vmem:[#allocation2 + $0x8] sm:$0xff]  ;;  %947 = vst.msk [vmem:[#allocation2 + $0x10] sm:$0xff] %vm945_vm4, %v912_v27 }
  0x9e   : > { %2391 = vmatprep.mubr.msk.bf16.mxu0 %vm1080_vm6, %v1105_v28  ;;  %1082 = vst.msk [vmem:[#allocation2 + $0x10] sm:$0xff] %vm1078_vm5, %v1045_v26 }
  0x9f   : > { %1269 = vmatmul.mubr.bf16.vlgmr.msra.gmra.mrb[0].mxu0 %v1104_v29  ;;  %v648_v30 = vpop.permute.xlu1 %647  ;;  %v515_v31 = vpop.permute.xlu0 %514 }
  0xa0   : > { %549 = vst.msk [vmem:[#allocation2 + $0x20] sm:$0xff] %vm546_vm1, %v515_v31 }
  0xa1   : > { %682 = vst.msk [vmem:[#allocation2 + $0x20] sm:$0xff] %vm679_vm2, %v648_v30 }
  0xa3   : > { %v914_v32 = vpop.permute.xlu1 %913  ;;  %v1107_v33 = vld [vmem:[#allocation2 + $0x18] sm:$0xff]  ;;  %v781_v34 = vpop.permute.xlu0 %780 }
  0xa4   : > { %2392 = vmatprep.mubr.msk.bf16.mxu0 %vm1080_vm6, %v1107_v33  ;;  %815 = vst.msk [vmem:[#allocation2 + $0x20] sm:$0xff] %vm812_vm3, %v781_v34 }
  0xa5   : > { %v1106_v35 = vld [vmem:[#allocation2 + $0x10] sm:$0xff]  ;;  %948 = vst.msk [vmem:[#allocation2 + $0x20] sm:$0xff] %vm945_vm4, %v914_v32 }
  0xa7   : > { %1277 = vmatmul.mubr.bf16.gmra.mrb[4].mxu0 %v1106_v35  ;;  %v517_v36 = vpop.permute.xlu1 %516  ;;  %v1047_v37 = vpop.permute.xlu0 %1046 }
  0xa8   : > { %550 = vst.msk [vmem:[#allocation2 + $0x30] sm:$0xff] %vm546_vm1, %v517_v36 }
  0xa9   : > { %1084 = vst.msk [vmem:[#allocation2 + $0x20] sm:$0xff] %vm1078_vm5, %v1047_v37 }
  0xaa   : > { %1085 = vst.msk [vmem:[#allocation2 + $0x28] sm:$0xff] %vm1080_vm6, %v1047_v37 }
  0xab   : > { %v650_v38 = vpop.permute.xlu1 %649  ;;  %v523_v39 = vpop.permute.xlu0 %522 }
  0xac   : > { %683 = vst.msk [vmem:[#allocation2 + $0x30] sm:$0xff] %vm679_vm2, %v650_v38  ;;  %v1486_v38 = vlaneseq }
  0xad   : > { %553 = vst.msk [vmem:[#allocation2 + $0x60] sm:$0xff] %vm546_vm1, %v523_v39 }
  0xae   : > { %v3063_v39 = vshrl.u32 %v1486_v38, 7 }
  0xaf   : > { %v783_v40 = vpop.permute.xlu1 %782  ;;  %v656_v41 = vpop.permute.xlu0 %655 }
  0xb0   : > { %816 = vst.msk [vmem:[#allocation2 + $0x30] sm:$0xff] %vm812_vm3, %v783_v40  ;;  %v1108_v43 = vld [vmem:[#allocation2 + $0x20] sm:$0xff]  ;;  %v1488_v40 = vadd.s32 8, %v3063_v39 }
  0xb1   : > { %v1109_v42 = vld [vmem:[#allocation2 + $0x28] sm:$0xff]  ;;  %686 = vst.msk [vmem:[#allocation2 + $0x60] sm:$0xff] %vm679_vm2, %v656_v41 }
  0xb2   : > { %2393 = vmatprep.mubr.msk.bf16.mxu0 %vm1080_vm6, %v1109_v42  ;;  %v3067_v41 = vmul.u32.u64.low 2863311531, %v3063_v39  ;;  %v3068_v42 = vmul.u32.u64.high 2863311531, %v3063_v39, %v3067_v41 }
  0xb3   : > { %1285 = vmatmul.mubr.bf16.gmra.mrb[8].mxu0 %v1108_v43  ;;  %v916_v44 = vpop.permute.xlu1 %915  ;;  %v789_v45 = vpop.permute.xlu0 %788 }
  0xb4   : > { %949 = vst.msk [vmem:[#allocation2 + $0x30] sm:$0xff] %vm945_vm4, %v916_v44  ;;  %v3070_v43 = vmul.u32.u64.low 2863311531, %v1488_v40  ;;  %v3071_v44 = vmul.u32.u64.high 2863311531, %v1488_v40, %v3070_v43 }
  0xb5   : > { %819 = vst.msk [vmem:[#allocation2 + $0x60] sm:$0xff] %vm812_vm3, %v789_v45  ;;  %v1489_v45 = vadd.s32 16, %v3063_v39 }
  0xb7   : > { %v1049_v46 = vpop.permute.xlu1 %1048  ;;  %v922_v47 = vpop.permute.xlu0 %921 }
  0xb8   : > { %1086 = vst.msk [vmem:[#allocation2 + $0x30] sm:$0xff] %vm1078_vm5, %v1049_v46 }
  0xb9   : > { %1087 = vst.msk [vmem:[#allocation2 + $0x38] sm:$0xff] %vm1080_vm6, %v1049_v46  ;;  %v1490_v46 = vadd.s32 24, %v3063_v39 }
  0xba   : > { %952 = vst.msk [vmem:[#allocation2 + $0x60] sm:$0xff] %vm945_vm4, %v922_v47 }
  0xbb   : > { %v519_v48 = vpop.permute.xlu1 %518  ;;  %v1055_v49 = vpop.permute.xlu0 %1054 }
  0xbc   : > { %551 = vst.msk [vmem:[#allocation2 + $0x40] sm:$0xff] %vm546_vm1, %v519_v48  ;;  %v3075_v47 = vmul.u32.u64.low 2863311531, %v1489_v45  ;;  %v3076_v48 = vmul.u32.u64.high 2863311531, %v1489_v45, %v3075_v47 }
  0xbd   : > { %1092 = vst.msk [vmem:[#allocation2 + $0x60] sm:$0xff] %vm1078_vm5, %v1055_v49 }
  0xbe   : > { %1093 = vst.msk [vmem:[#allocation2 + $0x68] sm:$0xff] %vm1080_vm6, %v1055_v49  ;;  %v1517_v49 = vshrl.u32 %v3068_v42, 4 }
  0xbf   : > { %v652_v50 = vpop.permute.xlu1 %651  ;;  %v1110_v52 = vld [vmem:[#allocation2 + $0x30] sm:$0xff]  ;;  %v525_v53 = vpop.permute.xlu0 %524 }
  0xc0   : > { %v1111_v51 = vld [vmem:[#allocation2 + $0x38] sm:$0xff]  ;;  %684 = vst.msk [vmem:[#allocation2 + $0x40] sm:$0xff] %vm679_vm2, %v652_v50  ;;  %v1528_v50 = vshrl.u32 %v3071_v44, 4 }
  0xc1   : > { %2394 = vmatprep.mubr.msk.bf16.mxu0 %vm1080_vm6, %v1111_v51  ;;  %554 = vst.msk [vmem:[#allocation2 + $0x70] sm:$0xff] %vm546_vm1, %v525_v53  ;;  %v1518_v53 = vmul.u32 24, %v1517_v49 }
  0xc2   : > { %1293 = vmatmul.mubr.bf16.gmra.mrb[12].mxu0 %v1110_v52  ;;  %v3080_v51 = vmul.u32.u64.low 2863311531, %v1490_v46  ;;  %v3081_v52 = vmul.u32.u64.high 2863311531, %v1490_v46, %v3080_v51 }
  0xc3   : > { %v785_v54 = vpop.permute.xlu1 %784  ;;  %v658_v55 = vpop.permute.xlu0 %657 }
  0xc4   : > { %817 = vst.msk [vmem:[#allocation2 + $0x40] sm:$0xff] %vm812_vm3, %v785_v54  ;;  %v1116_v57 = vld [vmem:[#allocation2 + $0x60] sm:$0xff]  ;;  %v1529_v54 = vmul.u32 24, %v1528_v50 }
  0xc5   : > { %v1117_v56 = vld [vmem:[#allocation2 + $0x68] sm:$0xff]  ;;  %687 = vst.msk [vmem:[#allocation2 + $0x70] sm:$0xff] %vm679_vm2, %v658_v55  ;;  %v1539_v55 = vshrl.u32 %v3076_v48, 4 }
  0xc6   : > { %2397 = vmatprep.mubr.msk.bf16.mxu1 %vm1080_vm6, %v1117_v56  ;;  %v1491_v56 = vadd.s32 32, %v3063_v39 }
  0xc7   : > { %1317 = vmatmul.mubr.bf16.vlgmr.msra.gmra.mrb[0].mxu1 %v1116_v57  ;;  %v918_v58 = vpop.permute.xlu1 %917  ;;  %v791_v59 = vpop.permute.xlu0 %790  ;;  %v1519_v57 = vsub.s32 %v3063_v39, %v1518_v53 }
  0xc8   : > { %950 = vst.msk [vmem:[#allocation2 + $0x40] sm:$0xff] %vm945_vm4, %v918_v58  ;;  %v3087_v58 = vadd.s32 40, %v3063_v39 }
  0xc9   : > { %820 = vst.msk [vmem:[#allocation2 + $0x70] sm:$0xff] %vm812_vm3, %v791_v59  ;;  %v1530_v59 = vsub.s32 %v1488_v40, %v1529_v54  ;;  %vm1775_vm7 = vcmp.ne.s32.totalorder %v1519_v57, 0  ;;  %vm1799_vm8 = vcmp.lt.s32.totalorder %v1519_v57, 0 }
  0xca   : > { %vm1823_vm11 = vmand %vm1799_vm8, %vm1775_vm7 }
  0xcb   : > { %v1051_v60 = vpop.permute.xlu1 %1050  ;;  %v924_v61 = vpop.permute.xlu0 %923  ;;  %vm1776_vm9 = vcmp.ne.s32.totalorder %v1530_v59, 0  ;;  %vm1800_vm10 = vcmp.lt.s32.totalorder %v1530_v59, 0 }
  0xcc   : > { %1088 = vst.msk [vmem:[#allocation2 + $0x40] sm:$0xff] %vm1078_vm5, %v1051_v60  ;;  %vm3099_vm12 = vmand %vm1800_vm10, %vm1776_vm9 }
  0xcd   : > { %1089 = vst.msk [vmem:[#allocation2 + $0x48] sm:$0xff] %vm1080_vm6, %v1051_v60  ;;  %v1550_v60 = vshrl.u32 %v3081_v52, 4 }
  0xce   : > { %953 = vst.msk [vmem:[#allocation2 + $0x70] sm:$0xff] %vm945_vm4, %v924_v61  ;;  %v1540_v61 = vmul.u32 24, %v1539_v55 }
  0xcf   : > { %v521_v62 = vpop.permute.xlu1 %520  ;;  %v1057_v63 = vpop.permute.xlu0 %1056 }
  0xd0   : > { %552 = vst.msk [vmem:[#allocation2 + $0x50] sm:$0xff] %vm546_vm1, %v521_v62 }
  0xd1   : > { %1094 = vst.msk [vmem:[#allocation2 + $0x70] sm:$0xff] %vm1078_vm5, %v1057_v63 }
  0xd2   : > { %1095 = vst.msk [vmem:[#allocation2 + $0x78] sm:$0xff] %vm1080_vm6, %v1057_v63  ;;  %v3090_v62 = vmul.u32.u64.low 2863311531, %v1491_v56  ;;  %v3091_v63 = vmul.u32.u64.high 2863311531, %v1491_v56, %v3090_v62 }
  0xd3   : > { %v654_v0 = vpop.permute.xlu1 %653  ;;  %v1112_v2 = vld [vmem:[#allocation2 + $0x40] sm:$0xff]  ;;  %v527_v3 = vpop.permute.xlu0 %526 }
  0xd4   : > { %v1113_v1 = vld [vmem:[#allocation2 + $0x48] sm:$0xff]  ;;  %685 = vst.msk [vmem:[#allocation2 + $0x50] sm:$0xff] %vm679_vm2, %v654_v0 }
  0xd5   : > { %2395 = vmatprep.mubr.msk.bf16.mxu0 %vm1080_vm6, %v1113_v1  ;;  %555 = vst.msk [vmem:[#allocation2 + $0x80] sm:$0xff] %vm546_vm1, %v527_v3  ;;  %v3096_v0 = vmul.u32.u64.low 2863311531, %v3087_v58  ;;  %v3097_v1 = vmul.u32.u64.high 2863311531, %v3087_v58, %v3096_v0  ;;  %v1551_v3 = vmul.u32 24, %v1550_v60 }
  0xd6   : > { %1301 = vmatmul.mubr.bf16.gmra.mrb[16].mxu0 %v1112_v2  ;;  %v1847_v2 = vadd.s32 24, %v1519_v57 }
  0xd7   : > { %v787_v4 = vpop.permute.xlu1 %786  ;;  %v660_v5 = vpop.permute.xlu0 %659 }
  0xd8   : > { %818 = vst.msk [vmem:[#allocation2 + $0x50] sm:$0xff] %vm812_vm3, %v787_v4  ;;  %v1118_v7 = vld [vmem:[#allocation2 + $0x70] sm:$0xff]  ;;  %v1541_v4 = vsub.s32 %v1489_v45, %v1540_v61 }
  0xd9   : > { %v1119_v6 = vld [vmem:[#allocation2 + $0x78] sm:$0xff]  ;;  %688 = vst.msk [vmem:[#allocation2 + $0x80] sm:$0xff] %vm679_vm2, %v660_v5  ;;  %v1848_v5 = vadd.s32 24, %v1530_v59 }
  0xda   : > { %2398 = vmatprep.mubr.msk.bf16.mxu1 %vm1080_vm6, %v1119_v6  ;;  %vm1777_vm13 = vcmp.ne.s32.totalorder %v1541_v4, 0  ;;  %vm1801_vm14 = vcmp.lt.s32.totalorder %v1541_v4, 0  ;;  %v3170_v6 = vadd.s32 96, %v3063_v39 }
  0xdb   : > { %1325 = vmatmul.mubr.bf16.gmra.mrb[4].mxu1 %v1118_v7  ;;  %v920_v8 = vpop.permute.xlu1 %919  ;;  %v793_v9 = vpop.permute.xlu0 %792  ;;  %v1871_v7 = vsel %vm1823_vm11, %v1847_v2, %v1519_v57  ;;  %vm3107_vm0 = vmand %vm1801_vm14, %vm1777_vm13 }
  0xdc   : > { %951 = vst.msk [vmem:[#allocation2 + $0x50] sm:$0xff] %vm945_vm4, %v920_v8  ;;  %v1552_v8 = vsub.s32 %v1490_v46, %v1551_v3  ;;  %vm1895_vm15 = vcmp.lt.s32.totalorder %v1871_v7, 16 }
  0xdd   : > { %821 = vst.msk [vmem:[#allocation2 + $0x80] sm:$0xff] %vm812_vm3, %v793_v9  ;;  %v1561_v9 = vshrl.u32 %v3091_v63, 4 }
  0xdf   : > { %v1053_v10 = vpop.permute.xlu1 %1052  ;;  %v926_v11 = vpop.permute.xlu0 %925 }
  0xe0   : > { %1090 = vst.msk [vmem:[#allocation2 + $0x50] sm:$0xff] %vm1078_vm5, %v1053_v10 }
  0xe1   : > { %1091 = vst.msk [vmem:[#allocation2 + $0x58] sm:$0xff] %vm1080_vm6, %v1053_v10  ;;  %v1872_v10 = vsel %vm3099_vm12, %v1848_v5, %v1530_v59 }
  0xe2   : > { %954 = vst.msk [vmem:[#allocation2 + $0x80] sm:$0xff] %vm945_vm4, %v926_v11  ;;  %v1849_v11 = vadd.s32 24, %v1541_v4 }
  0xe3   : > { %v529_v12 = vpop.permute.xlu1 %528  ;;  %v1059_v13 = vpop.permute.xlu0 %1058 }
  0xe4   : > { %556 = vst.msk [vmem:[#allocation2 + $0x90] sm:$0xff] %vm546_vm1, %v529_v12  ;;  %v1572_v12 = vshrl.u32 %v3097_v1, 4 }
  0xe5   : > { %1096 = vst.msk [vmem:[#allocation2 + $0x80] sm:$0xff] %vm1078_vm5, %v1059_v13 }
  0xe6   : > { %1097 = vst.msk [vmem:[#allocation2 + $0x88] sm:$0xff] %vm1080_vm6, %v1059_v13 }
  0xe7   : > { %v795_v14 = vpop.permute.xlu1 %794  ;;  %v1114_v16 = vld [vmem:[#allocation2 + $0x50] sm:$0xff]  ;;  %v662_v17 = vpop.permute.xlu0 %661 }
  0xe8   : > { %v1115_v15 = vld [vmem:[#allocation2 + $0x58] sm:$0xff]  ;;  %689 = vst.msk [vmem:[#allocation2 + $0x90] sm:$0xff] %vm679_vm2, %v662_v17 }
  0xe9   : > { %2396 = vmatprep.mubr.msk.bf16.mxu0 %vm1080_vm6, %v1115_v15  ;;  %822 = vst.msk [vmem:[#allocation2 + $0x90] sm:$0xff] %vm812_vm3, %v795_v14  ;;  %v3112_v14 = vadd.s32 48, %v3063_v39 }
  0xea   : > { %1309 = vmatmul.mubr.bf16.gmra.mrb[20].mxu0 %v1114_v16  ;;  %v1562_v16 = vmul.u32 24, %v1561_v9  ;;  %v3173_v9 = vadd.s32 64, %v3063_v39 }
  0xeb   : > { %v1061_v18 = vpop.permute.xlu1 %1060  ;;  %v928_v19 = vpop.permute.xlu0 %927 }
  0xec   : > { %1099 = vst.msk [vmem:[#allocation2 + $0x98] sm:$0xff] %vm1080_vm6, %v1061_v18  ;;  %v1120_v21 = vld [vmem:[#allocation2 + $0x80] sm:$0xff] }
  0xed   : > { %v1121_v20 = vld [vmem:[#allocation2 + $0x88] sm:$0xff]  ;;  %955 = vst.msk [vmem:[#allocation2 + $0x90] sm:$0xff] %vm945_vm4, %v928_v19 }
  0xee   : > { %2399 = vmatprep.mubr.msk.bf16.mxu1 %vm1080_vm6, %v1121_v20  ;;  %1098 = vst.msk [vmem:[#allocation2 + $0x90] sm:$0xff] %vm1078_vm5, %v1061_v18  ;;  %v1850_v20 = vadd.s32 24, %v1552_v8 }
  0xef   : > { %1333 = vmatmul.mubr.bf16.gmra.mrb[8].mxu1 %v1120_v21  ;;  %v664_v22 = vpop.permute.xlu1 %663  ;;  %v531_v23 = vpop.permute.xlu0 %530  ;;  %v3120_v21 = vadd.s32 56, %v3063_v39 }
  0xf0   : > { %557 = vst.msk [vmem:[#allocation2 + $0xa0] sm:$0xff] %vm546_vm1, %v531_v23 }
  0xf1   : > { %690 = vst.msk [vmem:[#allocation2 + $0xa0] sm:$0xff] %vm679_vm2, %v664_v22  ;;  %v3143_v38 = vmul.u32.u64.low 2863311531, %v3120_v21  ;;  %v3144_v40 = vmul.u32.u64.high 2863311531, %v3120_v21, %v3143_v38 }
  0xf3   : > { %v930_v24 = vpop.permute.xlu1 %929  ;;  %v1123_v25 = vld [vmem:[#allocation2 + $0x98] sm:$0xff]  ;;  %v797_v26 = vpop.permute.xlu0 %796  ;;  %v1594_v1 = vshrl.u32 %v3144_v40, 4 }
  0xf4   : > { %2400 = vmatprep.mubr.msk.bf16.mxu1 %vm1080_vm6, %v1123_v25  ;;  %823 = vst.msk [vmem:[#allocation2 + $0xa0] sm:$0xff] %vm812_vm3, %v797_v26  ;;  %v1573_v26 = vmul.u32 24, %v1572_v12  ;;  %v3177_v12 = vmul.u32.u64.low 2863311531, %v3170_v6  ;;  %v3178_v13 = vmul.u32.u64.high 2863311531, %v3170_v6, %v3177_v12 }
  0xf5   : > { %v1122_v27 = vld [vmem:[#allocation2 + $0x90] sm:$0xff]  ;;  %956 = vst.msk [vmem:[#allocation2 + $0xa0] sm:$0xff] %vm945_vm4, %v930_v24  ;;  %v1873_v24 = vsel %vm3107_vm0, %v1849_v11, %v1541_v4 }
  0xf6   : > { %vm1897_vm7 = vcmp.lt.s32.totalorder %v1873_v24, 16  ;;  %v1574_v43 = vsub.s32 %v3087_v58, %v1573_v26  ;;  %v3189_v24 = vmul.u32.u64.low 2863311531, %v3173_v9  ;;  %v3190_v25 = vmul.u32.u64.high 2863311531, %v3173_v9, %v3189_v24 }
  0xf7   : > { %1341 = vmatmul.mubr.bf16.gmra.mrb[12].mxu1 %v1122_v27  ;;  %v533_v28 = vpop.permute.xlu1 %532  ;;  %v1063_v29 = vpop.permute.xlu0 %1062  ;;  %v1649_v46 = vshrl.u32 %v3178_v13, 4 }
  0xf8   : > { %558 = vst.msk [vmem:[#allocation2 + $0xb0] sm:$0xff] %vm546_vm1, %v533_v28  ;;  %vm1778_vm1 = vcmp.ne.s32.totalorder %v1552_v8, 0  ;;  %vm1780_vm11 = vcmp.ne.s32.totalorder %v1574_v43, 0  ;;  %vm1804_vm12 = vcmp.lt.s32.totalorder %v1574_v43, 0  ;;  %v1852_v0 = vadd.s32 24, %v1574_v43 }
  0xf9   : > { %1100 = vst.msk [vmem:[#allocation2 + $0xa0] sm:$0xff] %vm1078_vm5, %v1063_v29  ;;  %vm1828_vm14 = vmand %vm1804_vm12, %vm1780_vm11 }
  0xfa   : > { %1101 = vst.msk [vmem:[#allocation2 + $0xa8] sm:$0xff] %vm1080_vm6, %v1063_v29  ;;  %v1876_v7 = vsel %vm1828_vm14, %v1852_v0, %v1574_v43 }
  0xfb   : > { %v799_v30 = vpop.permute.xlu1 %798  ;;  %v666_v31 = vpop.permute.xlu0 %665  ;;  %vm1900_vm0 = vcmp.lt.s32.totalorder %v1876_v7, 16 }
  0xfc   : > { %691 = vst.msk [vmem:[#allocation2 + $0xb0] sm:$0xff] %vm679_vm2, %v666_v31  ;;  %vm1802_vm2 = vcmp.lt.s32.totalorder %v1552_v8, 0 }
  0xfd   : > { %824 = vst.msk [vmem:[#allocation2 + $0xb0] sm:$0xff] %vm812_vm3, %v799_v30  ;;  %vm3733_vm3 = vcmask 60416   ;;  %v3133_v30 = vmul.u32.u64.low 2863311531, %v3112_v14  ;;  %v3134_v31 = vmul.u32.u64.high 2863311531, %v3112_v14, %v3133_v30 }
  0xff   : > { %v1065_v32 = vpop.permute.xlu1 %1064  ;;  %v932_v33 = vpop.permute.xlu0 %931  ;;  %v1583_v58 = vshrl.u32 %v3134_v31, 4 }
 0x100   : > { %1103 = vst.msk [vmem:[#allocation2 + $0xb8] sm:$0xff] %vm1080_vm6, %v1065_v32  ;;  %v1124_v35 = vld [vmem:[#allocation2 + $0xa0] sm:$0xff] }
 0x101   : > { %v1125_v34 = vld [vmem:[#allocation2 + $0xa8] sm:$0xff]  ;;  %957 = vst.msk [vmem:[#allocation2 + $0xb0] sm:$0xff] %vm945_vm4, %v932_v33  ;;  %vm1991_vm4 = vcmask 64512   ;;  %v1584_v5 = vmul.u32 24, %v1583_v58 }
 0x102   : > { %2401 = vmatprep.mubr.msk.bf16.mxu1 %vm1080_vm6, %v1125_v34  ;;  %1102 = vst.msk [vmem:[#allocation2 + $0xb0] sm:$0xff] %vm1078_vm5, %v1065_v32  ;;  %vm1896_vm5 = vcmp.lt.s32.totalorder %v1872_v10, 16 }
 0x103   : > { %1349 = vmatmul.mubr.bf16.gmra.mrb[16].mxu1 %v1124_v35  ;;  %v1563_v35 = vsub.s32 %v1491_v56, %v1562_v16  ;;  %v1585_v10 = vsub.s32 %v3112_v14, %v1584_v5 }
 0x105   : > { %vm1779_vm9 = vcmp.ne.s32.totalorder %v1563_v35, 0  ;;  %vm1803_vm10 = vcmp.lt.s32.totalorder %v1563_v35, 0  ;;  %v1851_v50 = vadd.s32 24, %v1563_v35 }
 0x106   : > { %vm1827_vm13 = vmand %vm1803_vm10, %vm1779_vm9 }
 0x107   : > { %v1127_v36 = vld [vmem:[#allocation2 + $0xb8] sm:$0xff]  ;;  %v1875_v4 = vsel %vm1827_vm13, %v1851_v50, %v1563_v35 }
 0x108   : > { %2402 = vmatprep.mubr.msk.bf16.mxu1 %vm1080_vm6, %v1127_v36  ;;  %vm3126_vm6 = vmand %vm1802_vm2, %vm1778_vm1  ;;  %vm1781_vm1 = vcmp.ne.s32.totalorder %v1585_v10, 0  ;;  %vm1805_vm2 = vcmp.lt.s32.totalorder %v1585_v10, 0 }
 0x109   : > { %v1126_v37 = vld [vmem:[#allocation2 + $0xb0] sm:$0xff] }
 0x10b   : > { %1357 = vmatmul.mubr.bf16.gmra.mrb[20].mxu1 %v1126_v37  ;;  %v1874_v37 = vsel %vm3126_vm6, %v1850_v20, %v1552_v8  ;;  %v1595_v8 = vmul.u32 24, %v1594_v1  ;;  %v3185_v20 = vadd.s32 72, %v3063_v39 }
 0x10c   : > { %vm3149_vm8 = vcmp.lt.s32.totalorder %v1874_v37, 16 }
 0x172   : > { %v1270_v15 = vpop.f32.mrb[0].mxu0 }
 0x173   : > { %v2430_v17 = vpack.c.bf16 %v1270_v15, %v1270_v15  ;;  %v1967_v18 = vsel %vm1895_vm15, %v1270_v15, 0.0  ;;  %v1272_v19 = vpop.f32.mrb[1].mxu0  ;;  %vm1899_vm15 = vcmp.lt.s32.totalorder %v1875_v4, 16  ;;  %v3181_v15 = vadd.s32 104, %v3063_v39 }
 0x174   : > { %v2039_v22 = vmul.f32 %v1967_v18, %v1967_v18  ;;  %v1273_v23 = vpop.f32.mrb[2].mxu0  ;;  %v1992_v32 = vsel %vm1991_vm4, %v1967_v18, 0.0  ;;  %v1596_v19 = vsub.s32 %v3120_v21, %v1595_v8 }
 0x175   : > { %1462 = vst.msk [vmem:[%s3117_s15] sm:$0xf] %vm3733_vm3, %v2430_v17  ;;  %v2431_v27 = vpack.c.bf16 %v1273_v23, %v1273_v23  ;;  %v1968_v28 = vsel %vm1896_vm5, %v1273_v23, 0.0  ;;  %v1275_v29 = vpop.f32.mrb[3].mxu0 }
 0x176   : > { %v1993_v33 = vsel %vm1991_vm4, %v1968_v28, 0.0  ;;  %v2040_v34 = vmul.f32 %v1968_v28, %v1968_v28  ;;  %v2063_v41 = vsel %vm1991_vm4, %v2039_v22, 0.0  ;;  %vm1782_vm5 = vcmp.ne.s32.totalorder %v1596_v19, 0 }
 0x177   : > { %1463 = vst.msk [vmem:[%s3117_s15 + $0x4] sm:$0xf] %vm3733_vm3, %v2431_v27  ;;  %v1994_v36 = vadd.f32 %v1993_v33, %v1992_v32  ;;  %vm1806_vm6 = vcmp.lt.s32.totalorder %v1596_v19, 0  ;;  %v1854_v40 = vadd.s32 24, %v1596_v19 }
 0x178   : > { %v2064_v42 = vsel %vm1991_vm4, %v2040_v34, 0.0  ;;  %v1853_v34 = vadd.s32 24, %v1585_v10 }
 0x179   : > { %v2065_v44 = vadd.f32 %v2064_v42, %v2063_v41  ;;  %v3205_v41 = vadd.s32 112, %v3063_v39 }
 0x17a   : > { %v1278_v45 = vpop.f32.mrb[4].mxu0 }
 0x17b   : > { %v2432_v47 = vpack.c.bf16 %v1278_v45, %v1278_v45  ;;  %v1969_v48 = vsel %vm1897_vm7, %v1278_v45, 0.0  ;;  %v1280_v49 = vpop.f32.mrb[5].mxu0  ;;  %vm1829_vm7 = vmand %vm1805_vm2, %vm1781_vm1 }
 0x17c   : > { %v1995_v51 = vsel %vm1991_vm4, %v1969_v48, 0.0  ;;  %v2041_v52 = vmul.f32 %v1969_v48, %v1969_v48  ;;  %v1281_v53 = vpop.f32.mrb[6].mxu0  ;;  %v1877_v45 = vsel %vm1829_vm7, %v1853_v34, %v1585_v10  ;;  %v1605_v48 = vshrl.u32 %v3190_v25, 4 }
 0x17d   : > { %1464 = vst.msk [vmem:[%s3117_s15 + $0x8] sm:$0xf] %vm3733_vm3, %v2432_v47  ;;  %v1996_v54 = vadd.f32 %v1995_v51, %v1994_v36  ;;  %v2433_v55 = vpack.c.bf16 %v1281_v53, %v1281_v53  ;;  %v1970_v56 = vsel %vm3149_vm8, %v1281_v53, 0.0  ;;  %v1283_v57 = vpop.f32.mrb[7].mxu0  ;;  %vm3207_vm8 = vmand %vm1806_vm6, %vm1782_vm5  ;;  %v3217_v47 = vadd.s32 120, %v3063_v39 }
 0x17e   : > { %v2066_v59 = vsel %vm1991_vm4, %v2041_v52, 0.0  ;;  %v1997_v60 = vsel %vm1991_vm4, %v1970_v56, 0.0  ;;  %v2042_v61 = vmul.f32 %v1970_v56, %v1970_v56  ;;  %v3221_v49 = vadd.s32 80, %v3063_v39 }
 0x17f   : > { %v2067_v62 = vadd.f32 %v2066_v59, %v2065_v44  ;;  %1465 = vst.msk [vmem:[%s3117_s15 + $0xc] sm:$0xf] %vm3733_vm3, %v2433_v55  ;;  %v1998_v63 = vadd.f32 %v1997_v60, %v1996_v54  ;;  %v3200_v36 = vmul.u32.u64.low 2863311531, %v3185_v20  ;;  %v3201_v37 = vmul.u32.u64.high 2863311531, %v3185_v20, %v3200_v36 }
 0x180   : > { %v2068_v2 = vsel %vm1991_vm4, %v2042_v61, 0.0  ;;  %v3212_v43 = vmul.u32.u64.low 2863311531, %v3181_v15  ;;  %v3213_v44 = vmul.u32.u64.high 2863311531, %v3181_v15, %v3212_v43  ;;  %v1878_v50 = vsel %vm3207_vm8, %v1854_v40, %v1596_v19 }
 0x181   : > { %v2069_v3 = vadd.f32 %v2068_v2, %v2067_v62  ;;  %v3226_v51 = vmul.u32.u64.low 2863311531, %v3205_v41  ;;  %v3227_v52 = vmul.u32.u64.high 2863311531, %v3205_v41, %v3226_v51  ;;  %v3230_v53 = vadd.s32 88, %v3063_v39 }
 0x182   : > { %vm1901_vm9 = vcmp.lt.s32.totalorder %v1877_v45, 16  ;;  %v1650_v54 = vmul.u32 24, %v1649_v46  ;;  %v1616_v55 = vshrl.u32 %v3201_v37, 4  ;;  %vm3237_vm10 = vcmp.lt.s32.totalorder %v1878_v50, 16 }
 0x183   : > { %v3234_v56 = vmul.u32.u64.low 2863311531, %v3217_v47  ;;  %v3235_v57 = vmul.u32.u64.high 2863311531, %v3217_v47, %v3234_v56  ;;  %v1606_v60 = vmul.u32 24, %v1605_v48  ;;  %v1660_v8 = vshrl.u32 %v3213_v44, 4 }
 0x184   : > { %v3242_v61 = vmul.u32.u64.low 2863311531, %v3221_v49  ;;  %v3243_v62 = vmul.u32.u64.high 2863311531, %v3221_v49, %v3242_v61  ;;  %v3252_v10 = vadd.s32 128, %v3063_v39 }
 0x185   : > { %v1682_v37 = vshrl.u32 %v3235_v57, 4 }
 0x186   : > { %v1286_v11 = vpop.f32.mrb[8].mxu0  ;;  %v1627_v51 = vshrl.u32 %v3243_v62, 4 }
 0x187   : > { %v2434_v16 = vpack.c.bf16 %v1286_v11, %v1286_v11  ;;  %v1971_v17 = vsel %vm1899_vm15, %v1286_v11, 0.0  ;;  %v1288_v18 = vpop.f32.mrb[9].mxu0  ;;  %v1683_v50 = vmul.u32 24, %v1682_v37 }
 0x188   : > { %v1999_v14 = vsel %vm1991_vm4, %v1971_v17, 0.0  ;;  %v2043_v22 = vmul.f32 %v1971_v17, %v1971_v17  ;;  %v1289_v23 = vpop.f32.mrb[10].mxu0  ;;  %v1617_v17 = vmul.u32 24, %v1616_v55 }
 0x189   : > { %1466 = vst.msk [vmem:[%s3117_s15 + $0x10] sm:$0xf] %vm3733_vm3, %v2434_v16  ;;  %v2000_v26 = vadd.f32 %v1999_v14, %v1998_v63  ;;  %v2435_v27 = vpack.c.bf16 %v1289_v23, %v1289_v23  ;;  %v1972_v28 = vsel %vm1900_vm0, %v1289_v23, 0.0  ;;  %v1291_v29 = vpop.f32.mrb[11].mxu0 }
 0x18a   : > { %v2070_v21 = vsel %vm1991_vm4, %v2043_v22, 0.0  ;;  %v2001_v30 = vsel %vm1991_vm4, %v1972_v28, 0.0  ;;  %v2044_v31 = vmul.f32 %v1972_v28, %v1972_v28  ;;  %v3261_v22 = vsub.s32 %v3170_v6, %v1650_v54 }
 0x18b   : > { %v2071_v32 = vadd.f32 %v2070_v21, %v2069_v3  ;;  %1467 = vst.msk [vmem:[%s3117_s15 + $0x14] sm:$0xf] %vm3733_vm3, %v2435_v27  ;;  %v2002_v33 = vadd.f32 %v2001_v30, %v2000_v26  ;;  %v3246_v2 = vmul.u32.u64.low 2863311531, %v3230_v53  ;;  %v3247_v3 = vmul.u32.u64.high 2863311531, %v3230_v53, %v3246_v2 }
 0x18c   : > { %v2072_v35 = vsel %vm1991_vm4, %v2044_v31, 0.0  ;;  %v1607_v26 = vsub.s32 %v3173_v9, %v1606_v60  ;;  %v1671_v27 = vshrl.u32 %v3227_v52, 4  ;;  %v3284_v9 = vadd.s32 136, %v3063_v39 }
 0x18d   : > { %v2073_v38 = vadd.f32 %v2072_v35, %v2071_v32  ;;  %v3275_v6 = vmul.u32.u64.low 2863311531, %v3252_v10  ;;  %v3276_v30 = vmul.u32.u64.high 2863311531, %v3252_v10, %v3275_v6  ;;  %vm1787_vm11 = vcmp.ne.s32.totalorder %v3261_v22, 0 }
 0x18e   : > { %v1661_v35 = vmul.u32 24, %v1660_v8  ;;  %vm1783_vm12 = vcmp.ne.s32.totalorder %v1607_v26, 0  ;;  %vm1807_vm13 = vcmp.lt.s32.totalorder %v1607_v26, 0  ;;  %vm1811_vm14 = vcmp.lt.s32.totalorder %v3261_v22, 0 }
 0x18f   : > { %v3300_v40 = vadd.s32 24, %v3261_v22  ;;  %v1855_v42 = vadd.s32 24, %v1607_v26  ;;  %v1672_v43 = vmul.u32 24, %v1671_v27  ;;  %vm3308_vm1 = vmand %vm1807_vm13, %vm1783_vm12  ;;  %v1638_v52 = vshrl.u32 %v3247_v3, 4 }
 0x190   : > { %v3305_v44 = vmul.u32.u64.low 2863311531, %v3284_v9  ;;  %v3306_v45 = vmul.u32.u64.high 2863311531, %v3284_v9, %v3305_v44  ;;  %vm3316_vm2 = vmand %vm1811_vm14, %vm1787_vm11  ;;  %v3329_v59 = vsub.s32 %v3181_v15, %v1661_v35  ;;  %v1693_v61 = vshrl.u32 %v3276_v30, 4 }
 0x191   : > { %v1879_v62 = vsel %vm3308_vm1, %v1855_v42, %v1607_v26  ;;  %v1639_v2 = vmul.u32 24, %v1638_v52  ;;  %v1883_v15 = vsel %vm3316_vm2, %v3300_v40, %v3261_v22 }
 0x192   : > { %vm1788_vm6 = vcmp.ne.s32.totalorder %v3329_v59, 0  ;;  %vm1812_vm7 = vcmp.lt.s32.totalorder %v3329_v59, 0  ;;  %vm1903_vm8 = vcmp.lt.s32.totalorder %v1879_v62, 16 }
 0x195   : > { %v1294_v58 = vpop.f32.mrb[12].mxu0 }
 0x196   : > { %v2436_v63 = vpack.c.bf16 %v1294_v58, %v1294_v58  ;;  %v1973_v0 = vsel %vm1901_vm9, %v1294_v58, 0.0  ;;  %v1296_v1 = vpop.f32.mrb[13].mxu0 }
 0x197   : > { %v2003_v4 = vsel %vm1991_vm4, %v1973_v0, 0.0  ;;  %v2045_v5 = vmul.f32 %v1973_v0, %v1973_v0  ;;  %v1297_v7 = vpop.f32.mrb[14].mxu0  ;;  %v3342_v0 = vsub.s32 %v3217_v47, %v1683_v50  ;;  %v1628_v1 = vmul.u32 24, %v1627_v51 }
 0x198   : > { %1468 = vst.msk [vmem:[%s3117_s15 + $0x18] sm:$0xf] %vm3733_vm3, %v2436_v63  ;;  %v2004_v11 = vadd.f32 %v2003_v4, %v2002_v33  ;;  %v2437_v12 = vpack.c.bf16 %v1297_v7, %v1297_v7  ;;  %v1974_v13 = vsel %vm3237_vm10, %v1297_v7, 0.0  ;;  %v1299_v16 = vpop.f32.mrb[15].mxu0  ;;  %v1618_v33 = vsub.s32 %v3185_v20, %v1617_v17 }
 0x199   : > { %v2074_v18 = vsel %vm1991_vm4, %v2045_v5, 0.0  ;;  %v2005_v19 = vsel %vm1991_vm4, %v1974_v13, 0.0  ;;  %v2046_v14 = vmul.f32 %v1974_v13, %v1974_v13  ;;  %v3296_v20 = vadd.s32 152, %v3063_v39 }
 0x19a   : > { %v2075_v23 = vadd.f32 %v2074_v18, %v2073_v38  ;;  %1469 = vst.msk [vmem:[%s3117_s15 + $0x1c] sm:$0xf] %vm3733_vm3, %v2437_v12  ;;  %v3265_v24 = vadd.f32 %v2005_v19, %v2004_v11  ;;  %v3267_v25 = vpop.f32.mrb[0].mxu1  ;;  %v3293_v38 = vadd.s32 144, %v3063_v39  ;;  %vm1784_vm15 = vcmp.ne.s32.totalorder %v1618_v33, 0 }
 0x19b   : > { %v2076_v28 = vsel %vm1991_vm4, %v2046_v14, 0.0  ;;  %v2442_v29 = vpack.c.bf16 %v3267_v25, %v3267_v25  ;;  %v1320_v21 = vpop.f32.mrb[1].mxu1  ;;  %vm1808_vm0 = vcmp.lt.s32.totalorder %v1618_v33, 0  ;;  %v1856_v48 = vadd.s32 24, %v1618_v33 }
 0x19c   : > { %v3278_v31 = vadd.f32 %v2076_v28, %v2075_v23  ;;  %v3280_v32 = vpop.f32.mrb[2].mxu1  ;;  %v3321_v55 = vmul.u32.u64.low 2863311531, %v3293_v38  ;;  %v3322_v56 = vmul.u32.u64.high 2863311531, %v3293_v38, %v3321_v55  ;;  %vm3331_vm5 = vmand %vm1808_vm0, %vm1784_vm15  ;;  %v3339_v63 = vsub.s32 %v3205_v41, %v1672_v43 }
 0x19d   : > { %1474 = vst.msk [vmem:[%s3117_s15 + $0x30] sm:$0xf] %vm3733_vm3, %v2442_v29  ;;  %v2443_v34 = vpack.c.bf16 %v3280_v32, %v3280_v32  ;;  %v1323_v36 = vpop.f32.mrb[3].mxu1  ;;  %v3325_v57 = vmul.u32.u64.low 2863311531, %v3296_v20  ;;  %v3326_v58 = vmul.u32.u64.high 2863311531, %v3296_v20, %v3325_v57  ;;  %v1880_v3 = vsel %vm3331_vm5, %v1856_v48, %v1618_v33  ;;  %vm3413_vm15 = vmand %vm1812_vm7, %vm1788_vm6 }
 0x19e   : > { %v1694_v41 = vmul.u32 24, %v1693_v61  ;;  %v3353_v4 = vadd.s32 24, %v3329_v59  ;;  %vm1789_vm9 = vcmp.ne.s32.totalorder %v3339_v63, 0  ;;  %vm1813_vm10 = vcmp.lt.s32.totalorder %v3339_v63, 0 }
 0x19f   : > { %1475 = vst.msk [vmem:[%s3117_s15 + $0x34] sm:$0xf] %vm3733_vm3, %v2443_v34  ;;  %v1704_v47 = vshrl.u32 %v3306_v45, 4  ;;  %vm3358_vm11 = vcmp.lt.s32.totalorder %v1880_v3, 16  ;;  %vm1790_vm12 = vcmp.ne.s32.totalorder %v3342_v0, 0  ;;  %v3364_v8 = vsub.s32 %v3221_v49, %v1628_v1  ;;  %vm3430_vm1 = vmand %vm1813_vm10, %vm1789_vm9 }
 0x1a0   : > { %v3367_v11 = vsub.s32 %v3230_v53, %v1639_v2  ;;  %v1715_v17 = vshrl.u32 %v3322_v56, 4  ;;  %v1726_v18 = vshrl.u32 %v3326_v58, 4  ;;  %v3373_v26 = vsub.s32 %v3252_v10, %v1694_v41 }
 0x1a1   : > { %v3376_v49 = vadd.s32 160, %v3063_v39  ;;  %v1705_v21 = vmul.u32 24, %v1704_v47  ;;  %v3386_v10 = vadd.s32 168, %v3063_v39  ;;  %vm1814_vm13 = vcmp.lt.s32.totalorder %v3342_v0, 0 }
 0x1a2   : > { %v1716_v36 = vmul.u32 24, %v1715_v17  ;;  %v1727_v37 = vmul.u32 24, %v1726_v18  ;;  %vm1785_vm14 = vcmp.ne.s32.totalorder %v3364_v8, 0  ;;  %vm1809_vm0 = vcmp.lt.s32.totalorder %v3364_v8, 0  ;;  %vm3446_vm7 = vmand %vm1814_vm13, %vm1790_vm12 }
 0x1a3   : > { %v3399_v45 = vmul.u32.u64.low 2863311531, %v3376_v49  ;;  %v3400_v46 = vmul.u32.u64.high 2863311531, %v3376_v49, %v3399_v45  ;;  %v1706_v50 = vsub.s32 %v3284_v9, %v1705_v21  ;;  %v1861_v58 = vadd.s32 24, %v3339_v63  ;;  %vm3458_vm10 = vmand %vm1809_vm0, %vm1785_vm14 }
 0x1a4   : > { %v3423_v56 = vmul.u32.u64.low 2863311531, %v3386_v10  ;;  %v3424_v57 = vmul.u32.u64.high 2863311531, %v3386_v10, %v3423_v56  ;;  %vm1786_vm5 = vcmp.ne.s32.totalorder %v3367_v11, 0  ;;  %vm1810_vm6 = vcmp.lt.s32.totalorder %v3367_v11, 0 }
 0x1a5   : > { %v3438_v60 = vsub.s32 %v3293_v38, %v1716_v36  ;;  %v1862_v62 = vadd.s32 24, %v3342_v0  ;;  %vm1815_vm9 = vcmp.lt.s32.totalorder %v3373_v26, 0  ;;  %v3454_v1 = vsub.s32 %v3296_v20, %v1727_v37  ;;  %vm3477_vm14 = vmand %vm1810_vm6, %vm1786_vm5 }
 0x1a6   : > { %v1857_v2 = vadd.s32 24, %v3364_v8  ;;  %v1858_v3 = vadd.s32 24, %v3367_v11  ;;  %vm1816_vm12 = vcmp.lt.s32.totalorder %v1706_v50, 0  ;;  %vm3469_vm13 = vcmp.lt.s32.totalorder %v1883_v15, 16 }
 0x1a7   : > { %v1863_v47 = vadd.s32 24, %v3373_v26  ;;  %v1884_v54 = vsel %vm3413_vm15, %v3353_v4, %v3329_v59  ;;  %v1864_v40 = vadd.s32 24, %v1706_v50  ;;  %vm1793_vm0 = vcmp.ne.s32.totalorder %v3438_v60, 0 }
 0x1a8   : > { %v1885_v15 = vsel %vm3430_vm1, %v1861_v58, %v3339_v63  ;;  %vm1794_vm6 = vcmp.ne.s32.totalorder %v3454_v1, 0  ;;  %vm1818_vm15 = vcmp.lt.s32.totalorder %v3454_v1, 0  ;;  %v1737_v59 = vshrl.u32 %v3400_v46, 4 }
 0x1a9   : > { %v1302_v5 = vpop.f32.mrb[16].mxu0  ;;  %v1886_v4 = vsel %vm3446_vm7, %v1862_v62, %v3342_v0  ;;  %v1881_v7 = vsel %vm3458_vm10, %v1857_v2, %v3364_v8  ;;  %v1882_v63 = vsel %vm3477_vm14, %v1858_v3, %v3367_v11  ;;  %v1866_v0 = vadd.s32 24, %v3454_v1 }
 0x1aa   : > { %v2438_v12 = vpack.c.bf16 %v1302_v5, %v1302_v5  ;;  %v1975_v13 = vsel %vm1903_vm8, %v1302_v5, 0.0  ;;  %v1304_v16 = vpop.f32.mrb[17].mxu0  ;;  %vm1791_vm8 = vcmp.ne.s32.totalorder %v3373_v26, 0  ;;  %v1748_v17 = vshrl.u32 %v3424_v57, 4 }
 0x1ab   : > { %v2007_v19 = vsel %vm1991_vm4, %v1975_v13, 0.0  ;;  %v2047_v14 = vmul.f32 %v1975_v13, %v1975_v13  ;;  %v1305_v23 = vpop.f32.mrb[18].mxu0  ;;  %vm3486_vm2 = vmand %vm1815_vm9, %vm1791_vm8  ;;  %v3522_v8 = vadd.s32 176, %v3063_v39  ;;  %vm3524_vm7 = vcmp.lt.s32.totalorder %v1884_v54, 16 }
 0x1ac   : > { %1470 = vst.msk [vmem:[%s3117_s15 + $0x20] sm:$0xf] %vm3733_vm3, %v2438_v12  ;;  %v2008_v53 = vadd.f32 %v2007_v19, %v3265_v24  ;;  %v2439_v27 = vpack.c.bf16 %v1305_v23, %v1305_v23  ;;  %v1976_v28 = vsel %vm3358_vm11, %v1305_v23, 0.0  ;;  %v1307_v29 = vpop.f32.mrb[19].mxu0  ;;  %vm1792_vm11 = vcmp.ne.s32.totalorder %v1706_v50, 0  ;;  %vm3530_vm8 = vmand %vm1818_vm15, %vm1794_vm6 }
 0x1ad   : > { %v2078_v6 = vsel %vm1991_vm4, %v2047_v14, 0.0  ;;  %v2009_v30 = vsel %vm1991_vm4, %v1976_v28, 0.0  ;;  %v2048_v33 = vmul.f32 %v1976_v28, %v1976_v28  ;;  %vm3495_vm5 = vmand %vm1816_vm12, %vm1792_vm11  ;;  %v1865_v12 = vadd.s32 24, %v3438_v60 }
 0x1ae   : > { %v2079_v34 = vadd.f32 %v2078_v6, %v3278_v31  ;;  %1471 = vst.msk [vmem:[%s3117_s15 + $0x24] sm:$0xf] %vm3733_vm3, %v2439_v27  ;;  %v3391_v24 = vadd.f32 %v2009_v30, %v2008_v53  ;;  %v3393_v35 = vpop.f32.mrb[4].mxu1  ;;  %v1887_v13 = vsel %vm3486_vm2, %v1863_v47, %v3373_v26  ;;  %v1888_v11 = vsel %vm3495_vm5, %v1864_v40, %v1706_v50 }
 0x1af   : > { %v2080_v42 = vsel %vm1991_vm4, %v2048_v33, 0.0  ;;  %v2444_v43 = vpack.c.bf16 %v3393_v35, %v3393_v35  ;;  %v1328_v44 = vpop.f32.mrb[5].mxu1  ;;  %v3535_v14 = vadd.s32 184, %v3063_v39  ;;  %vm3541_vm9 = vcmp.lt.s32.totalorder %v1886_v4, 16 }
 0x1b0   : > { %v3402_v31 = vadd.f32 %v2080_v42, %v2079_v34  ;;  %v3404_v48 = vpop.f32.mrb[6].mxu1  ;;  %vm1905_vm10 = vcmp.lt.s32.totalorder %v1881_v7, 16  ;;  %v1738_v53 = vmul.u32 24, %v1737_v59  ;;  %v1979_v27 = vsel %vm3469_vm13, %v3267_v25, 0.0 }
 0x1b1   : > { %1476 = vst.msk [vmem:[%s3117_s15 + $0x38] sm:$0xf] %vm3733_vm3, %v2444_v43  ;;  %v2445_v52 = vpack.c.bf16 %v3404_v48, %v3404_v48  ;;  %v1331_v55 = vpop.f32.mrb[7].mxu1  ;;  %vm3548_vm11 = vcmp.lt.s32.totalorder %v1882_v63, 16  ;;  %vm3552_vm12 = vcmp.lt.s32.totalorder %v1887_v13, 16  ;;  %vm3559_vm14 = vcmp.lt.s32.totalorder %v1888_v11, 16 }
 0x1b2   : > { %v1890_v25 = vsel %vm3530_vm8, %v1866_v0, %v3454_v1  ;;  %v1749_v30 = vmul.u32 24, %v1748_v17  ;;  %v3567_v33 = vmul.u32.u64.low 2863311531, %v3522_v8  ;;  %v3568_v34 = vmul.u32.u64.high 2863311531, %v3522_v8, %v3567_v33 }
 0x1b3   : > { %1477 = vst.msk [vmem:[%s3117_s15 + $0x3c] sm:$0xf] %vm3733_vm3, %v2445_v52  ;;  %vm1817_vm3 = vcmp.lt.s32.totalorder %v3438_v60, 0  ;;  %v3571_v43 = vmul.u32.u64.low 2863311531, %v3535_v14  ;;  %v3572_v44 = vmul.u32.u64.high 2863311531, %v3535_v14, %v3571_v43  ;;  %v2051_v45 = vmul.f32 %v1979_v27, %v1979_v27 }
 0x1b4   : > { %vm3515_vm1 = vmand %vm1817_vm3, %vm1793_vm0  ;;  %vm3537_vm3 = vcmp.lt.s32.totalorder %v1885_v15, 16  ;;  %v3576_v52 = vsub.s32 %v3376_v49, %v1738_v53  ;;  %v1980_v55 = vsel %vm3524_vm7, %v3280_v32, 0.0  ;;  %vm3786_vm13 = vcmask 60416  }
 0x1b5   : > { %v1889_v29 = vsel %vm3515_vm1, %v1865_v12, %v3438_v60  ;;  %v3593_v32 = vsub.s32 %v3386_v10, %v1749_v30  ;;  %v2015_v1 = vsel %vm1991_vm4, %v1979_v27, 0.0  ;;  %vm3789_vm0 = vmmov %vm3786_vm13  ;;  %vm3602_vm5 = vcmp.lt.s32.totalorder %v1890_v25, 16 }
 0x1b6   : > { %vm3586_vm2 = vcmp.lt.s32.totalorder %v1889_v29, 16  ;;  %v2052_v41 = vmul.f32 %v1980_v55, %v1980_v55  ;;  %v1982_v10 = vsel %vm3541_vm9, %v3404_v48, 0.0  ;;  %vm1795_vm6 = vcmp.ne.s32.totalorder %v3576_v52, 0  ;;  %vm3792_vm1 = vmmov %vm3789_vm0 }
 0x1b7   : > { %vm1819_vm15 = vcmp.lt.s32.totalorder %v3576_v52, 0  ;;  %v2017_v5 = vsel %vm1991_vm4, %v1980_v55, 0.0  ;;  %v2054_v63 = vmul.f32 %v1982_v10, %v1982_v10  ;;  %v1759_v16 = vshrl.u32 %v3568_v34, 4  ;;  %vm3793_vm7 = vmmov %vm3789_vm0 }
 0x1b8   : > { %v2088_v0 = vsel %vm1991_vm4, %v2052_v41, 0.0  ;;  %v1867_v18 = vadd.s32 24, %v3576_v52  ;;  %v1770_v11 = vshrl.u32 %v3572_v44, 4  ;;  %v2021_v28 = vsel %vm1991_vm4, %v1982_v10, 0.0  ;;  %vm3794_vm9 = vmmov %vm3789_vm0 }
 0x1b9   : > { %vm1796_vm8 = vcmp.ne.s32.totalorder %v3593_v32, 0  ;;  %v2092_v39 = vsel %vm1991_vm4, %v2054_v63, 0.0  ;;  %v1760_v30 = vmul.u32 24, %v1759_v16 }
 0x1bd   : > { %v1310_v21 = vpop.f32.mrb[20].mxu0 }
 0x1be   : > { %v2440_v36 = vpack.c.bf16 %v1310_v21, %v1310_v21  ;;  %v1977_v37 = vsel %vm1905_vm10, %v1310_v21, 0.0  ;;  %v1312_v42 = vpop.f32.mrb[21].mxu0  ;;  %vm3645_vm10 = vmand %vm1819_vm15, %vm1795_vm6 }
 0x1bf   : > { %v2011_v46 = vsel %vm1991_vm4, %v1977_v37, 0.0  ;;  %v2049_v50 = vmul.f32 %v1977_v37, %v1977_v37  ;;  %v1313_v51 = vpop.f32.mrb[22].mxu0  ;;  %v1891_v10 = vsel %vm3645_vm10, %v1867_v18, %v3576_v52  ;;  %vm3805_vm10 = vmmov %vm3793_vm7 }
 0x1c0   : > { %1472 = vst.msk [vmem:[%s3117_s15 + $0x28] sm:$0xf] %vm3786_vm13, %v2440_v36  ;;  %v2012_v56 = vadd.f32 %v2011_v46, %v3391_v24  ;;  %v2441_v57 = vpack.c.bf16 %v1313_v51, %v1313_v51  ;;  %v1978_v9 = vsel %vm3548_vm11, %v1313_v51, 0.0  ;;  %v1315_v58 = vpop.f32.mrb[23].mxu0  ;;  %v1981_v24 = vsel %vm3537_vm3, %v3393_v35, 0.0  ;;  %vm3797_vm11 = vmmov %vm3789_vm0 }
 0x1c1   : > { %v2082_v49 = vsel %vm1991_vm4, %v2049_v50, 0.0  ;;  %v2013_v61 = vsel %vm1991_vm4, %v1978_v9, 0.0  ;;  %v2050_v62 = vmul.f32 %v1978_v9, %v1978_v9  ;;  %v2053_v59 = vmul.f32 %v1981_v24, %v1981_v24 }
 0x1c2   : > { %v2083_v38 = vadd.f32 %v2082_v49, %v3402_v31  ;;  %1473 = vst.msk [vmem:[%s3117_s15 + $0x2c] sm:$0xf] %vm3789_vm0, %v2441_v57  ;;  %v2014_v2 = vadd.f32 %v2013_v61, %v2012_v56  ;;  %v1334_v3 = vpop.f32.mrb[8].mxu1  ;;  %v2086_v31 = vsel %vm1991_vm4, %v2051_v45, 0.0  ;;  %v2019_v17 = vsel %vm1991_vm4, %v1981_v24, 0.0 }
 0x1c3   : > { %v2084_v47 = vsel %vm1991_vm4, %v2050_v62, 0.0  ;;  %v2446_v54 = vpack.c.bf16 %v1334_v3, %v1334_v3  ;;  %v1336_v35 = vpop.f32.mrb[9].mxu1  ;;  %v1983_v48 = vsel %vm3552_vm12, %v1334_v3, 0.0  ;;  %v2090_v27 = vsel %vm1991_vm4, %v2053_v59, 0.0 }
 0x1c4   : > { %v2016_v22 = vadd.f32 %v2015_v1, %v2014_v2  ;;  %v2085_v40 = vadd.f32 %v2084_v47, %v2083_v38  ;;  %v1337_v15 = vpop.f32.mrb[10].mxu1  ;;  %v2055_v26 = vmul.f32 %v1983_v48, %v1983_v48  ;;  %vm1820_vm3 = vcmp.lt.s32.totalorder %v3593_v32, 0 }
 0x1c5   : > { %1478 = vst.msk [vmem:[%s3117_s15 + $0x40] sm:$0xf] %vm3792_vm1, %v2446_v54  ;;  %v2447_v4 = vpack.c.bf16 %v1337_v15, %v1337_v15  ;;  %v1339_v7 = vpop.f32.mrb[11].mxu1  ;;  %v1984_v53 = vsel %vm3559_vm14, %v1337_v15, 0.0  ;;  %v2023_v33 = vsel %vm1991_vm4, %v1983_v48, 0.0  ;;  %v1771_v46 = vmul.u32 24, %v1770_v11  ;;  %vm3659_vm12 = vmand %vm1820_vm3, %vm1796_vm8 }
 0x1c6   : > { %v2018_v12 = vadd.f32 %v2017_v5, %v2016_v22  ;;  %v2087_v13 = vadd.f32 %v2086_v31, %v2085_v40  ;;  %v2056_v34 = vmul.f32 %v1984_v53, %v1984_v53  ;;  %v2094_v44 = vsel %vm1991_vm4, %v2055_v26, 0.0  ;;  %vm3804_vm8 = vmmov %vm3793_vm7 }
 0x1c7   : > { %1479 = vst.msk [vmem:[%s3117_s15 + $0x44] sm:$0xf] %vm3793_vm7, %v2447_v4  ;;  %v2025_v50 = vsel %vm1991_vm4, %v1984_v53, 0.0  ;;  %v1868_v49 = vadd.s32 24, %v3593_v32  ;;  %v1761_v24 = vsub.s32 %v3522_v8, %v1760_v30  ;;  %v1772_v8 = vsub.s32 %v3535_v14, %v1771_v46 }
 0x1c8   : > { %v2089_v19 = vadd.f32 %v2088_v0, %v2087_v13  ;;  %v2020_v23 = vadd.f32 %v2019_v17, %v2018_v12  ;;  %v2096_v61 = vsel %vm1991_vm4, %v2056_v34, 0.0 }
 0x1c9   : > { %v1892_v31 = vsel %vm3659_vm12, %v1868_v49, %v3593_v32  ;;  %vm1797_vm14 = vcmp.ne.s32.totalorder %v1761_v24, 0  ;;  %vm1821_vm13 = vcmp.lt.s32.totalorder %v1761_v24, 0  ;;  %v1869_v40 = vadd.s32 24, %v1761_v24 }
 0x1ca   : > { %v2022_v29 = vadd.f32 %v2021_v28, %v2020_v23  ;;  %v2091_v21 = vadd.f32 %v2090_v27, %v2089_v19  ;;  %v1342_v25 = vpop.f32.mrb[12].mxu1  ;;  %vm1798_vm0 = vcmp.ne.s32.totalorder %v1772_v8, 0  ;;  %vm1916_vm6 = vcmp.lt.s32.totalorder %v1892_v31, 16  ;;  %vm3673_vm15 = vmand %vm1821_vm13, %vm1797_vm14 }
 0x1cb   : > { %v2448_v6 = vpack.c.bf16 %v1342_v25, %v1342_v25  ;;  %v1985_v36 = vsel %vm3586_vm2, %v1342_v25, 0.0  ;;  %v1344_v37 = vpop.f32.mrb[13].mxu1  ;;  %vm1915_vm2 = vcmp.lt.s32.totalorder %v1891_v10, 16  ;;  %v1870_v48 = vadd.s32 24, %v1772_v8 }
 0x1cc   : > { %v2024_v42 = vadd.f32 %v2023_v33, %v2022_v29  ;;  %v2093_v43 = vadd.f32 %v2092_v39, %v2091_v21  ;;  %v1345_v45 = vpop.f32.mrb[14].mxu1  ;;  %v2057_v51 = vmul.f32 %v1985_v36, %v1985_v36  ;;  %v2027_v62 = vsel %vm1991_vm4, %v1985_v36, 0.0 }
 0x1cd   : > { %1480 = vst.msk [vmem:[%s3117_s15 + $0x48] sm:$0xf] %vm3794_vm9, %v2448_v6  ;;  %v2449_v55 = vpack.c.bf16 %v1345_v45, %v1345_v45  ;;  %v1986_v56 = vsel %vm3602_vm5, %v1345_v45, 0.0  ;;  %v1347_v57 = vpop.f32.mrb[15].mxu1  ;;  %vm1822_vm5 = vcmp.lt.s32.totalorder %v1772_v8, 0  ;;  %v1893_v17 = vsel %vm3673_vm15, %v1869_v40, %v1761_v24 }
 0x1ce   : > { %v2095_v9 = vadd.f32 %v2094_v44, %v2093_v43  ;;  %v2026_v58 = vadd.f32 %v2025_v50, %v2024_v42  ;;  %v2058_v1 = vmul.f32 %v1986_v56, %v1986_v56  ;;  %v2098_v20 = vsel %vm1991_vm4, %v2057_v51, 0.0  ;;  %vm3678_vm1 = vmand %vm1822_vm5, %vm1798_vm0 }
 0x1cf   : > { %1481 = vst.msk [vmem:[%s3117_s15 + $0x4c] sm:$0xf] %vm3797_vm11, %v2449_v55  ;;  %v2029_v41 = vsel %vm1991_vm4, %v1986_v56, 0.0  ;;  %v1894_v53 = vsel %vm3678_vm1, %v1870_v48, %v1772_v8  ;;  %vm1917_vm3 = vcmp.lt.s32.totalorder %v1893_v17, 16  ;;  %vm3806_vm11 = vmmov %vm3793_vm7  ;;  %v2698_v56 = vmov (!%p2427_p7), 0.0  }
 0x1d0   : > { %v2097_v38 = vadd.f32 %v2096_v61, %v2095_v9  ;;  %v2028_v2 = vadd.f32 %v2027_v62, %v2026_v58  ;;  %v2100_v35 = vsel %vm1991_vm4, %v2058_v1, 0.0  ;;  %vm1918_vm9 = vcmp.lt.s32.totalorder %v1894_v53, 16  ;;  %2114 = vst.msk [vmem:[%s2783_s10] sm:$0xff] (!%p2427_p7), %vm1991_vm4, %v2698_v56  ;;  %2115 = vst.msk [vmem:[%s2788_s13] sm:$0xff] (!%p2427_p7), %vm1991_vm4, %v2698_v56 }
 0x1d2   : > { %v2099_v47 = vadd.f32 %v2098_v20, %v2097_v38  ;;  %v2030_v54 = vadd.f32 %v2029_v41, %v2028_v2 }
 0x1d4   : > { %v2101_v22 = vadd.f32 %v2100_v35, %v2099_v47 }
 0x1d6   : > { %v1350_v15 = vpop.f32.mrb[16].mxu1 }
 0x1d7   : > { %v2450_v52 = vpack.c.bf16 %v1350_v15, %v1350_v15  ;;  %v1987_v5 = vsel %vm1915_vm2, %v1350_v15, 0.0  ;;  %v1352_v59 = vpop.f32.mrb[17].mxu1 }
 0x1d8   : > { %v2031_v32 = vsel %vm1991_vm4, %v1987_v5, 0.0  ;;  %v2059_v4 = vmul.f32 %v1987_v5, %v1987_v5  ;;  %v1353_v7 = vpop.f32.mrb[18].mxu1 }
 0x1d9   : > { %1482 = vst.msk [vmem:[%s3117_s15 + $0x50] sm:$0xf] %vm3793_vm7, %v2450_v52  ;;  %v2032_v12 = vadd.f32 %v2031_v32, %v2030_v54  ;;  %v2451_v13 = vpack.c.bf16 %v1353_v7, %v1353_v7  ;;  %v1988_v16 = vsel %vm1916_vm6, %v1353_v7, 0.0  ;;  %v1355_v0 = vpop.f32.mrb[19].mxu1 }
 0x1da   : > { %v2102_v18 = vsel %vm1991_vm4, %v2059_v4, 0.0  ;;  %v2033_v11 = vsel %vm1991_vm4, %v1988_v16, 0.0  ;;  %v2060_v19 = vmul.f32 %v1988_v16, %v1988_v16 }
 0x1db   : > { %v2103_v23 = vadd.f32 %v2102_v18, %v2101_v22  ;;  %1483 = vst.msk [vmem:[%s3117_s15 + $0x54] sm:$0xf] %vm3804_vm8, %v2451_v13  ;;  %v2034_v26 = vadd.f32 %v2033_v11, %v2032_v12 }
 0x1dc   : > { %v2104_v27 = vsel %vm1991_vm4, %v2060_v19, 0.0 }
 0x1dd   : > { %v2105_v28 = vadd.f32 %v2104_v27, %v2103_v23 }
 0x1de   : > { %v1358_v39 = vpop.f32.mrb[20].mxu1 }
 0x1df   : > { %v2452_v29 = vpack.c.bf16 %v1358_v39, %v1358_v39  ;;  %v1989_v21 = vsel %vm1917_vm3, %v1358_v39, 0.0  ;;  %v1360_v25 = vpop.f32.mrb[21].mxu1  ;;  %2113 = sbr.rel (%p2427_p7) target bundleno = 486 (0x1e6), region = 36 }
 0x1e0   : > { %v2035_v30 = vsel %vm1991_vm4, %v1989_v21, 0.0  ;;  %v2061_v33 = vmul.f32 %v1989_v21, %v1989_v21  ;;  %v1361_v34 = vpop.f32.mrb[22].mxu1 }
 0x1e1   : > { %1484 = vst.msk [vmem:[%s3117_s15 + $0x58] sm:$0xf] %vm3805_vm10, %v2452_v29  ;;  %v2036_v6 = vadd.f32 %v2035_v30, %v2034_v26  ;;  %v2453_v36 = vpack.c.bf16 %v1361_v34, %v1361_v34  ;;  %v1990_v37 = vsel %vm1918_vm9, %v1361_v34, 0.0  ;;  %v1363_v42 = vpop.f32.mrb[23].mxu1 }
 0x1e2   : > { %v2106_v43 = vsel %vm1991_vm4, %v2061_v33, 0.0  ;;  %v2037_v44 = vsel %vm1991_vm4, %v1990_v37, 0.0  ;;  %v2062_v45 = vmul.f32 %v1990_v37, %v1990_v37 }
 0x1e3   : > { %v2107_v46 = vadd.f32 %v2106_v43, %v2105_v28  ;;  %1485 = vst.msk [vmem:[%s3117_s15 + $0x5c] sm:$0xf] %vm3806_vm11, %v2453_v36  ;;  %v2038_v50 = vadd.f32 %v2037_v44, %v2036_v6 }
 0x1e4   : > { %v2108_v51 = vsel %vm1991_vm4, %v2062_v45, 0.0 }
 0x1e5   : > { %v2109_v55 = vadd.f32 %v2108_v51, %v2107_v46 }
 0x1e6 PF: > { %v2116_v57 = vld [vmem:[%s2783_s10] sm:$0xff] }
 0x1e7   : > { %v2119_v9 = vld [vmem:[%s2788_s13] sm:$0xff]  ;;  %v2117_v58 = vadd.f32 %v2116_v57, %v2038_v50 }
 0x1e8   : > { %v2120_v60 = vadd.f32 %v2119_v9, %v2109_v55 }
 0x1e9   : > { %2118 = vst.msk [vmem:[%s2783_s10] sm:$0xff] %vm1991_vm4, %v2117_v58 }
 0x1ea   : > { %2121 = vst.msk [vmem:[%s2788_s13] sm:$0xff] %vm1991_vm4, %v2120_v60 }
 0x1eb PF: > { %s16_s22 = sadd.s32 1, %s2690_s22   ;;  %s3807_s18 = smov %s2682_s20 }
 0x1ec   : > { %p13_p8 = scmp.ge.s32.totalorder %s16_s22, 6   ;;  %s3808_s19 = smov %s2686_s21 }
 0x1ed   : > { %s3809_s20 = smov %s3812_s23  ;;  %s3810_s21 = smov %s3816_s24 }
 0x1ee   :  { %15 = sbr.rel (!%p13_p8) target bundleno = 3 (0x3), region = 93 }

</bundles_post_ra>
